<compile_context>
chip_gen: v5e
topology: v5e:2x2
jax: 0.10.0
libtpu: 0.0.40
codegen_flags: <defaults>
</compile_context>

<pallas_src>
import functools

import jax
import jax.numpy as jnp
from jax import lax
from jax.experimental import pallas as pl
from jax.experimental.pallas import tpu as pltpu

BN_EPS = 1e-5
LRELU_SLOPE = 0.2


# ------------------------------ Pallas kernels ------------------------------ #

def _conv_s2d_kernel(*refs, offsets, k4, r_out, with_bn):
    """Per-image k=4,s=2,p=1 conv as a 4-tap k=2,s=1 conv on the s2d input.

      x_ref : (1, Rf, 4*Cin)   bf16  flattened, zero-padded space-to-depth input
      w_ref : (4*4*Cin, Cout)  bf16  per-tap weight matrices stacked along rows
      m_ref : (r_out, 1)       f32   1.0 on real output cols, 0.0 on the junk
                                     column (only present when with_bn)
      z_ref : (1, r_out, Cout) f32   conv output (LeakyReLU fused when no BN)
      ssum/ssq : (1, 1, Cout)  f32   per-image masked sum / sum-of-squares
    """
    if with_bn:
        x_ref, w_ref, m_ref, z_ref, ssum_ref, ssq_ref = refs
    else:
        x_ref, w_ref, z_ref = refs

    acc = None
    for t, off in enumerate(offsets):            # 4 static taps
        lhs = x_ref[0, off:off + r_out, :]       # (r_out, 4*Cin) bf16 view
        rhs = w_ref[t * k4:(t + 1) * k4, :]      # (4*Cin, Cout)  bf16
        part = jnp.dot(lhs, rhs, preferred_element_type=jnp.float32)
        acc = part if acc is None else acc + part

    if with_bn:
        z_ref[0] = acc
        masked = acc * m_ref[...]                # exclude junk column from stats
        ssum_ref[0] = jnp.sum(masked, axis=0, keepdims=True)
        ssq_ref[0] = jnp.sum(masked * acc, axis=0, keepdims=True)
    else:                                        # first block: no BatchNorm
        z_ref[0] = jnp.where(acc > 0, acc, LRELU_SLOPE * acc)


def _bn_lrelu_kernel(z_ref, sc_ref, sh_ref, y_ref):
    """Lane-dense elementwise BatchNorm (scale/shift) + LeakyReLU(0.2)."""
    v = z_ref[...] * sc_ref[...] + sh_ref[...]
    y_ref[...] = jnp.where(v > 0, v, LRELU_SLOPE * v)


def _final_sigmoid_kernel(x_ref, w_ref, o_ref):
    """Last block: 4x4 VALID conv == one dot product per image, then sigmoid."""
    o_ref[...] = jax.nn.sigmoid(
        jnp.dot(x_ref[...], w_ref[...], preferred_element_type=jnp.float32))


# ------------------------------- glue helpers ------------------------------- #

def _spectral_normalize(w, u, eps=1e-12):
    """torch.nn.utils.spectral_norm forward semantics (one power iteration)."""
    cout = w.shape[0]
    wm = w.reshape(cout, -1)
    v = wm.T @ u
    v = v / (jnp.linalg.norm(v) + eps)
    u_new = wm @ v
    u_new = u_new / (jnp.linalg.norm(u_new) + eps)
    sigma = jnp.dot(u_new, wm @ v)
    return w / sigma


def _s2d_weight(w):
    """(Cout, Cin, 4, 4) conv weight -> (16*Cin, Cout) stacked k=2 tap matrices.

    Row index = (dh*2 + dw) * 4*Cin + (ph_h*2*Cin + ph_w*Cin + ci), matching the
    space-to-depth channel order produced by _pad_s2d_flatten.
    """
    cout, cin = w.shape[0], w.shape[1]
    wt = w.transpose(2, 3, 1, 0)                 # (kh, kw, ci, co)
    wt = wt.reshape(2, 2, 2, 2, cin, cout)       # (dh, ph_h, dw, ph_w, ci, co)
    wt = wt.transpose(0, 2, 1, 3, 4, 5)          # (dh, dw, ph_h, ph_w, ci, co)
    return wt.reshape(16 * cin, cout)


def _pad_s2d_flatten(y):
    """NHWC activation -> flattened space-to-depth layout of the padded input.

    (N, H, W, C) f32 -> (N, Rf, 4C) bf16, where row r*W2 + c holds the 2x2
    phase group at s2d position (r, c); H2 = H/2 + 1, W2 = W/2 + 1.
    """
    n, h, w, c = y.shape
    h2, w2c = h // 2 + 1, w // 2 + 1
    xp = jnp.pad(y, ((0, 0), (1, 1), (1, 1), (0, 0)))
    x2 = xp.reshape(n, h2, 2, w2c, 2, c).transpose(0, 1, 3, 2, 4, 5)
    x2 = x2.reshape(n, h2 * w2c, 4 * c)
    r_out = (h // 2) * w2c                       # output rows incl. junk column
    rf = -(-(r_out + w2c + 1) // 8) * 8          # taps read up to row r_out+w2c
    x2 = jnp.pad(x2, ((0, 0), (0, rf - h2 * w2c), (0, 0)))
    return x2.astype(jnp.bfloat16), w2c, r_out


def _drop_junk_col(z, dims):
    oh, ow, w2c, c = dims
    return z.reshape(z.shape[0], oh, w2c, c)[:, :, :ow, :]


def _conv_block(y_nhwc, w_sn, *, with_bn):
    """GEMM stage of one discriminator block as a batch-gridded Pallas kernel."""
    n, h, w, _ = y_nhwc.shape
    oh, ow = h // 2, w // 2
    c_out = w_sn.shape[0]
    x2f, w2c, r_out = _pad_s2d_flatten(y_nhwc)
    rf, k4 = x2f.shape[1], x2f.shape[2]
    w2 = _s2d_weight(w_sn).astype(jnp.bfloat16)

    kernel = functools.partial(
        _conv_s2d_kernel,
        offsets=(0, 1, w2c, w2c + 1), k4=k4, r_out=r_out, with_bn=with_bn)

    in_specs = [pl.BlockSpec((1, rf, k4), lambda i: (i, 0, 0)),
                pl.BlockSpec((4 * k4, c_out), lambda i: (0, 0))]
    operands = [x2f, w2]

    z_shape = jax.ShapeDtypeStruct((n, r_out, c_out), jnp.float32)
    z_spec = pl.BlockSpec((1, r_out, c_out), lambda i: (i, 0, 0))
    if with_bn:
        mask = (jnp.arange(r_out) % w2c != (w2c - 1)).astype(jnp.float32)
        operands.append(mask.reshape(r_out, 1))
        in_specs.append(pl.BlockSpec((r_out, 1), lambda i: (0, 0)))
        stat_shape = jax.ShapeDtypeStruct((n, 1, c_out), jnp.float32)
        stat_spec = pl.BlockSpec((1, 1, c_out), lambda i: (i, 0, 0))
        out_shape = (z_shape, stat_shape, stat_shape)
        out_specs = (z_spec, stat_spec, stat_spec)
    else:
        out_shape = z_shape
        out_specs = z_spec

    res = pl.pallas_call(
        kernel,
        grid=(n,),
        in_specs=in_specs,
        out_specs=out_specs,
        out_shape=out_shape,
        compiler_params=pltpu.CompilerParams(
            dimension_semantics=("parallel",)),   # batch splits across TCs (v7x)
    )(*operands)
    return res, (oh, ow, w2c, c_out)


def _bn_lrelu(z, ssum, ssq, gamma, beta, dims):
    """Finalize global batch statistics (tiny reduction over per-image partials)
    and apply scale/shift + LeakyReLU with a lane-dense Pallas kernel."""
    oh, ow, w2c, c = dims
    n = z.shape[0]
    count = jnp.float32(n * oh * ow)
    s = jnp.sum(ssum, axis=(0, 1))
    sq = jnp.sum(ssq, axis=(0, 1))
    mean = s / count
    var = jnp.maximum(sq / count - mean * mean, 0.0)     # biased variance
    scale = gamma * lax.rsqrt(var + BN_EPS)
    shift = beta - mean * scale

    l = w2c * c
    zl = z.reshape(n, oh, l)                             # lane-dense last dim
    sc = jnp.tile(scale, w2c).reshape(1, 1, l)
    sh = jnp.tile(shift, w2c).reshape(1, 1, l)
    y = pl.pallas_call(
        _bn_lrelu_kernel,
        grid=(n,),
        in_specs=[pl.BlockSpec((1, oh, l), lambda i: (i, 0, 0)),
                  pl.BlockSpec((1, 1, l), lambda i: (0, 0, 0)),
                  pl.BlockSpec((1, 1, l), lambda i: (0, 0, 0))],
        out_specs=pl.BlockSpec((1, oh, l), lambda i: (i, 0, 0)),
        out_shape=jax.ShapeDtypeStruct((n, oh, l), jnp.float32),
        compiler_params=pltpu.CompilerParams(
            dimension_semantics=("parallel",)),
    )(zl, sc, sh)
    return y.reshape(n, oh, w2c, c)[:, :, :ow, :]        # drop junk column


def _final_block(y_nhwc, w_sn):
    n, h, w, c = y_nhwc.shape                  # 4x4 spatial, 4x4 VALID conv
    k = h * w * c
    xf = y_nhwc.reshape(n, k).astype(jnp.bfloat16)
    wv = w_sn[0].transpose(1, 2, 0).reshape(k, 1).astype(jnp.bfloat16)
    vspec = pl.BlockSpec(memory_space=pltpu.MemorySpace.VMEM)
    out = pl.pallas_call(
        _final_sigmoid_kernel,
        in_specs=[vspec, vspec],
        out_specs=vspec,
        out_shape=jax.ShapeDtypeStruct((n, 1), jnp.float32),
    )(xf, wv)
    return out[:, 0]


# ------------------------------ Discriminator ------------------------------- #

def init_discriminator_params(key, feature_maps, image_channels):
    fm = feature_maps
    chans = [(image_channels, fm), (fm, 2 * fm), (2 * fm, 4 * fm),
             (4 * fm, 8 * fm), (8 * fm, 1)]
    params = {}
    for i, (cin, cout) in enumerate(chans):
        key, kw, ku = jax.random.split(key, 3)
        scale = 1.0 / jnp.sqrt(jnp.float32(cin * 16))
        params[f"w{i}"] = jax.random.normal(kw, (cout, cin, 4, 4), jnp.float32) * scale
        u = jax.random.normal(ku, (cout,), jnp.float32)
        params[f"u{i}"] = u / (jnp.linalg.norm(u) + 1e-12)   # spectral-norm u
        if 1 <= i <= 3:                                      # BN (default init)
            params[f"gamma{i}"] = jnp.ones((cout,), jnp.float32)
            params[f"beta{i}"] = jnp.zeros((cout,), jnp.float32)
    return params


@jax.jit
def discriminator_forward(params, x_nchw):
    y = x_nchw.astype(jnp.float32).transpose(0, 2, 3, 1)     # NHWC, once

    # block 0: SN-conv + LeakyReLU (no BN), LeakyReLU fused into the conv kernel
    w = _spectral_normalize(params["w0"], params["u0"])
    z, dims = _conv_block(y, w, with_bn=False)
    y = _drop_junk_col(z, dims)

    # blocks 1..3: SN-conv + BatchNorm (batch stats) + LeakyReLU
    for i in (1, 2, 3):
        w = _spectral_normalize(params[f"w{i}"], params[f"u{i}"])
        (z, ssum, ssq), dims = _conv_block(y, w, with_bn=True)
        y = _bn_lrelu(z, ssum, ssq, params[f"gamma{i}"], params[f"beta{i}"], dims)

    # block 4: SN-conv(8F -> 1, k=4, s=1, p=0) + sigmoid; .view(-1,1).squeeze(1)
    w = _spectral_normalize(params["w4"], params["u4"])
    return _final_block(y, w)


# ------------------------- pure-JAX reference (check) ----------------------- #

@jax.jit
def reference_forward(params, x_nchw):
    dn = ("NHWC", "OIHW", "NHWC")
    y = x_nchw.astype(jnp.float32).transpose(0, 2, 3, 1)
    for i in range(4):
        w = _spectral_normalize(params[f"w{i}"], params[f"u{i}"])
        y = lax.conv_general_dilated(
            y.astype(jnp.bfloat16), w.astype(jnp.bfloat16), (2, 2),
            ((1, 1), (1, 1)), dimension_numbers=dn,
            preferred_element_type=jnp.float32)
        if i >= 1:
            mean = jnp.mean(y, axis=(0, 1, 2))
            var = jnp.mean(jnp.square(y - mean), axis=(0, 1, 2))
            y = (y - mean) * lax.rsqrt(var + BN_EPS) * params[f"gamma{i}"] \
                + params[f"beta{i}"]
        y = jnp.where(y > 0, y, LRELU_SLOPE * y)
    w = _spectral_normalize(params["w4"], params["u4"])
    logit = lax.conv_general_dilated(
        y.astype(jnp.bfloat16), w.astype(jnp.bfloat16), (1, 1), "VALID",
        dimension_numbers=dn, preferred_element_type=jnp.float32)
    return jax.nn.sigmoid(logit).reshape(-1)


if __name__ == "__main__":
    feature_maps, image_channels, batch = 8, 3, 2      # 64x64 -> (N,) scores

    key = jax.random.PRNGKey(0)
    pkey, xkey = jax.random.split(key)
    params = init_discriminator_params(pkey, feature_maps, image_channels)
    x = jax.random.normal(xkey, (batch, image_channels, 64, 64), jnp.float32)

    out = discriminator_forward(params, x)
    jax.block_until_ready(out)
    ref = reference_forward(params, x)
    jax.block_until_ready(ref)

    assert out.shape == (batch,), out.shape
    assert bool(jnp.all(jnp.isfinite(out)))
    assert bool(jnp.all((out >= 0.0) & (out <= 1.0)))      # sigmoid range
    max_err = float(jnp.max(jnp.abs(out - ref)))
    assert max_err < 5e-2, f"max |pallas - reference| = {max_err}"
    print("KERNEL_OK")
</pallas_src>

<mosaic_0001>
module attributes {stable_mosaic.version = 11 : i64} {
  func.func @_conv_s2d_kernel(%arg0: i32, %arg1: memref<1x1096x12xbf16, #tpu.memory_space<vmem>>, %arg2: memref<48x8xbf16, #tpu.memory_space<vmem>>, %arg3: memref<1x1056x8xf32, #tpu.memory_space<vmem>>) attributes {dimension_semantics = [#tpu.dimension_semantics<parallel>], iteration_bounds = array<i64: 2>, scalar_prefetch = 0 : i64, scratch_operands = 0 : i64, tpu.core_type = #tpu.core_type<tc>, window_params = [{transform_indices = @transform_0, window_bounds = array<i64: 1, 1096, 12>}, {pipeline_mode = #tpu.pipeline_mode<synchronous>, transform_indices = @transform_1, window_bounds = array<i64: 48, 8>}, {transform_indices = @transform_2, window_bounds = array<i64: 1, 1056, 8>}]} {
    %c0 = arith.constant 0 : index
    %c0_0 = arith.constant 0 : index
    %c0_1 = arith.constant 0 : index
    %0 = vector.load %arg1[%c0, %c0_0, %c0_1] : memref<1x1096x12xbf16, #tpu.memory_space<vmem>>, vector<1x1056x12xbf16>
    %1 = vector.shape_cast %0 : vector<1x1056x12xbf16> to vector<1056x12xbf16>
    %c0_2 = arith.constant 0 : index
    %c0_3 = arith.constant 0 : index
    %2 = vector.load %arg2[%c0_2, %c0_3] : memref<48x8xbf16, #tpu.memory_space<vmem>>, vector<12x8xbf16>
    %cst = arith.constant dense<0.000000e+00> : vector<1056x8xf32>
    %3 = tpu.matmul %1, %2, %cst {dimension_numbers = #tpu.dot_dimension_numbers<[1], [0], [0], [1], [0, 0, 1, 1], [], []>} : vector<1056x12xbf16>, vector<12x8xbf16>, vector<1056x8xf32> -> vector<1056x8xf32>
    %c0_4 = arith.constant 0 : index
    %c1 = arith.constant 1 : index
    %c0_5 = arith.constant 0 : index
    %4 = vector.load %arg1[%c0_4, %c1, %c0_5] : memref<1x1096x12xbf16, #tpu.memory_space<vmem>>, vector<1x1056x12xbf16>
    %5 = vector.shape_cast %4 : vector<1x1056x12xbf16> to vector<1056x12xbf16>
    %c12 = arith.constant 12 : index
    %c0_6 = arith.constant 0 : index
    %6 = vector.load %arg2[%c12, %c0_6] : memref<48x8xbf16, #tpu.memory_space<vmem>>, vector<12x8xbf16>
    %cst_7 = arith.constant dense<0.000000e+00> : vector<1056x8xf32>
    %7 = tpu.matmul %5, %6, %cst_7 {dimension_numbers = #tpu.dot_dimension_numbers<[1], [0], [0], [1], [0, 0, 1, 1], [], []>} : vector<1056x12xbf16>, vector<12x8xbf16>, vector<1056x8xf32> -> vector<1056x8xf32>
    %8 = arith.addf %3, %7 : vector<1056x8xf32>
    %c0_8 = arith.constant 0 : index
    %c33 = arith.constant 33 : index
    %c0_9 = arith.constant 0 : index
    %9 = vector.load %arg1[%c0_8, %c33, %c0_9] : memref<1x1096x12xbf16, #tpu.memory_space<vmem>>, vector<1x1056x12xbf16>
    %10 = vector.shape_cast %9 : vector<1x1056x12xbf16> to vector<1056x12xbf16>
    %c24 = arith.constant 24 : index
    %c0_10 = arith.constant 0 : index
    %11 = vector.load %arg2[%c24, %c0_10] : memref<48x8xbf16, #tpu.memory_space<vmem>>, vector<12x8xbf16>
    %cst_11 = arith.constant dense<0.000000e+00> : vector<1056x8xf32>
    %12 = tpu.matmul %10, %11, %cst_11 {dimension_numbers = #tpu.dot_dimension_numbers<[1], [0], [0], [1], [0, 0, 1, 1], [], []>} : vector<1056x12xbf16>, vector<12x8xbf16>, vector<1056x8xf32> -> vector<1056x8xf32>
    %13 = arith.addf %8, %12 : vector<1056x8xf32>
    %c0_12 = arith.constant 0 : index
    %c34 = arith.constant 34 : index
    %c0_13 = arith.constant 0 : index
    %14 = vector.load %arg1[%c0_12, %c34, %c0_13] : memref<1x1096x12xbf16, #tpu.memory_space<vmem>>, vector<1x1056x12xbf16>
    %15 = vector.shape_cast %14 : vector<1x1056x12xbf16> to vector<1056x12xbf16>
    %c36 = arith.constant 36 : index
    %c0_14 = arith.constant 0 : index
    %16 = vector.load %arg2[%c36, %c0_14] : memref<48x8xbf16, #tpu.memory_space<vmem>>, vector<12x8xbf16>
    %cst_15 = arith.constant dense<0.000000e+00> : vector<1056x8xf32>
    %17 = tpu.matmul %15, %16, %cst_15 {dimension_numbers = #tpu.dot_dimension_numbers<[1], [0], [0], [1], [0, 0, 1, 1], [], []>} : vector<1056x12xbf16>, vector<12x8xbf16>, vector<1056x8xf32> -> vector<1056x8xf32>
    %18 = arith.addf %13, %17 : vector<1056x8xf32>
    %cst_16 = arith.constant 0.000000e+00 : f32
    %19 = vector.broadcast %cst_16 : f32 to vector<1056x8xf32>
    %20 = arith.cmpf ogt, %18, %19 : vector<1056x8xf32>
    %cst_17 = arith.constant 2.000000e-01 : f32
    %21 = vector.broadcast %cst_17 : f32 to vector<1056x8xf32>
    %22 = arith.mulf %21, %18 : vector<1056x8xf32>
    %23 = arith.select %20, %18, %22 : vector<1056x8xi1>, vector<1056x8xf32>
    %c0_18 = arith.constant 0 : index
    %c0_19 = arith.constant 0 : index
    %c0_20 = arith.constant 0 : index
    %24 = vector.load %arg3[%c0_18, %c0_19, %c0_20] : memref<1x1056x8xf32, #tpu.memory_space<vmem>>, vector<1x1056x8xf32>
    %25 = vector.shape_cast %24 : vector<1x1056x8xf32> to vector<1056x8xf32>
    %26 = vector.shape_cast %23 : vector<1056x8xf32> to vector<1x1056x8xf32>
    tpu.vector_store %arg3[%c0_18, %c0_19, %c0_20], %26 {strides = array<i32>} : memref<1x1056x8xf32, #tpu.memory_space<vmem>>, vector<1x1056x8xf32>,
    return
  }
  func.func @transform_0(%arg0: i32) -> (i32, i32, i32) {
    %c0_i32 = arith.constant 0 : i32
    %c0_i32_0 = arith.constant 0 : i32
    %c0_i32_1 = arith.constant 0 : i32
    return %arg0, %c0_i32, %c0_i32_0 : i32, i32, i32
  }
  func.func @transform_1(%arg0: i32) -> (i32, i32) {
    %c0_i32 = arith.constant 0 : i32
    %c0_i32_0 = arith.constant 0 : i32
    %c0_i32_1 = arith.constant 0 : i32
    return %c0_i32, %c0_i32_0 : i32, i32
  }
  func.func @transform_2(%arg0: i32) -> (i32, i32, i32) {
    %c0_i32 = arith.constant 0 : i32
    %c0_i32_0 = arith.constant 0 : i32
    %c0_i32_1 = arith.constant 0 : i32
    return %arg0, %c0_i32, %c0_i32_0 : i32, i32, i32
  }
}

module attributes {stable_mosaic.version = 11 : i64} {
  func.func @_conv_s2d_kernel(%arg0: i32, %arg1: memref<1x296x32xbf16, #tpu.memory_space<vmem>>, %arg2: memref<128x16xbf16, #tpu.memory_space<vmem>>, %arg3: memref<272x1xf32, #tpu.memory_space<vmem>>, %arg4: memref<1x272x16xf32, #tpu.memory_space<vmem>>, %arg5: memref<1x1x16xf32, #tpu.memory_space<vmem>>, %arg6: memref<1x1x16xf32, #tpu.memory_space<vmem>>) attributes {dimension_semantics = [#tpu.dimension_semantics<parallel>], iteration_bounds = array<i64: 2>, scalar_prefetch = 0 : i64, scratch_operands = 0 : i64, tpu.core_type = #tpu.core_type<tc>, window_params = [{transform_indices = @transform_0, window_bounds = array<i64: 1, 296, 32>}, {pipeline_mode = #tpu.pipeline_mode<synchronous>, transform_indices = @transform_1, window_bounds = array<i64: 128, 16>}, {pipeline_mode = #tpu.pipeline_mode<synchronous>, transform_indices = @transform_2, window_bounds = array<i64: 272, 1>}, {transform_indices = @transform_3, window_bounds = array<i64: 1, 272, 16>}, {transform_indices = @transform_4, window_bounds = array<i64: 1, 1, 16>}, {transform_indices = @transform_5, window_bounds = array<i64: 1, 1, 16>}]} {
    %c0 = arith.constant 0 : index
    %c0_0 = arith.constant 0 : index
    %c0_1 = arith.constant 0 : index
    %0 = vector.load %arg1[%c0, %c0_0, %c0_1] : memref<1x296x32xbf16, #tpu.memory_space<vmem>>, vector<1x272x32xbf16>
    %1 = vector.shape_cast %0 : vector<1x272x32xbf16> to vector<272x32xbf16>
    %c0_2 = arith.constant 0 : index
    %c0_3 = arith.constant 0 : index
    %2 = vector.load %arg2[%c0_2, %c0_3] : memref<128x16xbf16, #tpu.memory_space<vmem>>, vector<32x16xbf16>
    %cst = arith.constant dense<0.000000e+00> : vector<272x16xf32>
    %3 = tpu.matmul %1, %2, %cst {dimension_numbers = #tpu.dot_dimension_numbers<[1], [0], [0], [1], [0, 0, 1, 1], [], []>} : vector<272x32xbf16>, vector<32x16xbf16>, vector<272x16xf32> -> vector<272x16xf32>
    %c0_4 = arith.constant 0 : index
    %c1 = arith.constant 1 : index
    %c0_5 = arith.constant 0 : index
    %4 = vector.load %arg1[%c0_4, %c1, %c0_5] : memref<1x296x32xbf16, #tpu.memory_space<vmem>>, vector<1x272x32xbf16>
    %5 = vector.shape_cast %4 : vector<1x272x32xbf16> to vector<272x32xbf16>
    %c32 = arith.constant 32 : index
    %c0_6 = arith.constant 0 : index
    %6 = vector.load %arg2[%c32, %c0_6] : memref<128x16xbf16, #tpu.memory_space<vmem>>, vector<32x16xbf16>
    %cst_7 = arith.constant dense<0.000000e+00> : vector<272x16xf32>
    %7 = tpu.matmul %5, %6, %cst_7 {dimension_numbers = #tpu.dot_dimension_numbers<[1], [0], [0], [1], [0, 0, 1, 1], [], []>} : vector<272x32xbf16>, vector<32x16xbf16>, vector<272x16xf32> -> vector<272x16xf32>
    %8 = arith.addf %3, %7 : vector<272x16xf32>
    %c0_8 = arith.constant 0 : index
    %c17 = arith.constant 17 : index
    %c0_9 = arith.constant 0 : index
    %9 = vector.load %arg1[%c0_8, %c17, %c0_9] : memref<1x296x32xbf16, #tpu.memory_space<vmem>>, vector<1x272x32xbf16>
    %10 = vector.shape_cast %9 : vector<1x272x32xbf16> to vector<272x32xbf16>
    %c64 = arith.constant 64 : index
    %c0_10 = arith.constant 0 : index
    %11 = vector.load %arg2[%c64, %c0_10] : memref<128x16xbf16, #tpu.memory_space<vmem>>, vector<32x16xbf16>
    %cst_11 = arith.constant dense<0.000000e+00> : vector<272x16xf32>
    %12 = tpu.matmul %10, %11, %cst_11 {dimension_numbers = #tpu.dot_dimension_numbers<[1], [0], [0], [1], [0, 0, 1, 1], [], []>} : vector<272x32xbf16>, vector<32x16xbf16>, vector<272x16xf32> -> vector<272x16xf32>
    %13 = arith.addf %8, %12 : vector<272x16xf32>
    %c0_12 = arith.constant 0 : index
    %c18 = arith.constant 18 : index
    %c0_13 = arith.constant 0 : index
    %14 = vector.load %arg1[%c0_12, %c18, %c0_13] : memref<1x296x32xbf16, #tpu.memory_space<vmem>>, vector<1x272x32xbf16>
    %15 = vector.shape_cast %14 : vector<1x272x32xbf16> to vector<272x32xbf16>
    %c96 = arith.constant 96 : index
    %c0_14 = arith.constant 0 : index
    %16 = vector.load %arg2[%c96, %c0_14] : memref<128x16xbf16, #tpu.memory_space<vmem>>, vector<32x16xbf16>
    %cst_15 = arith.constant dense<0.000000e+00> : vector<272x16xf32>
    %17 = tpu.matmul %15, %16, %cst_15 {dimension_numbers = #tpu.dot_dimension_numbers<[1], [0], [0], [1], [0, 0, 1, 1], [], []>} : vector<272x32xbf16>, vector<32x16xbf16>, vector<272x16xf32> -> vector<272x16xf32>
    %18 = arith.addf %13, %17 : vector<272x16xf32>
    %c0_16 = arith.constant 0 : index
    %c0_17 = arith.constant 0 : index
    %c0_18 = arith.constant 0 : index
    %19 = vector.load %arg4[%c0_16, %c0_17, %c0_18] : memref<1x272x16xf32, #tpu.memory_space<vmem>>, vector<1x272x16xf32>
    %20 = vector.shape_cast %19 : vector<1x272x16xf32> to vector<272x16xf32>
    %21 = vector.shape_cast %18 : vector<272x16xf32> to vector<1x272x16xf32>
    tpu.vector_store %arg4[%c0_16, %c0_17, %c0_18], %21 {strides = array<i32>} : memref<1x272x16xf32, #tpu.memory_space<vmem>>, vector<1x272x16xf32>,
    %c0_19 = arith.constant 0 : index
    %c0_20 = arith.constant 0 : index
    %22 = vector.load %arg3[%c0_19, %c0_20] : memref<272x1xf32, #tpu.memory_space<vmem>>, vector<272x1xf32>
    %23 = vector.broadcast %22 : vector<272x1xf32> to vector<272x16xf32>
    %24 = arith.mulf %18, %23 : vector<272x16xf32>
    %cst_21 = arith.constant dense<0.000000e+00> : vector<16xf32>
    %25 = vector.multi_reduction <add>, %24, %cst_21 [0] : vector<272x16xf32> to vector<16xf32>
    %26 = vector.shape_cast %25 : vector<16xf32> to vector<1x16xf32>
    %c0_22 = arith.constant 0 : index
    %c0_23 = arith.constant 0 : index
    %c0_24 = arith.constant 0 : index
    %27 = vector.load %arg5[%c0_22, %c0_23, %c0_24] : memref<1x1x16xf32, #tpu.memory_space<vmem>>, vector<1x1x16xf32>
    %28 = vector.shape_cast %27 : vector<1x1x16xf32> to vector<1x16xf32>
    %29 = vector.shape_cast %26 : vector<1x16xf32> to vector<1x1x16xf32>
    tpu.vector_store %arg5[%c0_22, %c0_23, %c0_24], %29 {strides = array<i32>} : memref<1x1x16xf32, #tpu.memory_space<vmem>>, vector<1x1x16xf32>,
    %30 = arith.mulf %24, %18 : vector<272x16xf32>
    %cst_25 = arith.constant dense<0.000000e+00> : vector<16xf32>
    %31 = vector.multi_reduction <add>, %30, %cst_25 [0] : vector<272x16xf32> to vector<16xf32>
    %32 = vector.shape_cast %31 : vector<16xf32> to vector<1x16xf32>
    %c0_26 = arith.constant 0 : index
    %c0_27 = arith.constant 0 : index
    %c0_28 = arith.constant 0 : index
    %33 = vector.load %arg6[%c0_26, %c0_27, %c0_28] : memref<1x1x16xf32, #tpu.memory_space<vmem>>, vector<1x1x16xf32>
    %34 = vector.shape_cast %33 : vector<1x1x16xf32> to vector<1x16xf32>
    %35 = vector.shape_cast %32 : vector<1x16xf32> to vector<1x1x16xf32>
    tpu.vector_store %arg6[%c0_26, %c0_27, %c0_28], %35 {strides = array<i32>} : memref<1x1x16xf32, #tpu.memory_space<vmem>>, vector<1x1x16xf32>,
    return
  }
  func.func @transform_0(%arg0: i32) -> (i32, i32, i32) {
    %c0_i32 = arith.constant 0 : i32
    %c0_i32_0 = arith.constant 0 : i32
    %c0_i32_1 = arith.constant 0 : i32
    return %arg0, %c0_i32, %c0_i32_0 : i32, i32, i32
  }
  func.func @transform_1(%arg0: i32) -> (i32, i32) {
    %c0_i32 = arith.constant 0 : i32
    %c0_i32_0 = arith.constant 0 : i32
    %c0_i32_1 = arith.constant 0 : i32
    return %c0_i32, %c0_i32_0 : i32, i32
  }
  func.func @transform_2(%arg0: i32) -> (i32, i32) {
    %c0_i32 = arith.constant 0 : i32
    %c0_i32_0 = arith.constant 0 : i32
    %c0_i32_1 = arith.constant 0 : i32
    return %c0_i32, %c0_i32_0 : i32, i32
  }
  func.func @transform_3(%arg0: i32) -> (i32, i32, i32) {
    %c0_i32 = arith.constant 0 : i32
    %c0_i32_0 = arith.constant 0 : i32
    %c0_i32_1 = arith.constant 0 : i32
    return %arg0, %c0_i32, %c0_i32_0 : i32, i32, i32
  }
  func.func @transform_4(%arg0: i32) -> (i32, i32, i32) {
    %c0_i32 = arith.constant 0 : i32
    %c0_i32_0 = arith.constant 0 : i32
    %c0_i32_1 = arith.constant 0 : i32
    return %arg0, %c0_i32, %c0_i32_0 : i32, i32, i32
  }
  func.func @transform_5(%arg0: i32) -> (i32, i32, i32) {
    %c0_i32 = arith.constant 0 : i32
    %c0_i32_0 = arith.constant 0 : i32
    %c0_i32_1 = arith.constant 0 : i32
    return %arg0, %c0_i32, %c0_i32_0 : i32, i32, i32
  }
}

module attributes {stable_mosaic.version = 11 : i64} {
  func.func @_bn_lrelu_kernel(%arg0: i32, %arg1: memref<1x16x272xf32, #tpu.memory_space<vmem>>, %arg2: memref<1x1x272xf32, #tpu.memory_space<vmem>>, %arg3: memref<1x1x272xf32, #tpu.memory_space<vmem>>, %arg4: memref<1x16x272xf32, #tpu.memory_space<vmem>>) attributes {dimension_semantics = [#tpu.dimension_semantics<parallel>], iteration_bounds = array<i64: 2>, scalar_prefetch = 0 : i64, scratch_operands = 0 : i64, tpu.core_type = #tpu.core_type<tc>, window_params = [{transform_indices = @transform_0, window_bounds = array<i64: 1, 16, 272>}, {pipeline_mode = #tpu.pipeline_mode<synchronous>, transform_indices = @transform_1, window_bounds = array<i64: 1, 1, 272>}, {pipeline_mode = #tpu.pipeline_mode<synchronous>, transform_indices = @transform_2, window_bounds = array<i64: 1, 1, 272>}, {transform_indices = @transform_3, window_bounds = array<i64: 1, 16, 272>}]} {
    %c0 = arith.constant 0 : index
    %c0_0 = arith.constant 0 : index
    %c0_1 = arith.constant 0 : index
    %0 = vector.load %arg1[%c0, %c0_0, %c0_1] : memref<1x16x272xf32, #tpu.memory_space<vmem>>, vector<1x16x272xf32>
    %c0_2 = arith.constant 0 : index
    %c0_3 = arith.constant 0 : index
    %c0_4 = arith.constant 0 : index
    %1 = vector.load %arg2[%c0_2, %c0_3, %c0_4] : memref<1x1x272xf32, #tpu.memory_space<vmem>>, vector<1x1x272xf32>
    %2 = vector.broadcast %1 : vector<1x1x272xf32> to vector<1x16x272xf32>
    %3 = arith.mulf %0, %2 : vector<1x16x272xf32>
    %c0_5 = arith.constant 0 : index
    %c0_6 = arith.constant 0 : index
    %c0_7 = arith.constant 0 : index
    %4 = vector.load %arg3[%c0_5, %c0_6, %c0_7] : memref<1x1x272xf32, #tpu.memory_space<vmem>>, vector<1x1x272xf32>
    %5 = vector.broadcast %4 : vector<1x1x272xf32> to vector<1x16x272xf32>
    %6 = arith.addf %3, %5 : vector<1x16x272xf32>
    %cst = arith.constant 0.000000e+00 : f32
    %7 = vector.broadcast %cst : f32 to vector<1x16x272xf32>
    %8 = arith.cmpf ogt, %6, %7 : vector<1x16x272xf32>
    %cst_8 = arith.constant 2.000000e-01 : f32
    %9 = vector.broadcast %cst_8 : f32 to vector<1x16x272xf32>
    %10 = arith.mulf %9, %6 : vector<1x16x272xf32>
    %11 = arith.select %8, %6, %10 : vector<1x16x272xi1>, vector<1x16x272xf32>
    %c0_9 = arith.constant 0 : index
    %c0_10 = arith.constant 0 : index
    %c0_11 = arith.constant 0 : index
    %12 = vector.load %arg4[%c0_9, %c0_10, %c0_11] : memref<1x16x272xf32, #tpu.memory_space<vmem>>, vector<1x16x272xf32>
    tpu.vector_store %arg4[%c0_9, %c0_10, %c0_11], %11 {strides = array<i32>} : memref<1x16x272xf32, #tpu.memory_space<vmem>>, vector<1x16x272xf32>,
    return
  }
  func.func @transform_0(%arg0: i32) -> (i32, i32, i32) {
    %c0_i32 = arith.constant 0 : i32
    %c0_i32_0 = arith.constant 0 : i32
    %c0_i32_1 = arith.constant 0 : i32
    return %arg0, %c0_i32, %c0_i32_0 : i32, i32, i32
  }
  func.func @transform_1(%arg0: i32) -> (i32, i32, i32) {
    %c0_i32 = arith.constant 0 : i32
    %c0_i32_0 = arith.constant 0 : i32
    %c0_i32_1 = arith.constant 0 : i32
    %c0_i32_2 = arith.constant 0 : i32
    return %c0_i32, %c0_i32_0, %c0_i32_1 : i32, i32, i32
  }
  func.func @transform_2(%arg0: i32) -> (i32, i32, i32) {
    %c0_i32 = arith.constant 0 : i32
    %c0_i32_0 = arith.constant 0 : i32
    %c0_i32_1 = arith.constant 0 : i32
    %c0_i32_2 = arith.constant 0 : i32
    return %c0_i32, %c0_i32_0, %c0_i32_1 : i32, i32, i32
  }
  func.func @transform_3(%arg0: i32) -> (i32, i32, i32) {
    %c0_i32 = arith.constant 0 : i32
    %c0_i32_0 = arith.constant 0 : i32
    %c0_i32_1 = arith.constant 0 : i32
    return %arg0, %c0_i32, %c0_i32_0 : i32, i32, i32
  }
}

module attributes {stable_mosaic.version = 11 : i64} {
  func.func @_conv_s2d_kernel(%arg0: i32, %arg1: memref<1x88x64xbf16, #tpu.memory_space<vmem>>, %arg2: memref<256x32xbf16, #tpu.memory_space<vmem>>, %arg3: memref<72x1xf32, #tpu.memory_space<vmem>>, %arg4: memref<1x72x32xf32, #tpu.memory_space<vmem>>, %arg5: memref<1x1x32xf32, #tpu.memory_space<vmem>>, %arg6: memref<1x1x32xf32, #tpu.memory_space<vmem>>) attributes {dimension_semantics = [#tpu.dimension_semantics<parallel>], iteration_bounds = array<i64: 2>, scalar_prefetch = 0 : i64, scratch_operands = 0 : i64, tpu.core_type = #tpu.core_type<tc>, window_params = [{transform_indices = @transform_0, window_bounds = array<i64: 1, 88, 64>}, {pipeline_mode = #tpu.pipeline_mode<synchronous>, transform_indices = @transform_1, window_bounds = array<i64: 256, 32>}, {pipeline_mode = #tpu.pipeline_mode<synchronous>, transform_indices = @transform_2, window_bounds = array<i64: 72, 1>}, {transform_indices = @transform_3, window_bounds = array<i64: 1, 72, 32>}, {transform_indices = @transform_4, window_bounds = array<i64: 1, 1, 32>}, {transform_indices = @transform_5, window_bounds = array<i64: 1, 1, 32>}]} {
    %c0 = arith.constant 0 : index
    %c0_0 = arith.constant 0 : index
    %c0_1 = arith.constant 0 : index
    %0 = vector.load %arg1[%c0, %c0_0, %c0_1] : memref<1x88x64xbf16, #tpu.memory_space<vmem>>, vector<1x72x64xbf16>
    %1 = vector.shape_cast %0 : vector<1x72x64xbf16> to vector<72x64xbf16>
    %c0_2 = arith.constant 0 : index
    %c0_3 = arith.constant 0 : index
    %2 = vector.load %arg2[%c0_2, %c0_3] : memref<256x32xbf16, #tpu.memory_space<vmem>>, vector<64x32xbf16>
    %cst = arith.constant dense<0.000000e+00> : vector<72x32xf32>
    %3 = tpu.matmul %1, %2, %cst {dimension_numbers = #tpu.dot_dimension_numbers<[1], [0], [0], [1], [0, 0, 1, 1], [], []>} : vector<72x64xbf16>, vector<64x32xbf16>, vector<72x32xf32> -> vector<72x32xf32>
    %c0_4 = arith.constant 0 : index
    %c1 = arith.constant 1 : index
    %c0_5 = arith.constant 0 : index
    %4 = vector.load %arg1[%c0_4, %c1, %c0_5] : memref<1x88x64xbf16, #tpu.memory_space<vmem>>, vector<1x72x64xbf16>
    %5 = vector.shape_cast %4 : vector<1x72x64xbf16> to vector<72x64xbf16>
    %c64 = arith.constant 64 : index
    %c0_6 = arith.constant 0 : index
    %6 = vector.load %arg2[%c64, %c0_6] : memref<256x32xbf16, #tpu.memory_space<vmem>>, vector<64x32xbf16>
    %cst_7 = arith.constant dense<0.000000e+00> : vector<72x32xf32>
    %7 = tpu.matmul %5, %6, %cst_7 {dimension_numbers = #tpu.dot_dimension_numbers<[1], [0], [0], [1], [0, 0, 1, 1], [], []>} : vector<72x64xbf16>, vector<64x32xbf16>, vector<72x32xf32> -> vector<72x32xf32>
    %8 = arith.addf %3, %7 : vector<72x32xf32>
    %c0_8 = arith.constant 0 : index
    %c9 = arith.constant 9 : index
    %c0_9 = arith.constant 0 : index
    %9 = vector.load %arg1[%c0_8, %c9, %c0_9] : memref<1x88x64xbf16, #tpu.memory_space<vmem>>, vector<1x72x64xbf16>
    %10 = vector.shape_cast %9 : vector<1x72x64xbf16> to vector<72x64xbf16>
    %c128 = arith.constant 128 : index
    %c0_10 = arith.constant 0 : index
    %11 = vector.load %arg2[%c128, %c0_10] : memref<256x32xbf16, #tpu.memory_space<vmem>>, vector<64x32xbf16>
    %cst_11 = arith.constant dense<0.000000e+00> : vector<72x32xf32>
    %12 = tpu.matmul %10, %11, %cst_11 {dimension_numbers = #tpu.dot_dimension_numbers<[1], [0], [0], [1], [0, 0, 1, 1], [], []>} : vector<72x64xbf16>, vector<64x32xbf16>, vector<72x32xf32> -> vector<72x32xf32>
    %13 = arith.addf %8, %12 : vector<72x32xf32>
    %c0_12 = arith.constant 0 : index
    %c10 = arith.constant 10 : index
    %c0_13 = arith.constant 0 : index
    %14 = vector.load %arg1[%c0_12, %c10, %c0_13] : memref<1x88x64xbf16, #tpu.memory_space<vmem>>, vector<1x72x64xbf16>
    %15 = vector.shape_cast %14 : vector<1x72x64xbf16> to vector<72x64xbf16>
    %c192 = arith.constant 192 : index
    %c0_14 = arith.constant 0 : index
    %16 = vector.load %arg2[%c192, %c0_14] : memref<256x32xbf16, #tpu.memory_space<vmem>>, vector<64x32xbf16>
    %cst_15 = arith.constant dense<0.000000e+00> : vector<72x32xf32>
    %17 = tpu.matmul %15, %16, %cst_15 {dimension_numbers = #tpu.dot_dimension_numbers<[1], [0], [0], [1], [0, 0, 1, 1], [], []>} : vector<72x64xbf16>, vector<64x32xbf16>, vector<72x32xf32> -> vector<72x32xf32>
    %18 = arith.addf %13, %17 : vector<72x32xf32>
    %c0_16 = arith.constant 0 : index
    %c0_17 = arith.constant 0 : index
    %c0_18 = arith.constant 0 : index
    %19 = vector.load %arg4[%c0_16, %c0_17, %c0_18] : memref<1x72x32xf32, #tpu.memory_space<vmem>>, vector<1x72x32xf32>
    %20 = vector.shape_cast %19 : vector<1x72x32xf32> to vector<72x32xf32>
    %21 = vector.shape_cast %18 : vector<72x32xf32> to vector<1x72x32xf32>
    tpu.vector_store %arg4[%c0_16, %c0_17, %c0_18], %21 {strides = array<i32>} : memref<1x72x32xf32, #tpu.memory_space<vmem>>, vector<1x72x32xf32>,
    %c0_19 = arith.constant 0 : index
    %c0_20 = arith.constant 0 : index
    %22 = vector.load %arg3[%c0_19, %c0_20] : memref<72x1xf32, #tpu.memory_space<vmem>>, vector<72x1xf32>
    %23 = vector.broadcast %22 : vector<72x1xf32> to vector<72x32xf32>
    %24 = arith.mulf %18, %23 : vector<72x32xf32>
    %cst_21 = arith.constant dense<0.000000e+00> : vector<32xf32>
    %25 = vector.multi_reduction <add>, %24, %cst_21 [0] : vector<72x32xf32> to vector<32xf32>
    %26 = vector.shape_cast %25 : vector<32xf32> to vector<1x32xf32>
    %c0_22 = arith.constant 0 : index
    %c0_23 = arith.constant 0 : index
    %c0_24 = arith.constant 0 : index
    %27 = vector.load %arg5[%c0_22, %c0_23, %c0_24] : memref<1x1x32xf32, #tpu.memory_space<vmem>>, vector<1x1x32xf32>
    %28 = vector.shape_cast %27 : vector<1x1x32xf32> to vector<1x32xf32>
    %29 = vector.shape_cast %26 : vector<1x32xf32> to vector<1x1x32xf32>
    tpu.vector_store %arg5[%c0_22, %c0_23, %c0_24], %29 {strides = array<i32>} : memref<1x1x32xf32, #tpu.memory_space<vmem>>, vector<1x1x32xf32>,
    %30 = arith.mulf %24, %18 : vector<72x32xf32>
    %cst_25 = arith.constant dense<0.000000e+00> : vector<32xf32>
    %31 = vector.multi_reduction <add>, %30, %cst_25 [0] : vector<72x32xf32> to vector<32xf32>
    %32 = vector.shape_cast %31 : vector<32xf32> to vector<1x32xf32>
    %c0_26 = arith.constant 0 : index
    %c0_27 = arith.constant 0 : index
    %c0_28 = arith.constant 0 : index
    %33 = vector.load %arg6[%c0_26, %c0_27, %c0_28] : memref<1x1x32xf32, #tpu.memory_space<vmem>>, vector<1x1x32xf32>
    %34 = vector.shape_cast %33 : vector<1x1x32xf32> to vector<1x32xf32>
    %35 = vector.shape_cast %32 : vector<1x32xf32> to vector<1x1x32xf32>
    tpu.vector_store %arg6[%c0_26, %c0_27, %c0_28], %35 {strides = array<i32>} : memref<1x1x32xf32, #tpu.memory_space<vmem>>, vector<1x1x32xf32>,
    return
  }
  func.func @transform_0(%arg0: i32) -> (i32, i32, i32) {
    %c0_i32 = arith.constant 0 : i32
    %c0_i32_0 = arith.constant 0 : i32
    %c0_i32_1 = arith.constant 0 : i32
    return %arg0, %c0_i32, %c0_i32_0 : i32, i32, i32
  }
  func.func @transform_1(%arg0: i32) -> (i32, i32) {
    %c0_i32 = arith.constant 0 : i32
    %c0_i32_0 = arith.constant 0 : i32
    %c0_i32_1 = arith.constant 0 : i32
    return %c0_i32, %c0_i32_0 : i32, i32
  }
  func.func @transform_2(%arg0: i32) -> (i32, i32) {
    %c0_i32 = arith.constant 0 : i32
    %c0_i32_0 = arith.constant 0 : i32
    %c0_i32_1 = arith.constant 0 : i32
    return %c0_i32, %c0_i32_0 : i32, i32
  }
  func.func @transform_3(%arg0: i32) -> (i32, i32, i32) {
    %c0_i32 = arith.constant 0 : i32
    %c0_i32_0 = arith.constant 0 : i32
    %c0_i32_1 = arith.constant 0 : i32
    return %arg0, %c0_i32, %c0_i32_0 : i32, i32, i32
  }
  func.func @transform_4(%arg0: i32) -> (i32, i32, i32) {
    %c0_i32 = arith.constant 0 : i32
    %c0_i32_0 = arith.constant 0 : i32
    %c0_i32_1 = arith.constant 0 : i32
    return %arg0, %c0_i32, %c0_i32_0 : i32, i32, i32
  }
  func.func @transform_5(%arg0: i32) -> (i32, i32, i32) {
    %c0_i32 = arith.constant 0 : i32
    %c0_i32_0 = arith.constant 0 : i32
    %c0_i32_1 = arith.constant 0 : i32
    return %arg0, %c0_i32, %c0_i32_0 : i32, i32, i32
  }
}

module attributes {stable_mosaic.version = 11 : i64} {
  func.func @_bn_lrelu_kernel(%arg0: i32, %arg1: memref<1x8x288xf32, #tpu.memory_space<vmem>>, %arg2: memref<1x1x288xf32, #tpu.memory_space<vmem>>, %arg3: memref<1x1x288xf32, #tpu.memory_space<vmem>>, %arg4: memref<1x8x288xf32, #tpu.memory_space<vmem>>) attributes {dimension_semantics = [#tpu.dimension_semantics<parallel>], iteration_bounds = array<i64: 2>, scalar_prefetch = 0 : i64, scratch_operands = 0 : i64, tpu.core_type = #tpu.core_type<tc>, window_params = [{transform_indices = @transform_0, window_bounds = array<i64: 1, 8, 288>}, {pipeline_mode = #tpu.pipeline_mode<synchronous>, transform_indices = @transform_1, window_bounds = array<i64: 1, 1, 288>}, {pipeline_mode = #tpu.pipeline_mode<synchronous>, transform_indices = @transform_2, window_bounds = array<i64: 1, 1, 288>}, {transform_indices = @transform_3, window_bounds = array<i64: 1, 8, 288>}]} {
    %c0 = arith.constant 0 : index
    %c0_0 = arith.constant 0 : index
    %c0_1 = arith.constant 0 : index
    %0 = vector.load %arg1[%c0, %c0_0, %c0_1] : memref<1x8x288xf32, #tpu.memory_space<vmem>>, vector<1x8x288xf32>
    %c0_2 = arith.constant 0 : index
    %c0_3 = arith.constant 0 : index
    %c0_4 = arith.constant 0 : index
    %1 = vector.load %arg2[%c0_2, %c0_3, %c0_4] : memref<1x1x288xf32, #tpu.memory_space<vmem>>, vector<1x1x288xf32>
    %2 = vector.broadcast %1 : vector<1x1x288xf32> to vector<1x8x288xf32>
    %3 = arith.mulf %0, %2 : vector<1x8x288xf32>
    %c0_5 = arith.constant 0 : index
    %c0_6 = arith.constant 0 : index
    %c0_7 = arith.constant 0 : index
    %4 = vector.load %arg3[%c0_5, %c0_6, %c0_7] : memref<1x1x288xf32, #tpu.memory_space<vmem>>, vector<1x1x288xf32>
    %5 = vector.broadcast %4 : vector<1x1x288xf32> to vector<1x8x288xf32>
    %6 = arith.addf %3, %5 : vector<1x8x288xf32>
    %cst = arith.constant 0.000000e+00 : f32
    %7 = vector.broadcast %cst : f32 to vector<1x8x288xf32>
    %8 = arith.cmpf ogt, %6, %7 : vector<1x8x288xf32>
    %cst_8 = arith.constant 2.000000e-01 : f32
    %9 = vector.broadcast %cst_8 : f32 to vector<1x8x288xf32>
    %10 = arith.mulf %9, %6 : vector<1x8x288xf32>
    %11 = arith.select %8, %6, %10 : vector<1x8x288xi1>, vector<1x8x288xf32>
    %c0_9 = arith.constant 0 : index
    %c0_10 = arith.constant 0 : index
    %c0_11 = arith.constant 0 : index
    %12 = vector.load %arg4[%c0_9, %c0_10, %c0_11] : memref<1x8x288xf32, #tpu.memory_space<vmem>>, vector<1x8x288xf32>
    tpu.vector_store %arg4[%c0_9, %c0_10, %c0_11], %11 {strides = array<i32>} : memref<1x8x288xf32, #tpu.memory_space<vmem>>, vector<1x8x288xf32>,
    return
  }
  func.func @transform_0(%arg0: i32) -> (i32, i32, i32) {
    %c0_i32 = arith.constant 0 : i32
    %c0_i32_0 = arith.constant 0 : i32
    %c0_i32_1 = arith.constant 0 : i32
    return %arg0, %c0_i32, %c0_i32_0 : i32, i32, i32
  }
  func.func @transform_1(%arg0: i32) -> (i32, i32, i32) {
    %c0_i32 = arith.constant 0 : i32
    %c0_i32_0 = arith.constant 0 : i32
    %c0_i32_1 = arith.constant 0 : i32
    %c0_i32_2 = arith.constant 0 : i32
    return %c0_i32, %c0_i32_0, %c0_i32_1 : i32, i32, i32
  }
  func.func @transform_2(%arg0: i32) -> (i32, i32, i32) {
    %c0_i32 = arith.constant 0 : i32
    %c0_i32_0 = arith.constant 0 : i32
    %c0_i32_1 = arith.constant 0 : i32
    %c0_i32_2 = arith.constant 0 : i32
    return %c0_i32, %c0_i32_0, %c0_i32_1 : i32, i32, i32
  }
  func.func @transform_3(%arg0: i32) -> (i32, i32, i32) {
    %c0_i32 = arith.constant 0 : i32
    %c0_i32_0 = arith.constant 0 : i32
    %c0_i32_1 = arith.constant 0 : i32
    return %arg0, %c0_i32, %c0_i32_0 : i32, i32, i32
  }
}

module attributes {stable_mosaic.version = 11 : i64} {
  func.func @_conv_s2d_kernel(%arg0: i32, %arg1: memref<1x32x128xbf16, #tpu.memory_space<vmem>>, %arg2: memref<512x64xbf16, #tpu.memory_space<vmem>>, %arg3: memref<20x1xf32, #tpu.memory_space<vmem>>, %arg4: memref<1x20x64xf32, #tpu.memory_space<vmem>>, %arg5: memref<1x1x64xf32, #tpu.memory_space<vmem>>, %arg6: memref<1x1x64xf32, #tpu.memory_space<vmem>>) attributes {dimension_semantics = [#tpu.dimension_semantics<parallel>], iteration_bounds = array<i64: 2>, scalar_prefetch = 0 : i64, scratch_operands = 0 : i64, tpu.core_type = #tpu.core_type<tc>, window_params = [{transform_indices = @transform_0, window_bounds = array<i64: 1, 32, 128>}, {pipeline_mode = #tpu.pipeline_mode<synchronous>, transform_indices = @transform_1, window_bounds = array<i64: 512, 64>}, {pipeline_mode = #tpu.pipeline_mode<synchronous>, transform_indices = @transform_2, window_bounds = array<i64: 20, 1>}, {transform_indices = @transform_3, window_bounds = array<i64: 1, 20, 64>}, {transform_indices = @transform_4, window_bounds = array<i64: 1, 1, 64>}, {transform_indices = @transform_5, window_bounds = array<i64: 1, 1, 64>}]} {
    %c0 = arith.constant 0 : index
    %c0_0 = arith.constant 0 : index
    %c0_1 = arith.constant 0 : index
    %0 = vector.load %arg1[%c0, %c0_0, %c0_1] : memref<1x32x128xbf16, #tpu.memory_space<vmem>>, vector<1x20x128xbf16>
    %1 = vector.shape_cast %0 : vector<1x20x128xbf16> to vector<20x128xbf16>
    %c0_2 = arith.constant 0 : index
    %c0_3 = arith.constant 0 : index
    %2 = vector.load %arg2[%c0_2, %c0_3] : memref<512x64xbf16, #tpu.memory_space<vmem>>, vector<128x64xbf16>
    %cst = arith.constant dense<0.000000e+00> : vector<20x64xf32>
    %3 = tpu.matmul %1, %2, %cst {dimension_numbers = #tpu.dot_dimension_numbers<[1], [0], [0], [1], [0, 0, 1, 1], [], []>} : vector<20x128xbf16>, vector<128x64xbf16>, vector<20x64xf32> -> vector<20x64xf32>
    %c0_4 = arith.constant 0 : index
    %c1 = arith.constant 1 : index
    %c0_5 = arith.constant 0 : index
    %4 = vector.load %arg1[%c0_4, %c1, %c0_5] : memref<1x32x128xbf16, #tpu.memory_space<vmem>>, vector<1x20x128xbf16>
    %5 = vector.shape_cast %4 : vector<1x20x128xbf16> to vector<20x128xbf16>
    %c128 = arith.constant 128 : index
    %c0_6 = arith.constant 0 : index
    %6 = vector.load %arg2[%c128, %c0_6] : memref<512x64xbf16, #tpu.memory_space<vmem>>, vector<128x64xbf16>
    %cst_7 = arith.constant dense<0.000000e+00> : vector<20x64xf32>
    %7 = tpu.matmul %5, %6, %cst_7 {dimension_numbers = #tpu.dot_dimension_numbers<[1], [0], [0], [1], [0, 0, 1, 1], [], []>} : vector<20x128xbf16>, vector<128x64xbf16>, vector<20x64xf32> -> vector<20x64xf32>
    %8 = arith.addf %3, %7 : vector<20x64xf32>
    %c0_8 = arith.constant 0 : index
    %c5 = arith.constant 5 : index
    %c0_9 = arith.constant 0 : index
    %9 = vector.load %arg1[%c0_8, %c5, %c0_9] : memref<1x32x128xbf16, #tpu.memory_space<vmem>>, vector<1x20x128xbf16>
    %10 = vector.shape_cast %9 : vector<1x20x128xbf16> to vector<20x128xbf16>
    %c256 = arith.constant 256 : index
    %c0_10 = arith.constant 0 : index
    %11 = vector.load %arg2[%c256, %c0_10] : memref<512x64xbf16, #tpu.memory_space<vmem>>, vector<128x64xbf16>
    %cst_11 = arith.constant dense<0.000000e+00> : vector<20x64xf32>
    %12 = tpu.matmul %10, %11, %cst_11 {dimension_numbers = #tpu.dot_dimension_numbers<[1], [0], [0], [1], [0, 0, 1, 1], [], []>} : vector<20x128xbf16>, vector<128x64xbf16>, vector<20x64xf32> -> vector<20x64xf32>
    %13 = arith.addf %8, %12 : vector<20x64xf32>
    %c0_12 = arith.constant 0 : index
    %c6 = arith.constant 6 : index
    %c0_13 = arith.constant 0 : index
    %14 = vector.load %arg1[%c0_12, %c6, %c0_13] : memref<1x32x128xbf16, #tpu.memory_space<vmem>>, vector<1x20x128xbf16>
    %15 = vector.shape_cast %14 : vector<1x20x128xbf16> to vector<20x128xbf16>
    %c384 = arith.constant 384 : index
    %c0_14 = arith.constant 0 : index
    %16 = vector.load %arg2[%c384, %c0_14] : memref<512x64xbf16, #tpu.memory_space<vmem>>, vector<128x64xbf16>
    %cst_15 = arith.constant dense<0.000000e+00> : vector<20x64xf32>
    %17 = tpu.matmul %15, %16, %cst_15 {dimension_numbers = #tpu.dot_dimension_numbers<[1], [0], [0], [1], [0, 0, 1, 1], [], []>} : vector<20x128xbf16>, vector<128x64xbf16>, vector<20x64xf32> -> vector<20x64xf32>
    %18 = arith.addf %13, %17 : vector<20x64xf32>
    %c0_16 = arith.constant 0 : index
    %c0_17 = arith.constant 0 : index
    %c0_18 = arith.constant 0 : index
    %19 = vector.load %arg4[%c0_16, %c0_17, %c0_18] : memref<1x20x64xf32, #tpu.memory_space<vmem>>, vector<1x20x64xf32>
    %20 = vector.shape_cast %19 : vector<1x20x64xf32> to vector<20x64xf32>
    %21 = vector.shape_cast %18 : vector<20x64xf32> to vector<1x20x64xf32>
    tpu.vector_store %arg4[%c0_16, %c0_17, %c0_18], %21 {strides = array<i32>} : memref<1x20x64xf32, #tpu.memory_space<vmem>>, vector<1x20x64xf32>,
    %c0_19 = arith.constant 0 : index
    %c0_20 = arith.constant 0 : index
    %22 = vector.load %arg3[%c0_19, %c0_20] : memref<20x1xf32, #tpu.memory_space<vmem>>, vector<20x1xf32>
    %23 = vector.broadcast %22 : vector<20x1xf32> to vector<20x64xf32>
    %24 = arith.mulf %18, %23 : vector<20x64xf32>
    %cst_21 = arith.constant dense<0.000000e+00> : vector<64xf32>
    %25 = vector.multi_reduction <add>, %24, %cst_21 [0] : vector<20x64xf32> to vector<64xf32>
    %26 = vector.shape_cast %25 : vector<64xf32> to vector<1x64xf32>
    %c0_22 = arith.constant 0 : index
    %c0_23 = arith.constant 0 : index
    %c0_24 = arith.constant 0 : index
    %27 = vector.load %arg5[%c0_22, %c0_23, %c0_24] : memref<1x1x64xf32, #tpu.memory_space<vmem>>, vector<1x1x64xf32>
    %28 = vector.shape_cast %27 : vector<1x1x64xf32> to vector<1x64xf32>
    %29 = vector.shape_cast %26 : vector<1x64xf32> to vector<1x1x64xf32>
    tpu.vector_store %arg5[%c0_22, %c0_23, %c0_24], %29 {strides = array<i32>} : memref<1x1x64xf32, #tpu.memory_space<vmem>>, vector<1x1x64xf32>,
    %30 = arith.mulf %24, %18 : vector<20x64xf32>
    %cst_25 = arith.constant dense<0.000000e+00> : vector<64xf32>
    %31 = vector.multi_reduction <add>, %30, %cst_25 [0] : vector<20x64xf32> to vector<64xf32>
    %32 = vector.shape_cast %31 : vector<64xf32> to vector<1x64xf32>
    %c0_26 = arith.constant 0 : index
    %c0_27 = arith.constant 0 : index
    %c0_28 = arith.constant 0 : index
    %33 = vector.load %arg6[%c0_26, %c0_27, %c0_28] : memref<1x1x64xf32, #tpu.memory_space<vmem>>, vector<1x1x64xf32>
    %34 = vector.shape_cast %33 : vector<1x1x64xf32> to vector<1x64xf32>
    %35 = vector.shape_cast %32 : vector<1x64xf32> to vector<1x1x64xf32>
    tpu.vector_store %arg6[%c0_26, %c0_27, %c0_28], %35 {strides = array<i32>} : memref<1x1x64xf32, #tpu.memory_space<vmem>>, vector<1x1x64xf32>,
    return
  }
  func.func @transform_0(%arg0: i32) -> (i32, i32, i32) {
    %c0_i32 = arith.constant 0 : i32
    %c0_i32_0 = arith.constant 0 : i32
    %c0_i32_1 = arith.constant 0 : i32
    return %arg0, %c0_i32, %c0_i32_0 : i32, i32, i32
  }
  func.func @transform_1(%arg0: i32) -> (i32, i32) {
    %c0_i32 = arith.constant 0 : i32
    %c0_i32_0 = arith.constant 0 : i32
    %c0_i32_1 = arith.constant 0 : i32
    return %c0_i32, %c0_i32_0 : i32, i32
  }
  func.func @transform_2(%arg0: i32) -> (i32, i32) {
    %c0_i32 = arith.constant 0 : i32
    %c0_i32_0 = arith.constant 0 : i32
    %c0_i32_1 = arith.constant 0 : i32
    return %c0_i32, %c0_i32_0 : i32, i32
  }
  func.func @transform_3(%arg0: i32) -> (i32, i32, i32) {
    %c0_i32 = arith.constant 0 : i32
    %c0_i32_0 = arith.constant 0 : i32
    %c0_i32_1 = arith.constant 0 : i32
    return %arg0, %c0_i32, %c0_i32_0 : i32, i32, i32
  }
  func.func @transform_4(%arg0: i32) -> (i32, i32, i32) {
    %c0_i32 = arith.constant 0 : i32
    %c0_i32_0 = arith.constant 0 : i32
    %c0_i32_1 = arith.constant 0 : i32
    return %arg0, %c0_i32, %c0_i32_0 : i32, i32, i32
  }
  func.func @transform_5(%arg0: i32) -> (i32, i32, i32) {
    %c0_i32 = arith.constant 0 : i32
    %c0_i32_0 = arith.constant 0 : i32
    %c0_i32_1 = arith.constant 0 : i32
    return %arg0, %c0_i32, %c0_i32_0 : i32, i32, i32
  }
}

module attributes {stable_mosaic.version = 11 : i64} {
  func.func @_bn_lrelu_kernel(%arg0: i32, %arg1: memref<1x4x320xf32, #tpu.memory_space<vmem>>, %arg2: memref<1x1x320xf32, #tpu.memory_space<vmem>>, %arg3: memref<1x1x320xf32, #tpu.memory_space<vmem>>, %arg4: memref<1x4x320xf32, #tpu.memory_space<vmem>>) attributes {dimension_semantics = [#tpu.dimension_semantics<parallel>], iteration_bounds = array<i64: 2>, scalar_prefetch = 0 : i64, scratch_operands = 0 : i64, tpu.core_type = #tpu.core_type<tc>, window_params = [{transform_indices = @transform_0, window_bounds = array<i64: 1, 4, 320>}, {pipeline_mode = #tpu.pipeline_mode<synchronous>, transform_indices = @transform_1, window_bounds = array<i64: 1, 1, 320>}, {pipeline_mode = #tpu.pipeline_mode<synchronous>, transform_indices = @transform_2, window_bounds = array<i64: 1, 1, 320>}, {transform_indices = @transform_3, window_bounds = array<i64: 1, 4, 320>}]} {
    %c0 = arith.constant 0 : index
    %c0_0 = arith.constant 0 : index
    %c0_1 = arith.constant 0 : index
    %0 = vector.load %arg1[%c0, %c0_0, %c0_1] : memref<1x4x320xf32, #tpu.memory_space<vmem>>, vector<1x4x320xf32>
    %c0_2 = arith.constant 0 : index
    %c0_3 = arith.constant 0 : index
    %c0_4 = arith.constant 0 : index
    %1 = vector.load %arg2[%c0_2, %c0_3, %c0_4] : memref<1x1x320xf32, #tpu.memory_space<vmem>>, vector<1x1x320xf32>
    %2 = vector.broadcast %1 : vector<1x1x320xf32> to vector<1x4x320xf32>
    %3 = arith.mulf %0, %2 : vector<1x4x320xf32>
    %c0_5 = arith.constant 0 : index
    %c0_6 = arith.constant 0 : index
    %c0_7 = arith.constant 0 : index
    %4 = vector.load %arg3[%c0_5, %c0_6, %c0_7] : memref<1x1x320xf32, #tpu.memory_space<vmem>>, vector<1x1x320xf32>
    %5 = vector.broadcast %4 : vector<1x1x320xf32> to vector<1x4x320xf32>
    %6 = arith.addf %3, %5 : vector<1x4x320xf32>
    %cst = arith.constant 0.000000e+00 : f32
    %7 = vector.broadcast %cst : f32 to vector<1x4x320xf32>
    %8 = arith.cmpf ogt, %6, %7 : vector<1x4x320xf32>
    %cst_8 = arith.constant 2.000000e-01 : f32
    %9 = vector.broadcast %cst_8 : f32 to vector<1x4x320xf32>
    %10 = arith.mulf %9, %6 : vector<1x4x320xf32>
    %11 = arith.select %8, %6, %10 : vector<1x4x320xi1>, vector<1x4x320xf32>
    %c0_9 = arith.constant 0 : index
    %c0_10 = arith.constant 0 : index
    %c0_11 = arith.constant 0 : index
    %12 = vector.load %arg4[%c0_9, %c0_10, %c0_11] : memref<1x4x320xf32, #tpu.memory_space<vmem>>, vector<1x4x320xf32>
    tpu.vector_store %arg4[%c0_9, %c0_10, %c0_11], %11 {strides = array<i32>} : memref<1x4x320xf32, #tpu.memory_space<vmem>>, vector<1x4x320xf32>,
    return
  }
  func.func @transform_0(%arg0: i32) -> (i32, i32, i32) {
    %c0_i32 = arith.constant 0 : i32
    %c0_i32_0 = arith.constant 0 : i32
    %c0_i32_1 = arith.constant 0 : i32
    return %arg0, %c0_i32, %c0_i32_0 : i32, i32, i32
  }
  func.func @transform_1(%arg0: i32) -> (i32, i32, i32) {
    %c0_i32 = arith.constant 0 : i32
    %c0_i32_0 = arith.constant 0 : i32
    %c0_i32_1 = arith.constant 0 : i32
    %c0_i32_2 = arith.constant 0 : i32
    return %c0_i32, %c0_i32_0, %c0_i32_1 : i32, i32, i32
  }
  func.func @transform_2(%arg0: i32) -> (i32, i32, i32) {
    %c0_i32 = arith.constant 0 : i32
    %c0_i32_0 = arith.constant 0 : i32
    %c0_i32_1 = arith.constant 0 : i32
    %c0_i32_2 = arith.constant 0 : i32
    return %c0_i32, %c0_i32_0, %c0_i32_1 : i32, i32, i32
  }
  func.func @transform_3(%arg0: i32) -> (i32, i32, i32) {
    %c0_i32 = arith.constant 0 : i32
    %c0_i32_0 = arith.constant 0 : i32
    %c0_i32_1 = arith.constant 0 : i32
    return %arg0, %c0_i32, %c0_i32_0 : i32, i32, i32
  }
}

module attributes {stable_mosaic.version = 11 : i64} {
  func.func @_final_sigmoid_kernel(%arg0: memref<2x1024xbf16, #tpu.memory_space<vmem>>, %arg1: memref<1024x1xbf16, #tpu.memory_space<vmem>>, %arg2: memref<2x1xf32, #tpu.memory_space<vmem>>) attributes {dimension_semantics = [], scalar_prefetch = 0 : i64, scratch_operands = 0 : i64, tpu.core_type = #tpu.core_type<tc>} {
    %c0 = arith.constant 0 : index
    %c0_0 = arith.constant 0 : index
    %0 = vector.load %arg0[%c0, %c0_0] : memref<2x1024xbf16, #tpu.memory_space<vmem>>, vector<2x1024xbf16>
    %c0_1 = arith.constant 0 : index
    %c0_2 = arith.constant 0 : index
    %1 = vector.load %arg1[%c0_1, %c0_2] : memref<1024x1xbf16, #tpu.memory_space<vmem>>, vector<1024x1xbf16>
    %cst = arith.constant dense<0.000000e+00> : vector<2x1xf32>
    %2 = tpu.matmul %0, %1, %cst {dimension_numbers = #tpu.dot_dimension_numbers<[1], [0], [0], [1], [0, 0, 1, 1], [], []>} : vector<2x1024xbf16>, vector<1024x1xbf16>, vector<2x1xf32> -> vector<2x1xf32>
    %3 = arith.negf %2 : vector<2x1xf32>
    %4 = math.exp %3 : vector<2x1xf32>
    %cst_3 = arith.constant 1.000000e+00 : f32
    %5 = vector.broadcast %cst_3 : f32 to vector<2x1xf32>
    %6 = arith.addf %5, %4 : vector<2x1xf32>
    %7 = arith.divf %5, %6 : vector<2x1xf32>
    %c0_4 = arith.constant 0 : index
    %c0_5 = arith.constant 0 : index
    %8 = vector.load %arg2[%c0_4, %c0_5] : memref<2x1xf32, #tpu.memory_space<vmem>>, vector<2x1xf32>
    tpu.vector_store %arg2[%c0_4, %c0_5], %7 {strides = array<i32>} : memref<2x1xf32, #tpu.memory_space<vmem>>, vector<2x1xf32>,
    return
  }
}

</mosaic_0001>

<bundles_post_ra>
// kernel: discriminator_forward.8
= control target key start
LH: loop header
LB: loop body
LE: loop exit
PB: predicated region body
PF: predicated region fallthrough
CT: control target
= control target key end

     0   :  { %s6243_s9 = smov 0   ;;  %s7443_s0 = inlined_call_operand.vmem [shape: bf16[2,1096,12], index: 0, kind: input, shape index: {}]   ;;  %s7444_s1 = inlined_call_operand.vmem [shape: bf16[48,8], index: 1, kind: input, shape index: {}]   ;;  %s7445_s2 = inlined_call_operand.vmem [shape: f32[2,1056,8], index: 2, kind: output, shape index: {}]  }
   0x1 LB: > { %s5254_s10 = sadd.s32 4294967295, %s6226_s9   ;;  %p5258_p0 = scmp.ge.s32.totalorder %s6226_s9, 1  ;;  %s6226_s9 = sphi %s6243_s9, %s12_s9  }
   0x2   : > { %p112_p1 = scmp.lt.s32.totalorder %s6226_s9, 3 }
   0x4   : > { %p113_p2 = pnand %p5258_p0, %p112_p1 }
   0x5   : > { %p134_p3 = scmp.lt.s32.totalorder (!%p113_p2), %s5254_s10, 1 }
   0x6   : > { %116 = sbr.rel (%p113_p2) target bundleno = 1215 (0x4bf), region = 28 }
   0xb   : > { %v5597_v0 = vld [vmem:[%s7444_s1] sm:$0xf]  ;;  %v6133_v1 = vld [vmem:[%s7444_s1] sm:$0x30]  ;;  %vm1353_vm0 = vcmask 1045504   ;;  %s7447_s10 = smov (!%p134_p3, %s5254_s10), 1 }
   0xc   : > { %v5598_v2 = vor.u32 %v6133_v1, %v5597_v0  ;;  %v5997_v3 = vld [vmem:[%s7444_s1 + $0x10] sm:$0xc]  ;;  %v6201_v4 = vld [vmem:[%s7444_s1 + $0x10] sm:$0xf0]  ;;  %v5927_v6 = vld [vmem:[%s7444_s1 + $0xc] sm:$0xf] }
   0xd   : > { %v5998_v5 = vor.u32 %v6201_v4, %v5997_v3  ;;  %v6200_v7 = vld [vmem:[%s7444_s1 + $0xc] sm:$0x30]  ;;  %v5527_v10 = vld [vmem:[%s7444_s1 + $0x4] sm:$0xc]  ;;  %v6134_v11 = vld [vmem:[%s7444_s1 + $0x4] sm:$0xf0] }
   0xe   : > { %v1834_v8 = vsel %vm1353_vm0, %v5598_v2, 0  ;;  %v5928_v9 = vor.u32 %v6200_v7, %v5927_v6  ;;  %s6210_s27 = smul.u32 548, %s7447_s10  ;;  %v5528_v13 = vor.u32 %v6134_v11, %v5527_v10  ;;  %vm1154_vm1 = vcmask 97280  }
   0xf   : > { %1843 = vmatpush.bf16.msra.mxu1 %v1834_v8  ;;  %v3997_v12 = vrot.slane %v5998_v5, 2  ;;  %vm3858_vm2 = vcmask 1046528   ;;  %vm615_vm3 = vsmask.f32 7424  ;;  %s6211_s3 = smul.u32 1056, %s7447_s10  ;;  %vm5066_vm4 = vcmask 64512  }
  0x10   : > { %v3379_v14 = vsel %vm1353_vm0, %v5928_v9, 0  ;;  %s6284_s30 = scalar_lea.vmem %s7443_s0, %s6210_s27  ;;  %v1153_v16 = vrot.slane %v5528_v13, 2 }
  0x11   : > { %v4197_v15 = vsel %vm1353_vm0, %v3997_v12, 0  ;;  %3388 = vmatpush.bf16.msra.mxu2 %v3379_v14  ;;  %v6067_v17 = vld [vmem:[%s6284_s30] sm:$0xff]  ;;  %v6207_v18 = vld [vmem:[%s6284_s30 + $0x10] sm:$0xf0]  ;;  %v6135_v19 = vld [vmem:[%s6284_s30 + $0x18] sm:$0xff]  ;;  %s6382_s6 = scalar_lea.vmem %s7445_s2, %s6211_s3 }
  0x12   : > { %4206 = vmatpush.bf16.msra.mxu3 %v4197_v15  ;;  %v6208_v20 = vld [vmem:[%s6284_s30 + $0x10] sm:$0xe]  ;;  %v1355_v21 = vsel %vm1353_vm0, %v1153_v16, 0  ;;  %v6068_v23 = vld [vmem:[%s6284_s30 + $0x8] sm:$0xff]  ;;  %v619_v24 = vshll.u32 %v6067_v17, 16  ;;  %5599 = vmatmul.msk.bf16.vlgmr.msra.gmra.mxu1 %vm1154_vm1, %v6067_v17  ;;  %v3860_v26 = vrot.slane %v6135_v19, 1 }
  0x13   : > { %v6206_v22 = vld [vmem:[%s6284_s30 + $0x10] sm:$0xff]   ;;  %v6209_v25 = vor.u32 %v6208_v20, %v6207_v18  ;;  %1364 = vmatpush.bf16.msra.mxu0 %v1355_v21  ;;  %v2651_v29 = vshll.u32 %v6135_v19, 16  ;;  %v617_v30 = vshrl.u32 %v6067_v17, 16  ;;  %v624_v31 = vshll.u32 %v6068_v23, 16  ;;  %v6136_v43 = vld [vmem:[%s6284_s30 + $0x20] sm:$0xff]  ;;  %v6070_v56 = vld [vmem:[%s6284_s30 + $0x18] sm:$0xff] }
  0x14   : > { %v2644_v27 = vshrl.u32 %v6206_v22, 16  ;;  %v2646_v28 = vshll.u32 %v6206_v22, 16  ;;  %v621_v33 = vrot.slane %v619_v24, 1  ;;  %v6069_v42 = vld [vmem:[%s6284_s30 + $0x10] sm:$0xff]  ;;  %v628_v44 = vshrl.u32 %v6068_v23, 16  ;;  %v6137_v57 = vld [vmem:[%s6284_s30 + $0x28] sm:$0xff] }
  0x15   : > { %v3859_v32 = vrot.slane %v6209_v25, 1  ;;  %v2653_v35 = vrot.slane %v2651_v29, 1  ;;  %v626_v36 = vrot.slane %v624_v31, 1  ;;  %v632_v45 = vshll.u32 %v6069_v42, 16  ;;  %v6071_v6 = vld [vmem:[%s6284_s30 + $0x20] sm:$0xff]  ;;  %v6138_v7 = vld [vmem:[%s6284_s30 + $0x30] sm:$0xff] }
  0x16   : > { %v2648_v34 = vrot.slane %v2646_v28, 1  ;;  %v622_v38 = vor.u32 %v621_v33, %v617_v30  ;;  %v2655_v46 = vshrl.u32 %v6135_v19, 16  ;;  %v2659_v47 = vshll.u32 %v6136_v43, 16  ;;  %v6072_v20 = vld [vmem:[%s6284_s30 + $0x28] sm:$0xff]  ;;  %v6139_v21 = vld [vmem:[%s6284_s30 + $0x38] sm:$0xff] }
  0x17   : > { %v3861_v37 = vsel %vm3858_vm2, %v3859_v32, %v3860_v26  ;;  %v3862_v48 = vrot.slane %v6136_v43, 1  ;;  %v630_v49 = vor.u32 %v628_v44, %v626_v36  ;;  %v634_v50 = vrot.slane %v632_v45, 1 }
  0x18   : > { %5999 = vmatmul.msk.bf16.vlgmr.msra.gmra.mxu3 %vm1154_vm1, %v3861_v37  ;;  %v2649_v39 = vor.u32 %v2648_v34, %v2644_v27  ;;  %v627_v40 = vsel %vm615_vm3, %v622_v38, %v626_v36  ;;  %v2657_v51 = vor.u32 %v2655_v46, %v2653_v35  ;;  %v2661_v52 = vrot.slane %v2659_v47, 1  ;;  %v6073_v34 = vld [vmem:[%s6284_s30 + $0x30] sm:$0xff] }
  0x19   : > { %5529 = vmatmul.msk.bf16.vlgmr.msra.gmra.mxu0 %vm1154_vm1, %v627_v40  ;;  %v3863_v53 = vsel %vm3858_vm2, %v3860_v26, %v3862_v48  ;;  %v635_v54 = vsel %vm615_vm3, %v630_v49, %v634_v50  ;;  %v636_v58 = vshrl.u32 %v6069_v42, 16  ;;  %v640_v59 = vshll.u32 %v6070_v56, 16  ;;  %v6141_v49 = vld [vmem:[%s6284_s30 + $0x48] sm:$0xff] }
  0x1a   : > { %v2654_v41 = vsel %vm615_vm3, %v2649_v39, %v2653_v35  ;;  %v2662_v55 = vsel %vm615_vm3, %v2657_v51, %v2661_v52  ;;  %v2663_v60 = vshrl.u32 %v6136_v43, 16  ;;  %v2667_v61 = vshll.u32 %v6137_v57, 16  ;;  %v6140_v35 = vld [vmem:[%s6284_s30 + $0x40] sm:$0xff] }
  0x1b   : > { %5929 = vmatmul.msk.bf16.vlgmr.msra.gmra.mxu2 %vm1154_vm1, %v2654_v41  ;;  %v3864_v62 = vrot.slane %v6137_v57, 1  ;;  %v638_v63 = vor.u32 %v636_v58, %v634_v50  ;;  %v642_v0 = vrot.slane %v640_v59, 1  ;;  %v644_v8 = vshrl.u32 %v6070_v56, 16 }
  0x1c   : > { %v2665_v1 = vor.u32 %v2663_v60, %v2661_v52  ;;  %v2669_v2 = vrot.slane %v2667_v61, 1  ;;  %v648_v9 = vshll.u32 %v6071_v6, 16  ;;  %v2671_v10 = vshrl.u32 %v6137_v57, 16 }
  0x1d   : > { %v3865_v3 = vsel %vm3858_vm2, %v3862_v48, %v3864_v62  ;;  %v643_v4 = vsel %vm615_vm3, %v638_v63, %v642_v0  ;;  %v2675_v11 = vshll.u32 %v6138_v7, 16  ;;  %v3866_v12 = vrot.slane %v6138_v7, 1  ;;  %v6074_v48 = vld [vmem:[%s6284_s30 + $0x38] sm:$0xff]  ;;  %v6142_v63 = vld [vmem:[%s6284_s30 + $0x50] sm:$0xff] }
  0x1e   : > { %v2670_v5 = vsel %vm615_vm3, %v2665_v1, %v2669_v2  ;;  %v646_v13 = vor.u32 %v644_v8, %v642_v0  ;;  %v650_v14 = vrot.slane %v648_v9, 1  ;;  %v2673_v15 = vor.u32 %v2671_v10, %v2669_v2 }
  0x1f   : > { %v2677_v16 = vrot.slane %v2675_v11, 1  ;;  %v3867_v17 = vsel %vm3858_vm2, %v3864_v62, %v3866_v12  ;;  %v652_v22 = vshrl.u32 %v6071_v6, 16  ;;  %v2679_v24 = vshrl.u32 %v6138_v7, 16  ;;  %v6075_v62 = vld [vmem:[%s6284_s30 + $0x40] sm:$0xff] }
  0x20   : > { %v651_v18 = vsel %vm615_vm3, %v646_v13, %v650_v14  ;;  %v2683_v25 = vshll.u32 %v6139_v21, 16  ;;  %v3868_v26 = vrot.slane %v6139_v21, 1  ;;  %v660_v36 = vshrl.u32 %v6072_v20, 16  ;;  %v6143_v13 = vld [vmem:[%s6284_s30 + $0x58] sm:$0xff] }
  0x21   : > { %v2678_v19 = vsel %vm615_vm3, %v2673_v15, %v2677_v16  ;;  %v654_v27 = vor.u32 %v652_v22, %v650_v14  ;;  %v2681_v29 = vor.u32 %v2679_v24, %v2677_v16  ;;  %v664_v37 = vshll.u32 %v6073_v34, 16 }
  0x22   : > { %5600 = vmatmul.msk.bf16.gmra.mxu1 %vm1154_vm1, %v6068_v23  ;;  %v656_v23 = vshll.u32 %v6072_v20, 16  ;;  %v2685_v30 = vrot.slane %v2683_v25, 1  ;;  %v3869_v31 = vsel %vm3858_vm2, %v3866_v12, %v3868_v26  ;;  %v2687_v38 = vshrl.u32 %v6139_v21, 16  ;;  %v6076_v12 = vld [vmem:[%s6284_s30 + $0x48] sm:$0xff] }
  0x23   : > { %v2691_v39 = vshll.u32 %v6140_v35, 16  ;;  %v3870_v40 = vrot.slane %v6140_v35, 1  ;;  %v668_v50 = vshrl.u32 %v6073_v34, 16  ;;  %v672_v51 = vshll.u32 %v6074_v48, 16 }
  0x24   : > { %v658_v28 = vrot.slane %v656_v23, 1  ;;  %v2686_v33 = vsel %vm615_vm3, %v2681_v29, %v2685_v30  ;;  %v2689_v43 = vor.u32 %v2687_v38, %v2685_v30  ;;  %v2695_v52 = vshrl.u32 %v6140_v35, 16 }
  0x25   : > { %v2693_v44 = vrot.slane %v2691_v39, 1  ;;  %v3871_v45 = vsel %vm3858_vm2, %v3868_v26, %v3870_v40  ;;  %v676_v0 = vshrl.u32 %v6074_v48, 16  ;;  %v680_v1 = vshll.u32 %v6075_v62, 16 }
  0x26   : > { %v659_v32 = vsel %vm615_vm3, %v654_v27, %v658_v28  ;;  %v662_v41 = vor.u32 %v660_v36, %v658_v28  ;;  %v2703_v2 = vshrl.u32 %v6141_v49, 16  ;;  %v684_v14 = vshrl.u32 %v6075_v62, 16 }
  0x27   : > { %v2694_v47 = vsel %vm615_vm3, %v2689_v43, %v2693_v44  ;;  %v2697_v57 = vor.u32 %v2695_v52, %v2693_v44  ;;  %v688_v15 = vshll.u32 %v6076_v12, 16  ;;  %v692_v36 = vshrl.u32 %v6076_v12, 16 }
  0x28   : > { %6000 = vmatmul.msk.bf16.gmra.mxu3 %vm1154_vm1, %v3863_v53  ;;  %v2699_v53 = vshll.u32 %v6141_v49, 16  ;;  %v2719_v39 = vshrl.u32 %v6143_v13, 16 }
  0x29   : > { %5530 = vmatmul.msk.bf16.gmra.mxu0 %vm1154_vm1, %v635_v54  ;;  %v3872_v54 = vrot.slane %v6141_v49, 1  ;;  %v690_v21 = vrot.slane %v688_v15, 1 }
  0x2a   : > { %v2701_v58 = vrot.slane %v2699_v53, 1 }
  0x2b   : > { %5930 = vmatmul.msk.bf16.gmra.mxu2 %vm1154_vm1, %v2662_v55  ;;  %v3873_v59 = vsel %vm3858_vm2, %v3870_v40, %v3872_v54 }
  0x2c   : > { %v2702_v61 = vsel %vm615_vm3, %v2697_v57, %v2701_v58  ;;  %v2705_v7 = vor.u32 %v2703_v2, %v2701_v58 }
  0x32   : > { %5601 = vmatmul.msk.bf16.gmra.mxu1 %vm1154_vm1, %v6069_v42  ;;  %v666_v42 = vrot.slane %v664_v37, 1 }
  0x34   : > { %v667_v46 = vsel %vm615_vm3, %v662_v41, %v666_v42  ;;  %v670_v55 = vor.u32 %v668_v50, %v666_v42 }
  0x38   : > { %6001 = vmatmul.msk.bf16.gmra.mxu3 %vm1154_vm1, %v3865_v3  ;;  %v2707_v3 = vshll.u32 %v6142_v63, 16 }
  0x39   : > { %5531 = vmatmul.msk.bf16.gmra.mxu0 %vm1154_vm1, %v643_v4  ;;  %v3874_v4 = vrot.slane %v6142_v63, 1 }
  0x3a   : > { %v2709_v8 = vrot.slane %v2707_v3, 1 }
  0x3b   : > { %5931 = vmatmul.msk.bf16.gmra.mxu2 %vm1154_vm1, %v2670_v5  ;;  %v3875_v9 = vsel %vm3858_vm2, %v3872_v54, %v3874_v4 }
  0x3c   : > { %v2710_v11 = vsel %vm615_vm3, %v2705_v7, %v2709_v8 }
  0x42   : > { %5602 = vmatmul.msk.bf16.gmra.mxu1 %vm1154_vm1, %v6070_v56  ;;  %v674_v56 = vrot.slane %v672_v51, 1 }
  0x44   : > { %v675_v60 = vsel %vm615_vm3, %v670_v55, %v674_v56  ;;  %v678_v5 = vor.u32 %v676_v0, %v674_v56 }
  0x48   : > { %6002 = vmatmul.msk.bf16.gmra.mxu3 %vm1154_vm1, %v3867_v17  ;;  %v2711_v17 = vshrl.u32 %v6142_v63, 16  ;;  %v6395_v63 = vld [vmem:[%s6284_s30 + $0x68] sm:$0xff] }
  0x49   : > { %5532 = vmatmul.msk.bf16.gmra.mxu0 %vm1154_vm1, %v651_v18  ;;  %v2715_v18 = vshll.u32 %v6143_v13, 16 }
  0x4a   : > { %v2713_v22 = vor.u32 %v2711_v17, %v2709_v8  ;;  %v2731_v8 = vshll.u32 %v6395_v63, 16 }
  0x4b   : > { %5932 = vmatmul.msk.bf16.gmra.mxu2 %vm1154_vm1, %v2678_v19  ;;  %v3876_v19 = vrot.slane %v6143_v13, 1  ;;  %v2717_v23 = vrot.slane %v2715_v18, 1 }
  0x4d   : > { %v3877_v24 = vsel %vm3858_vm2, %v3874_v4, %v3876_v19  ;;  %v2718_v27 = vsel %vm615_vm3, %v2713_v22, %v2717_v23 }
  0x52   : > { %5603 = vmatmul.msk.bf16.gmra.mxu1 %vm1154_vm1, %v6071_v6  ;;  %v682_v6 = vrot.slane %v680_v1, 1 }
  0x54   : > { %v683_v10 = vsel %vm615_vm3, %v678_v5, %v682_v6 }
  0x58   : > { %6003 = vmatmul.msk.bf16.gmra.mxu3 %vm1154_vm1, %v3869_v31  ;;  %v6077_v31 = vld [vmem:[%s6284_s30 + $0x50] sm:$0xff] }
  0x59   : > { %5533 = vmatmul.msk.bf16.gmra.mxu0 %vm1154_vm1, %v659_v32  ;;  %v6374_v32 = vld [vmem:[%s6284_s30 + $0x60] sm:$0xff]  ;;  %v696_v37 = vshll.u32 %v6077_v31, 16  ;;  %v700_v4 = vshrl.u32 %v6077_v31, 16 }
  0x5a   : > { %v2723_v40 = vshll.u32 %v6374_v32, 16  ;;  %v3878_v42 = vrot.slane %v6374_v32, 1  ;;  %v2727_v7 = vshrl.u32 %v6374_v32, 16 }
  0x5b   : > { %5933 = vmatmul.msk.bf16.gmra.mxu2 %vm1154_vm1, %v2686_v33 }
  0x5c   : > { %v3879_v51 = vsel %vm3858_vm2, %v3876_v19, %v3878_v42 }
  0x62   : > { %5604 = vmatmul.msk.bf16.gmra.mxu1 %vm1154_vm1, %v6072_v20  ;;  %v686_v20 = vor.u32 %v684_v14, %v682_v6 }
  0x64   : > { %v691_v26 = vsel %vm615_vm3, %v686_v20, %v690_v21 }
  0x68   : > { %6004 = vmatmul.msk.bf16.gmra.mxu3 %vm1154_vm1, %v3871_v45  ;;  %v694_v45 = vor.u32 %v692_v36, %v690_v21 }
  0x69   : > { %5534 = vmatmul.msk.bf16.gmra.mxu0 %vm1154_vm1, %v667_v46  ;;  %v698_v46 = vrot.slane %v696_v37, 1 }
  0x6b   : > { %5934 = vmatmul.msk.bf16.gmra.mxu2 %vm1154_vm1, %v2694_v47  ;;  %v2721_v47 = vor.u32 %v2719_v39, %v2717_v23  ;;  %v699_v55 = vsel %vm615_vm3, %v694_v45, %v698_v46  ;;  %v702_v13 = vor.u32 %v700_v4, %v698_v46  ;;  %v2735_v39 = vshrl.u32 %v6395_v63, 16 }
  0x72   : > { %5605 = vmatmul.msk.bf16.gmra.mxu1 %vm1154_vm1, %v6073_v34 }
  0x78   : > { %6005 = vmatmul.msk.bf16.gmra.mxu3 %vm1154_vm1, %v3873_v59 }
  0x79   : > { %5535 = vmatmul.msk.bf16.gmra.mxu0 %vm1154_vm1, %v675_v60 }
  0x7b   : > { %5935 = vmatmul.msk.bf16.gmra.mxu2 %vm1154_vm1, %v2702_v61 }
  0x82   : > { %5606 = vmatmul.msk.bf16.gmra.mxu1 %vm1154_vm1, %v6074_v48  ;;  %v2725_v48 = vrot.slane %v2723_v40, 1 }
  0x84   : > { %v2726_v56 = vsel %vm615_vm3, %v2721_v47, %v2725_v48  ;;  %v2729_v15 = vor.u32 %v2727_v7, %v2725_v48 }
  0x88   : > { %6006 = vmatmul.msk.bf16.gmra.mxu3 %vm1154_vm1, %v3875_v9 }
  0x89   : > { %5536 = vmatmul.msk.bf16.gmra.mxu0 %vm1154_vm1, %v683_v10  ;;  %v3880_v10 = vrot.slane %v6395_v63, 1  ;;  %v6431_v63 = vld [vmem:[%s6284_s30 + $0x78] sm:$0xff] }
  0x8b   : > { %5936 = vmatmul.msk.bf16.gmra.mxu2 %vm1154_vm1, %v2710_v11  ;;  %v3881_v19 = vsel %vm3858_vm2, %v3878_v42, %v3880_v10 }
  0x8f   : > { %v1845_v16 = vpop.f32.mrf.mxu1 }
  0x92   : > { %5607 = vmatmul.msk.bf16.gmra.mxu1 %vm1154_vm1, %v6075_v62  ;;  %v6078_v62 = vld [vmem:[%s6284_s30 + $0x58] sm:$0xff] }
  0x93   : > { %v704_v5 = vshll.u32 %v6078_v62, 16  ;;  %v708_v36 = vshrl.u32 %v6078_v62, 16 }
  0x95   : > { %v706_v14 = vrot.slane %v704_v5, 1 }
  0x96   : > { %v1366_v25 = vpop.f32.mrf.mxu0 }
  0x97   : > { %v1847_v28 = vpop.f32.mrf.mxu1  ;;  %v1846_v29 = vadd.f32 %v1845_v16, %v1366_v25  ;;  %v2733_v16 = vrot.slane %v2731_v8, 1  ;;  %v707_v23 = vsel %vm615_vm3, %v702_v13, %v706_v14  ;;  %v710_v45 = vor.u32 %v708_v36, %v706_v14 }
  0x98   : > { %6007 = vmatmul.msk.bf16.gmra.mxu3 %vm1154_vm1, %v3877_v24  ;;  %v2747_v8 = vshll.u32 %v6431_v63, 16 }
  0x99   : > { %5537 = vmatmul.msk.bf16.gmra.mxu0 %vm1154_vm1, %v691_v26  ;;  %v2734_v24 = vsel %vm615_vm3, %v2729_v15, %v2733_v16  ;;  %v2737_v47 = vor.u32 %v2735_v39, %v2733_v16  ;;  %v2751_v39 = vshrl.u32 %v6431_v63, 16 }
  0x9a   : > { %v2749_v16 = vrot.slane %v2747_v8, 1 }
  0x9b   : > { %5937 = vmatmul.msk.bf16.gmra.mxu2 %vm1154_vm1, %v2718_v27  ;;  %v4208_v30 = vpop.f32.mrf.mxu3 }
  0x9e   : > { %v3390_v33 = vpop.f32.mrf.mxu2  ;;  %v1368_v35 = vpop.f32.mrf.mxu0 }
  0x9f   : > { %v3720_v34 = vadd.f32 %v3390_v33, %v1846_v29  ;;  %v1850_v38 = vpop.f32.mrf.mxu1  ;;  %v1848_v50 = vadd.f32 %v1847_v28, %v1368_v35 }
  0xa1   : > { %v4538_v41 = vadd.f32 %v4208_v30, %v3720_v34  ;;  %v6079_v30 = vld [vmem:[%s6284_s30 + $0x60] sm:$0xff] }
  0xa2   : > { %5608 = vmatmul.msk.bf16.gmra.mxu1 %vm1154_vm1, %v6076_v12  ;;  %v712_v37 = vshll.u32 %v6079_v30, 16  ;;  %v716_v4 = vshrl.u32 %v6079_v30, 16 }
  0xa3   : > { %vm4670_vm5 = vcmp.gt.f32.partialorder %v4538_v41, 0.0  ;;  %v4802_v43 = vmul.f32 0.2, %v4538_v41  ;;  %v4210_v44 = vpop.f32.mrf.mxu3 }
  0xa4   : > { %v714_v46 = vrot.slane %v712_v37, 1 }
  0xa5   : > { %v4934_v49 = vsel %vm4670_vm5, %v4538_v41, %v4802_v43 }
  0xa6   : > { %5067 = vst.msk [vmem:[%s6382_s6] sm:$0xff] %vm5066_vm4, %v4934_v49  ;;  %v3392_v52 = vpop.f32.mrf.mxu2  ;;  %v1371_v54 = vpop.f32.mrf.mxu0  ;;  %v718_v13 = vor.u32 %v716_v4, %v714_v46 }
  0xa7   : > { %v3721_v53 = vadd.f32 %v3392_v52, %v1848_v50  ;;  %v1852_v57 = vpop.f32.mrf.mxu1  ;;  %v1851_v60 = vadd.f32 %v1850_v38, %v1371_v54 }
  0xa8   : > { %6008 = vmatmul.msk.bf16.gmra.mxu3 %vm1154_vm1, %v3879_v51 }
  0xa9   : > { %v4539_v58 = vadd.f32 %v4210_v44, %v3721_v53  ;;  %5538 = vmatmul.msk.bf16.gmra.mxu0 %vm1154_vm1, %v699_v55  ;;  %v715_v55 = vsel %vm615_vm3, %v710_v45, %v714_v46 }
  0xab   : > { %vm4671_vm6 = vcmp.gt.f32.partialorder %v4539_v58, 0.0  ;;  %v4803_v59 = vmul.f32 0.2, %v4539_v58  ;;  %5938 = vmatmul.msk.bf16.gmra.mxu2 %vm1154_vm1, %v2726_v56  ;;  %v4213_v61 = vpop.f32.mrf.mxu3 }
  0xad   : > { %v4935_v0 = vsel %vm4671_vm6, %v4539_v58, %v4803_v59 }
  0xae   : > { %5068 = vst.msk [vmem:[%s6382_s6 + $0x8] sm:$0xff] %vm5066_vm4, %v4935_v0  ;;  %v3395_v1 = vpop.f32.mrf.mxu2  ;;  %v1373_v3 = vpop.f32.mrf.mxu0 }
  0xaf   : > { %v3722_v2 = vadd.f32 %v3395_v1, %v1851_v60  ;;  %v1855_v6 = vpop.f32.mrf.mxu1  ;;  %v1853_v18 = vadd.f32 %v1852_v57, %v1373_v3 }
  0xb1   : > { %v4540_v9 = vadd.f32 %v4213_v61, %v3722_v2 }
  0xb2   : > { %5609 = vmatmul.msk.bf16.gmra.mxu1 %vm1154_vm1, %v6077_v31  ;;  %v6413_v31 = vld [vmem:[%s6284_s30 + $0x70] sm:$0xff] }
  0xb3   : > { %vm4672_vm7 = vcmp.gt.f32.partialorder %v4540_v9, 0.0  ;;  %v4804_v11 = vmul.f32 0.2, %v4540_v9  ;;  %v4215_v12 = vpop.f32.mrf.mxu3  ;;  %v2739_v40 = vshll.u32 %v6413_v31, 16  ;;  %v3882_v42 = vrot.slane %v6413_v31, 1 }
  0xb4   : > { %v2743_v7 = vshrl.u32 %v6413_v31, 16  ;;  %v6449_v31 = vld [vmem:[%s6284_s30 + $0x80] sm:$0xff] }
  0xb5   : > { %v4936_v17 = vsel %vm4672_vm7, %v4540_v9, %v4804_v11  ;;  %v2741_v48 = vrot.slane %v2739_v40, 1  ;;  %v3883_v51 = vsel %vm3858_vm2, %v3880_v10, %v3882_v42  ;;  %v3884_v10 = vrot.slane %v6431_v63, 1  ;;  %v6467_v63 = vld [vmem:[%s6284_s30 + $0x88] sm:$0xff] }
  0xb6   : > { %5069 = vst.msk [vmem:[%s6382_s6 + $0x10] sm:$0xff] %vm5066_vm4, %v4936_v17  ;;  %v3397_v20 = vpop.f32.mrf.mxu2  ;;  %v1376_v22 = vpop.f32.mrf.mxu0  ;;  %v2755_v40 = vshll.u32 %v6449_v31, 16  ;;  %v2763_v8 = vshll.u32 %v6467_v63, 16 }
  0xb7   : > { %v3723_v21 = vadd.f32 %v3397_v20, %v1853_v18  ;;  %v1857_v25 = vpop.f32.mrf.mxu1  ;;  %v1856_v28 = vadd.f32 %v1855_v6, %v1376_v22  ;;  %v2742_v56 = vsel %vm615_vm3, %v2737_v47, %v2741_v48  ;;  %v2745_v15 = vor.u32 %v2743_v7, %v2741_v48 }
  0xb8   : > { %6009 = vmatmul.msk.bf16.gmra.mxu3 %vm1154_vm1, %v3881_v19  ;;  %v3885_v19 = vsel %vm3858_vm2, %v3882_v42, %v3884_v10  ;;  %v3886_v42 = vrot.slane %v6449_v31, 1  ;;  %v2753_v47 = vor.u32 %v2751_v39, %v2749_v16  ;;  %v2757_v48 = vrot.slane %v2755_v40, 1 }
  0xb9   : > { %v4541_v26 = vadd.f32 %v4215_v12, %v3723_v21  ;;  %5539 = vmatmul.msk.bf16.gmra.mxu0 %vm1154_vm1, %v707_v23  ;;  %v2759_v7 = vshrl.u32 %v6449_v31, 16  ;;  %v6485_v31 = vld [vmem:[%s6284_s30 + $0x90] sm:$0xff]  ;;  %v2767_v39 = vshrl.u32 %v6467_v63, 16 }
  0xba   : > { %v2771_v40 = vshll.u32 %v6485_v31, 16 }
  0xbb   : > { %vm4673_vm8 = vcmp.gt.f32.partialorder %v4541_v26, 0.0  ;;  %v4805_v27 = vmul.f32 0.2, %v4541_v26  ;;  %5939 = vmatmul.msk.bf16.gmra.mxu2 %vm1154_vm1, %v2734_v24  ;;  %v4218_v29 = vpop.f32.mrf.mxu3  ;;  %v2750_v24 = vsel %vm615_vm3, %v2745_v15, %v2749_v16  ;;  %v2761_v15 = vor.u32 %v2759_v7, %v2757_v48 }
  0xbc   : > { %v2765_v16 = vrot.slane %v2763_v8, 1  ;;  %v2775_v7 = vshrl.u32 %v6485_v31, 16 }
  0xbd   : > { %v4937_v32 = vsel %vm4673_vm8, %v4541_v26, %v4805_v27 }
  0xbe   : > { %5070 = vst.msk [vmem:[%s6382_s6 + $0x18] sm:$0xff] %vm5066_vm4, %v4937_v32  ;;  %v3400_v33 = vpop.f32.mrf.mxu2  ;;  %v1378_v35 = vpop.f32.mrf.mxu0 }
  0xbf   : > { %v3724_v34 = vadd.f32 %v3400_v33, %v1856_v28  ;;  %v1860_v38 = vpop.f32.mrf.mxu1  ;;  %v1858_v50 = vadd.f32 %v1857_v25, %v1378_v35 }
  0xc1   : > { %v4542_v41 = vadd.f32 %v4218_v29, %v3724_v34 }
  0xc2   : > { %5610 = vmatmul.msk.bf16.gmra.mxu1 %vm1154_vm1, %v6078_v62  ;;  %v6080_v62 = vld [vmem:[%s6284_s30 + $0x68] sm:$0xff] }
  0xc3   : > { %vm4674_vm9 = vcmp.gt.f32.partialorder %v4542_v41, 0.0  ;;  %v4806_v43 = vmul.f32 0.2, %v4542_v41  ;;  %v4220_v44 = vpop.f32.mrf.mxu3  ;;  %v720_v5 = vshll.u32 %v6080_v62, 16  ;;  %v724_v36 = vshrl.u32 %v6080_v62, 16 }
  0xc5   : > { %v4938_v49 = vsel %vm4674_vm9, %v4542_v41, %v4806_v43  ;;  %v722_v14 = vrot.slane %v720_v5, 1 }
  0xc6   : > { %5071 = vst.msk [vmem:[%s6382_s6 + $0x20] sm:$0xff] %vm5066_vm4, %v4938_v49  ;;  %v3402_v52 = vpop.f32.mrf.mxu2  ;;  %v1381_v54 = vpop.f32.mrf.mxu0 }
  0xc7   : > { %v3725_v53 = vadd.f32 %v3402_v52, %v1858_v50  ;;  %v1862_v57 = vpop.f32.mrf.mxu1  ;;  %v1861_v60 = vadd.f32 %v1860_v38, %v1381_v54  ;;  %v723_v23 = vsel %vm615_vm3, %v718_v13, %v722_v14  ;;  %v726_v45 = vor.u32 %v724_v36, %v722_v14 }
  0xc8   : > { %6010 = vmatmul.msk.bf16.gmra.mxu3 %vm1154_vm1, %v3883_v51  ;;  %v3887_v51 = vsel %vm3858_vm2, %v3884_v10, %v3886_v42  ;;  %v3888_v10 = vrot.slane %v6467_v63, 1  ;;  %v6503_v63 = vld [vmem:[%s6284_s30 + $0x98] sm:$0xff] }
  0xc9   : > { %v4543_v58 = vadd.f32 %v4220_v44, %v3725_v53  ;;  %5540 = vmatmul.msk.bf16.gmra.mxu0 %vm1154_vm1, %v715_v55  ;;  %v2779_v8 = vshll.u32 %v6503_v63, 16 }
  0xcb   : > { %vm4675_vm10 = vcmp.gt.f32.partialorder %v4543_v58, 0.0  ;;  %v4807_v59 = vmul.f32 0.2, %v4543_v58  ;;  %5940 = vmatmul.msk.bf16.gmra.mxu2 %vm1154_vm1, %v2742_v56  ;;  %v4223_v61 = vpop.f32.mrf.mxu3  ;;  %v2758_v56 = vsel %vm615_vm3, %v2753_v47, %v2757_v48  ;;  %v2769_v47 = vor.u32 %v2767_v39, %v2765_v16 }
  0xcc   : > { %v2773_v48 = vrot.slane %v2771_v40, 1  ;;  %v2783_v39 = vshrl.u32 %v6503_v63, 16 }
  0xcd   : > { %v4939_v0 = vsel %vm4675_vm10, %v4543_v58, %v4807_v59 }
  0xce   : > { %5072 = vst.msk [vmem:[%s6382_s6 + $0x28] sm:$0xff] %vm5066_vm4, %v4939_v0  ;;  %v3405_v1 = vpop.f32.mrf.mxu2  ;;  %v1383_v3 = vpop.f32.mrf.mxu0 }
  0xcf   : > { %v3726_v2 = vadd.f32 %v3405_v1, %v1861_v60  ;;  %v1865_v6 = vpop.f32.mrf.mxu1  ;;  %v1863_v18 = vadd.f32 %v1862_v57, %v1383_v3 }
  0xd1   : > { %v4544_v9 = vadd.f32 %v4223_v61, %v3726_v2 }
  0xd2   : > { %5611 = vmatmul.msk.bf16.gmra.mxu1 %vm1154_vm1, %v6079_v30  ;;  %v6081_v30 = vld [vmem:[%s6284_s30 + $0x70] sm:$0xff] }
  0xd3   : > { %vm4676_vm11 = vcmp.gt.f32.partialorder %v4544_v9, 0.0  ;;  %v4808_v11 = vmul.f32 0.2, %v4544_v9  ;;  %v4225_v12 = vpop.f32.mrf.mxu3  ;;  %v728_v37 = vshll.u32 %v6081_v30, 16  ;;  %v732_v4 = vshrl.u32 %v6081_v30, 16 }
  0xd5   : > { %v4940_v17 = vsel %vm4676_vm11, %v4544_v9, %v4808_v11  ;;  %v730_v46 = vrot.slane %v728_v37, 1 }
  0xd6   : > { %5073 = vst.msk [vmem:[%s6382_s6 + $0x30] sm:$0xff] %vm5066_vm4, %v4940_v17  ;;  %v3407_v20 = vpop.f32.mrf.mxu2  ;;  %v1386_v22 = vpop.f32.mrf.mxu0 }
  0xd7   : > { %v3727_v21 = vadd.f32 %v3407_v20, %v1863_v18  ;;  %v1867_v25 = vpop.f32.mrf.mxu1  ;;  %v1866_v28 = vadd.f32 %v1865_v6, %v1386_v22  ;;  %v731_v55 = vsel %vm615_vm3, %v726_v45, %v730_v46  ;;  %v734_v13 = vor.u32 %v732_v4, %v730_v46 }
  0xd8   : > { %6011 = vmatmul.msk.bf16.gmra.mxu3 %vm1154_vm1, %v3885_v19  ;;  %v3889_v19 = vsel %vm3858_vm2, %v3886_v42, %v3888_v10  ;;  %v3890_v42 = vrot.slane %v6485_v31, 1  ;;  %v6521_v31 = vld [vmem:[%s6284_s30 + $0xa0] sm:$0xff] }
  0xd9   : > { %v4545_v26 = vadd.f32 %v4225_v12, %v3727_v21  ;;  %5541 = vmatmul.msk.bf16.gmra.mxu0 %vm1154_vm1, %v723_v23  ;;  %v2787_v40 = vshll.u32 %v6521_v31, 16 }
  0xdb   : > { %vm4677_vm12 = vcmp.gt.f32.partialorder %v4545_v26, 0.0  ;;  %v4809_v27 = vmul.f32 0.2, %v4545_v26  ;;  %5941 = vmatmul.msk.bf16.gmra.mxu2 %vm1154_vm1, %v2750_v24  ;;  %v4228_v29 = vpop.f32.mrf.mxu3  ;;  %v2766_v24 = vsel %vm615_vm3, %v2761_v15, %v2765_v16  ;;  %v2777_v15 = vor.u32 %v2775_v7, %v2773_v48 }
  0xdc   : > { %v2781_v16 = vrot.slane %v2779_v8, 1  ;;  %v2791_v7 = vshrl.u32 %v6521_v31, 16 }
  0xdd   : > { %v4941_v32 = vsel %vm4677_vm12, %v4545_v26, %v4809_v27 }
  0xde   : > { %5074 = vst.msk [vmem:[%s6382_s6 + $0x38] sm:$0xff] %vm5066_vm4, %v4941_v32  ;;  %v3410_v33 = vpop.f32.mrf.mxu2  ;;  %v1388_v35 = vpop.f32.mrf.mxu0 }
  0xdf   : > { %v3728_v34 = vadd.f32 %v3410_v33, %v1866_v28  ;;  %v1870_v38 = vpop.f32.mrf.mxu1  ;;  %v1868_v50 = vadd.f32 %v1867_v25, %v1388_v35 }
  0xe1   : > { %v4546_v41 = vadd.f32 %v4228_v29, %v3728_v34 }
  0xe2   : > { %5612 = vmatmul.msk.bf16.gmra.mxu1 %vm1154_vm1, %v6080_v62  ;;  %v6082_v62 = vld [vmem:[%s6284_s30 + $0x78] sm:$0xff] }
  0xe3   : > { %vm4678_vm13 = vcmp.gt.f32.partialorder %v4546_v41, 0.0  ;;  %v4810_v43 = vmul.f32 0.2, %v4546_v41  ;;  %v4230_v44 = vpop.f32.mrf.mxu3  ;;  %v736_v5 = vshll.u32 %v6082_v62, 16  ;;  %v740_v36 = vshrl.u32 %v6082_v62, 16 }
  0xe5   : > { %v4942_v49 = vsel %vm4678_vm13, %v4546_v41, %v4810_v43  ;;  %v738_v14 = vrot.slane %v736_v5, 1 }
  0xe6   : > { %5075 = vst.msk [vmem:[%s6382_s6 + $0x40] sm:$0xff] %vm5066_vm4, %v4942_v49  ;;  %v3412_v52 = vpop.f32.mrf.mxu2  ;;  %v1391_v54 = vpop.f32.mrf.mxu0 }
  0xe7   : > { %v3729_v53 = vadd.f32 %v3412_v52, %v1868_v50  ;;  %v1872_v57 = vpop.f32.mrf.mxu1  ;;  %v1871_v60 = vadd.f32 %v1870_v38, %v1391_v54  ;;  %v739_v23 = vsel %vm615_vm3, %v734_v13, %v738_v14  ;;  %v742_v45 = vor.u32 %v740_v36, %v738_v14 }
  0xe8   : > { %6012 = vmatmul.msk.bf16.gmra.mxu3 %vm1154_vm1, %v3887_v51  ;;  %v3891_v51 = vsel %vm3858_vm2, %v3888_v10, %v3890_v42  ;;  %v3892_v10 = vrot.slane %v6503_v63, 1  ;;  %v6539_v63 = vld [vmem:[%s6284_s30 + $0xa8] sm:$0xff] }
  0xe9   : > { %v4547_v58 = vadd.f32 %v4230_v44, %v3729_v53  ;;  %5542 = vmatmul.msk.bf16.gmra.mxu0 %vm1154_vm1, %v731_v55  ;;  %v2795_v8 = vshll.u32 %v6539_v63, 16 }
  0xeb   : > { %vm4679_vm14 = vcmp.gt.f32.partialorder %v4547_v58, 0.0  ;;  %v4811_v59 = vmul.f32 0.2, %v4547_v58  ;;  %5942 = vmatmul.msk.bf16.gmra.mxu2 %vm1154_vm1, %v2758_v56  ;;  %v4233_v61 = vpop.f32.mrf.mxu3  ;;  %v2774_v56 = vsel %vm615_vm3, %v2769_v47, %v2773_v48  ;;  %v2785_v47 = vor.u32 %v2783_v39, %v2781_v16 }
  0xec   : > { %v2789_v48 = vrot.slane %v2787_v40, 1  ;;  %v2799_v39 = vshrl.u32 %v6539_v63, 16 }
  0xed   : > { %v4943_v0 = vsel %vm4679_vm14, %v4547_v58, %v4811_v59 }
  0xee   : > { %5076 = vst.msk [vmem:[%s6382_s6 + $0x48] sm:$0xff] %vm5066_vm4, %v4943_v0  ;;  %v3415_v1 = vpop.f32.mrf.mxu2  ;;  %v1393_v3 = vpop.f32.mrf.mxu0 }
  0xef   : > { %v3730_v2 = vadd.f32 %v3415_v1, %v1871_v60  ;;  %v1875_v6 = vpop.f32.mrf.mxu1  ;;  %v1873_v18 = vadd.f32 %v1872_v57, %v1393_v3 }
  0xf1   : > { %v4548_v9 = vadd.f32 %v4233_v61, %v3730_v2 }
  0xf2   : > { %5613 = vmatmul.msk.bf16.gmra.mxu1 %vm1154_vm1, %v6081_v30  ;;  %v6083_v30 = vld [vmem:[%s6284_s30 + $0x80] sm:$0xff] }
  0xf3   : > { %vm4680_vm15 = vcmp.gt.f32.partialorder %v4548_v9, 0.0  ;;  %v4812_v11 = vmul.f32 0.2, %v4548_v9  ;;  %v4235_v12 = vpop.f32.mrf.mxu3  ;;  %v744_v37 = vshll.u32 %v6083_v30, 16  ;;  %v748_v4 = vshrl.u32 %v6083_v30, 16 }
  0xf5   : > { %v4944_v17 = vsel %vm4680_vm15, %v4548_v9, %v4812_v11  ;;  %v746_v46 = vrot.slane %v744_v37, 1 }
  0xf6   : > { %5077 = vst.msk [vmem:[%s6382_s6 + $0x50] sm:$0xff] %vm5066_vm4, %v4944_v17  ;;  %v3417_v20 = vpop.f32.mrf.mxu2  ;;  %v1396_v22 = vpop.f32.mrf.mxu0 }
  0xf7   : > { %v3731_v21 = vadd.f32 %v3417_v20, %v1873_v18  ;;  %v1877_v25 = vpop.f32.mrf.mxu1  ;;  %v1876_v28 = vadd.f32 %v1875_v6, %v1396_v22  ;;  %v747_v55 = vsel %vm615_vm3, %v742_v45, %v746_v46  ;;  %v750_v13 = vor.u32 %v748_v4, %v746_v46 }
  0xf8   : > { %6013 = vmatmul.msk.bf16.gmra.mxu3 %vm1154_vm1, %v3889_v19  ;;  %v3893_v19 = vsel %vm3858_vm2, %v3890_v42, %v3892_v10  ;;  %v3894_v42 = vrot.slane %v6521_v31, 1  ;;  %v6557_v31 = vld [vmem:[%s6284_s30 + $0xb0] sm:$0xff] }
  0xf9   : > { %v4549_v26 = vadd.f32 %v4235_v12, %v3731_v21  ;;  %5543 = vmatmul.msk.bf16.gmra.mxu0 %vm1154_vm1, %v739_v23  ;;  %v2803_v40 = vshll.u32 %v6557_v31, 16 }
  0xfb   : > { %vm4681_vm0 = vcmp.gt.f32.partialorder %v4549_v26, 0.0  ;;  %v4813_v27 = vmul.f32 0.2, %v4549_v26  ;;  %5943 = vmatmul.msk.bf16.gmra.mxu2 %vm1154_vm1, %v2766_v24  ;;  %v4238_v29 = vpop.f32.mrf.mxu3  ;;  %v2782_v24 = vsel %vm615_vm3, %v2777_v15, %v2781_v16  ;;  %v2793_v15 = vor.u32 %v2791_v7, %v2789_v48 }
  0xfc   : > { %v2797_v16 = vrot.slane %v2795_v8, 1  ;;  %v2807_v7 = vshrl.u32 %v6557_v31, 16 }
  0xfd   : > { %v4945_v32 = vsel %vm4681_vm0, %v4549_v26, %v4813_v27 }
  0xfe   : > { %5078 = vst.msk [vmem:[%s6382_s6 + $0x58] sm:$0xff] %vm5066_vm4, %v4945_v32  ;;  %v3420_v33 = vpop.f32.mrf.mxu2  ;;  %v1398_v35 = vpop.f32.mrf.mxu0 }
  0xff   : > { %v3732_v34 = vadd.f32 %v3420_v33, %v1876_v28  ;;  %v1880_v38 = vpop.f32.mrf.mxu1  ;;  %v1878_v50 = vadd.f32 %v1877_v25, %v1398_v35 }
 0x101   : > { %v4550_v41 = vadd.f32 %v4238_v29, %v3732_v34 }
 0x102   : > { %5614 = vmatmul.msk.bf16.gmra.mxu1 %vm1154_vm1, %v6082_v62  ;;  %v6084_v62 = vld [vmem:[%s6284_s30 + $0x88] sm:$0xff] }
 0x103   : > { %vm4682_vm5 = vcmp.gt.f32.partialorder %v4550_v41, 0.0  ;;  %v4814_v43 = vmul.f32 0.2, %v4550_v41  ;;  %v4240_v44 = vpop.f32.mrf.mxu3  ;;  %v752_v5 = vshll.u32 %v6084_v62, 16  ;;  %v756_v36 = vshrl.u32 %v6084_v62, 16 }
 0x105   : > { %v4946_v49 = vsel %vm4682_vm5, %v4550_v41, %v4814_v43  ;;  %v754_v14 = vrot.slane %v752_v5, 1 }
 0x106   : > { %5079 = vst.msk [vmem:[%s6382_s6 + $0x60] sm:$0xff] %vm5066_vm4, %v4946_v49  ;;  %v3422_v52 = vpop.f32.mrf.mxu2  ;;  %v1401_v54 = vpop.f32.mrf.mxu0 }
 0x107   : > { %v3733_v53 = vadd.f32 %v3422_v52, %v1878_v50  ;;  %v1882_v57 = vpop.f32.mrf.mxu1  ;;  %v1881_v60 = vadd.f32 %v1880_v38, %v1401_v54  ;;  %v755_v23 = vsel %vm615_vm3, %v750_v13, %v754_v14  ;;  %v758_v45 = vor.u32 %v756_v36, %v754_v14 }
 0x108   : > { %6014 = vmatmul.msk.bf16.gmra.mxu3 %vm1154_vm1, %v3891_v51  ;;  %v3895_v51 = vsel %vm3858_vm2, %v3892_v10, %v3894_v42  ;;  %v3896_v10 = vrot.slane %v6539_v63, 1  ;;  %v6575_v63 = vld [vmem:[%s6284_s30 + $0xb8] sm:$0xff] }
 0x109   : > { %v4551_v58 = vadd.f32 %v4240_v44, %v3733_v53  ;;  %5544 = vmatmul.msk.bf16.gmra.mxu0 %vm1154_vm1, %v747_v55  ;;  %v2811_v8 = vshll.u32 %v6575_v63, 16 }
 0x10b   : > { %vm4683_vm6 = vcmp.gt.f32.partialorder %v4551_v58, 0.0  ;;  %v4815_v59 = vmul.f32 0.2, %v4551_v58  ;;  %5944 = vmatmul.msk.bf16.gmra.mxu2 %vm1154_vm1, %v2774_v56  ;;  %v4243_v61 = vpop.f32.mrf.mxu3  ;;  %v2790_v56 = vsel %vm615_vm3, %v2785_v47, %v2789_v48  ;;  %v2801_v47 = vor.u32 %v2799_v39, %v2797_v16 }
 0x10c   : > { %v2805_v48 = vrot.slane %v2803_v40, 1  ;;  %v2815_v39 = vshrl.u32 %v6575_v63, 16 }
 0x10d   : > { %v4947_v0 = vsel %vm4683_vm6, %v4551_v58, %v4815_v59 }
 0x10e   : > { %5080 = vst.msk [vmem:[%s6382_s6 + $0x68] sm:$0xff] %vm5066_vm4, %v4947_v0  ;;  %v3425_v1 = vpop.f32.mrf.mxu2  ;;  %v1403_v3 = vpop.f32.mrf.mxu0 }
 0x10f   : > { %v3734_v2 = vadd.f32 %v3425_v1, %v1881_v60  ;;  %v1885_v6 = vpop.f32.mrf.mxu1  ;;  %v1883_v18 = vadd.f32 %v1882_v57, %v1403_v3 }
 0x111   : > { %v4552_v9 = vadd.f32 %v4243_v61, %v3734_v2 }
 0x112   : > { %5615 = vmatmul.msk.bf16.gmra.mxu1 %vm1154_vm1, %v6083_v30  ;;  %v6085_v30 = vld [vmem:[%s6284_s30 + $0x90] sm:$0xff] }
 0x113   : > { %vm4684_vm7 = vcmp.gt.f32.partialorder %v4552_v9, 0.0  ;;  %v4816_v11 = vmul.f32 0.2, %v4552_v9  ;;  %v4245_v12 = vpop.f32.mrf.mxu3  ;;  %v760_v37 = vshll.u32 %v6085_v30, 16  ;;  %v764_v4 = vshrl.u32 %v6085_v30, 16 }
 0x115   : > { %v4948_v17 = vsel %vm4684_vm7, %v4552_v9, %v4816_v11  ;;  %v762_v46 = vrot.slane %v760_v37, 1 }
 0x116   : > { %5081 = vst.msk [vmem:[%s6382_s6 + $0x70] sm:$0xff] %vm5066_vm4, %v4948_v17  ;;  %v3427_v20 = vpop.f32.mrf.mxu2  ;;  %v1406_v22 = vpop.f32.mrf.mxu0 }
 0x117   : > { %v3735_v21 = vadd.f32 %v3427_v20, %v1883_v18  ;;  %v1887_v25 = vpop.f32.mrf.mxu1  ;;  %v1886_v28 = vadd.f32 %v1885_v6, %v1406_v22  ;;  %v763_v55 = vsel %vm615_vm3, %v758_v45, %v762_v46  ;;  %v766_v13 = vor.u32 %v764_v4, %v762_v46 }
 0x118   : > { %6015 = vmatmul.msk.bf16.gmra.mxu3 %vm1154_vm1, %v3893_v19  ;;  %v3897_v19 = vsel %vm3858_vm2, %v3894_v42, %v3896_v10  ;;  %v3898_v42 = vrot.slane %v6557_v31, 1  ;;  %v6593_v31 = vld [vmem:[%s6284_s30 + $0xc0] sm:$0xff] }
 0x119   : > { %v4553_v26 = vadd.f32 %v4245_v12, %v3735_v21  ;;  %5545 = vmatmul.msk.bf16.gmra.mxu0 %vm1154_vm1, %v755_v23  ;;  %v2819_v40 = vshll.u32 %v6593_v31, 16 }
 0x11b   : > { %vm4685_vm8 = vcmp.gt.f32.partialorder %v4553_v26, 0.0  ;;  %v4817_v27 = vmul.f32 0.2, %v4553_v26  ;;  %5945 = vmatmul.msk.bf16.gmra.mxu2 %vm1154_vm1, %v2782_v24  ;;  %v4248_v29 = vpop.f32.mrf.mxu3  ;;  %v2798_v24 = vsel %vm615_vm3, %v2793_v15, %v2797_v16  ;;  %v2809_v15 = vor.u32 %v2807_v7, %v2805_v48 }
 0x11c   : > { %v2813_v16 = vrot.slane %v2811_v8, 1  ;;  %v2823_v7 = vshrl.u32 %v6593_v31, 16 }
 0x11d   : > { %v4949_v32 = vsel %vm4685_vm8, %v4553_v26, %v4817_v27 }
 0x11e   : > { %5082 = vst.msk [vmem:[%s6382_s6 + $0x78] sm:$0xff] %vm5066_vm4, %v4949_v32  ;;  %v3430_v33 = vpop.f32.mrf.mxu2  ;;  %v1408_v35 = vpop.f32.mrf.mxu0 }
 0x11f   : > { %v3736_v34 = vadd.f32 %v3430_v33, %v1886_v28  ;;  %v1890_v38 = vpop.f32.mrf.mxu1  ;;  %v1888_v50 = vadd.f32 %v1887_v25, %v1408_v35 }
 0x121   : > { %v4554_v41 = vadd.f32 %v4248_v29, %v3736_v34 }
 0x122   : > { %5616 = vmatmul.msk.bf16.gmra.mxu1 %vm1154_vm1, %v6084_v62  ;;  %v6086_v62 = vld [vmem:[%s6284_s30 + $0x98] sm:$0xff] }
 0x123   : > { %vm4686_vm9 = vcmp.gt.f32.partialorder %v4554_v41, 0.0  ;;  %v4818_v43 = vmul.f32 0.2, %v4554_v41  ;;  %v4250_v44 = vpop.f32.mrf.mxu3  ;;  %v768_v5 = vshll.u32 %v6086_v62, 16  ;;  %v772_v36 = vshrl.u32 %v6086_v62, 16 }
 0x125   : > { %v4950_v49 = vsel %vm4686_vm9, %v4554_v41, %v4818_v43  ;;  %v770_v14 = vrot.slane %v768_v5, 1 }
 0x126   : > { %5083 = vst.msk [vmem:[%s6382_s6 + $0x80] sm:$0xff] %vm5066_vm4, %v4950_v49  ;;  %v3432_v52 = vpop.f32.mrf.mxu2  ;;  %v1411_v54 = vpop.f32.mrf.mxu0 }
 0x127   : > { %v3737_v53 = vadd.f32 %v3432_v52, %v1888_v50  ;;  %v1892_v57 = vpop.f32.mrf.mxu1  ;;  %v1891_v60 = vadd.f32 %v1890_v38, %v1411_v54  ;;  %v771_v23 = vsel %vm615_vm3, %v766_v13, %v770_v14  ;;  %v774_v45 = vor.u32 %v772_v36, %v770_v14 }
 0x128   : > { %6016 = vmatmul.msk.bf16.gmra.mxu3 %vm1154_vm1, %v3895_v51  ;;  %v3899_v51 = vsel %vm3858_vm2, %v3896_v10, %v3898_v42  ;;  %v3900_v10 = vrot.slane %v6575_v63, 1  ;;  %v6611_v63 = vld [vmem:[%s6284_s30 + $0xc8] sm:$0xff] }
 0x129   : > { %v4555_v58 = vadd.f32 %v4250_v44, %v3737_v53  ;;  %5546 = vmatmul.msk.bf16.gmra.mxu0 %vm1154_vm1, %v763_v55  ;;  %v2827_v8 = vshll.u32 %v6611_v63, 16 }
 0x12b   : > { %vm4687_vm10 = vcmp.gt.f32.partialorder %v4555_v58, 0.0  ;;  %v4819_v59 = vmul.f32 0.2, %v4555_v58  ;;  %5946 = vmatmul.msk.bf16.gmra.mxu2 %vm1154_vm1, %v2790_v56  ;;  %v4253_v61 = vpop.f32.mrf.mxu3  ;;  %v2806_v56 = vsel %vm615_vm3, %v2801_v47, %v2805_v48  ;;  %v2817_v47 = vor.u32 %v2815_v39, %v2813_v16 }
 0x12c   : > { %v2821_v48 = vrot.slane %v2819_v40, 1  ;;  %v2831_v39 = vshrl.u32 %v6611_v63, 16 }
 0x12d   : > { %v4951_v0 = vsel %vm4687_vm10, %v4555_v58, %v4819_v59 }
 0x12e   : > { %5084 = vst.msk [vmem:[%s6382_s6 + $0x88] sm:$0xff] %vm5066_vm4, %v4951_v0  ;;  %v3435_v1 = vpop.f32.mrf.mxu2  ;;  %v1413_v3 = vpop.f32.mrf.mxu0 }
 0x12f   : > { %v3738_v2 = vadd.f32 %v3435_v1, %v1891_v60  ;;  %v1895_v6 = vpop.f32.mrf.mxu1  ;;  %v1893_v18 = vadd.f32 %v1892_v57, %v1413_v3 }
 0x131   : > { %v4556_v9 = vadd.f32 %v4253_v61, %v3738_v2 }
 0x132   : > { %5617 = vmatmul.msk.bf16.gmra.mxu1 %vm1154_vm1, %v6085_v30  ;;  %v6087_v30 = vld [vmem:[%s6284_s30 + $0xa0] sm:$0xff] }
 0x133   : > { %vm4688_vm11 = vcmp.gt.f32.partialorder %v4556_v9, 0.0  ;;  %v4820_v11 = vmul.f32 0.2, %v4556_v9  ;;  %v4255_v12 = vpop.f32.mrf.mxu3  ;;  %v776_v37 = vshll.u32 %v6087_v30, 16  ;;  %v780_v4 = vshrl.u32 %v6087_v30, 16 }
 0x135   : > { %v4952_v17 = vsel %vm4688_vm11, %v4556_v9, %v4820_v11  ;;  %v778_v46 = vrot.slane %v776_v37, 1 }
 0x136   : > { %5085 = vst.msk [vmem:[%s6382_s6 + $0x90] sm:$0xff] %vm5066_vm4, %v4952_v17  ;;  %v3437_v20 = vpop.f32.mrf.mxu2  ;;  %v1416_v22 = vpop.f32.mrf.mxu0 }
 0x137   : > { %v3739_v21 = vadd.f32 %v3437_v20, %v1893_v18  ;;  %v1897_v25 = vpop.f32.mrf.mxu1  ;;  %v1896_v28 = vadd.f32 %v1895_v6, %v1416_v22  ;;  %v779_v55 = vsel %vm615_vm3, %v774_v45, %v778_v46  ;;  %v782_v13 = vor.u32 %v780_v4, %v778_v46 }
 0x138   : > { %6017 = vmatmul.msk.bf16.gmra.mxu3 %vm1154_vm1, %v3897_v19  ;;  %v3901_v19 = vsel %vm3858_vm2, %v3898_v42, %v3900_v10  ;;  %v3902_v42 = vrot.slane %v6593_v31, 1  ;;  %v6629_v31 = vld [vmem:[%s6284_s30 + $0xd0] sm:$0xff] }
 0x139   : > { %v4557_v26 = vadd.f32 %v4255_v12, %v3739_v21  ;;  %5547 = vmatmul.msk.bf16.gmra.mxu0 %vm1154_vm1, %v771_v23  ;;  %v2835_v40 = vshll.u32 %v6629_v31, 16 }
 0x13b   : > { %vm4689_vm12 = vcmp.gt.f32.partialorder %v4557_v26, 0.0  ;;  %v4821_v27 = vmul.f32 0.2, %v4557_v26  ;;  %5947 = vmatmul.msk.bf16.gmra.mxu2 %vm1154_vm1, %v2798_v24  ;;  %v4258_v29 = vpop.f32.mrf.mxu3  ;;  %v2814_v24 = vsel %vm615_vm3, %v2809_v15, %v2813_v16  ;;  %v2825_v15 = vor.u32 %v2823_v7, %v2821_v48 }
 0x13c   : > { %v2829_v16 = vrot.slane %v2827_v8, 1  ;;  %v2839_v7 = vshrl.u32 %v6629_v31, 16 }
 0x13d   : > { %v4953_v32 = vsel %vm4689_vm12, %v4557_v26, %v4821_v27 }
 0x13e   : > { %5086 = vst.msk [vmem:[%s6382_s6 + $0x98] sm:$0xff] %vm5066_vm4, %v4953_v32  ;;  %v3440_v33 = vpop.f32.mrf.mxu2  ;;  %v1418_v35 = vpop.f32.mrf.mxu0 }
 0x13f   : > { %v3740_v34 = vadd.f32 %v3440_v33, %v1896_v28  ;;  %v1900_v38 = vpop.f32.mrf.mxu1  ;;  %v1898_v50 = vadd.f32 %v1897_v25, %v1418_v35 }
 0x141   : > { %v4558_v41 = vadd.f32 %v4258_v29, %v3740_v34 }
 0x142   : > { %5618 = vmatmul.msk.bf16.gmra.mxu1 %vm1154_vm1, %v6086_v62  ;;  %v6088_v62 = vld [vmem:[%s6284_s30 + $0xa8] sm:$0xff] }
 0x143   : > { %vm4690_vm13 = vcmp.gt.f32.partialorder %v4558_v41, 0.0  ;;  %v4822_v43 = vmul.f32 0.2, %v4558_v41  ;;  %v4260_v44 = vpop.f32.mrf.mxu3  ;;  %v784_v5 = vshll.u32 %v6088_v62, 16  ;;  %v788_v36 = vshrl.u32 %v6088_v62, 16 }
 0x145   : > { %v4954_v49 = vsel %vm4690_vm13, %v4558_v41, %v4822_v43  ;;  %v786_v14 = vrot.slane %v784_v5, 1 }
 0x146   : > { %5087 = vst.msk [vmem:[%s6382_s6 + $0xa0] sm:$0xff] %vm5066_vm4, %v4954_v49  ;;  %v3442_v52 = vpop.f32.mrf.mxu2  ;;  %v1421_v54 = vpop.f32.mrf.mxu0 }
 0x147   : > { %v3741_v53 = vadd.f32 %v3442_v52, %v1898_v50  ;;  %v1902_v57 = vpop.f32.mrf.mxu1  ;;  %v1901_v60 = vadd.f32 %v1900_v38, %v1421_v54  ;;  %v787_v23 = vsel %vm615_vm3, %v782_v13, %v786_v14  ;;  %v790_v45 = vor.u32 %v788_v36, %v786_v14 }
 0x148   : > { %6018 = vmatmul.msk.bf16.gmra.mxu3 %vm1154_vm1, %v3899_v51  ;;  %v3903_v51 = vsel %vm3858_vm2, %v3900_v10, %v3902_v42  ;;  %v3904_v10 = vrot.slane %v6611_v63, 1  ;;  %v6647_v63 = vld [vmem:[%s6284_s30 + $0xd8] sm:$0xff] }
 0x149   : > { %v4559_v58 = vadd.f32 %v4260_v44, %v3741_v53  ;;  %5548 = vmatmul.msk.bf16.gmra.mxu0 %vm1154_vm1, %v779_v55  ;;  %v2843_v8 = vshll.u32 %v6647_v63, 16 }
 0x14b   : > { %vm4691_vm14 = vcmp.gt.f32.partialorder %v4559_v58, 0.0  ;;  %v4823_v59 = vmul.f32 0.2, %v4559_v58  ;;  %5948 = vmatmul.msk.bf16.gmra.mxu2 %vm1154_vm1, %v2806_v56  ;;  %v4263_v61 = vpop.f32.mrf.mxu3  ;;  %v2822_v56 = vsel %vm615_vm3, %v2817_v47, %v2821_v48  ;;  %v2833_v47 = vor.u32 %v2831_v39, %v2829_v16 }
 0x14c   : > { %v2837_v48 = vrot.slane %v2835_v40, 1  ;;  %v2847_v39 = vshrl.u32 %v6647_v63, 16 }
 0x14d   : > { %v4955_v0 = vsel %vm4691_vm14, %v4559_v58, %v4823_v59 }
 0x14e   : > { %5088 = vst.msk [vmem:[%s6382_s6 + $0xa8] sm:$0xff] %vm5066_vm4, %v4955_v0  ;;  %v3445_v1 = vpop.f32.mrf.mxu2  ;;  %v1423_v3 = vpop.f32.mrf.mxu0 }
 0x14f   : > { %v3742_v2 = vadd.f32 %v3445_v1, %v1901_v60  ;;  %v1905_v6 = vpop.f32.mrf.mxu1  ;;  %v1903_v18 = vadd.f32 %v1902_v57, %v1423_v3 }
 0x151   : > { %v4560_v9 = vadd.f32 %v4263_v61, %v3742_v2 }
 0x152   : > { %5619 = vmatmul.msk.bf16.gmra.mxu1 %vm1154_vm1, %v6087_v30  ;;  %v6089_v30 = vld [vmem:[%s6284_s30 + $0xb0] sm:$0xff] }
 0x153   : > { %vm4692_vm15 = vcmp.gt.f32.partialorder %v4560_v9, 0.0  ;;  %v4824_v11 = vmul.f32 0.2, %v4560_v9  ;;  %v4265_v12 = vpop.f32.mrf.mxu3  ;;  %v792_v37 = vshll.u32 %v6089_v30, 16  ;;  %v796_v4 = vshrl.u32 %v6089_v30, 16 }
 0x155   : > { %v4956_v17 = vsel %vm4692_vm15, %v4560_v9, %v4824_v11  ;;  %v794_v46 = vrot.slane %v792_v37, 1 }
 0x156   : > { %5089 = vst.msk [vmem:[%s6382_s6 + $0xb0] sm:$0xff] %vm5066_vm4, %v4956_v17  ;;  %v3447_v20 = vpop.f32.mrf.mxu2  ;;  %v1426_v22 = vpop.f32.mrf.mxu0 }
 0x157   : > { %v3743_v21 = vadd.f32 %v3447_v20, %v1903_v18  ;;  %v1907_v25 = vpop.f32.mrf.mxu1  ;;  %v1906_v28 = vadd.f32 %v1905_v6, %v1426_v22  ;;  %v795_v55 = vsel %vm615_vm3, %v790_v45, %v794_v46  ;;  %v798_v13 = vor.u32 %v796_v4, %v794_v46 }
 0x158   : > { %6019 = vmatmul.msk.bf16.gmra.mxu3 %vm1154_vm1, %v3901_v19  ;;  %v3905_v19 = vsel %vm3858_vm2, %v3902_v42, %v3904_v10  ;;  %v3906_v42 = vrot.slane %v6629_v31, 1  ;;  %v6665_v31 = vld [vmem:[%s6284_s30 + $0xe0] sm:$0xff] }
 0x159   : > { %v4561_v26 = vadd.f32 %v4265_v12, %v3743_v21  ;;  %5549 = vmatmul.msk.bf16.gmra.mxu0 %vm1154_vm1, %v787_v23  ;;  %v2851_v40 = vshll.u32 %v6665_v31, 16 }
 0x15b   : > { %vm4693_vm0 = vcmp.gt.f32.partialorder %v4561_v26, 0.0  ;;  %v4825_v27 = vmul.f32 0.2, %v4561_v26  ;;  %5949 = vmatmul.msk.bf16.gmra.mxu2 %vm1154_vm1, %v2814_v24  ;;  %v4268_v29 = vpop.f32.mrf.mxu3  ;;  %v2830_v24 = vsel %vm615_vm3, %v2825_v15, %v2829_v16  ;;  %v2841_v15 = vor.u32 %v2839_v7, %v2837_v48 }
 0x15c   : > { %v2845_v16 = vrot.slane %v2843_v8, 1  ;;  %v2855_v7 = vshrl.u32 %v6665_v31, 16 }
 0x15d   : > { %v4957_v32 = vsel %vm4693_vm0, %v4561_v26, %v4825_v27 }
 0x15e   : > { %5090 = vst.msk [vmem:[%s6382_s6 + $0xb8] sm:$0xff] %vm5066_vm4, %v4957_v32  ;;  %v3450_v33 = vpop.f32.mrf.mxu2  ;;  %v1428_v35 = vpop.f32.mrf.mxu0 }
 0x15f   : > { %v3744_v34 = vadd.f32 %v3450_v33, %v1906_v28  ;;  %v1910_v38 = vpop.f32.mrf.mxu1  ;;  %v1908_v50 = vadd.f32 %v1907_v25, %v1428_v35 }
 0x161   : > { %v4562_v41 = vadd.f32 %v4268_v29, %v3744_v34 }
 0x162   : > { %5620 = vmatmul.msk.bf16.gmra.mxu1 %vm1154_vm1, %v6088_v62  ;;  %v6090_v62 = vld [vmem:[%s6284_s30 + $0xb8] sm:$0xff] }
 0x163   : > { %vm4694_vm5 = vcmp.gt.f32.partialorder %v4562_v41, 0.0  ;;  %v4826_v43 = vmul.f32 0.2, %v4562_v41  ;;  %v4270_v44 = vpop.f32.mrf.mxu3  ;;  %v800_v5 = vshll.u32 %v6090_v62, 16  ;;  %v804_v36 = vshrl.u32 %v6090_v62, 16 }
 0x165   : > { %v4958_v49 = vsel %vm4694_vm5, %v4562_v41, %v4826_v43  ;;  %v802_v14 = vrot.slane %v800_v5, 1 }
 0x166   : > { %5091 = vst.msk [vmem:[%s6382_s6 + $0xc0] sm:$0xff] %vm5066_vm4, %v4958_v49  ;;  %v3452_v52 = vpop.f32.mrf.mxu2  ;;  %v1431_v54 = vpop.f32.mrf.mxu0 }
 0x167   : > { %v3745_v53 = vadd.f32 %v3452_v52, %v1908_v50  ;;  %v1912_v57 = vpop.f32.mrf.mxu1  ;;  %v1911_v60 = vadd.f32 %v1910_v38, %v1431_v54  ;;  %v803_v23 = vsel %vm615_vm3, %v798_v13, %v802_v14  ;;  %v806_v45 = vor.u32 %v804_v36, %v802_v14 }
 0x168   : > { %6020 = vmatmul.msk.bf16.gmra.mxu3 %vm1154_vm1, %v3903_v51  ;;  %v3907_v51 = vsel %vm3858_vm2, %v3904_v10, %v3906_v42  ;;  %v3908_v10 = vrot.slane %v6647_v63, 1  ;;  %v6683_v63 = vld [vmem:[%s6284_s30 + $0xe8] sm:$0xff] }
 0x169   : > { %v4563_v58 = vadd.f32 %v4270_v44, %v3745_v53  ;;  %5550 = vmatmul.msk.bf16.gmra.mxu0 %vm1154_vm1, %v795_v55  ;;  %v2859_v8 = vshll.u32 %v6683_v63, 16 }
 0x16b   : > { %vm4695_vm6 = vcmp.gt.f32.partialorder %v4563_v58, 0.0  ;;  %v4827_v59 = vmul.f32 0.2, %v4563_v58  ;;  %5950 = vmatmul.msk.bf16.gmra.mxu2 %vm1154_vm1, %v2822_v56  ;;  %v4273_v61 = vpop.f32.mrf.mxu3  ;;  %v2838_v56 = vsel %vm615_vm3, %v2833_v47, %v2837_v48  ;;  %v2849_v47 = vor.u32 %v2847_v39, %v2845_v16 }
 0x16c   : > { %v2853_v48 = vrot.slane %v2851_v40, 1  ;;  %v2863_v39 = vshrl.u32 %v6683_v63, 16 }
 0x16d   : > { %v4959_v0 = vsel %vm4695_vm6, %v4563_v58, %v4827_v59 }
 0x16e   : > { %5092 = vst.msk [vmem:[%s6382_s6 + $0xc8] sm:$0xff] %vm5066_vm4, %v4959_v0  ;;  %v3455_v1 = vpop.f32.mrf.mxu2  ;;  %v1433_v3 = vpop.f32.mrf.mxu0 }
 0x16f   : > { %v3746_v2 = vadd.f32 %v3455_v1, %v1911_v60  ;;  %v1915_v6 = vpop.f32.mrf.mxu1  ;;  %v1913_v18 = vadd.f32 %v1912_v57, %v1433_v3 }
 0x171   : > { %v4564_v9 = vadd.f32 %v4273_v61, %v3746_v2 }
 0x172   : > { %5621 = vmatmul.msk.bf16.gmra.mxu1 %vm1154_vm1, %v6089_v30  ;;  %v6091_v30 = vld [vmem:[%s6284_s30 + $0xc0] sm:$0xff] }
 0x173   : > { %vm4696_vm7 = vcmp.gt.f32.partialorder %v4564_v9, 0.0  ;;  %v4828_v11 = vmul.f32 0.2, %v4564_v9  ;;  %v4275_v12 = vpop.f32.mrf.mxu3  ;;  %v808_v37 = vshll.u32 %v6091_v30, 16  ;;  %v812_v4 = vshrl.u32 %v6091_v30, 16 }
 0x175   : > { %v4960_v17 = vsel %vm4696_vm7, %v4564_v9, %v4828_v11  ;;  %v810_v46 = vrot.slane %v808_v37, 1 }
 0x176   : > { %5093 = vst.msk [vmem:[%s6382_s6 + $0xd0] sm:$0xff] %vm5066_vm4, %v4960_v17  ;;  %v3457_v20 = vpop.f32.mrf.mxu2  ;;  %v1436_v22 = vpop.f32.mrf.mxu0 }
 0x177   : > { %v3747_v21 = vadd.f32 %v3457_v20, %v1913_v18  ;;  %v1917_v25 = vpop.f32.mrf.mxu1  ;;  %v1916_v28 = vadd.f32 %v1915_v6, %v1436_v22  ;;  %v811_v55 = vsel %vm615_vm3, %v806_v45, %v810_v46  ;;  %v814_v13 = vor.u32 %v812_v4, %v810_v46 }
 0x178   : > { %6021 = vmatmul.msk.bf16.gmra.mxu3 %vm1154_vm1, %v3905_v19  ;;  %v3909_v19 = vsel %vm3858_vm2, %v3906_v42, %v3908_v10  ;;  %v3910_v42 = vrot.slane %v6665_v31, 1  ;;  %v6701_v31 = vld [vmem:[%s6284_s30 + $0xf0] sm:$0xff] }
 0x179   : > { %v4565_v26 = vadd.f32 %v4275_v12, %v3747_v21  ;;  %5551 = vmatmul.msk.bf16.gmra.mxu0 %vm1154_vm1, %v803_v23  ;;  %v2867_v40 = vshll.u32 %v6701_v31, 16 }
 0x17b   : > { %vm4697_vm8 = vcmp.gt.f32.partialorder %v4565_v26, 0.0  ;;  %v4829_v27 = vmul.f32 0.2, %v4565_v26  ;;  %5951 = vmatmul.msk.bf16.gmra.mxu2 %vm1154_vm1, %v2830_v24  ;;  %v4278_v29 = vpop.f32.mrf.mxu3  ;;  %v2846_v24 = vsel %vm615_vm3, %v2841_v15, %v2845_v16  ;;  %v2857_v15 = vor.u32 %v2855_v7, %v2853_v48 }
 0x17c   : > { %v2861_v16 = vrot.slane %v2859_v8, 1  ;;  %v2871_v7 = vshrl.u32 %v6701_v31, 16 }
 0x17d   : > { %v4961_v32 = vsel %vm4697_vm8, %v4565_v26, %v4829_v27 }
 0x17e   : > { %5094 = vst.msk [vmem:[%s6382_s6 + $0xd8] sm:$0xff] %vm5066_vm4, %v4961_v32  ;;  %v3460_v33 = vpop.f32.mrf.mxu2  ;;  %v1438_v35 = vpop.f32.mrf.mxu0 }
 0x17f   : > { %v3748_v34 = vadd.f32 %v3460_v33, %v1916_v28  ;;  %v1920_v38 = vpop.f32.mrf.mxu1  ;;  %v1918_v50 = vadd.f32 %v1917_v25, %v1438_v35 }
 0x181   : > { %v4566_v41 = vadd.f32 %v4278_v29, %v3748_v34 }
 0x182   : > { %5622 = vmatmul.msk.bf16.gmra.mxu1 %vm1154_vm1, %v6090_v62  ;;  %v6092_v62 = vld [vmem:[%s6284_s30 + $0xc8] sm:$0xff] }
 0x183   : > { %vm4698_vm9 = vcmp.gt.f32.partialorder %v4566_v41, 0.0  ;;  %v4830_v43 = vmul.f32 0.2, %v4566_v41  ;;  %v4280_v44 = vpop.f32.mrf.mxu3  ;;  %v816_v5 = vshll.u32 %v6092_v62, 16  ;;  %v820_v36 = vshrl.u32 %v6092_v62, 16 }
 0x185   : > { %v4962_v49 = vsel %vm4698_vm9, %v4566_v41, %v4830_v43  ;;  %v818_v14 = vrot.slane %v816_v5, 1 }
 0x186   : > { %5095 = vst.msk [vmem:[%s6382_s6 + $0xe0] sm:$0xff] %vm5066_vm4, %v4962_v49  ;;  %v3462_v52 = vpop.f32.mrf.mxu2  ;;  %v1441_v54 = vpop.f32.mrf.mxu0 }
 0x187   : > { %v3749_v53 = vadd.f32 %v3462_v52, %v1918_v50  ;;  %v1922_v57 = vpop.f32.mrf.mxu1  ;;  %v1921_v60 = vadd.f32 %v1920_v38, %v1441_v54  ;;  %v819_v23 = vsel %vm615_vm3, %v814_v13, %v818_v14  ;;  %v822_v45 = vor.u32 %v820_v36, %v818_v14 }
 0x188   : > { %6022 = vmatmul.msk.bf16.gmra.mxu3 %vm1154_vm1, %v3907_v51  ;;  %v3911_v51 = vsel %vm3858_vm2, %v3908_v10, %v3910_v42  ;;  %v3912_v10 = vrot.slane %v6683_v63, 1  ;;  %v6719_v63 = vld [vmem:[%s6284_s30 + $0xf8] sm:$0xff] }
 0x189   : > { %v4567_v58 = vadd.f32 %v4280_v44, %v3749_v53  ;;  %5552 = vmatmul.msk.bf16.gmra.mxu0 %vm1154_vm1, %v811_v55  ;;  %v2875_v8 = vshll.u32 %v6719_v63, 16 }
 0x18b   : > { %vm4699_vm10 = vcmp.gt.f32.partialorder %v4567_v58, 0.0  ;;  %v4831_v59 = vmul.f32 0.2, %v4567_v58  ;;  %5952 = vmatmul.msk.bf16.gmra.mxu2 %vm1154_vm1, %v2838_v56  ;;  %v4283_v61 = vpop.f32.mrf.mxu3  ;;  %v2854_v56 = vsel %vm615_vm3, %v2849_v47, %v2853_v48  ;;  %v2865_v47 = vor.u32 %v2863_v39, %v2861_v16 }
 0x18c   : > { %v2869_v48 = vrot.slane %v2867_v40, 1  ;;  %v2879_v39 = vshrl.u32 %v6719_v63, 16 }
 0x18d   : > { %v4963_v0 = vsel %vm4699_vm10, %v4567_v58, %v4831_v59 }
 0x18e   : > { %5096 = vst.msk [vmem:[%s6382_s6 + $0xe8] sm:$0xff] %vm5066_vm4, %v4963_v0  ;;  %v3465_v1 = vpop.f32.mrf.mxu2  ;;  %v1443_v3 = vpop.f32.mrf.mxu0 }
 0x18f   : > { %v3750_v2 = vadd.f32 %v3465_v1, %v1921_v60  ;;  %v1925_v6 = vpop.f32.mrf.mxu1  ;;  %v1923_v18 = vadd.f32 %v1922_v57, %v1443_v3 }
 0x191   : > { %v4568_v9 = vadd.f32 %v4283_v61, %v3750_v2 }
 0x192   : > { %5623 = vmatmul.msk.bf16.gmra.mxu1 %vm1154_vm1, %v6091_v30  ;;  %v6093_v30 = vld [vmem:[%s6284_s30 + $0xd0] sm:$0xff] }
 0x193   : > { %vm4700_vm11 = vcmp.gt.f32.partialorder %v4568_v9, 0.0  ;;  %v4832_v11 = vmul.f32 0.2, %v4568_v9  ;;  %v4285_v12 = vpop.f32.mrf.mxu3  ;;  %v824_v37 = vshll.u32 %v6093_v30, 16  ;;  %v828_v4 = vshrl.u32 %v6093_v30, 16 }
 0x195   : > { %v4964_v17 = vsel %vm4700_vm11, %v4568_v9, %v4832_v11  ;;  %v826_v46 = vrot.slane %v824_v37, 1 }
 0x196   : > { %5097 = vst.msk [vmem:[%s6382_s6 + $0xf0] sm:$0xff] %vm5066_vm4, %v4964_v17  ;;  %v3467_v20 = vpop.f32.mrf.mxu2  ;;  %v1446_v22 = vpop.f32.mrf.mxu0 }
 0x197   : > { %v3751_v21 = vadd.f32 %v3467_v20, %v1923_v18  ;;  %v1927_v25 = vpop.f32.mrf.mxu1  ;;  %v1926_v28 = vadd.f32 %v1925_v6, %v1446_v22  ;;  %v827_v55 = vsel %vm615_vm3, %v822_v45, %v826_v46  ;;  %v830_v13 = vor.u32 %v828_v4, %v826_v46 }
 0x198   : > { %6023 = vmatmul.msk.bf16.gmra.mxu3 %vm1154_vm1, %v3909_v19  ;;  %v3913_v19 = vsel %vm3858_vm2, %v3910_v42, %v3912_v10  ;;  %v3914_v42 = vrot.slane %v6701_v31, 1  ;;  %v6737_v31 = vld [vmem:[%s6284_s30 + $0x100] sm:$0xff] }
 0x199   : > { %v4569_v26 = vadd.f32 %v4285_v12, %v3751_v21  ;;  %5553 = vmatmul.msk.bf16.gmra.mxu0 %vm1154_vm1, %v819_v23  ;;  %v2883_v40 = vshll.u32 %v6737_v31, 16 }
 0x19b   : > { %vm4701_vm12 = vcmp.gt.f32.partialorder %v4569_v26, 0.0  ;;  %v4833_v27 = vmul.f32 0.2, %v4569_v26  ;;  %5953 = vmatmul.msk.bf16.gmra.mxu2 %vm1154_vm1, %v2846_v24  ;;  %v4288_v29 = vpop.f32.mrf.mxu3  ;;  %v2862_v24 = vsel %vm615_vm3, %v2857_v15, %v2861_v16  ;;  %v2873_v15 = vor.u32 %v2871_v7, %v2869_v48 }
 0x19c   : > { %v2877_v16 = vrot.slane %v2875_v8, 1  ;;  %v2887_v7 = vshrl.u32 %v6737_v31, 16 }
 0x19d   : > { %v4965_v32 = vsel %vm4701_vm12, %v4569_v26, %v4833_v27 }
 0x19e   : > { %5098 = vst.msk [vmem:[%s6382_s6 + $0xf8] sm:$0xff] %vm5066_vm4, %v4965_v32  ;;  %v3470_v33 = vpop.f32.mrf.mxu2  ;;  %v1448_v35 = vpop.f32.mrf.mxu0 }
 0x19f   : > { %v3752_v34 = vadd.f32 %v3470_v33, %v1926_v28  ;;  %v1930_v38 = vpop.f32.mrf.mxu1  ;;  %v1928_v50 = vadd.f32 %v1927_v25, %v1448_v35 }
 0x1a1   : > { %v4570_v41 = vadd.f32 %v4288_v29, %v3752_v34 }
 0x1a2   : > { %5624 = vmatmul.msk.bf16.gmra.mxu1 %vm1154_vm1, %v6092_v62  ;;  %v6094_v62 = vld [vmem:[%s6284_s30 + $0xd8] sm:$0xff] }
 0x1a3   : > { %vm4702_vm13 = vcmp.gt.f32.partialorder %v4570_v41, 0.0  ;;  %v4834_v43 = vmul.f32 0.2, %v4570_v41  ;;  %v4290_v44 = vpop.f32.mrf.mxu3  ;;  %v832_v5 = vshll.u32 %v6094_v62, 16  ;;  %v836_v36 = vshrl.u32 %v6094_v62, 16 }
 0x1a5   : > { %v4966_v49 = vsel %vm4702_vm13, %v4570_v41, %v4834_v43  ;;  %v834_v14 = vrot.slane %v832_v5, 1 }
 0x1a6   : > { %5099 = vst.msk [vmem:[%s6382_s6 + $0x100] sm:$0xff] %vm5066_vm4, %v4966_v49  ;;  %v3472_v52 = vpop.f32.mrf.mxu2  ;;  %v1451_v54 = vpop.f32.mrf.mxu0 }
 0x1a7   : > { %v3753_v53 = vadd.f32 %v3472_v52, %v1928_v50  ;;  %v1932_v57 = vpop.f32.mrf.mxu1  ;;  %v1931_v60 = vadd.f32 %v1930_v38, %v1451_v54  ;;  %v835_v23 = vsel %vm615_vm3, %v830_v13, %v834_v14  ;;  %v838_v45 = vor.u32 %v836_v36, %v834_v14 }
 0x1a8   : > { %6024 = vmatmul.msk.bf16.gmra.mxu3 %vm1154_vm1, %v3911_v51  ;;  %v3915_v51 = vsel %vm3858_vm2, %v3912_v10, %v3914_v42  ;;  %v3916_v10 = vrot.slane %v6719_v63, 1  ;;  %v6755_v63 = vld [vmem:[%s6284_s30 + $0x108] sm:$0xff] }
 0x1a9   : > { %v4571_v58 = vadd.f32 %v4290_v44, %v3753_v53  ;;  %5554 = vmatmul.msk.bf16.gmra.mxu0 %vm1154_vm1, %v827_v55  ;;  %v2891_v8 = vshll.u32 %v6755_v63, 16 }
 0x1ab   : > { %vm4703_vm14 = vcmp.gt.f32.partialorder %v4571_v58, 0.0  ;;  %v4835_v59 = vmul.f32 0.2, %v4571_v58  ;;  %5954 = vmatmul.msk.bf16.gmra.mxu2 %vm1154_vm1, %v2854_v56  ;;  %v4293_v61 = vpop.f32.mrf.mxu3  ;;  %v2870_v56 = vsel %vm615_vm3, %v2865_v47, %v2869_v48  ;;  %v2881_v47 = vor.u32 %v2879_v39, %v2877_v16 }
 0x1ac   : > { %v2885_v48 = vrot.slane %v2883_v40, 1  ;;  %v2895_v39 = vshrl.u32 %v6755_v63, 16 }
 0x1ad   : > { %v4967_v0 = vsel %vm4703_vm14, %v4571_v58, %v4835_v59 }
 0x1ae   : > { %5100 = vst.msk [vmem:[%s6382_s6 + $0x108] sm:$0xff] %vm5066_vm4, %v4967_v0  ;;  %v3475_v1 = vpop.f32.mrf.mxu2  ;;  %v1453_v3 = vpop.f32.mrf.mxu0 }
 0x1af   : > { %v3754_v2 = vadd.f32 %v3475_v1, %v1931_v60  ;;  %v1935_v6 = vpop.f32.mrf.mxu1  ;;  %v1933_v18 = vadd.f32 %v1932_v57, %v1453_v3 }
 0x1b1   : > { %v4572_v9 = vadd.f32 %v4293_v61, %v3754_v2 }
 0x1b2   : > { %5625 = vmatmul.msk.bf16.gmra.mxu1 %vm1154_vm1, %v6093_v30  ;;  %v6095_v30 = vld [vmem:[%s6284_s30 + $0xe0] sm:$0xff] }
 0x1b3   : > { %vm4704_vm15 = vcmp.gt.f32.partialorder %v4572_v9, 0.0  ;;  %v4836_v11 = vmul.f32 0.2, %v4572_v9  ;;  %v4295_v12 = vpop.f32.mrf.mxu3  ;;  %v840_v37 = vshll.u32 %v6095_v30, 16  ;;  %v844_v4 = vshrl.u32 %v6095_v30, 16 }
 0x1b5   : > { %v4968_v17 = vsel %vm4704_vm15, %v4572_v9, %v4836_v11  ;;  %v842_v46 = vrot.slane %v840_v37, 1 }
 0x1b6   : > { %5101 = vst.msk [vmem:[%s6382_s6 + $0x110] sm:$0xff] %vm5066_vm4, %v4968_v17  ;;  %v3477_v20 = vpop.f32.mrf.mxu2  ;;  %v1456_v22 = vpop.f32.mrf.mxu0 }
 0x1b7   : > { %v3755_v21 = vadd.f32 %v3477_v20, %v1933_v18  ;;  %v1937_v25 = vpop.f32.mrf.mxu1  ;;  %v1936_v28 = vadd.f32 %v1935_v6, %v1456_v22  ;;  %v843_v55 = vsel %vm615_vm3, %v838_v45, %v842_v46  ;;  %v846_v13 = vor.u32 %v844_v4, %v842_v46 }
 0x1b8   : > { %6025 = vmatmul.msk.bf16.gmra.mxu3 %vm1154_vm1, %v3913_v19  ;;  %v3917_v19 = vsel %vm3858_vm2, %v3914_v42, %v3916_v10  ;;  %v3918_v42 = vrot.slane %v6737_v31, 1  ;;  %v6773_v31 = vld [vmem:[%s6284_s30 + $0x110] sm:$0xff] }
 0x1b9   : > { %v4573_v26 = vadd.f32 %v4295_v12, %v3755_v21  ;;  %5555 = vmatmul.msk.bf16.gmra.mxu0 %vm1154_vm1, %v835_v23  ;;  %v2899_v40 = vshll.u32 %v6773_v31, 16 }
 0x1bb   : > { %vm4705_vm0 = vcmp.gt.f32.partialorder %v4573_v26, 0.0  ;;  %v4837_v27 = vmul.f32 0.2, %v4573_v26  ;;  %5955 = vmatmul.msk.bf16.gmra.mxu2 %vm1154_vm1, %v2862_v24  ;;  %v4298_v29 = vpop.f32.mrf.mxu3  ;;  %v2878_v24 = vsel %vm615_vm3, %v2873_v15, %v2877_v16  ;;  %v2889_v15 = vor.u32 %v2887_v7, %v2885_v48 }
 0x1bc   : > { %v2893_v16 = vrot.slane %v2891_v8, 1  ;;  %v2903_v7 = vshrl.u32 %v6773_v31, 16 }
 0x1bd   : > { %v4969_v32 = vsel %vm4705_vm0, %v4573_v26, %v4837_v27 }
 0x1be   : > { %5102 = vst.msk [vmem:[%s6382_s6 + $0x118] sm:$0xff] %vm5066_vm4, %v4969_v32  ;;  %v3480_v33 = vpop.f32.mrf.mxu2  ;;  %v1458_v35 = vpop.f32.mrf.mxu0 }
 0x1bf   : > { %v3756_v34 = vadd.f32 %v3480_v33, %v1936_v28  ;;  %v1940_v38 = vpop.f32.mrf.mxu1  ;;  %v1938_v50 = vadd.f32 %v1937_v25, %v1458_v35 }
 0x1c1   : > { %v4574_v41 = vadd.f32 %v4298_v29, %v3756_v34 }
 0x1c2   : > { %5626 = vmatmul.msk.bf16.gmra.mxu1 %vm1154_vm1, %v6094_v62  ;;  %v6096_v62 = vld [vmem:[%s6284_s30 + $0xe8] sm:$0xff] }
 0x1c3   : > { %vm4706_vm5 = vcmp.gt.f32.partialorder %v4574_v41, 0.0  ;;  %v4838_v43 = vmul.f32 0.2, %v4574_v41  ;;  %v4300_v44 = vpop.f32.mrf.mxu3  ;;  %v848_v5 = vshll.u32 %v6096_v62, 16  ;;  %v852_v36 = vshrl.u32 %v6096_v62, 16 }
 0x1c5   : > { %v4970_v49 = vsel %vm4706_vm5, %v4574_v41, %v4838_v43  ;;  %v850_v14 = vrot.slane %v848_v5, 1 }
 0x1c6   : > { %5103 = vst.msk [vmem:[%s6382_s6 + $0x120] sm:$0xff] %vm5066_vm4, %v4970_v49  ;;  %v3482_v52 = vpop.f32.mrf.mxu2  ;;  %v1461_v54 = vpop.f32.mrf.mxu0 }
 0x1c7   : > { %v3757_v53 = vadd.f32 %v3482_v52, %v1938_v50  ;;  %v1942_v57 = vpop.f32.mrf.mxu1  ;;  %v1941_v60 = vadd.f32 %v1940_v38, %v1461_v54  ;;  %v851_v23 = vsel %vm615_vm3, %v846_v13, %v850_v14  ;;  %v854_v45 = vor.u32 %v852_v36, %v850_v14 }
 0x1c8   : > { %6026 = vmatmul.msk.bf16.gmra.mxu3 %vm1154_vm1, %v3915_v51  ;;  %v3919_v51 = vsel %vm3858_vm2, %v3916_v10, %v3918_v42  ;;  %v3920_v10 = vrot.slane %v6755_v63, 1  ;;  %v6791_v63 = vld [vmem:[%s6284_s30 + $0x118] sm:$0xff] }
 0x1c9   : > { %v4575_v58 = vadd.f32 %v4300_v44, %v3757_v53  ;;  %5556 = vmatmul.msk.bf16.gmra.mxu0 %vm1154_vm1, %v843_v55  ;;  %v2907_v8 = vshll.u32 %v6791_v63, 16 }
 0x1cb   : > { %vm4707_vm6 = vcmp.gt.f32.partialorder %v4575_v58, 0.0  ;;  %v4839_v59 = vmul.f32 0.2, %v4575_v58  ;;  %5956 = vmatmul.msk.bf16.gmra.mxu2 %vm1154_vm1, %v2870_v56  ;;  %v4303_v61 = vpop.f32.mrf.mxu3  ;;  %v2886_v56 = vsel %vm615_vm3, %v2881_v47, %v2885_v48  ;;  %v2897_v47 = vor.u32 %v2895_v39, %v2893_v16 }
 0x1cc   : > { %v2901_v48 = vrot.slane %v2899_v40, 1  ;;  %v2911_v39 = vshrl.u32 %v6791_v63, 16 }
 0x1cd   : > { %v4971_v0 = vsel %vm4707_vm6, %v4575_v58, %v4839_v59 }
 0x1ce   : > { %5104 = vst.msk [vmem:[%s6382_s6 + $0x128] sm:$0xff] %vm5066_vm4, %v4971_v0  ;;  %v3485_v1 = vpop.f32.mrf.mxu2  ;;  %v1463_v3 = vpop.f32.mrf.mxu0 }
 0x1cf   : > { %v3758_v2 = vadd.f32 %v3485_v1, %v1941_v60  ;;  %v1945_v6 = vpop.f32.mrf.mxu1  ;;  %v1943_v18 = vadd.f32 %v1942_v57, %v1463_v3 }
 0x1d1   : > { %v4576_v9 = vadd.f32 %v4303_v61, %v3758_v2 }
 0x1d2   : > { %5627 = vmatmul.msk.bf16.gmra.mxu1 %vm1154_vm1, %v6095_v30  ;;  %v6097_v30 = vld [vmem:[%s6284_s30 + $0xf0] sm:$0xff] }
 0x1d3   : > { %vm4708_vm7 = vcmp.gt.f32.partialorder %v4576_v9, 0.0  ;;  %v4840_v11 = vmul.f32 0.2, %v4576_v9  ;;  %v4305_v12 = vpop.f32.mrf.mxu3  ;;  %v856_v37 = vshll.u32 %v6097_v30, 16  ;;  %v860_v4 = vshrl.u32 %v6097_v30, 16 }
 0x1d5   : > { %v4972_v17 = vsel %vm4708_vm7, %v4576_v9, %v4840_v11  ;;  %v858_v46 = vrot.slane %v856_v37, 1 }
 0x1d6   : > { %5105 = vst.msk [vmem:[%s6382_s6 + $0x130] sm:$0xff] %vm5066_vm4, %v4972_v17  ;;  %v3487_v20 = vpop.f32.mrf.mxu2  ;;  %v1466_v22 = vpop.f32.mrf.mxu0 }
 0x1d7   : > { %v3759_v21 = vadd.f32 %v3487_v20, %v1943_v18  ;;  %v1947_v25 = vpop.f32.mrf.mxu1  ;;  %v1946_v28 = vadd.f32 %v1945_v6, %v1466_v22  ;;  %v859_v55 = vsel %vm615_vm3, %v854_v45, %v858_v46  ;;  %v862_v13 = vor.u32 %v860_v4, %v858_v46 }
 0x1d8   : > { %6027 = vmatmul.msk.bf16.gmra.mxu3 %vm1154_vm1, %v3917_v19  ;;  %v3921_v19 = vsel %vm3858_vm2, %v3918_v42, %v3920_v10  ;;  %v3922_v42 = vrot.slane %v6773_v31, 1  ;;  %v6809_v31 = vld [vmem:[%s6284_s30 + $0x120] sm:$0xff] }
 0x1d9   : > { %v4577_v26 = vadd.f32 %v4305_v12, %v3759_v21  ;;  %5557 = vmatmul.msk.bf16.gmra.mxu0 %vm1154_vm1, %v851_v23  ;;  %v2915_v40 = vshll.u32 %v6809_v31, 16 }
 0x1db   : > { %vm4709_vm8 = vcmp.gt.f32.partialorder %v4577_v26, 0.0  ;;  %v4841_v27 = vmul.f32 0.2, %v4577_v26  ;;  %5957 = vmatmul.msk.bf16.gmra.mxu2 %vm1154_vm1, %v2878_v24  ;;  %v4308_v29 = vpop.f32.mrf.mxu3  ;;  %v2894_v24 = vsel %vm615_vm3, %v2889_v15, %v2893_v16  ;;  %v2905_v15 = vor.u32 %v2903_v7, %v2901_v48 }
 0x1dc   : > { %v2909_v16 = vrot.slane %v2907_v8, 1  ;;  %v2919_v7 = vshrl.u32 %v6809_v31, 16 }
 0x1dd   : > { %v4973_v32 = vsel %vm4709_vm8, %v4577_v26, %v4841_v27 }
 0x1de   : > { %5106 = vst.msk [vmem:[%s6382_s6 + $0x138] sm:$0xff] %vm5066_vm4, %v4973_v32  ;;  %v3490_v33 = vpop.f32.mrf.mxu2  ;;  %v1468_v35 = vpop.f32.mrf.mxu0 }
 0x1df   : > { %v3760_v34 = vadd.f32 %v3490_v33, %v1946_v28  ;;  %v1950_v38 = vpop.f32.mrf.mxu1  ;;  %v1948_v50 = vadd.f32 %v1947_v25, %v1468_v35 }
 0x1e1   : > { %v4578_v41 = vadd.f32 %v4308_v29, %v3760_v34 }
 0x1e2   : > { %5628 = vmatmul.msk.bf16.gmra.mxu1 %vm1154_vm1, %v6096_v62  ;;  %v6098_v62 = vld [vmem:[%s6284_s30 + $0xf8] sm:$0xff] }
 0x1e3   : > { %vm4710_vm9 = vcmp.gt.f32.partialorder %v4578_v41, 0.0  ;;  %v4842_v43 = vmul.f32 0.2, %v4578_v41  ;;  %v4310_v44 = vpop.f32.mrf.mxu3  ;;  %v864_v5 = vshll.u32 %v6098_v62, 16  ;;  %v868_v36 = vshrl.u32 %v6098_v62, 16 }
 0x1e5   : > { %v4974_v49 = vsel %vm4710_vm9, %v4578_v41, %v4842_v43  ;;  %v866_v14 = vrot.slane %v864_v5, 1 }
 0x1e6   : > { %5107 = vst.msk [vmem:[%s6382_s6 + $0x140] sm:$0xff] %vm5066_vm4, %v4974_v49  ;;  %v3492_v52 = vpop.f32.mrf.mxu2  ;;  %v1471_v54 = vpop.f32.mrf.mxu0 }
 0x1e7   : > { %v3761_v53 = vadd.f32 %v3492_v52, %v1948_v50  ;;  %v1952_v57 = vpop.f32.mrf.mxu1  ;;  %v1951_v60 = vadd.f32 %v1950_v38, %v1471_v54  ;;  %v867_v23 = vsel %vm615_vm3, %v862_v13, %v866_v14  ;;  %v870_v45 = vor.u32 %v868_v36, %v866_v14 }
 0x1e8   : > { %6028 = vmatmul.msk.bf16.gmra.mxu3 %vm1154_vm1, %v3919_v51  ;;  %v3923_v51 = vsel %vm3858_vm2, %v3920_v10, %v3922_v42  ;;  %v3924_v10 = vrot.slane %v6791_v63, 1  ;;  %v6827_v63 = vld [vmem:[%s6284_s30 + $0x128] sm:$0xff] }
 0x1e9   : > { %v4579_v58 = vadd.f32 %v4310_v44, %v3761_v53  ;;  %5558 = vmatmul.msk.bf16.gmra.mxu0 %vm1154_vm1, %v859_v55  ;;  %v2923_v8 = vshll.u32 %v6827_v63, 16 }
 0x1eb   : > { %vm4711_vm10 = vcmp.gt.f32.partialorder %v4579_v58, 0.0  ;;  %v4843_v59 = vmul.f32 0.2, %v4579_v58  ;;  %5958 = vmatmul.msk.bf16.gmra.mxu2 %vm1154_vm1, %v2886_v56  ;;  %v4313_v61 = vpop.f32.mrf.mxu3  ;;  %v2902_v56 = vsel %vm615_vm3, %v2897_v47, %v2901_v48  ;;  %v2913_v47 = vor.u32 %v2911_v39, %v2909_v16 }
 0x1ec   : > { %v2917_v48 = vrot.slane %v2915_v40, 1  ;;  %v2927_v39 = vshrl.u32 %v6827_v63, 16 }
 0x1ed   : > { %v4975_v0 = vsel %vm4711_vm10, %v4579_v58, %v4843_v59 }
 0x1ee   : > { %5108 = vst.msk [vmem:[%s6382_s6 + $0x148] sm:$0xff] %vm5066_vm4, %v4975_v0  ;;  %v3495_v1 = vpop.f32.mrf.mxu2  ;;  %v1473_v3 = vpop.f32.mrf.mxu0 }
 0x1ef   : > { %v3762_v2 = vadd.f32 %v3495_v1, %v1951_v60  ;;  %v1955_v6 = vpop.f32.mrf.mxu1  ;;  %v1953_v18 = vadd.f32 %v1952_v57, %v1473_v3 }
 0x1f1   : > { %v4580_v9 = vadd.f32 %v4313_v61, %v3762_v2 }
 0x1f2   : > { %5629 = vmatmul.msk.bf16.gmra.mxu1 %vm1154_vm1, %v6097_v30  ;;  %v6099_v30 = vld [vmem:[%s6284_s30 + $0x100] sm:$0xff] }
 0x1f3   : > { %vm4712_vm11 = vcmp.gt.f32.partialorder %v4580_v9, 0.0  ;;  %v4844_v11 = vmul.f32 0.2, %v4580_v9  ;;  %v4315_v12 = vpop.f32.mrf.mxu3  ;;  %v872_v37 = vshll.u32 %v6099_v30, 16  ;;  %v876_v4 = vshrl.u32 %v6099_v30, 16 }
 0x1f5   : > { %v4976_v17 = vsel %vm4712_vm11, %v4580_v9, %v4844_v11  ;;  %v874_v46 = vrot.slane %v872_v37, 1 }
 0x1f6   : > { %5109 = vst.msk [vmem:[%s6382_s6 + $0x150] sm:$0xff] %vm5066_vm4, %v4976_v17  ;;  %v3497_v20 = vpop.f32.mrf.mxu2  ;;  %v1476_v22 = vpop.f32.mrf.mxu0 }
 0x1f7   : > { %v3763_v21 = vadd.f32 %v3497_v20, %v1953_v18  ;;  %v1957_v25 = vpop.f32.mrf.mxu1  ;;  %v1956_v28 = vadd.f32 %v1955_v6, %v1476_v22  ;;  %v875_v55 = vsel %vm615_vm3, %v870_v45, %v874_v46  ;;  %v878_v13 = vor.u32 %v876_v4, %v874_v46 }
 0x1f8   : > { %6029 = vmatmul.msk.bf16.gmra.mxu3 %vm1154_vm1, %v3921_v19  ;;  %v3925_v19 = vsel %vm3858_vm2, %v3922_v42, %v3924_v10  ;;  %v3926_v42 = vrot.slane %v6809_v31, 1  ;;  %v6845_v31 = vld [vmem:[%s6284_s30 + $0x130] sm:$0xff] }
 0x1f9   : > { %v4581_v26 = vadd.f32 %v4315_v12, %v3763_v21  ;;  %5559 = vmatmul.msk.bf16.gmra.mxu0 %vm1154_vm1, %v867_v23  ;;  %v2931_v40 = vshll.u32 %v6845_v31, 16 }
 0x1fb   : > { %vm4713_vm12 = vcmp.gt.f32.partialorder %v4581_v26, 0.0  ;;  %v4845_v27 = vmul.f32 0.2, %v4581_v26  ;;  %5959 = vmatmul.msk.bf16.gmra.mxu2 %vm1154_vm1, %v2894_v24  ;;  %v4318_v29 = vpop.f32.mrf.mxu3  ;;  %v2910_v24 = vsel %vm615_vm3, %v2905_v15, %v2909_v16  ;;  %v2921_v15 = vor.u32 %v2919_v7, %v2917_v48 }
 0x1fc   : > { %v2925_v16 = vrot.slane %v2923_v8, 1  ;;  %v2935_v7 = vshrl.u32 %v6845_v31, 16 }
 0x1fd   : > { %v4977_v32 = vsel %vm4713_vm12, %v4581_v26, %v4845_v27 }
 0x1fe   : > { %5110 = vst.msk [vmem:[%s6382_s6 + $0x158] sm:$0xff] %vm5066_vm4, %v4977_v32  ;;  %v3500_v33 = vpop.f32.mrf.mxu2  ;;  %v1478_v35 = vpop.f32.mrf.mxu0 }
 0x1ff   : > { %v3764_v34 = vadd.f32 %v3500_v33, %v1956_v28  ;;  %v1960_v38 = vpop.f32.mrf.mxu1  ;;  %v1958_v50 = vadd.f32 %v1957_v25, %v1478_v35 }
 0x201   : > { %v4582_v41 = vadd.f32 %v4318_v29, %v3764_v34 }
 0x202   : > { %5630 = vmatmul.msk.bf16.gmra.mxu1 %vm1154_vm1, %v6098_v62  ;;  %v6100_v62 = vld [vmem:[%s6284_s30 + $0x108] sm:$0xff] }
 0x203   : > { %vm4714_vm13 = vcmp.gt.f32.partialorder %v4582_v41, 0.0  ;;  %v4846_v43 = vmul.f32 0.2, %v4582_v41  ;;  %v4320_v44 = vpop.f32.mrf.mxu3  ;;  %v880_v5 = vshll.u32 %v6100_v62, 16  ;;  %v884_v36 = vshrl.u32 %v6100_v62, 16 }
 0x205   : > { %v4978_v49 = vsel %vm4714_vm13, %v4582_v41, %v4846_v43  ;;  %v882_v14 = vrot.slane %v880_v5, 1 }
 0x206   : > { %5111 = vst.msk [vmem:[%s6382_s6 + $0x160] sm:$0xff] %vm5066_vm4, %v4978_v49  ;;  %v3502_v52 = vpop.f32.mrf.mxu2  ;;  %v1481_v54 = vpop.f32.mrf.mxu0 }
 0x207   : > { %v3765_v53 = vadd.f32 %v3502_v52, %v1958_v50  ;;  %v1962_v57 = vpop.f32.mrf.mxu1  ;;  %v1961_v60 = vadd.f32 %v1960_v38, %v1481_v54  ;;  %v883_v23 = vsel %vm615_vm3, %v878_v13, %v882_v14  ;;  %v886_v45 = vor.u32 %v884_v36, %v882_v14 }
 0x208   : > { %6030 = vmatmul.msk.bf16.gmra.mxu3 %vm1154_vm1, %v3923_v51  ;;  %v3927_v51 = vsel %vm3858_vm2, %v3924_v10, %v3926_v42  ;;  %v3928_v10 = vrot.slane %v6827_v63, 1  ;;  %v6863_v63 = vld [vmem:[%s6284_s30 + $0x138] sm:$0xff] }
 0x209   : > { %v4583_v58 = vadd.f32 %v4320_v44, %v3765_v53  ;;  %5560 = vmatmul.msk.bf16.gmra.mxu0 %vm1154_vm1, %v875_v55  ;;  %v2939_v8 = vshll.u32 %v6863_v63, 16 }
 0x20b   : > { %vm4715_vm14 = vcmp.gt.f32.partialorder %v4583_v58, 0.0  ;;  %v4847_v59 = vmul.f32 0.2, %v4583_v58  ;;  %5960 = vmatmul.msk.bf16.gmra.mxu2 %vm1154_vm1, %v2902_v56  ;;  %v4323_v61 = vpop.f32.mrf.mxu3  ;;  %v2918_v56 = vsel %vm615_vm3, %v2913_v47, %v2917_v48  ;;  %v2929_v47 = vor.u32 %v2927_v39, %v2925_v16 }
 0x20c   : > { %v2933_v48 = vrot.slane %v2931_v40, 1  ;;  %v2943_v39 = vshrl.u32 %v6863_v63, 16 }
 0x20d   : > { %v4979_v0 = vsel %vm4715_vm14, %v4583_v58, %v4847_v59 }
 0x20e   : > { %5112 = vst.msk [vmem:[%s6382_s6 + $0x168] sm:$0xff] %vm5066_vm4, %v4979_v0  ;;  %v3505_v1 = vpop.f32.mrf.mxu2  ;;  %v1483_v3 = vpop.f32.mrf.mxu0 }
 0x20f   : > { %v3766_v2 = vadd.f32 %v3505_v1, %v1961_v60  ;;  %v1965_v6 = vpop.f32.mrf.mxu1  ;;  %v1963_v18 = vadd.f32 %v1962_v57, %v1483_v3 }
 0x211   : > { %v4584_v9 = vadd.f32 %v4323_v61, %v3766_v2 }
 0x212   : > { %5631 = vmatmul.msk.bf16.gmra.mxu1 %vm1154_vm1, %v6099_v30  ;;  %v6101_v30 = vld [vmem:[%s6284_s30 + $0x110] sm:$0xff] }
 0x213   : > { %vm4716_vm15 = vcmp.gt.f32.partialorder %v4584_v9, 0.0  ;;  %v4848_v11 = vmul.f32 0.2, %v4584_v9  ;;  %v4325_v12 = vpop.f32.mrf.mxu3  ;;  %v888_v37 = vshll.u32 %v6101_v30, 16  ;;  %v892_v4 = vshrl.u32 %v6101_v30, 16 }
 0x215   : > { %v4980_v17 = vsel %vm4716_vm15, %v4584_v9, %v4848_v11  ;;  %v890_v46 = vrot.slane %v888_v37, 1 }
 0x216   : > { %5113 = vst.msk [vmem:[%s6382_s6 + $0x170] sm:$0xff] %vm5066_vm4, %v4980_v17  ;;  %v3507_v20 = vpop.f32.mrf.mxu2  ;;  %v1486_v22 = vpop.f32.mrf.mxu0 }
 0x217   : > { %v3767_v21 = vadd.f32 %v3507_v20, %v1963_v18  ;;  %v1967_v25 = vpop.f32.mrf.mxu1  ;;  %v1966_v28 = vadd.f32 %v1965_v6, %v1486_v22  ;;  %v891_v55 = vsel %vm615_vm3, %v886_v45, %v890_v46  ;;  %v894_v13 = vor.u32 %v892_v4, %v890_v46 }
 0x218   : > { %6031 = vmatmul.msk.bf16.gmra.mxu3 %vm1154_vm1, %v3925_v19  ;;  %v3929_v19 = vsel %vm3858_vm2, %v3926_v42, %v3928_v10  ;;  %v3930_v42 = vrot.slane %v6845_v31, 1  ;;  %v6881_v31 = vld [vmem:[%s6284_s30 + $0x140] sm:$0xff] }
 0x219   : > { %v4585_v26 = vadd.f32 %v4325_v12, %v3767_v21  ;;  %5561 = vmatmul.msk.bf16.gmra.mxu0 %vm1154_vm1, %v883_v23  ;;  %v2947_v40 = vshll.u32 %v6881_v31, 16 }
 0x21b   : > { %vm4717_vm0 = vcmp.gt.f32.partialorder %v4585_v26, 0.0  ;;  %v4849_v27 = vmul.f32 0.2, %v4585_v26  ;;  %5961 = vmatmul.msk.bf16.gmra.mxu2 %vm1154_vm1, %v2910_v24  ;;  %v4328_v29 = vpop.f32.mrf.mxu3  ;;  %v2926_v24 = vsel %vm615_vm3, %v2921_v15, %v2925_v16  ;;  %v2937_v15 = vor.u32 %v2935_v7, %v2933_v48 }
 0x21c   : > { %v2941_v16 = vrot.slane %v2939_v8, 1  ;;  %v2951_v7 = vshrl.u32 %v6881_v31, 16 }
 0x21d   : > { %v4981_v32 = vsel %vm4717_vm0, %v4585_v26, %v4849_v27 }
 0x21e   : > { %5114 = vst.msk [vmem:[%s6382_s6 + $0x178] sm:$0xff] %vm5066_vm4, %v4981_v32  ;;  %v3510_v33 = vpop.f32.mrf.mxu2  ;;  %v1488_v35 = vpop.f32.mrf.mxu0 }
 0x21f   : > { %v3768_v34 = vadd.f32 %v3510_v33, %v1966_v28  ;;  %v1970_v38 = vpop.f32.mrf.mxu1  ;;  %v1968_v50 = vadd.f32 %v1967_v25, %v1488_v35 }
 0x221   : > { %v4586_v41 = vadd.f32 %v4328_v29, %v3768_v34 }
 0x222   : > { %5632 = vmatmul.msk.bf16.gmra.mxu1 %vm1154_vm1, %v6100_v62  ;;  %v6102_v62 = vld [vmem:[%s6284_s30 + $0x118] sm:$0xff] }
 0x223   : > { %vm4718_vm5 = vcmp.gt.f32.partialorder %v4586_v41, 0.0  ;;  %v4850_v43 = vmul.f32 0.2, %v4586_v41  ;;  %v4330_v44 = vpop.f32.mrf.mxu3  ;;  %v896_v5 = vshll.u32 %v6102_v62, 16  ;;  %v900_v36 = vshrl.u32 %v6102_v62, 16 }
 0x225   : > { %v4982_v49 = vsel %vm4718_vm5, %v4586_v41, %v4850_v43  ;;  %v898_v14 = vrot.slane %v896_v5, 1 }
 0x226   : > { %5115 = vst.msk [vmem:[%s6382_s6 + $0x180] sm:$0xff] %vm5066_vm4, %v4982_v49  ;;  %v3512_v52 = vpop.f32.mrf.mxu2  ;;  %v1491_v54 = vpop.f32.mrf.mxu0 }
 0x227   : > { %v3769_v53 = vadd.f32 %v3512_v52, %v1968_v50  ;;  %v1972_v57 = vpop.f32.mrf.mxu1  ;;  %v1971_v60 = vadd.f32 %v1970_v38, %v1491_v54  ;;  %v899_v23 = vsel %vm615_vm3, %v894_v13, %v898_v14  ;;  %v902_v45 = vor.u32 %v900_v36, %v898_v14 }
 0x228   : > { %6032 = vmatmul.msk.bf16.gmra.mxu3 %vm1154_vm1, %v3927_v51  ;;  %v3931_v51 = vsel %vm3858_vm2, %v3928_v10, %v3930_v42  ;;  %v3932_v10 = vrot.slane %v6863_v63, 1  ;;  %v6899_v63 = vld [vmem:[%s6284_s30 + $0x148] sm:$0xff] }
 0x229   : > { %v4587_v58 = vadd.f32 %v4330_v44, %v3769_v53  ;;  %5562 = vmatmul.msk.bf16.gmra.mxu0 %vm1154_vm1, %v891_v55  ;;  %v2955_v8 = vshll.u32 %v6899_v63, 16 }
 0x22b   : > { %vm4719_vm6 = vcmp.gt.f32.partialorder %v4587_v58, 0.0  ;;  %v4851_v59 = vmul.f32 0.2, %v4587_v58  ;;  %5962 = vmatmul.msk.bf16.gmra.mxu2 %vm1154_vm1, %v2918_v56  ;;  %v4333_v61 = vpop.f32.mrf.mxu3  ;;  %v2934_v56 = vsel %vm615_vm3, %v2929_v47, %v2933_v48  ;;  %v2945_v47 = vor.u32 %v2943_v39, %v2941_v16 }
 0x22c   : > { %v2949_v48 = vrot.slane %v2947_v40, 1  ;;  %v2959_v39 = vshrl.u32 %v6899_v63, 16 }
 0x22d   : > { %v4983_v0 = vsel %vm4719_vm6, %v4587_v58, %v4851_v59 }
 0x22e   : > { %5116 = vst.msk [vmem:[%s6382_s6 + $0x188] sm:$0xff] %vm5066_vm4, %v4983_v0  ;;  %v3515_v1 = vpop.f32.mrf.mxu2  ;;  %v1493_v3 = vpop.f32.mrf.mxu0 }
 0x22f   : > { %v3770_v2 = vadd.f32 %v3515_v1, %v1971_v60  ;;  %v1975_v6 = vpop.f32.mrf.mxu1  ;;  %v1973_v18 = vadd.f32 %v1972_v57, %v1493_v3 }
 0x231   : > { %v4588_v9 = vadd.f32 %v4333_v61, %v3770_v2 }
 0x232   : > { %5633 = vmatmul.msk.bf16.gmra.mxu1 %vm1154_vm1, %v6101_v30  ;;  %v6103_v30 = vld [vmem:[%s6284_s30 + $0x120] sm:$0xff] }
 0x233   : > { %vm4720_vm7 = vcmp.gt.f32.partialorder %v4588_v9, 0.0  ;;  %v4852_v11 = vmul.f32 0.2, %v4588_v9  ;;  %v4335_v12 = vpop.f32.mrf.mxu3  ;;  %v904_v37 = vshll.u32 %v6103_v30, 16  ;;  %v908_v4 = vshrl.u32 %v6103_v30, 16 }
 0x235   : > { %v4984_v17 = vsel %vm4720_vm7, %v4588_v9, %v4852_v11  ;;  %v906_v46 = vrot.slane %v904_v37, 1 }
 0x236   : > { %5117 = vst.msk [vmem:[%s6382_s6 + $0x190] sm:$0xff] %vm5066_vm4, %v4984_v17  ;;  %v3517_v20 = vpop.f32.mrf.mxu2  ;;  %v1496_v22 = vpop.f32.mrf.mxu0 }
 0x237   : > { %v3771_v21 = vadd.f32 %v3517_v20, %v1973_v18  ;;  %v1977_v25 = vpop.f32.mrf.mxu1  ;;  %v1976_v28 = vadd.f32 %v1975_v6, %v1496_v22  ;;  %v907_v55 = vsel %vm615_vm3, %v902_v45, %v906_v46  ;;  %v910_v13 = vor.u32 %v908_v4, %v906_v46 }
 0x238   : > { %6033 = vmatmul.msk.bf16.gmra.mxu3 %vm1154_vm1, %v3929_v19  ;;  %v3933_v19 = vsel %vm3858_vm2, %v3930_v42, %v3932_v10  ;;  %v3934_v42 = vrot.slane %v6881_v31, 1  ;;  %v6917_v31 = vld [vmem:[%s6284_s30 + $0x150] sm:$0xff] }
 0x239   : > { %v4589_v26 = vadd.f32 %v4335_v12, %v3771_v21  ;;  %5563 = vmatmul.msk.bf16.gmra.mxu0 %vm1154_vm1, %v899_v23  ;;  %v2963_v40 = vshll.u32 %v6917_v31, 16 }
 0x23b   : > { %vm4721_vm8 = vcmp.gt.f32.partialorder %v4589_v26, 0.0  ;;  %v4853_v27 = vmul.f32 0.2, %v4589_v26  ;;  %5963 = vmatmul.msk.bf16.gmra.mxu2 %vm1154_vm1, %v2926_v24  ;;  %v4338_v29 = vpop.f32.mrf.mxu3  ;;  %v2942_v24 = vsel %vm615_vm3, %v2937_v15, %v2941_v16  ;;  %v2953_v15 = vor.u32 %v2951_v7, %v2949_v48 }
 0x23c   : > { %v2957_v16 = vrot.slane %v2955_v8, 1  ;;  %v2967_v7 = vshrl.u32 %v6917_v31, 16 }
 0x23d   : > { %v4985_v32 = vsel %vm4721_vm8, %v4589_v26, %v4853_v27 }
 0x23e   : > { %5118 = vst.msk [vmem:[%s6382_s6 + $0x198] sm:$0xff] %vm5066_vm4, %v4985_v32  ;;  %v3520_v33 = vpop.f32.mrf.mxu2  ;;  %v1498_v35 = vpop.f32.mrf.mxu0 }
 0x23f   : > { %v3772_v34 = vadd.f32 %v3520_v33, %v1976_v28  ;;  %v1980_v38 = vpop.f32.mrf.mxu1  ;;  %v1978_v50 = vadd.f32 %v1977_v25, %v1498_v35 }
 0x241   : > { %v4590_v41 = vadd.f32 %v4338_v29, %v3772_v34 }
 0x242   : > { %5634 = vmatmul.msk.bf16.gmra.mxu1 %vm1154_vm1, %v6102_v62  ;;  %v6104_v62 = vld [vmem:[%s6284_s30 + $0x128] sm:$0xff] }
 0x243   : > { %vm4722_vm9 = vcmp.gt.f32.partialorder %v4590_v41, 0.0  ;;  %v4854_v43 = vmul.f32 0.2, %v4590_v41  ;;  %v4340_v44 = vpop.f32.mrf.mxu3  ;;  %v912_v5 = vshll.u32 %v6104_v62, 16  ;;  %v916_v36 = vshrl.u32 %v6104_v62, 16 }
 0x245   : > { %v4986_v49 = vsel %vm4722_vm9, %v4590_v41, %v4854_v43  ;;  %v914_v14 = vrot.slane %v912_v5, 1 }
 0x246   : > { %5119 = vst.msk [vmem:[%s6382_s6 + $0x1a0] sm:$0xff] %vm5066_vm4, %v4986_v49  ;;  %v3522_v52 = vpop.f32.mrf.mxu2  ;;  %v1501_v54 = vpop.f32.mrf.mxu0 }
 0x247   : > { %v3773_v53 = vadd.f32 %v3522_v52, %v1978_v50  ;;  %v1982_v57 = vpop.f32.mrf.mxu1  ;;  %v1981_v60 = vadd.f32 %v1980_v38, %v1501_v54  ;;  %v915_v23 = vsel %vm615_vm3, %v910_v13, %v914_v14  ;;  %v918_v45 = vor.u32 %v916_v36, %v914_v14 }
 0x248   : > { %6034 = vmatmul.msk.bf16.gmra.mxu3 %vm1154_vm1, %v3931_v51  ;;  %v3935_v51 = vsel %vm3858_vm2, %v3932_v10, %v3934_v42  ;;  %v3936_v10 = vrot.slane %v6899_v63, 1  ;;  %v6935_v63 = vld [vmem:[%s6284_s30 + $0x158] sm:$0xff] }
 0x249   : > { %v4591_v58 = vadd.f32 %v4340_v44, %v3773_v53  ;;  %5564 = vmatmul.msk.bf16.gmra.mxu0 %vm1154_vm1, %v907_v55  ;;  %v2971_v8 = vshll.u32 %v6935_v63, 16 }
 0x24b   : > { %vm4723_vm10 = vcmp.gt.f32.partialorder %v4591_v58, 0.0  ;;  %v4855_v59 = vmul.f32 0.2, %v4591_v58  ;;  %5964 = vmatmul.msk.bf16.gmra.mxu2 %vm1154_vm1, %v2934_v56  ;;  %v4343_v61 = vpop.f32.mrf.mxu3  ;;  %v2950_v56 = vsel %vm615_vm3, %v2945_v47, %v2949_v48  ;;  %v2961_v47 = vor.u32 %v2959_v39, %v2957_v16 }
 0x24c   : > { %v2965_v48 = vrot.slane %v2963_v40, 1  ;;  %v2975_v39 = vshrl.u32 %v6935_v63, 16 }
 0x24d   : > { %v4987_v0 = vsel %vm4723_vm10, %v4591_v58, %v4855_v59 }
 0x24e   : > { %5120 = vst.msk [vmem:[%s6382_s6 + $0x1a8] sm:$0xff] %vm5066_vm4, %v4987_v0  ;;  %v3525_v1 = vpop.f32.mrf.mxu2  ;;  %v1503_v3 = vpop.f32.mrf.mxu0 }
 0x24f   : > { %v3774_v2 = vadd.f32 %v3525_v1, %v1981_v60  ;;  %v1985_v6 = vpop.f32.mrf.mxu1  ;;  %v1983_v18 = vadd.f32 %v1982_v57, %v1503_v3 }
 0x251   : > { %v4592_v9 = vadd.f32 %v4343_v61, %v3774_v2 }
 0x252   : > { %5635 = vmatmul.msk.bf16.gmra.mxu1 %vm1154_vm1, %v6103_v30  ;;  %v6105_v30 = vld [vmem:[%s6284_s30 + $0x130] sm:$0xff] }
 0x253   : > { %vm4724_vm11 = vcmp.gt.f32.partialorder %v4592_v9, 0.0  ;;  %v4856_v11 = vmul.f32 0.2, %v4592_v9  ;;  %v4345_v12 = vpop.f32.mrf.mxu3  ;;  %v920_v37 = vshll.u32 %v6105_v30, 16  ;;  %v924_v4 = vshrl.u32 %v6105_v30, 16 }
 0x255   : > { %v4988_v17 = vsel %vm4724_vm11, %v4592_v9, %v4856_v11  ;;  %v922_v46 = vrot.slane %v920_v37, 1 }
 0x256   : > { %5121 = vst.msk [vmem:[%s6382_s6 + $0x1b0] sm:$0xff] %vm5066_vm4, %v4988_v17  ;;  %v3527_v20 = vpop.f32.mrf.mxu2  ;;  %v1506_v22 = vpop.f32.mrf.mxu0 }
 0x257   : > { %v3775_v21 = vadd.f32 %v3527_v20, %v1983_v18  ;;  %v1987_v25 = vpop.f32.mrf.mxu1  ;;  %v1986_v28 = vadd.f32 %v1985_v6, %v1506_v22  ;;  %v923_v55 = vsel %vm615_vm3, %v918_v45, %v922_v46  ;;  %v926_v13 = vor.u32 %v924_v4, %v922_v46 }
 0x258   : > { %6035 = vmatmul.msk.bf16.gmra.mxu3 %vm1154_vm1, %v3933_v19  ;;  %v3937_v19 = vsel %vm3858_vm2, %v3934_v42, %v3936_v10  ;;  %v3938_v42 = vrot.slane %v6917_v31, 1  ;;  %v6953_v31 = vld [vmem:[%s6284_s30 + $0x160] sm:$0xff] }
 0x259   : > { %v4593_v26 = vadd.f32 %v4345_v12, %v3775_v21  ;;  %5565 = vmatmul.msk.bf16.gmra.mxu0 %vm1154_vm1, %v915_v23  ;;  %v2979_v40 = vshll.u32 %v6953_v31, 16 }
 0x25b   : > { %vm4725_vm12 = vcmp.gt.f32.partialorder %v4593_v26, 0.0  ;;  %v4857_v27 = vmul.f32 0.2, %v4593_v26  ;;  %5965 = vmatmul.msk.bf16.gmra.mxu2 %vm1154_vm1, %v2942_v24  ;;  %v4348_v29 = vpop.f32.mrf.mxu3  ;;  %v2958_v24 = vsel %vm615_vm3, %v2953_v15, %v2957_v16  ;;  %v2969_v15 = vor.u32 %v2967_v7, %v2965_v48 }
 0x25c   : > { %v2973_v16 = vrot.slane %v2971_v8, 1  ;;  %v2983_v7 = vshrl.u32 %v6953_v31, 16 }
 0x25d   : > { %v4989_v32 = vsel %vm4725_vm12, %v4593_v26, %v4857_v27 }
 0x25e   : > { %5122 = vst.msk [vmem:[%s6382_s6 + $0x1b8] sm:$0xff] %vm5066_vm4, %v4989_v32  ;;  %v3530_v33 = vpop.f32.mrf.mxu2  ;;  %v1508_v35 = vpop.f32.mrf.mxu0 }
 0x25f   : > { %v3776_v34 = vadd.f32 %v3530_v33, %v1986_v28  ;;  %v1990_v38 = vpop.f32.mrf.mxu1  ;;  %v1988_v50 = vadd.f32 %v1987_v25, %v1508_v35 }
 0x261   : > { %v4594_v41 = vadd.f32 %v4348_v29, %v3776_v34 }
 0x262   : > { %5636 = vmatmul.msk.bf16.gmra.mxu1 %vm1154_vm1, %v6104_v62  ;;  %v6106_v62 = vld [vmem:[%s6284_s30 + $0x138] sm:$0xff] }
 0x263   : > { %vm4726_vm13 = vcmp.gt.f32.partialorder %v4594_v41, 0.0  ;;  %v4858_v43 = vmul.f32 0.2, %v4594_v41  ;;  %v4350_v44 = vpop.f32.mrf.mxu3  ;;  %v928_v5 = vshll.u32 %v6106_v62, 16  ;;  %v932_v36 = vshrl.u32 %v6106_v62, 16 }
 0x265   : > { %v4990_v49 = vsel %vm4726_vm13, %v4594_v41, %v4858_v43  ;;  %v930_v14 = vrot.slane %v928_v5, 1 }
 0x266   : > { %5123 = vst.msk [vmem:[%s6382_s6 + $0x1c0] sm:$0xff] %vm5066_vm4, %v4990_v49  ;;  %v3532_v52 = vpop.f32.mrf.mxu2  ;;  %v1511_v54 = vpop.f32.mrf.mxu0 }
 0x267   : > { %v3777_v53 = vadd.f32 %v3532_v52, %v1988_v50  ;;  %v1992_v57 = vpop.f32.mrf.mxu1  ;;  %v1991_v60 = vadd.f32 %v1990_v38, %v1511_v54  ;;  %v931_v23 = vsel %vm615_vm3, %v926_v13, %v930_v14  ;;  %v934_v45 = vor.u32 %v932_v36, %v930_v14 }
 0x268   : > { %6036 = vmatmul.msk.bf16.gmra.mxu3 %vm1154_vm1, %v3935_v51  ;;  %v3939_v51 = vsel %vm3858_vm2, %v3936_v10, %v3938_v42  ;;  %v3940_v10 = vrot.slane %v6935_v63, 1  ;;  %v6971_v63 = vld [vmem:[%s6284_s30 + $0x168] sm:$0xff] }
 0x269   : > { %v4595_v58 = vadd.f32 %v4350_v44, %v3777_v53  ;;  %5566 = vmatmul.msk.bf16.gmra.mxu0 %vm1154_vm1, %v923_v55  ;;  %v2987_v8 = vshll.u32 %v6971_v63, 16 }
 0x26b   : > { %vm4727_vm14 = vcmp.gt.f32.partialorder %v4595_v58, 0.0  ;;  %v4859_v59 = vmul.f32 0.2, %v4595_v58  ;;  %5966 = vmatmul.msk.bf16.gmra.mxu2 %vm1154_vm1, %v2950_v56  ;;  %v4353_v61 = vpop.f32.mrf.mxu3  ;;  %v2966_v56 = vsel %vm615_vm3, %v2961_v47, %v2965_v48  ;;  %v2977_v47 = vor.u32 %v2975_v39, %v2973_v16 }
 0x26c   : > { %v2981_v48 = vrot.slane %v2979_v40, 1  ;;  %v2991_v39 = vshrl.u32 %v6971_v63, 16 }
 0x26d   : > { %v4991_v0 = vsel %vm4727_vm14, %v4595_v58, %v4859_v59 }
 0x26e   : > { %5124 = vst.msk [vmem:[%s6382_s6 + $0x1c8] sm:$0xff] %vm5066_vm4, %v4991_v0  ;;  %v3535_v1 = vpop.f32.mrf.mxu2  ;;  %v1513_v3 = vpop.f32.mrf.mxu0 }
 0x26f   : > { %v3778_v2 = vadd.f32 %v3535_v1, %v1991_v60  ;;  %v1995_v6 = vpop.f32.mrf.mxu1  ;;  %v1993_v18 = vadd.f32 %v1992_v57, %v1513_v3 }
 0x271   : > { %v4596_v9 = vadd.f32 %v4353_v61, %v3778_v2 }
 0x272   : > { %5637 = vmatmul.msk.bf16.gmra.mxu1 %vm1154_vm1, %v6105_v30  ;;  %v6107_v30 = vld [vmem:[%s6284_s30 + $0x140] sm:$0xff] }
 0x273   : > { %vm4728_vm15 = vcmp.gt.f32.partialorder %v4596_v9, 0.0  ;;  %v4860_v11 = vmul.f32 0.2, %v4596_v9  ;;  %v4355_v12 = vpop.f32.mrf.mxu3  ;;  %v936_v37 = vshll.u32 %v6107_v30, 16  ;;  %v940_v4 = vshrl.u32 %v6107_v30, 16 }
 0x275   : > { %v4992_v17 = vsel %vm4728_vm15, %v4596_v9, %v4860_v11  ;;  %v938_v46 = vrot.slane %v936_v37, 1 }
 0x276   : > { %5125 = vst.msk [vmem:[%s6382_s6 + $0x1d0] sm:$0xff] %vm5066_vm4, %v4992_v17  ;;  %v3537_v20 = vpop.f32.mrf.mxu2  ;;  %v1516_v22 = vpop.f32.mrf.mxu0 }
 0x277   : > { %v3779_v21 = vadd.f32 %v3537_v20, %v1993_v18  ;;  %v1997_v25 = vpop.f32.mrf.mxu1  ;;  %v1996_v28 = vadd.f32 %v1995_v6, %v1516_v22  ;;  %v939_v55 = vsel %vm615_vm3, %v934_v45, %v938_v46  ;;  %v942_v13 = vor.u32 %v940_v4, %v938_v46 }
 0x278   : > { %6037 = vmatmul.msk.bf16.gmra.mxu3 %vm1154_vm1, %v3937_v19  ;;  %v3941_v19 = vsel %vm3858_vm2, %v3938_v42, %v3940_v10  ;;  %v3942_v42 = vrot.slane %v6953_v31, 1  ;;  %v6989_v31 = vld [vmem:[%s6284_s30 + $0x170] sm:$0xff] }
 0x279   : > { %v4597_v26 = vadd.f32 %v4355_v12, %v3779_v21  ;;  %5567 = vmatmul.msk.bf16.gmra.mxu0 %vm1154_vm1, %v931_v23  ;;  %v2995_v40 = vshll.u32 %v6989_v31, 16 }
 0x27b   : > { %vm4729_vm0 = vcmp.gt.f32.partialorder %v4597_v26, 0.0  ;;  %v4861_v27 = vmul.f32 0.2, %v4597_v26  ;;  %5967 = vmatmul.msk.bf16.gmra.mxu2 %vm1154_vm1, %v2958_v24  ;;  %v4358_v29 = vpop.f32.mrf.mxu3  ;;  %v2974_v24 = vsel %vm615_vm3, %v2969_v15, %v2973_v16  ;;  %v2985_v15 = vor.u32 %v2983_v7, %v2981_v48 }
 0x27c   : > { %v2989_v16 = vrot.slane %v2987_v8, 1  ;;  %v2999_v7 = vshrl.u32 %v6989_v31, 16 }
 0x27d   : > { %v4993_v32 = vsel %vm4729_vm0, %v4597_v26, %v4861_v27 }
 0x27e   : > { %5126 = vst.msk [vmem:[%s6382_s6 + $0x1d8] sm:$0xff] %vm5066_vm4, %v4993_v32  ;;  %v3540_v33 = vpop.f32.mrf.mxu2  ;;  %v1518_v35 = vpop.f32.mrf.mxu0 }
 0x27f   : > { %v3780_v34 = vadd.f32 %v3540_v33, %v1996_v28  ;;  %v2000_v38 = vpop.f32.mrf.mxu1  ;;  %v1998_v50 = vadd.f32 %v1997_v25, %v1518_v35 }
 0x281   : > { %v4598_v41 = vadd.f32 %v4358_v29, %v3780_v34 }
 0x282   : > { %5638 = vmatmul.msk.bf16.gmra.mxu1 %vm1154_vm1, %v6106_v62  ;;  %v6108_v62 = vld [vmem:[%s6284_s30 + $0x148] sm:$0xff] }
 0x283   : > { %vm4730_vm5 = vcmp.gt.f32.partialorder %v4598_v41, 0.0  ;;  %v4862_v43 = vmul.f32 0.2, %v4598_v41  ;;  %v4360_v44 = vpop.f32.mrf.mxu3  ;;  %v944_v5 = vshll.u32 %v6108_v62, 16  ;;  %v948_v36 = vshrl.u32 %v6108_v62, 16 }
 0x285   : > { %v4994_v49 = vsel %vm4730_vm5, %v4598_v41, %v4862_v43  ;;  %v946_v14 = vrot.slane %v944_v5, 1 }
 0x286   : > { %5127 = vst.msk [vmem:[%s6382_s6 + $0x1e0] sm:$0xff] %vm5066_vm4, %v4994_v49  ;;  %v3542_v52 = vpop.f32.mrf.mxu2  ;;  %v1521_v54 = vpop.f32.mrf.mxu0 }
 0x287   : > { %v3781_v53 = vadd.f32 %v3542_v52, %v1998_v50  ;;  %v2002_v57 = vpop.f32.mrf.mxu1  ;;  %v2001_v60 = vadd.f32 %v2000_v38, %v1521_v54  ;;  %v947_v23 = vsel %vm615_vm3, %v942_v13, %v946_v14  ;;  %v950_v45 = vor.u32 %v948_v36, %v946_v14 }
 0x288   : > { %6038 = vmatmul.msk.bf16.gmra.mxu3 %vm1154_vm1, %v3939_v51  ;;  %v3943_v51 = vsel %vm3858_vm2, %v3940_v10, %v3942_v42  ;;  %v3944_v10 = vrot.slane %v6971_v63, 1  ;;  %v7007_v63 = vld [vmem:[%s6284_s30 + $0x178] sm:$0xff] }
 0x289   : > { %v4599_v58 = vadd.f32 %v4360_v44, %v3781_v53  ;;  %5568 = vmatmul.msk.bf16.gmra.mxu0 %vm1154_vm1, %v939_v55  ;;  %v3003_v8 = vshll.u32 %v7007_v63, 16 }
 0x28b   : > { %vm4731_vm6 = vcmp.gt.f32.partialorder %v4599_v58, 0.0  ;;  %v4863_v59 = vmul.f32 0.2, %v4599_v58  ;;  %5968 = vmatmul.msk.bf16.gmra.mxu2 %vm1154_vm1, %v2966_v56  ;;  %v4363_v61 = vpop.f32.mrf.mxu3  ;;  %v2982_v56 = vsel %vm615_vm3, %v2977_v47, %v2981_v48  ;;  %v2993_v47 = vor.u32 %v2991_v39, %v2989_v16 }
 0x28c   : > { %v2997_v48 = vrot.slane %v2995_v40, 1  ;;  %v3007_v39 = vshrl.u32 %v7007_v63, 16 }
 0x28d   : > { %v4995_v0 = vsel %vm4731_vm6, %v4599_v58, %v4863_v59 }
 0x28e   : > { %5128 = vst.msk [vmem:[%s6382_s6 + $0x1e8] sm:$0xff] %vm5066_vm4, %v4995_v0  ;;  %v3545_v1 = vpop.f32.mrf.mxu2  ;;  %v1523_v3 = vpop.f32.mrf.mxu0 }
 0x28f   : > { %v3782_v2 = vadd.f32 %v3545_v1, %v2001_v60  ;;  %v2005_v6 = vpop.f32.mrf.mxu1  ;;  %v2003_v18 = vadd.f32 %v2002_v57, %v1523_v3 }
 0x291   : > { %v4600_v9 = vadd.f32 %v4363_v61, %v3782_v2 }
 0x292   : > { %5639 = vmatmul.msk.bf16.gmra.mxu1 %vm1154_vm1, %v6107_v30  ;;  %v6109_v30 = vld [vmem:[%s6284_s30 + $0x150] sm:$0xff] }
 0x293   : > { %vm4732_vm7 = vcmp.gt.f32.partialorder %v4600_v9, 0.0  ;;  %v4864_v11 = vmul.f32 0.2, %v4600_v9  ;;  %v4365_v12 = vpop.f32.mrf.mxu3  ;;  %v952_v37 = vshll.u32 %v6109_v30, 16  ;;  %v956_v4 = vshrl.u32 %v6109_v30, 16 }
 0x295   : > { %v4996_v17 = vsel %vm4732_vm7, %v4600_v9, %v4864_v11  ;;  %v954_v46 = vrot.slane %v952_v37, 1 }
 0x296   : > { %5129 = vst.msk [vmem:[%s6382_s6 + $0x1f0] sm:$0xff] %vm5066_vm4, %v4996_v17  ;;  %v3547_v20 = vpop.f32.mrf.mxu2  ;;  %v1526_v22 = vpop.f32.mrf.mxu0 }
 0x297   : > { %v3783_v21 = vadd.f32 %v3547_v20, %v2003_v18  ;;  %v2007_v25 = vpop.f32.mrf.mxu1  ;;  %v2006_v28 = vadd.f32 %v2005_v6, %v1526_v22  ;;  %v955_v55 = vsel %vm615_vm3, %v950_v45, %v954_v46  ;;  %v958_v13 = vor.u32 %v956_v4, %v954_v46 }
 0x298   : > { %6039 = vmatmul.msk.bf16.gmra.mxu3 %vm1154_vm1, %v3941_v19  ;;  %v3945_v19 = vsel %vm3858_vm2, %v3942_v42, %v3944_v10  ;;  %v3946_v42 = vrot.slane %v6989_v31, 1  ;;  %v7025_v31 = vld [vmem:[%s6284_s30 + $0x180] sm:$0xff] }
 0x299   : > { %v4601_v26 = vadd.f32 %v4365_v12, %v3783_v21  ;;  %5569 = vmatmul.msk.bf16.gmra.mxu0 %vm1154_vm1, %v947_v23  ;;  %v3011_v40 = vshll.u32 %v7025_v31, 16 }
 0x29b   : > { %vm4733_vm8 = vcmp.gt.f32.partialorder %v4601_v26, 0.0  ;;  %v4865_v27 = vmul.f32 0.2, %v4601_v26  ;;  %5969 = vmatmul.msk.bf16.gmra.mxu2 %vm1154_vm1, %v2974_v24  ;;  %v4368_v29 = vpop.f32.mrf.mxu3  ;;  %v2990_v24 = vsel %vm615_vm3, %v2985_v15, %v2989_v16  ;;  %v3001_v15 = vor.u32 %v2999_v7, %v2997_v48 }
 0x29c   : > { %v3005_v16 = vrot.slane %v3003_v8, 1  ;;  %v3015_v7 = vshrl.u32 %v7025_v31, 16 }
 0x29d   : > { %v4997_v32 = vsel %vm4733_vm8, %v4601_v26, %v4865_v27 }
 0x29e   : > { %5130 = vst.msk [vmem:[%s6382_s6 + $0x1f8] sm:$0xff] %vm5066_vm4, %v4997_v32  ;;  %v3550_v33 = vpop.f32.mrf.mxu2  ;;  %v1528_v35 = vpop.f32.mrf.mxu0 }
 0x29f   : > { %v3784_v34 = vadd.f32 %v3550_v33, %v2006_v28  ;;  %v2010_v38 = vpop.f32.mrf.mxu1  ;;  %v2008_v50 = vadd.f32 %v2007_v25, %v1528_v35 }
 0x2a1   : > { %v4602_v41 = vadd.f32 %v4368_v29, %v3784_v34 }
 0x2a2   : > { %5640 = vmatmul.msk.bf16.gmra.mxu1 %vm1154_vm1, %v6108_v62  ;;  %v6110_v62 = vld [vmem:[%s6284_s30 + $0x158] sm:$0xff] }
 0x2a3   : > { %vm4734_vm9 = vcmp.gt.f32.partialorder %v4602_v41, 0.0  ;;  %v4866_v43 = vmul.f32 0.2, %v4602_v41  ;;  %v4370_v44 = vpop.f32.mrf.mxu3  ;;  %v960_v5 = vshll.u32 %v6110_v62, 16  ;;  %v964_v36 = vshrl.u32 %v6110_v62, 16 }
 0x2a5   : > { %v4998_v49 = vsel %vm4734_vm9, %v4602_v41, %v4866_v43  ;;  %v962_v14 = vrot.slane %v960_v5, 1 }
 0x2a6   : > { %5131 = vst.msk [vmem:[%s6382_s6 + $0x200] sm:$0xff] %vm5066_vm4, %v4998_v49  ;;  %v3552_v52 = vpop.f32.mrf.mxu2  ;;  %v1531_v54 = vpop.f32.mrf.mxu0 }
 0x2a7   : > { %v3785_v53 = vadd.f32 %v3552_v52, %v2008_v50  ;;  %v2012_v57 = vpop.f32.mrf.mxu1  ;;  %v2011_v60 = vadd.f32 %v2010_v38, %v1531_v54  ;;  %v963_v23 = vsel %vm615_vm3, %v958_v13, %v962_v14  ;;  %v966_v45 = vor.u32 %v964_v36, %v962_v14 }
 0x2a8   : > { %6040 = vmatmul.msk.bf16.gmra.mxu3 %vm1154_vm1, %v3943_v51  ;;  %v3947_v51 = vsel %vm3858_vm2, %v3944_v10, %v3946_v42  ;;  %v3948_v10 = vrot.slane %v7007_v63, 1  ;;  %v7043_v63 = vld [vmem:[%s6284_s30 + $0x188] sm:$0xff] }
 0x2a9   : > { %v4603_v58 = vadd.f32 %v4370_v44, %v3785_v53  ;;  %5570 = vmatmul.msk.bf16.gmra.mxu0 %vm1154_vm1, %v955_v55  ;;  %v3019_v8 = vshll.u32 %v7043_v63, 16 }
 0x2ab   : > { %vm4735_vm10 = vcmp.gt.f32.partialorder %v4603_v58, 0.0  ;;  %v4867_v59 = vmul.f32 0.2, %v4603_v58  ;;  %5970 = vmatmul.msk.bf16.gmra.mxu2 %vm1154_vm1, %v2982_v56  ;;  %v4373_v61 = vpop.f32.mrf.mxu3  ;;  %v2998_v56 = vsel %vm615_vm3, %v2993_v47, %v2997_v48  ;;  %v3009_v47 = vor.u32 %v3007_v39, %v3005_v16 }
 0x2ac   : > { %v3013_v48 = vrot.slane %v3011_v40, 1  ;;  %v3023_v39 = vshrl.u32 %v7043_v63, 16 }
 0x2ad   : > { %v4999_v0 = vsel %vm4735_vm10, %v4603_v58, %v4867_v59 }
 0x2ae   : > { %5132 = vst.msk [vmem:[%s6382_s6 + $0x208] sm:$0xff] %vm5066_vm4, %v4999_v0  ;;  %v3555_v1 = vpop.f32.mrf.mxu2  ;;  %v1533_v3 = vpop.f32.mrf.mxu0 }
 0x2af   : > { %v3786_v2 = vadd.f32 %v3555_v1, %v2011_v60  ;;  %v2015_v6 = vpop.f32.mrf.mxu1  ;;  %v2013_v18 = vadd.f32 %v2012_v57, %v1533_v3 }
 0x2b1   : > { %v4604_v9 = vadd.f32 %v4373_v61, %v3786_v2 }
 0x2b2   : > { %5641 = vmatmul.msk.bf16.gmra.mxu1 %vm1154_vm1, %v6109_v30  ;;  %v6111_v30 = vld [vmem:[%s6284_s30 + $0x160] sm:$0xff] }
 0x2b3   : > { %vm4736_vm11 = vcmp.gt.f32.partialorder %v4604_v9, 0.0  ;;  %v4868_v11 = vmul.f32 0.2, %v4604_v9  ;;  %v4375_v12 = vpop.f32.mrf.mxu3  ;;  %v968_v37 = vshll.u32 %v6111_v30, 16  ;;  %v972_v4 = vshrl.u32 %v6111_v30, 16 }
 0x2b5   : > { %v5000_v17 = vsel %vm4736_vm11, %v4604_v9, %v4868_v11  ;;  %v970_v46 = vrot.slane %v968_v37, 1 }
 0x2b6   : > { %5133 = vst.msk [vmem:[%s6382_s6 + $0x210] sm:$0xff] %vm5066_vm4, %v5000_v17  ;;  %v3557_v20 = vpop.f32.mrf.mxu2  ;;  %v1536_v22 = vpop.f32.mrf.mxu0 }
 0x2b7   : > { %v3787_v21 = vadd.f32 %v3557_v20, %v2013_v18  ;;  %v2017_v25 = vpop.f32.mrf.mxu1  ;;  %v2016_v28 = vadd.f32 %v2015_v6, %v1536_v22  ;;  %v971_v55 = vsel %vm615_vm3, %v966_v45, %v970_v46  ;;  %v974_v13 = vor.u32 %v972_v4, %v970_v46 }
 0x2b8   : > { %6041 = vmatmul.msk.bf16.gmra.mxu3 %vm1154_vm1, %v3945_v19  ;;  %v3949_v19 = vsel %vm3858_vm2, %v3946_v42, %v3948_v10  ;;  %v3950_v42 = vrot.slane %v7025_v31, 1  ;;  %v7061_v31 = vld [vmem:[%s6284_s30 + $0x190] sm:$0xff] }
 0x2b9   : > { %v4605_v26 = vadd.f32 %v4375_v12, %v3787_v21  ;;  %5571 = vmatmul.msk.bf16.gmra.mxu0 %vm1154_vm1, %v963_v23  ;;  %v3027_v40 = vshll.u32 %v7061_v31, 16 }
 0x2bb   : > { %vm4737_vm12 = vcmp.gt.f32.partialorder %v4605_v26, 0.0  ;;  %v4869_v27 = vmul.f32 0.2, %v4605_v26  ;;  %5971 = vmatmul.msk.bf16.gmra.mxu2 %vm1154_vm1, %v2990_v24  ;;  %v4378_v29 = vpop.f32.mrf.mxu3  ;;  %v3006_v24 = vsel %vm615_vm3, %v3001_v15, %v3005_v16  ;;  %v3017_v15 = vor.u32 %v3015_v7, %v3013_v48 }
 0x2bc   : > { %v3021_v16 = vrot.slane %v3019_v8, 1  ;;  %v3031_v7 = vshrl.u32 %v7061_v31, 16 }
 0x2bd   : > { %v5001_v32 = vsel %vm4737_vm12, %v4605_v26, %v4869_v27 }
 0x2be   : > { %5134 = vst.msk [vmem:[%s6382_s6 + $0x218] sm:$0xff] %vm5066_vm4, %v5001_v32  ;;  %v3560_v33 = vpop.f32.mrf.mxu2  ;;  %v1538_v35 = vpop.f32.mrf.mxu0 }
 0x2bf   : > { %v3788_v34 = vadd.f32 %v3560_v33, %v2016_v28  ;;  %v2020_v38 = vpop.f32.mrf.mxu1  ;;  %v2018_v50 = vadd.f32 %v2017_v25, %v1538_v35 }
 0x2c1   : > { %v4606_v41 = vadd.f32 %v4378_v29, %v3788_v34 }
 0x2c2   : > { %5642 = vmatmul.msk.bf16.gmra.mxu1 %vm1154_vm1, %v6110_v62  ;;  %v6112_v62 = vld [vmem:[%s6284_s30 + $0x168] sm:$0xff] }
 0x2c3   : > { %vm4738_vm13 = vcmp.gt.f32.partialorder %v4606_v41, 0.0  ;;  %v4870_v43 = vmul.f32 0.2, %v4606_v41  ;;  %v4380_v44 = vpop.f32.mrf.mxu3  ;;  %v976_v5 = vshll.u32 %v6112_v62, 16  ;;  %v980_v36 = vshrl.u32 %v6112_v62, 16 }
 0x2c5   : > { %v5002_v49 = vsel %vm4738_vm13, %v4606_v41, %v4870_v43  ;;  %v978_v14 = vrot.slane %v976_v5, 1 }
 0x2c6   : > { %5135 = vst.msk [vmem:[%s6382_s6 + $0x220] sm:$0xff] %vm5066_vm4, %v5002_v49  ;;  %v3562_v52 = vpop.f32.mrf.mxu2  ;;  %v1541_v54 = vpop.f32.mrf.mxu0 }
 0x2c7   : > { %v3789_v53 = vadd.f32 %v3562_v52, %v2018_v50  ;;  %v2022_v57 = vpop.f32.mrf.mxu1  ;;  %v2021_v60 = vadd.f32 %v2020_v38, %v1541_v54  ;;  %v979_v23 = vsel %vm615_vm3, %v974_v13, %v978_v14  ;;  %v982_v45 = vor.u32 %v980_v36, %v978_v14 }
 0x2c8   : > { %6042 = vmatmul.msk.bf16.gmra.mxu3 %vm1154_vm1, %v3947_v51  ;;  %v3951_v51 = vsel %vm3858_vm2, %v3948_v10, %v3950_v42  ;;  %v3952_v10 = vrot.slane %v7043_v63, 1  ;;  %v7079_v63 = vld [vmem:[%s6284_s30 + $0x198] sm:$0xff] }
 0x2c9   : > { %v4607_v58 = vadd.f32 %v4380_v44, %v3789_v53  ;;  %5572 = vmatmul.msk.bf16.gmra.mxu0 %vm1154_vm1, %v971_v55  ;;  %v3035_v8 = vshll.u32 %v7079_v63, 16 }
 0x2cb   : > { %vm4739_vm14 = vcmp.gt.f32.partialorder %v4607_v58, 0.0  ;;  %v4871_v59 = vmul.f32 0.2, %v4607_v58  ;;  %5972 = vmatmul.msk.bf16.gmra.mxu2 %vm1154_vm1, %v2998_v56  ;;  %v4383_v61 = vpop.f32.mrf.mxu3  ;;  %v3014_v56 = vsel %vm615_vm3, %v3009_v47, %v3013_v48  ;;  %v3025_v47 = vor.u32 %v3023_v39, %v3021_v16 }
 0x2cc   : > { %v3029_v48 = vrot.slane %v3027_v40, 1  ;;  %v3039_v39 = vshrl.u32 %v7079_v63, 16 }
 0x2cd   : > { %v5003_v0 = vsel %vm4739_vm14, %v4607_v58, %v4871_v59 }
 0x2ce   : > { %5136 = vst.msk [vmem:[%s6382_s6 + $0x228] sm:$0xff] %vm5066_vm4, %v5003_v0  ;;  %v3565_v1 = vpop.f32.mrf.mxu2  ;;  %v1543_v3 = vpop.f32.mrf.mxu0 }
 0x2cf   : > { %v3790_v2 = vadd.f32 %v3565_v1, %v2021_v60  ;;  %v2025_v6 = vpop.f32.mrf.mxu1  ;;  %v2023_v18 = vadd.f32 %v2022_v57, %v1543_v3 }
 0x2d1   : > { %v4608_v9 = vadd.f32 %v4383_v61, %v3790_v2 }
 0x2d2   : > { %5643 = vmatmul.msk.bf16.gmra.mxu1 %vm1154_vm1, %v6111_v30  ;;  %v6113_v30 = vld [vmem:[%s6284_s30 + $0x170] sm:$0xff] }
 0x2d3   : > { %vm4740_vm15 = vcmp.gt.f32.partialorder %v4608_v9, 0.0  ;;  %v4872_v11 = vmul.f32 0.2, %v4608_v9  ;;  %v4385_v12 = vpop.f32.mrf.mxu3  ;;  %v984_v37 = vshll.u32 %v6113_v30, 16  ;;  %v988_v4 = vshrl.u32 %v6113_v30, 16 }
 0x2d5   : > { %v5004_v17 = vsel %vm4740_vm15, %v4608_v9, %v4872_v11  ;;  %v986_v46 = vrot.slane %v984_v37, 1 }
 0x2d6   : > { %5137 = vst.msk [vmem:[%s6382_s6 + $0x230] sm:$0xff] %vm5066_vm4, %v5004_v17  ;;  %v3567_v20 = vpop.f32.mrf.mxu2  ;;  %v1546_v22 = vpop.f32.mrf.mxu0 }
 0x2d7   : > { %v3791_v21 = vadd.f32 %v3567_v20, %v2023_v18  ;;  %v2027_v25 = vpop.f32.mrf.mxu1  ;;  %v2026_v28 = vadd.f32 %v2025_v6, %v1546_v22  ;;  %v987_v55 = vsel %vm615_vm3, %v982_v45, %v986_v46  ;;  %v990_v13 = vor.u32 %v988_v4, %v986_v46 }
 0x2d8   : > { %6043 = vmatmul.msk.bf16.gmra.mxu3 %vm1154_vm1, %v3949_v19  ;;  %v3953_v19 = vsel %vm3858_vm2, %v3950_v42, %v3952_v10  ;;  %v3954_v42 = vrot.slane %v7061_v31, 1  ;;  %v7097_v31 = vld [vmem:[%s6284_s30 + $0x1a0] sm:$0xff] }
 0x2d9   : > { %v4609_v26 = vadd.f32 %v4385_v12, %v3791_v21  ;;  %5573 = vmatmul.msk.bf16.gmra.mxu0 %vm1154_vm1, %v979_v23  ;;  %v3043_v40 = vshll.u32 %v7097_v31, 16 }
 0x2db   : > { %vm4741_vm0 = vcmp.gt.f32.partialorder %v4609_v26, 0.0  ;;  %v4873_v27 = vmul.f32 0.2, %v4609_v26  ;;  %5973 = vmatmul.msk.bf16.gmra.mxu2 %vm1154_vm1, %v3006_v24  ;;  %v4388_v29 = vpop.f32.mrf.mxu3  ;;  %v3022_v24 = vsel %vm615_vm3, %v3017_v15, %v3021_v16  ;;  %v3033_v15 = vor.u32 %v3031_v7, %v3029_v48 }
 0x2dc   : > { %v3037_v16 = vrot.slane %v3035_v8, 1  ;;  %v3047_v7 = vshrl.u32 %v7097_v31, 16 }
 0x2dd   : > { %v5005_v32 = vsel %vm4741_vm0, %v4609_v26, %v4873_v27 }
 0x2de   : > { %5138 = vst.msk [vmem:[%s6382_s6 + $0x238] sm:$0xff] %vm5066_vm4, %v5005_v32  ;;  %v3570_v33 = vpop.f32.mrf.mxu2  ;;  %v1548_v35 = vpop.f32.mrf.mxu0 }
 0x2df   : > { %v3792_v34 = vadd.f32 %v3570_v33, %v2026_v28  ;;  %v2030_v38 = vpop.f32.mrf.mxu1  ;;  %v2028_v50 = vadd.f32 %v2027_v25, %v1548_v35 }
 0x2e1   : > { %v4610_v41 = vadd.f32 %v4388_v29, %v3792_v34 }
 0x2e2   : > { %5644 = vmatmul.msk.bf16.gmra.mxu1 %vm1154_vm1, %v6112_v62  ;;  %v6114_v62 = vld [vmem:[%s6284_s30 + $0x178] sm:$0xff] }
 0x2e3   : > { %vm4742_vm5 = vcmp.gt.f32.partialorder %v4610_v41, 0.0  ;;  %v4874_v43 = vmul.f32 0.2, %v4610_v41  ;;  %v4390_v44 = vpop.f32.mrf.mxu3  ;;  %v992_v5 = vshll.u32 %v6114_v62, 16  ;;  %v996_v36 = vshrl.u32 %v6114_v62, 16 }
 0x2e5   : > { %v5006_v49 = vsel %vm4742_vm5, %v4610_v41, %v4874_v43  ;;  %v994_v14 = vrot.slane %v992_v5, 1 }
 0x2e6   : > { %5139 = vst.msk [vmem:[%s6382_s6 + $0x240] sm:$0xff] %vm5066_vm4, %v5006_v49  ;;  %v3572_v52 = vpop.f32.mrf.mxu2  ;;  %v1551_v54 = vpop.f32.mrf.mxu0 }
 0x2e7   : > { %v3793_v53 = vadd.f32 %v3572_v52, %v2028_v50  ;;  %v2032_v57 = vpop.f32.mrf.mxu1  ;;  %v2031_v60 = vadd.f32 %v2030_v38, %v1551_v54  ;;  %v995_v23 = vsel %vm615_vm3, %v990_v13, %v994_v14  ;;  %v998_v45 = vor.u32 %v996_v36, %v994_v14 }
 0x2e8   : > { %6044 = vmatmul.msk.bf16.gmra.mxu3 %vm1154_vm1, %v3951_v51  ;;  %v3955_v51 = vsel %vm3858_vm2, %v3952_v10, %v3954_v42  ;;  %v3956_v10 = vrot.slane %v7079_v63, 1  ;;  %v7115_v63 = vld [vmem:[%s6284_s30 + $0x1a8] sm:$0xff] }
 0x2e9   : > { %v4611_v58 = vadd.f32 %v4390_v44, %v3793_v53  ;;  %5574 = vmatmul.msk.bf16.gmra.mxu0 %vm1154_vm1, %v987_v55  ;;  %v3051_v8 = vshll.u32 %v7115_v63, 16 }
 0x2eb   : > { %vm4743_vm6 = vcmp.gt.f32.partialorder %v4611_v58, 0.0  ;;  %v4875_v59 = vmul.f32 0.2, %v4611_v58  ;;  %5974 = vmatmul.msk.bf16.gmra.mxu2 %vm1154_vm1, %v3014_v56  ;;  %v4393_v61 = vpop.f32.mrf.mxu3  ;;  %v3030_v56 = vsel %vm615_vm3, %v3025_v47, %v3029_v48  ;;  %v3041_v47 = vor.u32 %v3039_v39, %v3037_v16 }
 0x2ec   : > { %v3045_v48 = vrot.slane %v3043_v40, 1  ;;  %v3055_v39 = vshrl.u32 %v7115_v63, 16 }
 0x2ed   : > { %v5007_v0 = vsel %vm4743_vm6, %v4611_v58, %v4875_v59 }
 0x2ee   : > { %5140 = vst.msk [vmem:[%s6382_s6 + $0x248] sm:$0xff] %vm5066_vm4, %v5007_v0  ;;  %v3575_v1 = vpop.f32.mrf.mxu2  ;;  %v1553_v3 = vpop.f32.mrf.mxu0 }
 0x2ef   : > { %v3794_v2 = vadd.f32 %v3575_v1, %v2031_v60  ;;  %v2035_v6 = vpop.f32.mrf.mxu1  ;;  %v2033_v18 = vadd.f32 %v2032_v57, %v1553_v3 }
 0x2f1   : > { %v4612_v9 = vadd.f32 %v4393_v61, %v3794_v2 }
 0x2f2   : > { %5645 = vmatmul.msk.bf16.gmra.mxu1 %vm1154_vm1, %v6113_v30  ;;  %v6115_v30 = vld [vmem:[%s6284_s30 + $0x180] sm:$0xff] }
 0x2f3   : > { %vm4744_vm7 = vcmp.gt.f32.partialorder %v4612_v9, 0.0  ;;  %v4876_v11 = vmul.f32 0.2, %v4612_v9  ;;  %v4395_v12 = vpop.f32.mrf.mxu3  ;;  %v1000_v37 = vshll.u32 %v6115_v30, 16  ;;  %v1004_v4 = vshrl.u32 %v6115_v30, 16 }
 0x2f5   : > { %v5008_v17 = vsel %vm4744_vm7, %v4612_v9, %v4876_v11  ;;  %v1002_v46 = vrot.slane %v1000_v37, 1 }
 0x2f6   : > { %5141 = vst.msk [vmem:[%s6382_s6 + $0x250] sm:$0xff] %vm5066_vm4, %v5008_v17  ;;  %v3577_v20 = vpop.f32.mrf.mxu2  ;;  %v1556_v22 = vpop.f32.mrf.mxu0 }
 0x2f7   : > { %v3795_v21 = vadd.f32 %v3577_v20, %v2033_v18  ;;  %v2037_v25 = vpop.f32.mrf.mxu1  ;;  %v2036_v28 = vadd.f32 %v2035_v6, %v1556_v22  ;;  %v1003_v55 = vsel %vm615_vm3, %v998_v45, %v1002_v46  ;;  %v1006_v13 = vor.u32 %v1004_v4, %v1002_v46 }
 0x2f8   : > { %6045 = vmatmul.msk.bf16.gmra.mxu3 %vm1154_vm1, %v3953_v19  ;;  %v3957_v19 = vsel %vm3858_vm2, %v3954_v42, %v3956_v10  ;;  %v3958_v42 = vrot.slane %v7097_v31, 1  ;;  %v7133_v31 = vld [vmem:[%s6284_s30 + $0x1b0] sm:$0xff] }
 0x2f9   : > { %v4613_v26 = vadd.f32 %v4395_v12, %v3795_v21  ;;  %5575 = vmatmul.msk.bf16.gmra.mxu0 %vm1154_vm1, %v995_v23  ;;  %v3059_v40 = vshll.u32 %v7133_v31, 16 }
 0x2fb   : > { %vm4745_vm8 = vcmp.gt.f32.partialorder %v4613_v26, 0.0  ;;  %v4877_v27 = vmul.f32 0.2, %v4613_v26  ;;  %5975 = vmatmul.msk.bf16.gmra.mxu2 %vm1154_vm1, %v3022_v24  ;;  %v4398_v29 = vpop.f32.mrf.mxu3  ;;  %v3038_v24 = vsel %vm615_vm3, %v3033_v15, %v3037_v16  ;;  %v3049_v15 = vor.u32 %v3047_v7, %v3045_v48 }
 0x2fc   : > { %v3053_v16 = vrot.slane %v3051_v8, 1  ;;  %v3063_v7 = vshrl.u32 %v7133_v31, 16 }
 0x2fd   : > { %v5009_v32 = vsel %vm4745_vm8, %v4613_v26, %v4877_v27 }
 0x2fe   : > { %5142 = vst.msk [vmem:[%s6382_s6 + $0x258] sm:$0xff] %vm5066_vm4, %v5009_v32  ;;  %v3580_v33 = vpop.f32.mrf.mxu2  ;;  %v1558_v35 = vpop.f32.mrf.mxu0 }
 0x2ff   : > { %v3796_v34 = vadd.f32 %v3580_v33, %v2036_v28  ;;  %v2040_v38 = vpop.f32.mrf.mxu1  ;;  %v2038_v50 = vadd.f32 %v2037_v25, %v1558_v35 }
 0x301   : > { %v4614_v41 = vadd.f32 %v4398_v29, %v3796_v34 }
 0x302   : > { %5646 = vmatmul.msk.bf16.gmra.mxu1 %vm1154_vm1, %v6114_v62  ;;  %v6116_v62 = vld [vmem:[%s6284_s30 + $0x188] sm:$0xff] }
 0x303   : > { %vm4746_vm9 = vcmp.gt.f32.partialorder %v4614_v41, 0.0  ;;  %v4878_v43 = vmul.f32 0.2, %v4614_v41  ;;  %v4400_v44 = vpop.f32.mrf.mxu3  ;;  %v1008_v5 = vshll.u32 %v6116_v62, 16  ;;  %v1012_v36 = vshrl.u32 %v6116_v62, 16 }
 0x305   : > { %v5010_v49 = vsel %vm4746_vm9, %v4614_v41, %v4878_v43  ;;  %v1010_v14 = vrot.slane %v1008_v5, 1 }
 0x306   : > { %5143 = vst.msk [vmem:[%s6382_s6 + $0x260] sm:$0xff] %vm5066_vm4, %v5010_v49  ;;  %v3582_v52 = vpop.f32.mrf.mxu2  ;;  %v1561_v54 = vpop.f32.mrf.mxu0 }
 0x307   : > { %v3797_v53 = vadd.f32 %v3582_v52, %v2038_v50  ;;  %v2042_v57 = vpop.f32.mrf.mxu1  ;;  %v2041_v60 = vadd.f32 %v2040_v38, %v1561_v54  ;;  %v1011_v23 = vsel %vm615_vm3, %v1006_v13, %v1010_v14  ;;  %v1014_v45 = vor.u32 %v1012_v36, %v1010_v14 }
 0x308   : > { %6046 = vmatmul.msk.bf16.gmra.mxu3 %vm1154_vm1, %v3955_v51  ;;  %v3959_v51 = vsel %vm3858_vm2, %v3956_v10, %v3958_v42  ;;  %v3960_v10 = vrot.slane %v7115_v63, 1  ;;  %v7151_v63 = vld [vmem:[%s6284_s30 + $0x1b8] sm:$0xff] }
 0x309   : > { %v4615_v58 = vadd.f32 %v4400_v44, %v3797_v53  ;;  %5576 = vmatmul.msk.bf16.gmra.mxu0 %vm1154_vm1, %v1003_v55  ;;  %v3067_v8 = vshll.u32 %v7151_v63, 16 }
 0x30b   : > { %vm4747_vm10 = vcmp.gt.f32.partialorder %v4615_v58, 0.0  ;;  %v4879_v59 = vmul.f32 0.2, %v4615_v58  ;;  %5976 = vmatmul.msk.bf16.gmra.mxu2 %vm1154_vm1, %v3030_v56  ;;  %v4403_v61 = vpop.f32.mrf.mxu3  ;;  %v3046_v56 = vsel %vm615_vm3, %v3041_v47, %v3045_v48  ;;  %v3057_v47 = vor.u32 %v3055_v39, %v3053_v16 }
 0x30c   : > { %v3061_v48 = vrot.slane %v3059_v40, 1  ;;  %v3071_v39 = vshrl.u32 %v7151_v63, 16 }
 0x30d   : > { %v5011_v0 = vsel %vm4747_vm10, %v4615_v58, %v4879_v59 }
 0x30e   : > { %5144 = vst.msk [vmem:[%s6382_s6 + $0x268] sm:$0xff] %vm5066_vm4, %v5011_v0  ;;  %v3585_v1 = vpop.f32.mrf.mxu2  ;;  %v1563_v3 = vpop.f32.mrf.mxu0 }
 0x30f   : > { %v3798_v2 = vadd.f32 %v3585_v1, %v2041_v60  ;;  %v2045_v6 = vpop.f32.mrf.mxu1  ;;  %v2043_v18 = vadd.f32 %v2042_v57, %v1563_v3 }
 0x311   : > { %v4616_v9 = vadd.f32 %v4403_v61, %v3798_v2 }
 0x312   : > { %5647 = vmatmul.msk.bf16.gmra.mxu1 %vm1154_vm1, %v6115_v30  ;;  %v6117_v30 = vld [vmem:[%s6284_s30 + $0x190] sm:$0xff] }
 0x313   : > { %vm4748_vm11 = vcmp.gt.f32.partialorder %v4616_v9, 0.0  ;;  %v4880_v11 = vmul.f32 0.2, %v4616_v9  ;;  %v4405_v12 = vpop.f32.mrf.mxu3  ;;  %v1016_v37 = vshll.u32 %v6117_v30, 16  ;;  %v1020_v4 = vshrl.u32 %v6117_v30, 16 }
 0x315   : > { %v5012_v17 = vsel %vm4748_vm11, %v4616_v9, %v4880_v11  ;;  %v1018_v46 = vrot.slane %v1016_v37, 1 }
 0x316   : > { %5145 = vst.msk [vmem:[%s6382_s6 + $0x270] sm:$0xff] %vm5066_vm4, %v5012_v17  ;;  %v3587_v20 = vpop.f32.mrf.mxu2  ;;  %v1566_v22 = vpop.f32.mrf.mxu0 }
 0x317   : > { %v3799_v21 = vadd.f32 %v3587_v20, %v2043_v18  ;;  %v2047_v25 = vpop.f32.mrf.mxu1  ;;  %v2046_v28 = vadd.f32 %v2045_v6, %v1566_v22  ;;  %v1019_v55 = vsel %vm615_vm3, %v1014_v45, %v1018_v46  ;;  %v1022_v13 = vor.u32 %v1020_v4, %v1018_v46 }
 0x318   : > { %6047 = vmatmul.msk.bf16.gmra.mxu3 %vm1154_vm1, %v3957_v19  ;;  %v3961_v19 = vsel %vm3858_vm2, %v3958_v42, %v3960_v10  ;;  %v3962_v42 = vrot.slane %v7133_v31, 1  ;;  %v7169_v31 = vld [vmem:[%s6284_s30 + $0x1c0] sm:$0xff] }
 0x319   : > { %v4617_v26 = vadd.f32 %v4405_v12, %v3799_v21  ;;  %5577 = vmatmul.msk.bf16.gmra.mxu0 %vm1154_vm1, %v1011_v23  ;;  %v3075_v40 = vshll.u32 %v7169_v31, 16 }
 0x31b   : > { %vm4749_vm12 = vcmp.gt.f32.partialorder %v4617_v26, 0.0  ;;  %v4881_v27 = vmul.f32 0.2, %v4617_v26  ;;  %5977 = vmatmul.msk.bf16.gmra.mxu2 %vm1154_vm1, %v3038_v24  ;;  %v4408_v29 = vpop.f32.mrf.mxu3  ;;  %v3054_v24 = vsel %vm615_vm3, %v3049_v15, %v3053_v16  ;;  %v3065_v15 = vor.u32 %v3063_v7, %v3061_v48 }
 0x31c   : > { %v3069_v16 = vrot.slane %v3067_v8, 1  ;;  %v3079_v7 = vshrl.u32 %v7169_v31, 16 }
 0x31d   : > { %v5013_v32 = vsel %vm4749_vm12, %v4617_v26, %v4881_v27 }
 0x31e   : > { %5146 = vst.msk [vmem:[%s6382_s6 + $0x278] sm:$0xff] %vm5066_vm4, %v5013_v32  ;;  %v3590_v33 = vpop.f32.mrf.mxu2  ;;  %v1568_v35 = vpop.f32.mrf.mxu0 }
 0x31f   : > { %v3800_v34 = vadd.f32 %v3590_v33, %v2046_v28  ;;  %v2050_v38 = vpop.f32.mrf.mxu1  ;;  %v2048_v50 = vadd.f32 %v2047_v25, %v1568_v35 }
 0x321   : > { %v4618_v41 = vadd.f32 %v4408_v29, %v3800_v34 }
 0x322   : > { %5648 = vmatmul.msk.bf16.gmra.mxu1 %vm1154_vm1, %v6116_v62  ;;  %v6118_v62 = vld [vmem:[%s6284_s30 + $0x198] sm:$0xff] }
 0x323   : > { %vm4750_vm13 = vcmp.gt.f32.partialorder %v4618_v41, 0.0  ;;  %v4882_v43 = vmul.f32 0.2, %v4618_v41  ;;  %v4410_v44 = vpop.f32.mrf.mxu3  ;;  %v1024_v5 = vshll.u32 %v6118_v62, 16  ;;  %v1028_v36 = vshrl.u32 %v6118_v62, 16 }
 0x325   : > { %v5014_v49 = vsel %vm4750_vm13, %v4618_v41, %v4882_v43  ;;  %v1026_v14 = vrot.slane %v1024_v5, 1 }
 0x326   : > { %5147 = vst.msk [vmem:[%s6382_s6 + $0x280] sm:$0xff] %vm5066_vm4, %v5014_v49  ;;  %v3592_v52 = vpop.f32.mrf.mxu2  ;;  %v1571_v54 = vpop.f32.mrf.mxu0 }
 0x327   : > { %v3801_v53 = vadd.f32 %v3592_v52, %v2048_v50  ;;  %v2052_v57 = vpop.f32.mrf.mxu1  ;;  %v2051_v60 = vadd.f32 %v2050_v38, %v1571_v54  ;;  %v1027_v23 = vsel %vm615_vm3, %v1022_v13, %v1026_v14  ;;  %v1030_v45 = vor.u32 %v1028_v36, %v1026_v14 }
 0x328   : > { %6048 = vmatmul.msk.bf16.gmra.mxu3 %vm1154_vm1, %v3959_v51  ;;  %v3963_v51 = vsel %vm3858_vm2, %v3960_v10, %v3962_v42  ;;  %v3964_v10 = vrot.slane %v7151_v63, 1  ;;  %v7187_v63 = vld [vmem:[%s6284_s30 + $0x1c8] sm:$0xff] }
 0x329   : > { %v4619_v58 = vadd.f32 %v4410_v44, %v3801_v53  ;;  %5578 = vmatmul.msk.bf16.gmra.mxu0 %vm1154_vm1, %v1019_v55  ;;  %v3083_v8 = vshll.u32 %v7187_v63, 16 }
 0x32b   : > { %vm4751_vm14 = vcmp.gt.f32.partialorder %v4619_v58, 0.0  ;;  %v4883_v59 = vmul.f32 0.2, %v4619_v58  ;;  %5978 = vmatmul.msk.bf16.gmra.mxu2 %vm1154_vm1, %v3046_v56  ;;  %v4413_v61 = vpop.f32.mrf.mxu3  ;;  %v3062_v56 = vsel %vm615_vm3, %v3057_v47, %v3061_v48  ;;  %v3073_v47 = vor.u32 %v3071_v39, %v3069_v16 }
 0x32c   : > { %v3077_v48 = vrot.slane %v3075_v40, 1  ;;  %v3087_v39 = vshrl.u32 %v7187_v63, 16 }
 0x32d   : > { %v5015_v0 = vsel %vm4751_vm14, %v4619_v58, %v4883_v59 }
 0x32e   : > { %5148 = vst.msk [vmem:[%s6382_s6 + $0x288] sm:$0xff] %vm5066_vm4, %v5015_v0  ;;  %v3595_v1 = vpop.f32.mrf.mxu2  ;;  %v1573_v3 = vpop.f32.mrf.mxu0 }
 0x32f   : > { %v3802_v2 = vadd.f32 %v3595_v1, %v2051_v60  ;;  %v2055_v6 = vpop.f32.mrf.mxu1  ;;  %v2053_v18 = vadd.f32 %v2052_v57, %v1573_v3 }
 0x331   : > { %v4620_v9 = vadd.f32 %v4413_v61, %v3802_v2 }
 0x332   : > { %5649 = vmatmul.msk.bf16.gmra.mxu1 %vm1154_vm1, %v6117_v30  ;;  %v6119_v30 = vld [vmem:[%s6284_s30 + $0x1a0] sm:$0xff] }
 0x333   : > { %vm4752_vm15 = vcmp.gt.f32.partialorder %v4620_v9, 0.0  ;;  %v4884_v11 = vmul.f32 0.2, %v4620_v9  ;;  %v4415_v12 = vpop.f32.mrf.mxu3  ;;  %v1032_v37 = vshll.u32 %v6119_v30, 16  ;;  %v1036_v4 = vshrl.u32 %v6119_v30, 16 }
 0x335   : > { %v5016_v17 = vsel %vm4752_vm15, %v4620_v9, %v4884_v11  ;;  %v1034_v46 = vrot.slane %v1032_v37, 1 }
 0x336   : > { %5149 = vst.msk [vmem:[%s6382_s6 + $0x290] sm:$0xff] %vm5066_vm4, %v5016_v17  ;;  %v3597_v20 = vpop.f32.mrf.mxu2  ;;  %v1576_v22 = vpop.f32.mrf.mxu0 }
 0x337   : > { %v3803_v21 = vadd.f32 %v3597_v20, %v2053_v18  ;;  %v2057_v25 = vpop.f32.mrf.mxu1  ;;  %v2056_v28 = vadd.f32 %v2055_v6, %v1576_v22  ;;  %v1035_v55 = vsel %vm615_vm3, %v1030_v45, %v1034_v46  ;;  %v1038_v13 = vor.u32 %v1036_v4, %v1034_v46 }
 0x338   : > { %6049 = vmatmul.msk.bf16.gmra.mxu3 %vm1154_vm1, %v3961_v19  ;;  %v3965_v19 = vsel %vm3858_vm2, %v3962_v42, %v3964_v10  ;;  %v3966_v42 = vrot.slane %v7169_v31, 1  ;;  %v7205_v31 = vld [vmem:[%s6284_s30 + $0x1d0] sm:$0xff] }
 0x339   : > { %v4621_v26 = vadd.f32 %v4415_v12, %v3803_v21  ;;  %5579 = vmatmul.msk.bf16.gmra.mxu0 %vm1154_vm1, %v1027_v23  ;;  %v3091_v40 = vshll.u32 %v7205_v31, 16 }
 0x33b   : > { %vm4753_vm0 = vcmp.gt.f32.partialorder %v4621_v26, 0.0  ;;  %v4885_v27 = vmul.f32 0.2, %v4621_v26  ;;  %5979 = vmatmul.msk.bf16.gmra.mxu2 %vm1154_vm1, %v3054_v24  ;;  %v4418_v29 = vpop.f32.mrf.mxu3  ;;  %v3070_v24 = vsel %vm615_vm3, %v3065_v15, %v3069_v16  ;;  %v3081_v15 = vor.u32 %v3079_v7, %v3077_v48 }
 0x33c   : > { %v3085_v16 = vrot.slane %v3083_v8, 1  ;;  %v3095_v7 = vshrl.u32 %v7205_v31, 16 }
 0x33d   : > { %v5017_v32 = vsel %vm4753_vm0, %v4621_v26, %v4885_v27 }
 0x33e   : > { %5150 = vst.msk [vmem:[%s6382_s6 + $0x298] sm:$0xff] %vm5066_vm4, %v5017_v32  ;;  %v3600_v33 = vpop.f32.mrf.mxu2  ;;  %v1578_v35 = vpop.f32.mrf.mxu0 }
 0x33f   : > { %v3804_v34 = vadd.f32 %v3600_v33, %v2056_v28  ;;  %v2060_v38 = vpop.f32.mrf.mxu1  ;;  %v2058_v50 = vadd.f32 %v2057_v25, %v1578_v35 }
 0x341   : > { %v4622_v41 = vadd.f32 %v4418_v29, %v3804_v34 }
 0x342   : > { %5650 = vmatmul.msk.bf16.gmra.mxu1 %vm1154_vm1, %v6118_v62  ;;  %v6120_v62 = vld [vmem:[%s6284_s30 + $0x1a8] sm:$0xff] }
 0x343   : > { %vm4754_vm5 = vcmp.gt.f32.partialorder %v4622_v41, 0.0  ;;  %v4886_v43 = vmul.f32 0.2, %v4622_v41  ;;  %v4420_v44 = vpop.f32.mrf.mxu3  ;;  %v1040_v5 = vshll.u32 %v6120_v62, 16  ;;  %v1044_v36 = vshrl.u32 %v6120_v62, 16 }
 0x345   : > { %v5018_v49 = vsel %vm4754_vm5, %v4622_v41, %v4886_v43  ;;  %v1042_v14 = vrot.slane %v1040_v5, 1 }
 0x346   : > { %5151 = vst.msk [vmem:[%s6382_s6 + $0x2a0] sm:$0xff] %vm5066_vm4, %v5018_v49  ;;  %v3602_v52 = vpop.f32.mrf.mxu2  ;;  %v1581_v54 = vpop.f32.mrf.mxu0 }
 0x347   : > { %v3805_v53 = vadd.f32 %v3602_v52, %v2058_v50  ;;  %v2062_v57 = vpop.f32.mrf.mxu1  ;;  %v2061_v60 = vadd.f32 %v2060_v38, %v1581_v54  ;;  %v1043_v23 = vsel %vm615_vm3, %v1038_v13, %v1042_v14  ;;  %v1046_v45 = vor.u32 %v1044_v36, %v1042_v14 }
 0x348   : > { %6050 = vmatmul.msk.bf16.gmra.mxu3 %vm1154_vm1, %v3963_v51  ;;  %v3967_v51 = vsel %vm3858_vm2, %v3964_v10, %v3966_v42  ;;  %v3968_v10 = vrot.slane %v7187_v63, 1  ;;  %v7223_v63 = vld [vmem:[%s6284_s30 + $0x1d8] sm:$0xff] }
 0x349   : > { %v4623_v58 = vadd.f32 %v4420_v44, %v3805_v53  ;;  %5580 = vmatmul.msk.bf16.gmra.mxu0 %vm1154_vm1, %v1035_v55  ;;  %v3099_v8 = vshll.u32 %v7223_v63, 16 }
 0x34b   : > { %vm4755_vm6 = vcmp.gt.f32.partialorder %v4623_v58, 0.0  ;;  %v4887_v59 = vmul.f32 0.2, %v4623_v58  ;;  %5980 = vmatmul.msk.bf16.gmra.mxu2 %vm1154_vm1, %v3062_v56  ;;  %v4423_v61 = vpop.f32.mrf.mxu3  ;;  %v3078_v56 = vsel %vm615_vm3, %v3073_v47, %v3077_v48  ;;  %v3089_v47 = vor.u32 %v3087_v39, %v3085_v16 }
 0x34c   : > { %v3093_v48 = vrot.slane %v3091_v40, 1  ;;  %v3103_v39 = vshrl.u32 %v7223_v63, 16 }
 0x34d   : > { %v5019_v0 = vsel %vm4755_vm6, %v4623_v58, %v4887_v59 }
 0x34e   : > { %5152 = vst.msk [vmem:[%s6382_s6 + $0x2a8] sm:$0xff] %vm5066_vm4, %v5019_v0  ;;  %v3605_v1 = vpop.f32.mrf.mxu2  ;;  %v1583_v3 = vpop.f32.mrf.mxu0 }
 0x34f   : > { %v3806_v2 = vadd.f32 %v3605_v1, %v2061_v60  ;;  %v2065_v6 = vpop.f32.mrf.mxu1  ;;  %v2063_v18 = vadd.f32 %v2062_v57, %v1583_v3 }
 0x351   : > { %v4624_v9 = vadd.f32 %v4423_v61, %v3806_v2 }
 0x352   : > { %5651 = vmatmul.msk.bf16.gmra.mxu1 %vm1154_vm1, %v6119_v30  ;;  %v6121_v30 = vld [vmem:[%s6284_s30 + $0x1b0] sm:$0xff] }
 0x353   : > { %vm4756_vm7 = vcmp.gt.f32.partialorder %v4624_v9, 0.0  ;;  %v4888_v11 = vmul.f32 0.2, %v4624_v9  ;;  %v4425_v12 = vpop.f32.mrf.mxu3  ;;  %v1048_v37 = vshll.u32 %v6121_v30, 16  ;;  %v1052_v4 = vshrl.u32 %v6121_v30, 16 }
 0x355   : > { %v5020_v17 = vsel %vm4756_vm7, %v4624_v9, %v4888_v11  ;;  %v1050_v46 = vrot.slane %v1048_v37, 1 }
 0x356   : > { %5153 = vst.msk [vmem:[%s6382_s6 + $0x2b0] sm:$0xff] %vm5066_vm4, %v5020_v17  ;;  %v3607_v20 = vpop.f32.mrf.mxu2  ;;  %v1586_v22 = vpop.f32.mrf.mxu0 }
 0x357   : > { %v3807_v21 = vadd.f32 %v3607_v20, %v2063_v18  ;;  %v2067_v25 = vpop.f32.mrf.mxu1  ;;  %v2066_v28 = vadd.f32 %v2065_v6, %v1586_v22  ;;  %v1051_v55 = vsel %vm615_vm3, %v1046_v45, %v1050_v46  ;;  %v1054_v13 = vor.u32 %v1052_v4, %v1050_v46 }
 0x358   : > { %6051 = vmatmul.msk.bf16.gmra.mxu3 %vm1154_vm1, %v3965_v19  ;;  %v3969_v19 = vsel %vm3858_vm2, %v3966_v42, %v3968_v10  ;;  %v3970_v42 = vrot.slane %v7205_v31, 1  ;;  %v7241_v31 = vld [vmem:[%s6284_s30 + $0x1e0] sm:$0xff] }
 0x359   : > { %v4625_v26 = vadd.f32 %v4425_v12, %v3807_v21  ;;  %5581 = vmatmul.msk.bf16.gmra.mxu0 %vm1154_vm1, %v1043_v23  ;;  %v3107_v40 = vshll.u32 %v7241_v31, 16 }
 0x35b   : > { %vm4757_vm8 = vcmp.gt.f32.partialorder %v4625_v26, 0.0  ;;  %v4889_v27 = vmul.f32 0.2, %v4625_v26  ;;  %5981 = vmatmul.msk.bf16.gmra.mxu2 %vm1154_vm1, %v3070_v24  ;;  %v4428_v29 = vpop.f32.mrf.mxu3  ;;  %v3086_v24 = vsel %vm615_vm3, %v3081_v15, %v3085_v16  ;;  %v3097_v15 = vor.u32 %v3095_v7, %v3093_v48 }
 0x35c   : > { %v3101_v16 = vrot.slane %v3099_v8, 1  ;;  %v3111_v7 = vshrl.u32 %v7241_v31, 16 }
 0x35d   : > { %v5021_v32 = vsel %vm4757_vm8, %v4625_v26, %v4889_v27 }
 0x35e   : > { %5154 = vst.msk [vmem:[%s6382_s6 + $0x2b8] sm:$0xff] %vm5066_vm4, %v5021_v32  ;;  %v3610_v33 = vpop.f32.mrf.mxu2  ;;  %v1588_v35 = vpop.f32.mrf.mxu0 }
 0x35f   : > { %v3808_v34 = vadd.f32 %v3610_v33, %v2066_v28  ;;  %v2070_v38 = vpop.f32.mrf.mxu1  ;;  %v2068_v50 = vadd.f32 %v2067_v25, %v1588_v35 }
 0x361   : > { %v4626_v41 = vadd.f32 %v4428_v29, %v3808_v34 }
 0x362   : > { %5652 = vmatmul.msk.bf16.gmra.mxu1 %vm1154_vm1, %v6120_v62  ;;  %v6122_v62 = vld [vmem:[%s6284_s30 + $0x1b8] sm:$0xff] }
 0x363   : > { %vm4758_vm9 = vcmp.gt.f32.partialorder %v4626_v41, 0.0  ;;  %v4890_v43 = vmul.f32 0.2, %v4626_v41  ;;  %v4430_v44 = vpop.f32.mrf.mxu3  ;;  %v1056_v5 = vshll.u32 %v6122_v62, 16  ;;  %v1060_v36 = vshrl.u32 %v6122_v62, 16 }
 0x365   : > { %v5022_v49 = vsel %vm4758_vm9, %v4626_v41, %v4890_v43  ;;  %v1058_v14 = vrot.slane %v1056_v5, 1 }
 0x366   : > { %5155 = vst.msk [vmem:[%s6382_s6 + $0x2c0] sm:$0xff] %vm5066_vm4, %v5022_v49  ;;  %v3612_v52 = vpop.f32.mrf.mxu2  ;;  %v1591_v54 = vpop.f32.mrf.mxu0 }
 0x367   : > { %v3809_v53 = vadd.f32 %v3612_v52, %v2068_v50  ;;  %v2072_v57 = vpop.f32.mrf.mxu1  ;;  %v2071_v60 = vadd.f32 %v2070_v38, %v1591_v54  ;;  %v1059_v23 = vsel %vm615_vm3, %v1054_v13, %v1058_v14  ;;  %v1062_v45 = vor.u32 %v1060_v36, %v1058_v14 }
 0x368   : > { %6052 = vmatmul.msk.bf16.gmra.mxu3 %vm1154_vm1, %v3967_v51  ;;  %v3971_v51 = vsel %vm3858_vm2, %v3968_v10, %v3970_v42  ;;  %v3972_v10 = vrot.slane %v7223_v63, 1  ;;  %v7259_v63 = vld [vmem:[%s6284_s30 + $0x1e8] sm:$0xff] }
 0x369   : > { %v4627_v58 = vadd.f32 %v4430_v44, %v3809_v53  ;;  %5582 = vmatmul.msk.bf16.gmra.mxu0 %vm1154_vm1, %v1051_v55  ;;  %v3115_v8 = vshll.u32 %v7259_v63, 16 }
 0x36b   : > { %vm4759_vm10 = vcmp.gt.f32.partialorder %v4627_v58, 0.0  ;;  %v4891_v59 = vmul.f32 0.2, %v4627_v58  ;;  %5982 = vmatmul.msk.bf16.gmra.mxu2 %vm1154_vm1, %v3078_v56  ;;  %v4433_v61 = vpop.f32.mrf.mxu3  ;;  %v3094_v56 = vsel %vm615_vm3, %v3089_v47, %v3093_v48  ;;  %v3105_v47 = vor.u32 %v3103_v39, %v3101_v16 }
 0x36c   : > { %v3109_v48 = vrot.slane %v3107_v40, 1  ;;  %v3119_v39 = vshrl.u32 %v7259_v63, 16 }
 0x36d   : > { %v5023_v0 = vsel %vm4759_vm10, %v4627_v58, %v4891_v59 }
 0x36e   : > { %5156 = vst.msk [vmem:[%s6382_s6 + $0x2c8] sm:$0xff] %vm5066_vm4, %v5023_v0  ;;  %v3615_v1 = vpop.f32.mrf.mxu2  ;;  %v1593_v3 = vpop.f32.mrf.mxu0 }
 0x36f   : > { %v3810_v2 = vadd.f32 %v3615_v1, %v2071_v60  ;;  %v2075_v6 = vpop.f32.mrf.mxu1  ;;  %v2073_v18 = vadd.f32 %v2072_v57, %v1593_v3 }
 0x371   : > { %v4628_v9 = vadd.f32 %v4433_v61, %v3810_v2 }
 0x372   : > { %5653 = vmatmul.msk.bf16.gmra.mxu1 %vm1154_vm1, %v6121_v30  ;;  %v6123_v30 = vld [vmem:[%s6284_s30 + $0x1c0] sm:$0xff] }
 0x373   : > { %vm4760_vm11 = vcmp.gt.f32.partialorder %v4628_v9, 0.0  ;;  %v4892_v11 = vmul.f32 0.2, %v4628_v9  ;;  %v4435_v12 = vpop.f32.mrf.mxu3  ;;  %v1064_v37 = vshll.u32 %v6123_v30, 16  ;;  %v1068_v4 = vshrl.u32 %v6123_v30, 16 }
 0x375   : > { %v5024_v17 = vsel %vm4760_vm11, %v4628_v9, %v4892_v11  ;;  %v1066_v46 = vrot.slane %v1064_v37, 1 }
 0x376   : > { %5157 = vst.msk [vmem:[%s6382_s6 + $0x2d0] sm:$0xff] %vm5066_vm4, %v5024_v17  ;;  %v3617_v20 = vpop.f32.mrf.mxu2  ;;  %v1596_v22 = vpop.f32.mrf.mxu0 }
 0x377   : > { %v3811_v21 = vadd.f32 %v3617_v20, %v2073_v18  ;;  %v2077_v25 = vpop.f32.mrf.mxu1  ;;  %v2076_v28 = vadd.f32 %v2075_v6, %v1596_v22  ;;  %v1067_v55 = vsel %vm615_vm3, %v1062_v45, %v1066_v46  ;;  %v1070_v13 = vor.u32 %v1068_v4, %v1066_v46 }
 0x378   : > { %6053 = vmatmul.msk.bf16.gmra.mxu3 %vm1154_vm1, %v3969_v19  ;;  %v3973_v19 = vsel %vm3858_vm2, %v3970_v42, %v3972_v10  ;;  %v3974_v42 = vrot.slane %v7241_v31, 1  ;;  %v7277_v31 = vld [vmem:[%s6284_s30 + $0x1f0] sm:$0xff] }
 0x379   : > { %v4629_v26 = vadd.f32 %v4435_v12, %v3811_v21  ;;  %5583 = vmatmul.msk.bf16.gmra.mxu0 %vm1154_vm1, %v1059_v23  ;;  %v3123_v40 = vshll.u32 %v7277_v31, 16 }
 0x37b   : > { %vm4761_vm12 = vcmp.gt.f32.partialorder %v4629_v26, 0.0  ;;  %v4893_v27 = vmul.f32 0.2, %v4629_v26  ;;  %5983 = vmatmul.msk.bf16.gmra.mxu2 %vm1154_vm1, %v3086_v24  ;;  %v4438_v29 = vpop.f32.mrf.mxu3  ;;  %v3102_v24 = vsel %vm615_vm3, %v3097_v15, %v3101_v16  ;;  %v3113_v15 = vor.u32 %v3111_v7, %v3109_v48 }
 0x37c   : > { %v3117_v16 = vrot.slane %v3115_v8, 1  ;;  %v3127_v7 = vshrl.u32 %v7277_v31, 16 }
 0x37d   : > { %v5025_v32 = vsel %vm4761_vm12, %v4629_v26, %v4893_v27 }
 0x37e   : > { %5158 = vst.msk [vmem:[%s6382_s6 + $0x2d8] sm:$0xff] %vm5066_vm4, %v5025_v32  ;;  %v3620_v33 = vpop.f32.mrf.mxu2  ;;  %v1598_v35 = vpop.f32.mrf.mxu0 }
 0x37f   : > { %v3812_v34 = vadd.f32 %v3620_v33, %v2076_v28  ;;  %v2080_v38 = vpop.f32.mrf.mxu1  ;;  %v2078_v50 = vadd.f32 %v2077_v25, %v1598_v35 }
 0x381   : > { %v4630_v41 = vadd.f32 %v4438_v29, %v3812_v34 }
 0x382   : > { %5654 = vmatmul.msk.bf16.gmra.mxu1 %vm1154_vm1, %v6122_v62  ;;  %v6124_v62 = vld [vmem:[%s6284_s30 + $0x1c8] sm:$0xff] }
 0x383   : > { %vm4762_vm13 = vcmp.gt.f32.partialorder %v4630_v41, 0.0  ;;  %v4894_v43 = vmul.f32 0.2, %v4630_v41  ;;  %v4440_v44 = vpop.f32.mrf.mxu3  ;;  %v1072_v5 = vshll.u32 %v6124_v62, 16  ;;  %v1076_v36 = vshrl.u32 %v6124_v62, 16 }
 0x385   : > { %v5026_v49 = vsel %vm4762_vm13, %v4630_v41, %v4894_v43  ;;  %v1074_v14 = vrot.slane %v1072_v5, 1 }
 0x386   : > { %5159 = vst.msk [vmem:[%s6382_s6 + $0x2e0] sm:$0xff] %vm5066_vm4, %v5026_v49  ;;  %v3622_v52 = vpop.f32.mrf.mxu2  ;;  %v1601_v54 = vpop.f32.mrf.mxu0 }
 0x387   : > { %v3813_v53 = vadd.f32 %v3622_v52, %v2078_v50  ;;  %v2082_v57 = vpop.f32.mrf.mxu1  ;;  %v2081_v60 = vadd.f32 %v2080_v38, %v1601_v54  ;;  %v1075_v23 = vsel %vm615_vm3, %v1070_v13, %v1074_v14  ;;  %v1078_v45 = vor.u32 %v1076_v36, %v1074_v14 }
 0x388   : > { %6054 = vmatmul.msk.bf16.gmra.mxu3 %vm1154_vm1, %v3971_v51  ;;  %v3975_v51 = vsel %vm3858_vm2, %v3972_v10, %v3974_v42  ;;  %v3976_v10 = vrot.slane %v7259_v63, 1  ;;  %v7295_v63 = vld [vmem:[%s6284_s30 + $0x1f8] sm:$0xff] }
 0x389   : > { %v4631_v58 = vadd.f32 %v4440_v44, %v3813_v53  ;;  %5584 = vmatmul.msk.bf16.gmra.mxu0 %vm1154_vm1, %v1067_v55  ;;  %v3131_v8 = vshll.u32 %v7295_v63, 16 }
 0x38b   : > { %vm4763_vm14 = vcmp.gt.f32.partialorder %v4631_v58, 0.0  ;;  %v4895_v59 = vmul.f32 0.2, %v4631_v58  ;;  %5984 = vmatmul.msk.bf16.gmra.mxu2 %vm1154_vm1, %v3094_v56  ;;  %v4443_v61 = vpop.f32.mrf.mxu3  ;;  %v3110_v56 = vsel %vm615_vm3, %v3105_v47, %v3109_v48  ;;  %v3121_v47 = vor.u32 %v3119_v39, %v3117_v16 }
 0x38c   : > { %v3125_v48 = vrot.slane %v3123_v40, 1  ;;  %v3135_v39 = vshrl.u32 %v7295_v63, 16 }
 0x38d   : > { %v5027_v0 = vsel %vm4763_vm14, %v4631_v58, %v4895_v59 }
 0x38e   : > { %5160 = vst.msk [vmem:[%s6382_s6 + $0x2e8] sm:$0xff] %vm5066_vm4, %v5027_v0  ;;  %v3625_v1 = vpop.f32.mrf.mxu2  ;;  %v1603_v3 = vpop.f32.mrf.mxu0 }
 0x38f   : > { %v3814_v2 = vadd.f32 %v3625_v1, %v2081_v60  ;;  %v2085_v6 = vpop.f32.mrf.mxu1  ;;  %v2083_v18 = vadd.f32 %v2082_v57, %v1603_v3 }
 0x391   : > { %v4632_v9 = vadd.f32 %v4443_v61, %v3814_v2 }
 0x392   : > { %5655 = vmatmul.msk.bf16.gmra.mxu1 %vm1154_vm1, %v6123_v30  ;;  %v6125_v30 = vld [vmem:[%s6284_s30 + $0x1d0] sm:$0xff] }
 0x393   : > { %vm4764_vm15 = vcmp.gt.f32.partialorder %v4632_v9, 0.0  ;;  %v4896_v11 = vmul.f32 0.2, %v4632_v9  ;;  %v4445_v12 = vpop.f32.mrf.mxu3  ;;  %v1080_v37 = vshll.u32 %v6125_v30, 16  ;;  %v1084_v4 = vshrl.u32 %v6125_v30, 16 }
 0x395   : > { %v5028_v17 = vsel %vm4764_vm15, %v4632_v9, %v4896_v11  ;;  %v1082_v46 = vrot.slane %v1080_v37, 1 }
 0x396   : > { %5161 = vst.msk [vmem:[%s6382_s6 + $0x2f0] sm:$0xff] %vm5066_vm4, %v5028_v17  ;;  %v3627_v20 = vpop.f32.mrf.mxu2  ;;  %v1606_v22 = vpop.f32.mrf.mxu0 }
 0x397   : > { %v3815_v21 = vadd.f32 %v3627_v20, %v2083_v18  ;;  %v2087_v25 = vpop.f32.mrf.mxu1  ;;  %v2086_v28 = vadd.f32 %v2085_v6, %v1606_v22  ;;  %v1083_v55 = vsel %vm615_vm3, %v1078_v45, %v1082_v46  ;;  %v1086_v13 = vor.u32 %v1084_v4, %v1082_v46 }
 0x398   : > { %6055 = vmatmul.msk.bf16.gmra.mxu3 %vm1154_vm1, %v3973_v19  ;;  %v3977_v19 = vsel %vm3858_vm2, %v3974_v42, %v3976_v10  ;;  %v3978_v42 = vrot.slane %v7277_v31, 1  ;;  %v7313_v31 = vld [vmem:[%s6284_s30 + $0x200] sm:$0xff] }
 0x399   : > { %v4633_v26 = vadd.f32 %v4445_v12, %v3815_v21  ;;  %5585 = vmatmul.msk.bf16.gmra.mxu0 %vm1154_vm1, %v1075_v23  ;;  %v3139_v40 = vshll.u32 %v7313_v31, 16 }
 0x39b   : > { %vm4765_vm0 = vcmp.gt.f32.partialorder %v4633_v26, 0.0  ;;  %v4897_v27 = vmul.f32 0.2, %v4633_v26  ;;  %5985 = vmatmul.msk.bf16.gmra.mxu2 %vm1154_vm1, %v3102_v24  ;;  %v4448_v29 = vpop.f32.mrf.mxu3  ;;  %v3118_v24 = vsel %vm615_vm3, %v3113_v15, %v3117_v16  ;;  %v3129_v15 = vor.u32 %v3127_v7, %v3125_v48 }
 0x39c   : > { %v3133_v16 = vrot.slane %v3131_v8, 1  ;;  %v3143_v7 = vshrl.u32 %v7313_v31, 16 }
 0x39d   : > { %v5029_v32 = vsel %vm4765_vm0, %v4633_v26, %v4897_v27 }
 0x39e   : > { %5162 = vst.msk [vmem:[%s6382_s6 + $0x2f8] sm:$0xff] %vm5066_vm4, %v5029_v32  ;;  %v3630_v33 = vpop.f32.mrf.mxu2  ;;  %v1608_v35 = vpop.f32.mrf.mxu0 }
 0x39f   : > { %v3816_v34 = vadd.f32 %v3630_v33, %v2086_v28  ;;  %v2090_v38 = vpop.f32.mrf.mxu1  ;;  %v2088_v50 = vadd.f32 %v2087_v25, %v1608_v35 }
 0x3a1   : > { %v4634_v41 = vadd.f32 %v4448_v29, %v3816_v34 }
 0x3a2   : > { %5656 = vmatmul.msk.bf16.gmra.mxu1 %vm1154_vm1, %v6124_v62  ;;  %v6126_v62 = vld [vmem:[%s6284_s30 + $0x1d8] sm:$0xff] }
 0x3a3   : > { %vm4766_vm5 = vcmp.gt.f32.partialorder %v4634_v41, 0.0  ;;  %v4898_v43 = vmul.f32 0.2, %v4634_v41  ;;  %v4450_v44 = vpop.f32.mrf.mxu3  ;;  %v1088_v5 = vshll.u32 %v6126_v62, 16  ;;  %v1092_v36 = vshrl.u32 %v6126_v62, 16 }
 0x3a5   : > { %v5030_v49 = vsel %vm4766_vm5, %v4634_v41, %v4898_v43  ;;  %v1090_v14 = vrot.slane %v1088_v5, 1 }
 0x3a6   : > { %5163 = vst.msk [vmem:[%s6382_s6 + $0x300] sm:$0xff] %vm5066_vm4, %v5030_v49  ;;  %v3632_v52 = vpop.f32.mrf.mxu2  ;;  %v1611_v54 = vpop.f32.mrf.mxu0 }
 0x3a7   : > { %v3817_v53 = vadd.f32 %v3632_v52, %v2088_v50  ;;  %v2092_v57 = vpop.f32.mrf.mxu1  ;;  %v2091_v60 = vadd.f32 %v2090_v38, %v1611_v54  ;;  %v1091_v23 = vsel %vm615_vm3, %v1086_v13, %v1090_v14  ;;  %v1094_v45 = vor.u32 %v1092_v36, %v1090_v14 }
 0x3a8   : > { %6056 = vmatmul.msk.bf16.gmra.mxu3 %vm1154_vm1, %v3975_v51  ;;  %v3979_v51 = vsel %vm3858_vm2, %v3976_v10, %v3978_v42  ;;  %v3980_v10 = vrot.slane %v7295_v63, 1  ;;  %v7331_v63 = vld [vmem:[%s6284_s30 + $0x208] sm:$0xff] }
 0x3a9   : > { %v4635_v58 = vadd.f32 %v4450_v44, %v3817_v53  ;;  %5586 = vmatmul.msk.bf16.gmra.mxu0 %vm1154_vm1, %v1083_v55  ;;  %v3147_v8 = vshll.u32 %v7331_v63, 16 }
 0x3ab   : > { %vm4767_vm6 = vcmp.gt.f32.partialorder %v4635_v58, 0.0  ;;  %v4899_v59 = vmul.f32 0.2, %v4635_v58  ;;  %5986 = vmatmul.msk.bf16.gmra.mxu2 %vm1154_vm1, %v3110_v56  ;;  %v4453_v61 = vpop.f32.mrf.mxu3  ;;  %v3126_v56 = vsel %vm615_vm3, %v3121_v47, %v3125_v48  ;;  %v3137_v47 = vor.u32 %v3135_v39, %v3133_v16 }
 0x3ac   : > { %v3141_v48 = vrot.slane %v3139_v40, 1  ;;  %v3151_v39 = vshrl.u32 %v7331_v63, 16 }
 0x3ad   : > { %v5031_v0 = vsel %vm4767_vm6, %v4635_v58, %v4899_v59 }
 0x3ae   : > { %5164 = vst.msk [vmem:[%s6382_s6 + $0x308] sm:$0xff] %vm5066_vm4, %v5031_v0  ;;  %v3635_v1 = vpop.f32.mrf.mxu2  ;;  %v1613_v3 = vpop.f32.mrf.mxu0 }
 0x3af   : > { %v3818_v2 = vadd.f32 %v3635_v1, %v2091_v60  ;;  %v2095_v6 = vpop.f32.mrf.mxu1  ;;  %v2093_v18 = vadd.f32 %v2092_v57, %v1613_v3 }
 0x3b1   : > { %v4636_v9 = vadd.f32 %v4453_v61, %v3818_v2 }
 0x3b2   : > { %5657 = vmatmul.msk.bf16.gmra.mxu1 %vm1154_vm1, %v6125_v30  ;;  %v6127_v30 = vld [vmem:[%s6284_s30 + $0x1e0] sm:$0xff] }
 0x3b3   : > { %vm4768_vm7 = vcmp.gt.f32.partialorder %v4636_v9, 0.0  ;;  %v4900_v11 = vmul.f32 0.2, %v4636_v9  ;;  %v4455_v12 = vpop.f32.mrf.mxu3  ;;  %v1096_v37 = vshll.u32 %v6127_v30, 16  ;;  %v1100_v4 = vshrl.u32 %v6127_v30, 16 }
 0x3b5   : > { %v5032_v17 = vsel %vm4768_vm7, %v4636_v9, %v4900_v11  ;;  %v1098_v46 = vrot.slane %v1096_v37, 1 }
 0x3b6   : > { %5165 = vst.msk [vmem:[%s6382_s6 + $0x310] sm:$0xff] %vm5066_vm4, %v5032_v17  ;;  %v3637_v20 = vpop.f32.mrf.mxu2  ;;  %v1616_v22 = vpop.f32.mrf.mxu0 }
 0x3b7   : > { %v3819_v21 = vadd.f32 %v3637_v20, %v2093_v18  ;;  %v2097_v25 = vpop.f32.mrf.mxu1  ;;  %v2096_v28 = vadd.f32 %v2095_v6, %v1616_v22  ;;  %v1099_v55 = vsel %vm615_vm3, %v1094_v45, %v1098_v46  ;;  %v1102_v13 = vor.u32 %v1100_v4, %v1098_v46 }
 0x3b8   : > { %6057 = vmatmul.msk.bf16.gmra.mxu3 %vm1154_vm1, %v3977_v19  ;;  %v3981_v19 = vsel %vm3858_vm2, %v3978_v42, %v3980_v10  ;;  %v3982_v42 = vrot.slane %v7313_v31, 1  ;;  %v7349_v31 = vld [vmem:[%s6284_s30 + $0x210] sm:$0xff] }
 0x3b9   : > { %v4637_v26 = vadd.f32 %v4455_v12, %v3819_v21  ;;  %5587 = vmatmul.msk.bf16.gmra.mxu0 %vm1154_vm1, %v1091_v23  ;;  %v3155_v40 = vshll.u32 %v7349_v31, 16 }
 0x3bb   : > { %vm4769_vm8 = vcmp.gt.f32.partialorder %v4637_v26, 0.0  ;;  %v4901_v27 = vmul.f32 0.2, %v4637_v26  ;;  %5987 = vmatmul.msk.bf16.gmra.mxu2 %vm1154_vm1, %v3118_v24  ;;  %v4458_v29 = vpop.f32.mrf.mxu3  ;;  %v3134_v24 = vsel %vm615_vm3, %v3129_v15, %v3133_v16  ;;  %v3145_v15 = vor.u32 %v3143_v7, %v3141_v48 }
 0x3bc   : > { %v3149_v16 = vrot.slane %v3147_v8, 1  ;;  %v3159_v7 = vshrl.u32 %v7349_v31, 16 }
 0x3bd   : > { %v5033_v32 = vsel %vm4769_vm8, %v4637_v26, %v4901_v27 }
 0x3be   : > { %5166 = vst.msk [vmem:[%s6382_s6 + $0x318] sm:$0xff] %vm5066_vm4, %v5033_v32  ;;  %v3640_v33 = vpop.f32.mrf.mxu2  ;;  %v1618_v35 = vpop.f32.mrf.mxu0 }
 0x3bf   : > { %v3820_v34 = vadd.f32 %v3640_v33, %v2096_v28  ;;  %v2100_v38 = vpop.f32.mrf.mxu1  ;;  %v2098_v50 = vadd.f32 %v2097_v25, %v1618_v35 }
 0x3c1   : > { %v4638_v41 = vadd.f32 %v4458_v29, %v3820_v34 }
 0x3c2   : > { %5658 = vmatmul.msk.bf16.gmra.mxu1 %vm1154_vm1, %v6126_v62  ;;  %v6128_v62 = vld [vmem:[%s6284_s30 + $0x1e8] sm:$0xff] }
 0x3c3   : > { %vm4770_vm9 = vcmp.gt.f32.partialorder %v4638_v41, 0.0  ;;  %v4902_v43 = vmul.f32 0.2, %v4638_v41  ;;  %v4460_v44 = vpop.f32.mrf.mxu3  ;;  %v1104_v5 = vshll.u32 %v6128_v62, 16  ;;  %v1108_v36 = vshrl.u32 %v6128_v62, 16 }
 0x3c5   : > { %v5034_v49 = vsel %vm4770_vm9, %v4638_v41, %v4902_v43  ;;  %v1106_v14 = vrot.slane %v1104_v5, 1 }
 0x3c6   : > { %5167 = vst.msk [vmem:[%s6382_s6 + $0x320] sm:$0xff] %vm5066_vm4, %v5034_v49  ;;  %v3642_v52 = vpop.f32.mrf.mxu2  ;;  %v1621_v54 = vpop.f32.mrf.mxu0 }
 0x3c7   : > { %v3821_v53 = vadd.f32 %v3642_v52, %v2098_v50  ;;  %v2102_v57 = vpop.f32.mrf.mxu1  ;;  %v2101_v60 = vadd.f32 %v2100_v38, %v1621_v54  ;;  %v1107_v23 = vsel %vm615_vm3, %v1102_v13, %v1106_v14  ;;  %v1110_v45 = vor.u32 %v1108_v36, %v1106_v14 }
 0x3c8   : > { %6058 = vmatmul.msk.bf16.gmra.mxu3 %vm1154_vm1, %v3979_v51  ;;  %v3983_v51 = vsel %vm3858_vm2, %v3980_v10, %v3982_v42  ;;  %v3984_v10 = vrot.slane %v7331_v63, 1  ;;  %v7369_v63 = vld [vmem:[%s6284_s30 + $0x218] sm:$0xff] }
 0x3c9   : > { %v4639_v58 = vadd.f32 %v4460_v44, %v3821_v53  ;;  %5588 = vmatmul.msk.bf16.gmra.mxu0 %vm1154_vm1, %v1099_v55  ;;  %v3163_v8 = vshll.u32 %v7369_v63, 16 }
 0x3cb   : > { %vm4771_vm10 = vcmp.gt.f32.partialorder %v4639_v58, 0.0  ;;  %v4903_v59 = vmul.f32 0.2, %v4639_v58  ;;  %5988 = vmatmul.msk.bf16.gmra.mxu2 %vm1154_vm1, %v3126_v56  ;;  %v4463_v61 = vpop.f32.mrf.mxu3  ;;  %v3142_v56 = vsel %vm615_vm3, %v3137_v47, %v3141_v48  ;;  %v3153_v47 = vor.u32 %v3151_v39, %v3149_v16 }
 0x3cc   : > { %v3157_v48 = vrot.slane %v3155_v40, 1 }
 0x3cd   : > { %v5035_v0 = vsel %vm4771_vm10, %v4639_v58, %v4903_v59 }
 0x3ce   : > { %5168 = vst.msk [vmem:[%s6382_s6 + $0x328] sm:$0xff] %vm5066_vm4, %v5035_v0  ;;  %v3645_v1 = vpop.f32.mrf.mxu2  ;;  %v1623_v3 = vpop.f32.mrf.mxu0 }
 0x3cf   : > { %v3822_v2 = vadd.f32 %v3645_v1, %v2101_v60  ;;  %v2105_v6 = vpop.f32.mrf.mxu1  ;;  %v2103_v18 = vadd.f32 %v2102_v57, %v1623_v3 }
 0x3d1   : > { %v4640_v9 = vadd.f32 %v4463_v61, %v3822_v2 }
 0x3d2   : > { %5659 = vmatmul.msk.bf16.gmra.mxu1 %vm1154_vm1, %v6127_v30  ;;  %v6129_v30 = vld [vmem:[%s6284_s30 + $0x1f0] sm:$0xff] }
 0x3d3   : > { %vm4772_vm11 = vcmp.gt.f32.partialorder %v4640_v9, 0.0  ;;  %v4904_v11 = vmul.f32 0.2, %v4640_v9  ;;  %v4465_v12 = vpop.f32.mrf.mxu3  ;;  %v1112_v37 = vshll.u32 %v6129_v30, 16  ;;  %v1116_v4 = vshrl.u32 %v6129_v30, 16 }
 0x3d5   : > { %v5036_v17 = vsel %vm4772_vm11, %v4640_v9, %v4904_v11  ;;  %v1114_v46 = vrot.slane %v1112_v37, 1 }
 0x3d6   : > { %5169 = vst.msk [vmem:[%s6382_s6 + $0x330] sm:$0xff] %vm5066_vm4, %v5036_v17  ;;  %v3647_v20 = vpop.f32.mrf.mxu2  ;;  %v1626_v22 = vpop.f32.mrf.mxu0 }
 0x3d7   : > { %v3823_v21 = vadd.f32 %v3647_v20, %v2103_v18  ;;  %v2107_v25 = vpop.f32.mrf.mxu1  ;;  %v2106_v28 = vadd.f32 %v2105_v6, %v1626_v22  ;;  %v1115_v55 = vsel %vm615_vm3, %v1110_v45, %v1114_v46  ;;  %v1118_v13 = vor.u32 %v1116_v4, %v1114_v46 }
 0x3d8   : > { %6059 = vmatmul.msk.bf16.gmra.mxu3 %vm1154_vm1, %v3981_v19  ;;  %v3985_v19 = vsel %vm3858_vm2, %v3982_v42, %v3984_v10  ;;  %v3986_v42 = vrot.slane %v7349_v31, 1 }
 0x3d9   : > { %v4641_v26 = vadd.f32 %v4465_v12, %v3823_v21  ;;  %5589 = vmatmul.msk.bf16.gmra.mxu0 %vm1154_vm1, %v1107_v23 }
 0x3db   : > { %vm4773_vm12 = vcmp.gt.f32.partialorder %v4641_v26, 0.0  ;;  %v4905_v27 = vmul.f32 0.2, %v4641_v26  ;;  %5989 = vmatmul.msk.bf16.gmra.mxu2 %vm1154_vm1, %v3134_v24  ;;  %v4468_v29 = vpop.f32.mrf.mxu3  ;;  %v3150_v24 = vsel %vm615_vm3, %v3145_v15, %v3149_v16  ;;  %v3161_v15 = vor.u32 %v3159_v7, %v3157_v48 }
 0x3dc   : > { %v3165_v16 = vrot.slane %v3163_v8, 1 }
 0x3dd   : > { %v5037_v32 = vsel %vm4773_vm12, %v4641_v26, %v4905_v27 }
 0x3de   : > { %5170 = vst.msk [vmem:[%s6382_s6 + $0x338] sm:$0xff] %vm5066_vm4, %v5037_v32  ;;  %v3650_v33 = vpop.f32.mrf.mxu2  ;;  %v1628_v35 = vpop.f32.mrf.mxu0 }
 0x3df   : > { %v3824_v34 = vadd.f32 %v3650_v33, %v2106_v28  ;;  %v2110_v38 = vpop.f32.mrf.mxu1  ;;  %v2108_v50 = vadd.f32 %v2107_v25, %v1628_v35 }
 0x3e1   : > { %v4642_v41 = vadd.f32 %v4468_v29, %v3824_v34 }
 0x3e2   : > { %5660 = vmatmul.msk.bf16.gmra.mxu1 %vm1154_vm1, %v6128_v62  ;;  %v6130_v62 = vld [vmem:[%s6284_s30 + $0x1f8] sm:$0xff] }
 0x3e3   : > { %vm4774_vm13 = vcmp.gt.f32.partialorder %v4642_v41, 0.0  ;;  %v4906_v43 = vmul.f32 0.2, %v4642_v41  ;;  %v4470_v44 = vpop.f32.mrf.mxu3  ;;  %v1120_v5 = vshll.u32 %v6130_v62, 16  ;;  %v1124_v36 = vshrl.u32 %v6130_v62, 16 }
 0x3e5   : > { %v5038_v49 = vsel %vm4774_vm13, %v4642_v41, %v4906_v43  ;;  %v1122_v14 = vrot.slane %v1120_v5, 1 }
 0x3e6   : > { %5171 = vst.msk [vmem:[%s6382_s6 + $0x340] sm:$0xff] %vm5066_vm4, %v5038_v49  ;;  %v3652_v52 = vpop.f32.mrf.mxu2  ;;  %v1631_v54 = vpop.f32.mrf.mxu0 }
 0x3e7   : > { %v3825_v53 = vadd.f32 %v3652_v52, %v2108_v50  ;;  %v2112_v57 = vpop.f32.mrf.mxu1  ;;  %v2111_v60 = vadd.f32 %v2110_v38, %v1631_v54  ;;  %v1123_v23 = vsel %vm615_vm3, %v1118_v13, %v1122_v14  ;;  %v1126_v45 = vor.u32 %v1124_v36, %v1122_v14 }
 0x3e8   : > { %6060 = vmatmul.msk.bf16.gmra.mxu3 %vm1154_vm1, %v3983_v51  ;;  %v3987_v51 = vsel %vm3858_vm2, %v3984_v10, %v3986_v42  ;;  %v3988_v10 = vrot.slane %v7369_v63, 1 }
 0x3e9   : > { %v4643_v58 = vadd.f32 %v4470_v44, %v3825_v53  ;;  %5590 = vmatmul.msk.bf16.gmra.mxu0 %vm1154_vm1, %v1115_v55 }
 0x3eb   : > { %vm4775_vm14 = vcmp.gt.f32.partialorder %v4643_v58, 0.0  ;;  %v4907_v59 = vmul.f32 0.2, %v4643_v58  ;;  %5990 = vmatmul.msk.bf16.gmra.mxu2 %vm1154_vm1, %v3142_v56  ;;  %v4473_v61 = vpop.f32.mrf.mxu3  ;;  %v3158_v56 = vsel %vm615_vm3, %v3153_v47, %v3157_v48 }
 0x3ed   : > { %v5039_v0 = vsel %vm4775_vm14, %v4643_v58, %v4907_v59 }
 0x3ee   : > { %5172 = vst.msk [vmem:[%s6382_s6 + $0x348] sm:$0xff] %vm5066_vm4, %v5039_v0  ;;  %v3655_v1 = vpop.f32.mrf.mxu2  ;;  %v1633_v3 = vpop.f32.mrf.mxu0 }
 0x3ef   : > { %v3826_v2 = vadd.f32 %v3655_v1, %v2111_v60  ;;  %v2115_v6 = vpop.f32.mrf.mxu1  ;;  %v2113_v18 = vadd.f32 %v2112_v57, %v1633_v3 }
 0x3f1   : > { %v4644_v9 = vadd.f32 %v4473_v61, %v3826_v2 }
 0x3f2   : > { %5661 = vmatmul.msk.bf16.gmra.mxu1 %vm1154_vm1, %v6129_v30  ;;  %v6131_v30 = vld [vmem:[%s6284_s30 + $0x200] sm:$0xff] }
 0x3f3   : > { %vm4776_vm15 = vcmp.gt.f32.partialorder %v4644_v9, 0.0  ;;  %v4908_v11 = vmul.f32 0.2, %v4644_v9  ;;  %v4475_v12 = vpop.f32.mrf.mxu3  ;;  %v1128_v37 = vshll.u32 %v6131_v30, 16  ;;  %v1132_v4 = vshrl.u32 %v6131_v30, 16 }
 0x3f5   : > { %v5040_v17 = vsel %vm4776_vm15, %v4644_v9, %v4908_v11  ;;  %v1130_v46 = vrot.slane %v1128_v37, 1 }
 0x3f6   : > { %5173 = vst.msk [vmem:[%s6382_s6 + $0x350] sm:$0xff] %vm5066_vm4, %v5040_v17  ;;  %v3657_v20 = vpop.f32.mrf.mxu2  ;;  %v1636_v22 = vpop.f32.mrf.mxu0  ;;  %v279_v17 = vld [vmem:[%s6284_s30 + $0x210] sm:$0x1] }
 0x3f7   : > { %v3827_v21 = vadd.f32 %v3657_v20, %v2113_v18  ;;  %v2117_v25 = vpop.f32.mrf.mxu1  ;;  %v2116_v28 = vadd.f32 %v2115_v6, %v1636_v22  ;;  %v1131_v55 = vsel %vm615_vm3, %v1126_v45, %v1130_v46  ;;  %v1134_v13 = vor.u32 %v1132_v4, %v1130_v46 }
 0x3f8   : > { %6061 = vmatmul.msk.bf16.gmra.mxu3 %vm1154_vm1, %v3985_v19  ;;  %v3989_v20 = vsel %vm3858_vm2, %v3986_v42, %v3988_v10 }
 0x3f9   : > { %v4645_v26 = vadd.f32 %v4475_v12, %v3827_v21  ;;  %5591 = vmatmul.msk.bf16.gmra.mxu0 %vm1154_vm1, %v1123_v23  ;;  %v2307_v21 = vld [vmem:[%s6284_s30 + $0x220] sm:$0x1] }
 0x3fb   : > { %vm4777_vm0 = vcmp.gt.f32.partialorder %v4645_v26, 0.0  ;;  %v4909_v27 = vmul.f32 0.2, %v4645_v26  ;;  %5991 = vmatmul.msk.bf16.gmra.mxu2 %vm1154_vm1, %v3150_v24  ;;  %v4478_v29 = vpop.f32.mrf.mxu3 }
 0x3fd   : > { %v5041_v32 = vsel %vm4777_vm0, %v4645_v26, %v4909_v27  ;;  %v547_v26 = vunpack.c.l.b16 %v279_v17  ;;  %v3166_v27 = vsel %vm615_vm3, %v3161_v15, %v3165_v16 }
 0x3fe   : > { %5174 = vst.msk [vmem:[%s6382_s6 + $0x358] sm:$0xff] %vm5066_vm4, %v5041_v32  ;;  %v3660_v33 = vpop.f32.mrf.mxu2  ;;  %v1638_v35 = vpop.f32.mrf.mxu0 }
 0x3ff   : > { %v3828_v34 = vadd.f32 %v3660_v33, %v2116_v28  ;;  %v2120_v38 = vpop.f32.mrf.mxu1  ;;  %v2118_v50 = vadd.f32 %v2117_v25, %v1638_v35 }
 0x401   : > { %v4646_v41 = vadd.f32 %v4478_v29, %v3828_v34  ;;  %v2575_v29 = vunpack.c.l.b16 %v2307_v21  ;;  %v614_v34 = vpack.c.b16 %v547_v26, %v547_v26 }
 0x402   : > { %5662 = vmatmul.msk.bf16.gmra.mxu1 %vm1154_vm1, %v6130_v62  ;;  %v7366_v62 = vld [vmem:[%s6284_s30 + $0x208] sm:$0xff] }
 0x403   : > { %vm4778_vm5 = vcmp.gt.f32.partialorder %v4646_v41, 0.0  ;;  %v4910_v43 = vmul.f32 0.2, %v4646_v41  ;;  %v4480_v44 = vpop.f32.mrf.mxu3  ;;  %v1136_v5 = vshll.u32 %v7366_v62, 16  ;;  %v2642_v35 = vpack.c.b16 %v2575_v29, %v2575_v29 }
 0x404   : > { %v1140_v40 = vshrl.u32 %v7366_v62, 16 }
 0x405   : > { %v5042_v49 = vsel %vm4778_vm5, %v4646_v41, %v4910_v43  ;;  %v1138_v14 = vrot.slane %v1136_v5, 1  ;;  %v1144_v41 = vshll.u32 %v614_v34, 16  ;;  %v3167_v43 = vshrl.u32 %v7369_v63, 16 }
 0x406   : > { %5175 = vst.msk [vmem:[%s6382_s6 + $0x360] sm:$0xff] %vm5066_vm4, %v5042_v49  ;;  %v3662_v52 = vpop.f32.mrf.mxu2  ;;  %v1641_v54 = vpop.f32.mrf.mxu0  ;;  %v3990_v46 = vrot.slane %v2642_v35, 1 }
 0x407   : > { %v3829_v53 = vadd.f32 %v3662_v52, %v2118_v50  ;;  %v2122_v57 = vpop.f32.mrf.mxu1  ;;  %v2121_v60 = vadd.f32 %v2120_v38, %v1641_v54  ;;  %v1139_v25 = vsel %vm615_vm3, %v1134_v13, %v1138_v14  ;;  %v1142_v49 = vor.u32 %v1140_v40, %v1138_v14 }
 0x408   : > { %6062 = vmatmul.msk.bf16.gmra.mxu3 %vm1154_vm1, %v3987_v51  ;;  %v1146_v50 = vrot.slane %v1144_v41, 1  ;;  %v3169_v51 = vor.u32 %v3167_v43, %v3165_v16 }
 0x409   : > { %v4647_v58 = vadd.f32 %v4480_v44, %v3829_v53  ;;  %5592 = vmatmul.msk.bf16.gmra.mxu0 %vm1154_vm1, %v1131_v55  ;;  %v3171_v44 = vshll.u32 %v2642_v35, 16  ;;  %v3991_v55 = vsel %vm3858_vm2, %v3988_v10, %v3990_v46 }
 0x40b   : > { %vm4779_vm6 = vcmp.gt.f32.partialorder %v4647_v58, 0.0  ;;  %v4911_v59 = vmul.f32 0.2, %v4647_v58  ;;  %5992 = vmatmul.msk.bf16.gmra.mxu2 %vm1154_vm1, %v3158_v56  ;;  %v4483_v61 = vpop.f32.mrf.mxu3  ;;  %v3173_v52 = vrot.slane %v3171_v44, 1 }
 0x40d   : > { %v5043_v0 = vsel %vm4779_vm6, %v4647_v58, %v4911_v59  ;;  %v1147_v59 = vsel %vm615_vm3, %v1142_v49, %v1146_v50 }
 0x40e   : > { %5176 = vst.msk [vmem:[%s6382_s6 + $0x368] sm:$0xff] %vm5066_vm4, %v5043_v0  ;;  %v3665_v1 = vpop.f32.mrf.mxu2  ;;  %v1643_v3 = vpop.f32.mrf.mxu0 }
 0x40f   : > { %v3830_v2 = vadd.f32 %v3665_v1, %v2121_v60  ;;  %v2125_v6 = vpop.f32.mrf.mxu1  ;;  %v2123_v19 = vadd.f32 %v2122_v57, %v1643_v3  ;;  %v3174_v60 = vsel %vm615_vm3, %v3169_v51, %v3173_v52 }
 0x411   : > { %v4648_v9 = vadd.f32 %v4483_v61, %v3830_v2 }
 0x412   : > { %5663 = vmatmul.msk.bf16.gmra.mxu1 %vm1154_vm1, %v6131_v30 }
 0x413   : > { %vm4780_vm7 = vcmp.gt.f32.partialorder %v4648_v9, 0.0  ;;  %v4912_v11 = vmul.f32 0.2, %v4648_v9  ;;  %v4485_v12 = vpop.f32.mrf.mxu3 }
 0x415   : > { %v5044_v18 = vsel %vm4780_vm7, %v4648_v9, %v4912_v11 }
 0x416   : > { %5177 = vst.msk [vmem:[%s6382_s6 + $0x370] sm:$0xff] %vm5066_vm4, %v5044_v18  ;;  %v3667_v22 = vpop.f32.mrf.mxu2  ;;  %v1646_v24 = vpop.f32.mrf.mxu0 }
 0x417   : > { %v3831_v23 = vadd.f32 %v3667_v22, %v2123_v19  ;;  %v2127_v28 = vpop.f32.mrf.mxu1  ;;  %v2126_v32 = vadd.f32 %v2125_v6, %v1646_v24 }
 0x418   : > { %6063 = vmatmul.msk.bf16.gmra.mxu3 %vm1154_vm1, %v3989_v20 }
 0x419   : > { %v4649_v30 = vadd.f32 %v4485_v12, %v3831_v23  ;;  %5593 = vmatmul.msk.bf16.gmra.mxu0 %vm1154_vm1, %v1139_v25 }
 0x41b   : > { %vm4781_vm8 = vcmp.gt.f32.partialorder %v4649_v30, 0.0  ;;  %v4913_v31 = vmul.f32 0.2, %v4649_v30  ;;  %5993 = vmatmul.msk.bf16.gmra.mxu2 %vm1154_vm1, %v3166_v27  ;;  %v4488_v33 = vpop.f32.mrf.mxu3 }
 0x41d   : > { %v5045_v36 = vsel %vm4781_vm8, %v4649_v30, %v4913_v31 }
 0x41e   : > { %5178 = vst.msk [vmem:[%s6382_s6 + $0x378] sm:$0xff] %vm5066_vm4, %v5045_v36  ;;  %v3670_v37 = vpop.f32.mrf.mxu2  ;;  %v1648_v39 = vpop.f32.mrf.mxu0 }
 0x41f   : > { %v3832_v38 = vadd.f32 %v3670_v37, %v2126_v32  ;;  %v2130_v42 = vpop.f32.mrf.mxu1  ;;  %v2128_v54 = vadd.f32 %v2127_v28, %v1648_v39 }
 0x421   : > { %v4650_v45 = vadd.f32 %v4488_v33, %v3832_v38 }
 0x422   : > { %5664 = vmatmul.msk.bf16.gmra.mxu1 %vm1154_vm1, %v7366_v62 }
 0x423   : > { %vm4782_vm9 = vcmp.gt.f32.partialorder %v4650_v45, 0.0  ;;  %v4914_v47 = vmul.f32 0.2, %v4650_v45  ;;  %v4490_v48 = vpop.f32.mrf.mxu3 }
 0x425   : > { %v5046_v53 = vsel %vm4782_vm9, %v4650_v45, %v4914_v47 }
 0x426   : > { %5179 = vst.msk [vmem:[%s6382_s6 + $0x380] sm:$0xff] %vm5066_vm4, %v5046_v53  ;;  %v3672_v56 = vpop.f32.mrf.mxu2  ;;  %v1651_v58 = vpop.f32.mrf.mxu0 }
 0x427   : > { %v3833_v57 = vadd.f32 %v3672_v56, %v2128_v54  ;;  %v2132_v61 = vpop.f32.mrf.mxu1  ;;  %v2131_v0 = vadd.f32 %v2130_v42, %v1651_v58 }
 0x428   : > { %6064 = vmatmul.msk.bf16.gmra.mxu3 %vm1154_vm1, %v3991_v55 }
 0x429   : > { %v4651_v62 = vadd.f32 %v4490_v48, %v3833_v57  ;;  %5594 = vmatmul.msk.bf16.gmra.mxu0 %vm1154_vm1, %v1147_v59 }
 0x42b   : > { %vm4783_vm10 = vcmp.gt.f32.partialorder %v4651_v62, 0.0  ;;  %v4915_v63 = vmul.f32 0.2, %v4651_v62  ;;  %5994 = vmatmul.msk.bf16.gmra.mxu2 %vm1154_vm1, %v3174_v60  ;;  %v4493_v1 = vpop.f32.mrf.mxu3 }
 0x42d   : > { %v5047_v2 = vsel %vm4783_vm10, %v4651_v62, %v4915_v63 }
 0x42e   : > { %5180 = vst.msk [vmem:[%s6382_s6 + $0x388] sm:$0xff] %vm5066_vm4, %v5047_v2  ;;  %v3675_v3 = vpop.f32.mrf.mxu2  ;;  %v1653_v5 = vpop.f32.mrf.mxu0 }
 0x42f   : > { %v3834_v4 = vadd.f32 %v3675_v3, %v2131_v0  ;;  %v2135_v6 = vpop.f32.mrf.mxu1  ;;  %v2133_v11 = vadd.f32 %v2132_v61, %v1653_v5 }
 0x431   : > { %v4652_v7 = vadd.f32 %v4493_v1, %v3834_v4 }
 0x433   : > { %vm4784_vm2 = vcmp.gt.f32.partialorder %v4652_v7, 0.0  ;;  %v4916_v8 = vmul.f32 0.2, %v4652_v7  ;;  %v4495_v9 = vpop.f32.mrf.mxu3 }
 0x435   : > { %v5048_v10 = vsel %vm4784_vm2, %v4652_v7, %v4916_v8 }
 0x436   : > { %5181 = vst.msk [vmem:[%s6382_s6 + $0x390] sm:$0xff] %vm5066_vm4, %v5048_v10  ;;  %v3677_v12 = vpop.f32.mrf.mxu2  ;;  %v1656_v14 = vpop.f32.mrf.mxu0 }
 0x437   : > { %v3835_v13 = vadd.f32 %v3677_v12, %v2133_v11  ;;  %v2137_v15 = vpop.f32.mrf.mxu1  ;;  %v2136_v18 = vadd.f32 %v2135_v6, %v1656_v14 }
 0x439   : > { %v4653_v16 = vadd.f32 %v4495_v9, %v3835_v13 }
 0x43b   : > { %vm4785_vm1 = vcmp.gt.f32.partialorder %v4653_v16, 0.0  ;;  %v4917_v17 = vmul.f32 0.2, %v4653_v16  ;;  %v4498_v19 = vpop.f32.mrf.mxu3 }
 0x43d   : > { %v5049_v20 = vsel %vm4785_vm1, %v4653_v16, %v4917_v17 }
 0x43e   : > { %5182 = vst.msk [vmem:[%s6382_s6 + $0x398] sm:$0xff] %vm5066_vm4, %v5049_v20  ;;  %v3680_v21 = vpop.f32.mrf.mxu2  ;;  %v1658_v23 = vpop.f32.mrf.mxu0 }
 0x43f   : > { %v3836_v22 = vadd.f32 %v3680_v21, %v2136_v18  ;;  %v2140_v24 = vpop.f32.mrf.mxu1  ;;  %v2138_v29 = vadd.f32 %v2137_v15, %v1658_v23 }
 0x441   : > { %v4654_v25 = vadd.f32 %v4498_v19, %v3836_v22 }
 0x443   : > { %vm4786_vm3 = vcmp.gt.f32.partialorder %v4654_v25, 0.0  ;;  %v4918_v26 = vmul.f32 0.2, %v4654_v25  ;;  %v4500_v27 = vpop.f32.mrf.mxu3 }
 0x445   : > { %v5050_v28 = vsel %vm4786_vm3, %v4654_v25, %v4918_v26 }
 0x446   : > { %5183 = vst.msk [vmem:[%s6382_s6 + $0x3a0] sm:$0xff] %vm5066_vm4, %v5050_v28  ;;  %v3682_v30 = vpop.f32.mrf.mxu2  ;;  %v1661_v32 = vpop.f32.mrf.mxu0 }
 0x447   : > { %v3837_v31 = vadd.f32 %v3682_v30, %v2138_v29  ;;  %v2142_v33 = vpop.f32.mrf.mxu1  ;;  %v2141_v36 = vadd.f32 %v2140_v24, %v1661_v32 }
 0x449   : > { %v4655_v34 = vadd.f32 %v4500_v27, %v3837_v31 }
 0x44b   : > { %vm4787_vm11 = vcmp.gt.f32.partialorder %v4655_v34, 0.0  ;;  %v4919_v35 = vmul.f32 0.2, %v4655_v34  ;;  %v4503_v37 = vpop.f32.mrf.mxu3 }
 0x44d   : > { %v5051_v38 = vsel %vm4787_vm11, %v4655_v34, %v4919_v35 }
 0x44e   : > { %5184 = vst.msk [vmem:[%s6382_s6 + $0x3a8] sm:$0xff] %vm5066_vm4, %v5051_v38  ;;  %v3685_v39 = vpop.f32.mrf.mxu2  ;;  %v1663_v41 = vpop.f32.mrf.mxu0 }
 0x44f   : > { %v3838_v40 = vadd.f32 %v3685_v39, %v2141_v36  ;;  %v2145_v42 = vpop.f32.mrf.mxu1  ;;  %v2143_v47 = vadd.f32 %v2142_v33, %v1663_v41 }
 0x451   : > { %v4656_v43 = vadd.f32 %v4503_v37, %v3838_v40 }
 0x453   : > { %vm4788_vm12 = vcmp.gt.f32.partialorder %v4656_v43, 0.0  ;;  %v4920_v44 = vmul.f32 0.2, %v4656_v43  ;;  %v4505_v45 = vpop.f32.mrf.mxu3 }
 0x455   : > { %v5052_v46 = vsel %vm4788_vm12, %v4656_v43, %v4920_v44 }
 0x456   : > { %5185 = vst.msk [vmem:[%s6382_s6 + $0x3b0] sm:$0xff] %vm5066_vm4, %v5052_v46  ;;  %v3687_v48 = vpop.f32.mrf.mxu2  ;;  %v1666_v50 = vpop.f32.mrf.mxu0 }
 0x457   : > { %v3839_v49 = vadd.f32 %v3687_v48, %v2143_v47  ;;  %v2147_v51 = vpop.f32.mrf.mxu1  ;;  %v2146_v54 = vadd.f32 %v2145_v42, %v1666_v50 }
 0x459   : > { %v4657_v52 = vadd.f32 %v4505_v45, %v3839_v49 }
 0x45b   : > { %vm4789_vm13 = vcmp.gt.f32.partialorder %v4657_v52, 0.0  ;;  %v4921_v53 = vmul.f32 0.2, %v4657_v52  ;;  %v4508_v55 = vpop.f32.mrf.mxu3 }
 0x45d   : > { %v5053_v56 = vsel %vm4789_vm13, %v4657_v52, %v4921_v53 }
 0x45e   : > { %5186 = vst.msk [vmem:[%s6382_s6 + $0x3b8] sm:$0xff] %vm5066_vm4, %v5053_v56  ;;  %v3690_v57 = vpop.f32.mrf.mxu2  ;;  %v1668_v59 = vpop.f32.mrf.mxu0 }
 0x45f   : > { %v3840_v58 = vadd.f32 %v3690_v57, %v2146_v54  ;;  %v2150_v60 = vpop.f32.mrf.mxu1  ;;  %v2148_v1 = vadd.f32 %v2147_v51, %v1668_v59 }
 0x461   : > { %v4658_v61 = vadd.f32 %v4508_v55, %v3840_v58 }
 0x463   : > { %vm4790_vm14 = vcmp.gt.f32.partialorder %v4658_v61, 0.0  ;;  %v4922_v62 = vmul.f32 0.2, %v4658_v61  ;;  %v4510_v63 = vpop.f32.mrf.mxu3 }
 0x465   : > { %v5054_v0 = vsel %vm4790_vm14, %v4658_v61, %v4922_v62 }
 0x466   : > { %5187 = vst.msk [vmem:[%s6382_s6 + $0x3c0] sm:$0xff] %vm5066_vm4, %v5054_v0  ;;  %v3692_v2 = vpop.f32.mrf.mxu2  ;;  %v1671_v4 = vpop.f32.mrf.mxu0 }
 0x467   : > { %v3841_v3 = vadd.f32 %v3692_v2, %v2148_v1  ;;  %v2152_v5 = vpop.f32.mrf.mxu1  ;;  %v2151_v8 = vadd.f32 %v2150_v60, %v1671_v4 }
 0x469   : > { %v4659_v6 = vadd.f32 %v4510_v63, %v3841_v3 }
 0x46b   : > { %vm4791_vm15 = vcmp.gt.f32.partialorder %v4659_v6, 0.0  ;;  %v4923_v7 = vmul.f32 0.2, %v4659_v6  ;;  %v4513_v9 = vpop.f32.mrf.mxu3 }
 0x46d   : > { %v5055_v10 = vsel %vm4791_vm15, %v4659_v6, %v4923_v7 }
 0x46e   : > { %5188 = vst.msk [vmem:[%s6382_s6 + $0x3c8] sm:$0xff] %vm5066_vm4, %v5055_v10  ;;  %v3695_v11 = vpop.f32.mrf.mxu2  ;;  %v1673_v13 = vpop.f32.mrf.mxu0 }
 0x46f   : > { %v3842_v12 = vadd.f32 %v3695_v11, %v2151_v8  ;;  %v2155_v14 = vpop.f32.mrf.mxu1  ;;  %v2153_v19 = vadd.f32 %v2152_v5, %v1673_v13 }
 0x471   : > { %v4660_v15 = vadd.f32 %v4513_v9, %v3842_v12 }
 0x473   : > { %vm4792_vm0 = vcmp.gt.f32.partialorder %v4660_v15, 0.0  ;;  %v4924_v16 = vmul.f32 0.2, %v4660_v15  ;;  %v4515_v17 = vpop.f32.mrf.mxu3 }
 0x475   : > { %v5056_v18 = vsel %vm4792_vm0, %v4660_v15, %v4924_v16 }
 0x476   : > { %5189 = vst.msk [vmem:[%s6382_s6 + $0x3d0] sm:$0xff] %vm5066_vm4, %v5056_v18  ;;  %v3697_v20 = vpop.f32.mrf.mxu2  ;;  %v1676_v22 = vpop.f32.mrf.mxu0 }
 0x477   : > { %v3843_v21 = vadd.f32 %v3697_v20, %v2153_v19  ;;  %v2157_v23 = vpop.f32.mrf.mxu1  ;;  %v2156_v26 = vadd.f32 %v2155_v14, %v1676_v22 }
 0x479   : > { %v4661_v24 = vadd.f32 %v4515_v17, %v3843_v21 }
 0x47b   : > { %vm4793_vm5 = vcmp.gt.f32.partialorder %v4661_v24, 0.0  ;;  %v4925_v25 = vmul.f32 0.2, %v4661_v24  ;;  %v4518_v27 = vpop.f32.mrf.mxu3 }
 0x47d   : > { %v5057_v28 = vsel %vm4793_vm5, %v4661_v24, %v4925_v25 }
 0x47e   : > { %5190 = vst.msk [vmem:[%s6382_s6 + $0x3d8] sm:$0xff] %vm5066_vm4, %v5057_v28  ;;  %v3700_v29 = vpop.f32.mrf.mxu2  ;;  %v1678_v31 = vpop.f32.mrf.mxu0 }
 0x47f   : > { %v3844_v30 = vadd.f32 %v3700_v29, %v2156_v26  ;;  %v2160_v33 = vpop.f32.mrf.mxu1  ;;  %v2158_v37 = vadd.f32 %v2157_v23, %v1678_v31 }
 0x481   : > { %v4662_v32 = vadd.f32 %v4518_v27, %v3844_v30 }
 0x483   : > { %vm4794_vm6 = vcmp.gt.f32.partialorder %v4662_v32, 0.0  ;;  %v4926_v34 = vmul.f32 0.2, %v4662_v32  ;;  %v4520_v35 = vpop.f32.mrf.mxu3 }
 0x485   : > { %v5058_v36 = vsel %vm4794_vm6, %v4662_v32, %v4926_v34 }
 0x486   : > { %5191 = vst.msk [vmem:[%s6382_s6 + $0x3e0] sm:$0xff] %vm5066_vm4, %v5058_v36  ;;  %v3702_v38 = vpop.f32.mrf.mxu2  ;;  %v1681_v40 = vpop.f32.mrf.mxu0 }
 0x487   : > { %v3845_v39 = vadd.f32 %v3702_v38, %v2158_v37  ;;  %v2161_v43 = vadd.f32 %v2160_v33, %v1681_v40  ;;  %v2162_v45 = vpop.f32.mrf.mxu1 }
 0x489   : > { %v4663_v41 = vadd.f32 %v4520_v35, %v3845_v39 }
 0x48b   : > { %vm4795_vm7 = vcmp.gt.f32.partialorder %v4663_v41, 0.0  ;;  %v4927_v42 = vmul.f32 0.2, %v4663_v41  ;;  %v4523_v44 = vpop.f32.mrf.mxu3 }
 0x48d   : > { %v5059_v46 = vsel %vm4795_vm7, %v4663_v41, %v4927_v42 }
 0x48e   : > { %5192 = vst.msk [vmem:[%s6382_s6 + $0x3e8] sm:$0xff] %vm5066_vm4, %v5059_v46  ;;  %v3705_v47 = vpop.f32.mrf.mxu2  ;;  %v1683_v49 = vpop.f32.mrf.mxu0 }
 0x48f   : > { %v3846_v48 = vadd.f32 %v3705_v47, %v2161_v43  ;;  %v2163_v54 = vadd.f32 %v2162_v45, %v1683_v49  ;;  %v2165_v55 = vpop.f32.mrf.mxu1 }
 0x491   : > { %v4664_v50 = vadd.f32 %v4523_v44, %v3846_v48 }
 0x493   : > { %vm4796_vm8 = vcmp.gt.f32.partialorder %v4664_v50, 0.0  ;;  %v4928_v51 = vmul.f32 0.2, %v4664_v50  ;;  %v4525_v52 = vpop.f32.mrf.mxu3 }
 0x495   : > { %v5060_v53 = vsel %vm4796_vm8, %v4664_v50, %v4928_v51 }
 0x496   : > { %5193 = vst.msk [vmem:[%s6382_s6 + $0x3f0] sm:$0xff] %vm5066_vm4, %v5060_v53  ;;  %v3707_v56 = vpop.f32.mrf.mxu2  ;;  %v1686_v58 = vpop.f32.mrf.mxu0 }
 0x497   : > { %v3847_v57 = vadd.f32 %v3707_v56, %v2163_v54  ;;  %v2166_v61 = vadd.f32 %v2165_v55, %v1686_v58  ;;  %v2167_v3 = vpop.f32.mrf.mxu1 }
 0x499   : > { %v4665_v59 = vadd.f32 %v4525_v52, %v3847_v57 }
 0x49b   : > { %vm4797_vm9 = vcmp.gt.f32.partialorder %v4665_v59, 0.0  ;;  %v4929_v60 = vmul.f32 0.2, %v4665_v59  ;;  %v4528_v62 = vpop.f32.mrf.mxu3 }
 0x49d   : > { %v5061_v63 = vsel %vm4797_vm9, %v4665_v59, %v4929_v60 }
 0x49e   : > { %5194 = vst.msk [vmem:[%s6382_s6 + $0x3f8] sm:$0xff] %vm5066_vm4, %v5061_v63  ;;  %v3710_v0 = vpop.f32.mrf.mxu2  ;;  %v1688_v2 = vpop.f32.mrf.mxu0 }
 0x49f   : > { %v3848_v1 = vadd.f32 %v3710_v0, %v2166_v61  ;;  %v2168_v8 = vadd.f32 %v2167_v3, %v1688_v2  ;;  %v2170_v13 = vpop.f32.mrf.mxu1 }
 0x4a1   : > { %v4666_v4 = vadd.f32 %v4528_v62, %v3848_v1 }
 0x4a3   : > { %vm4798_vm10 = vcmp.gt.f32.partialorder %v4666_v4, 0.0  ;;  %v4930_v5 = vmul.f32 0.2, %v4666_v4  ;;  %v4530_v6 = vpop.f32.mrf.mxu3 }
 0x4a5   : > { %v5062_v7 = vsel %vm4798_vm10, %v4666_v4, %v4930_v5 }
 0x4a6   : > { %5195 = vst.msk [vmem:[%s6382_s6 + $0x400] sm:$0xff] %vm5066_vm4, %v5062_v7  ;;  %v3712_v9 = vpop.f32.mrf.mxu2  ;;  %v1691_v11 = vpop.f32.mrf.mxu0 }
 0x4a7   : > { %v3849_v10 = vadd.f32 %v3712_v9, %v2168_v8  ;;  %v2171_v15 = vadd.f32 %v2170_v13, %v1691_v11  ;;  %v2172_v23 = vpop.f32.mrf.mxu1 }
 0x4a9   : > { %v4667_v12 = vadd.f32 %v4530_v6, %v3849_v10 }
 0x4ab   : > { %vm4799_vm2 = vcmp.gt.f32.partialorder %v4667_v12, 0.0  ;;  %v4931_v14 = vmul.f32 0.2, %v4667_v12  ;;  %v4533_v17 = vpop.f32.mrf.mxu3 }
 0x4ad   : > { %v5063_v16 = vsel %vm4799_vm2, %v4667_v12, %v4931_v14 }
 0x4ae   : > { %5196 = vst.msk [vmem:[%s6382_s6 + $0x408] sm:$0xff] %vm5066_vm4, %v5063_v16  ;;  %v3715_v18 = vpop.f32.mrf.mxu2  ;;  %v1693_v21 = vpop.f32.mrf.mxu0 }
 0x4af   : > { %v3850_v19 = vadd.f32 %v3715_v18, %v2171_v15  ;;  %v2173_v25 = vadd.f32 %v2172_v23, %v1693_v21 }
 0x4b1   : > { %v4668_v20 = vadd.f32 %v4533_v17, %v3850_v19 }
 0x4b3   : > { %vm4800_vm1 = vcmp.gt.f32.partialorder %v4668_v20, 0.0  ;;  %v4932_v22 = vmul.f32 0.2, %v4668_v20  ;;  %v4535_v28 = vpop.f32.mrf.mxu3 }
 0x4b5   : > { %v5064_v24 = vsel %vm4800_vm1, %v4668_v20, %v4932_v22 }
 0x4b6   : > { %5197 = vst.msk [vmem:[%s6382_s6 + $0x410] sm:$0xff] %vm5066_vm4, %v5064_v24  ;;  %v3717_v26 = vpop.f32.mrf.mxu2 }
 0x4b7   : > { %v3851_v27 = vadd.f32 %v3717_v26, %v2173_v25 }
 0x4b9   : > { %v4669_v29 = vadd.f32 %v4535_v28, %v3851_v27 }
 0x4bb   : > { %vm4801_vm3 = vcmp.gt.f32.partialorder %v4669_v29, 0.0  ;;  %v4933_v30 = vmul.f32 0.2, %v4669_v29 }
 0x4bd   : > { %v5065_v31 = vsel %vm4801_vm3, %v4669_v29, %v4933_v30 }
 0x4be   : > { %5198 = vst.msk [vmem:[%s6382_s6 + $0x418] sm:$0xff] %vm5066_vm4, %v5065_v31 }
 0x4bf PF: > { %s12_s9 = sadd.s32 1, %s6226_s9  }
 0x4c0   : > { %p9_p4 = scmp.ge.s32.totalorder %s12_s9, 4  }
 0x4c2   :  { %11 = sbr.rel (!%p9_p4) target bundleno = 1 (0x1), region = 58 }

// kernel: tile.33
= control target key start
LH: loop header
LB: loop body
LE: loop exit
PB: predicated region body
PF: predicated region fallthrough
CT: control target
= control target key end

     0   :  { %s34_s0 = inlined_call_operand.vmem [shape: f32[16], index: 0, kind: input, shape index: {}]   ;;  %s35_s1 = inlined_call_operand.vmem [shape: f32[17,16], index: 1, kind: output, shape index: {}]  }
   0x1   :  { %v4_v0 = vld [vmem:[%s34_s0] ss:$0 sm:$0xff] }
   0x2   :  { %5 = vst [vmem:[%s35_s1] sm:$0xff] %v4_v0 }
   0x3   :  { %10 = vst [vmem:[%s35_s1 + $0x8] sm:$0xff] %v4_v0 }
   0x4   :  { %11 = vst [vmem:[%s35_s1 + $0x10] sm:$0xff] %v4_v0 }

// kernel: tile.34
= control target key start
LH: loop header
LB: loop body
LE: loop exit
PB: predicated region body
PF: predicated region fallthrough
CT: control target
= control target key end

     0   :  { %s6_s6 = smov 3  ;;  %s20_s9 = smov 3  ;;  %vm3_vm0 = vcmask 130048   ;;  %vm10_vm1 = vcmask 1048448   ;;  %vm17_vm2 = vcmask 917248   ;;  %vm24_vm3 = vcmask 786048   ;;  %s138_s0 = inlined_call_operand.vmem [shape: f32[17,16], index: 0, kind: input, shape index: {}]   ;;  %s139_s1 = inlined_call_operand.vmem [shape: f32[1,1,272], index: 1, kind: output, shape index: {}]  }
   0x1   :  { %v72_v0 = vld [vmem:[%s138_s0 + $0x7] ss:$8 sm:%s6_s6]   ;;  %s88_s10 = smov 112   ;;  %v74_v1 = vld [vmem:[%s138_s0 + $0x5] ss:$8 sm:%s20_s9]   ;;  %s89_s13 = smov 80  }
   0x2   :  { %8 = vrot.lane.b32.xlu0 %v72_v0, %s88_s10  ;;  %22 = vrot.lane.b32.xlu1 %v74_v1, %s89_s13  ;;  %s13_s14 = smov 3  ;;  %s27_s15 = smov 3  ;;  %v2_v7 = vld [vmem:[%s138_s0] ss:$8 sm:$0x7]   ;;  %vm31_vm4 = vcmask 654848  }
   0x3   :  { %s34_s16 = smov 3  ;;  %v73_v3 = vld [vmem:[%s138_s0 + $0x6] ss:$8 sm:%s13_s14]   ;;  %s90_s21 = smov 48   ;;  %v75_v4 = vld [vmem:[%s138_s0 + $0x4] ss:$8 sm:%s27_s15]  }
   0x4   :  { %v76_v2 = vld [vmem:[%s138_s0 + $0x3] ss:$8 sm:%s34_s16]   ;;  %s41_s24 = smov 3  ;;  %s91_s25 = smov 96   ;;  %vm38_vm5 = vcmask 523648   ;;  %vm45_vm6 = vcmask 392448  }
   0x5   :  { %36 = vrot.lane.b32.xlu2 %v76_v2, %s90_s21  ;;  %s92_s26 = smov 64   ;;  %s48_s27 = smov 3  ;;  %v77_v5 = vld [vmem:[%s138_s0 + $0x2] ss:$8 sm:%s41_s24]   ;;  %vm52_vm7 = vcmask 261248  }
   0x6   :  { %v78_v6 = vld [vmem:[%s138_s0 + $0x1] ss:$8 sm:%s48_s27]   ;;  %s93_s3 = smov 32   ;;  %s94_s4 = smov 16  }
   0x7   :  { %4 = vst.msk [vmem:[#allocation0] ss:$8 sm:$0x7] %vm3_vm0, %v2_v7  }
   0xa   :  { %15 = vrot.lane.b32.xlu0 %v73_v3, %s91_s25  ;;  %29 = vrot.lane.b32.xlu1 %v75_v4, %s92_s26 }
   0xd   :  { %43 = vrot.lane.b32.xlu2 %v77_v5, %s93_s3 }
   0xe   :  { %v67_v8 = vld [vmem:[#allocation0 + $0x10] sm:$0x1] }
   0xf   :  { %80 = vst [vmem:[%s139_s1 + $0x2] sm:$0x1] %v67_v8 }
  0x12   :  { %50 = vrot.lane.b32.xlu0 %v78_v6, %s94_s4 }
  0x5f   :  { %v37_v9 = vpop.permute.xlu2 %36  }
  0x67   :  { %v44_v10 = vpop.permute.xlu2 %43  }
  0x74   :  { %v9_v11 = vpop.permute.xlu0 %8   ;;  %v23_v12 = vpop.permute.xlu1 %22  }
  0x75   :  { %11 = vst.msk [vmem:[#allocation0] ss:$8 sm:$0x3] %vm10_vm1, %v9_v11  }
  0x7c   :  { %v16_v13 = vpop.permute.xlu0 %15   ;;  %v30_v14 = vpop.permute.xlu1 %29  }
  0x7d   :  { %18 = vst.msk [vmem:[#allocation0] ss:$8 sm:$0x3] %vm17_vm2, %v16_v13  }
  0x7e   :  { %25 = vst.msk [vmem:[#allocation0] ss:$8 sm:$0x3] %vm24_vm3, %v23_v12  }
  0x7f   :  { %32 = vst.msk [vmem:[#allocation0] ss:$8 sm:$0x3] %vm31_vm4, %v30_v14  }
  0x80   :  { %39 = vst.msk [vmem:[#allocation0] ss:$8 sm:$0x3] %vm38_vm5, %v37_v9  }
  0x81   :  { %46 = vst.msk [vmem:[#allocation0] ss:$8 sm:$0x3] %vm45_vm6, %v44_v10  }
  0x84   :  { %v51_v15 = vpop.permute.xlu0 %50  }
  0x85   :  { %53 = vst.msk [vmem:[#allocation0] ss:$8 sm:$0x3] %vm52_vm7, %v51_v15  }
  0x8c   :  { %v56_v16 = vld [vmem:[#allocation0] sm:$0x1]  ;;  %v61_v17 = vld [vmem:[#allocation0 + $0x8] sm:$0x1] }
  0x8d   :  { %59 = vst [vmem:[%s139_s1] sm:$0x1] %v56_v16 }
  0x8e   :  { %79 = vst [vmem:[%s139_s1 + $0x1] sm:$0x1] %v61_v17 }

// kernel: discriminator_forward.10
= control target key start
LH: loop header
LB: loop body
LE: loop exit
PB: predicated region body
PF: predicated region fallthrough
CT: control target
= control target key end

     0   :  { %s331_s12 = smov 0   ;;  %s359_s0 = inlined_call_operand.vmem [shape: f32[2,16,272], index: 0, kind: input, shape index: {}]   ;;  %s360_s1 = inlined_call_operand.vmem [shape: f32[1,1,272], index: 1, kind: input, shape index: {}]   ;;  %s361_s2 = inlined_call_operand.vmem [shape: f32[1,1,272], index: 2, kind: input, shape index: {}]   ;;  %s362_s3 = inlined_call_operand.vmem [shape: f32[2,16,272], index: 3, kind: output, shape index: {}]  }
   0x1 LB: > { %s285_s13 = sadd.s32 4294967295, %s309_s12   ;;  %p289_p0 = scmp.ge.s32.totalorder %s309_s12, 1  ;;  %s309_s12 = sphi %s331_s12, %s13_s12  }
   0x2   : > { %p137_p1 = scmp.lt.s32.totalorder %s309_s12, 3 }
   0x4   : > { %p138_p2 = pnand %p289_p0, %p137_p1 }
   0x5   : > { %p161_p3 = scmp.lt.s32.totalorder (!%p138_p2), %s285_s13, 1 }
   0x6   : > { %141 = sbr.rel (%p138_p2) target bundleno = 29 (0x1d), region = 32 }
   0xb   : > { %v177_v0 = vld [vmem:[%s360_s1] sm:$0x7]  ;;  %s364_s13 = smov (!%p161_p3, %s285_s13), 1  ;;  %vm225_vm0 = vcmask 130048  }
   0xc   : > { %v191_v1 = vld [vmem:[%s361_s2] sm:$0x7]  ;;  %s294_s18 = smul.u32 48, %s364_s13  ;;  %v179_v2 = vperm.slane %v177_v0, 0  ;;  %v180_v3 = vperm.slane %v177_v0, 1  ;;  %v181_v4 = vperm.slane %v177_v0, 2 }
   0xd   : > { %v193_v5 = vperm.slane %v191_v1, 0  ;;  %v194_v6 = vperm.slane %v191_v1, 1  ;;  %v195_v7 = vperm.slane %v191_v1, 2 }
   0xe   : > { %s165_s21 = scalar_lea.vmem %s359_s0, %s294_s18  ;;  %s170_s24 = scalar_lea.vmem %s362_s3, %s294_s18 }
   0xf   : > { %v171_v8 = vld [vmem:[%s165_s21] sm:$0xff]  ;;  %v172_v9 = vld [vmem:[%s165_s21 + $0x8] sm:$0xff]  ;;  %v173_v10 = vld [vmem:[%s165_s21 + $0x10] sm:$0xff] }
  0x10   : > { %v185_v11 = vmul.f32 %v179_v2, %v171_v8  ;;  %v186_v12 = vmul.f32 %v180_v3, %v172_v9  ;;  %v187_v13 = vmul.f32 %v181_v4, %v173_v10  ;;  %v174_v14 = vld [vmem:[%s165_s21 + $0x18] sm:$0xff]  ;;  %v175_v15 = vld [vmem:[%s165_s21 + $0x20] sm:$0xff]  ;;  %v176_v16 = vld [vmem:[%s165_s21 + $0x28] sm:$0xff] }
  0x11   : > { %v188_v17 = vmul.f32 %v179_v2, %v174_v14  ;;  %v189_v18 = vmul.f32 %v180_v3, %v175_v15  ;;  %v190_v19 = vmul.f32 %v181_v4, %v176_v16 }
  0x12   : > { %v199_v20 = vadd.f32 %v193_v5, %v185_v11  ;;  %v200_v21 = vadd.f32 %v194_v6, %v186_v12  ;;  %v201_v22 = vadd.f32 %v195_v7, %v187_v13 }
  0x13   : > { %v202_v23 = vadd.f32 %v193_v5, %v188_v17  ;;  %v203_v24 = vadd.f32 %v194_v6, %v189_v18  ;;  %v204_v25 = vadd.f32 %v195_v7, %v190_v19 }
  0x14   : > { %vm205_vm1 = vcmp.gt.f32.partialorder %v199_v20, 0.0  ;;  %v211_v26 = vmul.f32 0.2, %v199_v20  ;;  %vm206_vm2 = vcmp.gt.f32.partialorder %v200_v21, 0.0  ;;  %v212_v27 = vmul.f32 0.2, %v200_v21 }
  0x15   : > { %vm207_vm3 = vcmp.gt.f32.partialorder %v201_v22, 0.0  ;;  %v213_v28 = vmul.f32 0.2, %v201_v22  ;;  %vm208_vm4 = vcmp.gt.f32.partialorder %v202_v23, 0.0  ;;  %v214_v29 = vmul.f32 0.2, %v202_v23 }
  0x16   : > { %v217_v30 = vsel %vm205_vm1, %v199_v20, %v211_v26  ;;  %v218_v31 = vsel %vm206_vm2, %v200_v21, %v212_v27  ;;  %vm209_vm5 = vcmp.gt.f32.partialorder %v203_v24, 0.0  ;;  %v215_v32 = vmul.f32 0.2, %v203_v24 }
  0x17   : > { %223 = vst [vmem:[%s170_s24] sm:$0xff] %v217_v30  ;;  %v219_v33 = vsel %vm207_vm3, %v201_v22, %v213_v28  ;;  %v220_v34 = vsel %vm208_vm4, %v202_v23, %v214_v29  ;;  %vm210_vm6 = vcmp.gt.f32.partialorder %v204_v25, 0.0  ;;  %v216_v35 = vmul.f32 0.2, %v204_v25 }
  0x18   : > { %224 = vst [vmem:[%s170_s24 + $0x8] sm:$0xff] %v218_v31  ;;  %v221_v36 = vsel %vm209_vm5, %v203_v24, %v215_v32 }
  0x19   : > { %226 = vst.msk [vmem:[%s170_s24 + $0x10] sm:$0xff] %vm225_vm0, %v219_v33  ;;  %v222_v37 = vsel %vm210_vm6, %v204_v25, %v216_v35 }
  0x1a   : > { %227 = vst [vmem:[%s170_s24 + $0x18] sm:$0xff] %v220_v34 }
  0x1b   : > { %228 = vst [vmem:[%s170_s24 + $0x20] sm:$0xff] %v221_v36 }
  0x1c   : > { %229 = vst.msk [vmem:[%s170_s24 + $0x28] sm:$0xff] %vm225_vm0, %v222_v37 }
  0x1d PF: > { %s13_s12 = sadd.s32 1, %s309_s12  }
  0x1e   : > { %p10_p4 = scmp.ge.s32.totalorder %s13_s12, 4  }
  0x20   :  { %12 = sbr.rel (!%p10_p4) target bundleno = 1 (0x1), region = 62 }

// kernel: discriminator_forward.9
= control target key start
LH: loop header
LB: loop body
LE: loop exit
PB: predicated region body
PF: predicated region fallthrough
CT: control target
= control target key end

     0   :  { %s2410_s18 = smov 0   ;;  %s2978_s0 = inlined_call_operand.vmem [shape: bf16[2,296,32], index: 0, kind: input, shape index: {}]   ;;  %s2979_s1 = inlined_call_operand.vmem [shape: bf16[128,16], index: 1, kind: input, shape index: {}]   ;;  %s2980_s2 = inlined_call_operand.vmem [shape: f32[272,1], index: 2, kind: input, shape index: {}]   ;;  %s2981_s3 = inlined_call_operand.vmem [shape: f32[2,272,16], index: 3, kind: output, shape index: {0}]   ;;  %s2982_s4 = inlined_call_operand.vmem [shape: f32[2,1,16], index: 4, kind: output, shape index: {1}]   ;;  %s2983_s5 = inlined_call_operand.vmem [shape: f32[2,1,16], index: 5, kind: output, shape index: {2}]  }
   0x1 LB: > { %s2067_s19 = sadd.s32 4294967295, %s2377_s18   ;;  %p2071_p0 = scmp.ge.s32.totalorder %s2377_s18, 1  ;;  %s2377_s18 = sphi %s2410_s18, %s16_s18  }
   0x2   : > { %p192_p1 = scmp.lt.s32.totalorder %s2377_s18, 3 }
   0x4   : > { %p193_p2 = pnand %p2071_p0, %p192_p1 }
   0x5   : > { %p226_p3 = scmp.lt.s32.totalorder (!%p193_p2), %s2067_s19, 1 }
   0x6   : > { %196 = sbr.rel (%p193_p2) target bundleno = 445 (0x1bd), region = 32 }
   0xb   : > { %v2326_v0 = vld [vmem:[%s2979_s1 + $0x8] sm:$0xff]  ;;  %v2348_v1 = vld [vmem:[%s2979_s1 + $0x38] sm:$0xff]  ;;  %v2325_v4 = vld [vmem:[%s2979_s1] sm:$0xff]  ;;  %s2985_s19 = smov (!%p226_p3, %s2067_s19), 1  ;;  %v2379_v9 = vmov 0   ;;  %vm527_vm0 = vcmask 261120  }
   0xc   : > { %v2346_v2 = vld [vmem:[%s2979_s1 + $0x28] sm:$0xff]  ;;  %v2328_v3 = vld [vmem:[%s2979_s1 + $0x18] sm:$0xff]  ;;  %725 = vmatpush.bf16.msra.mxu1 %v2326_v0  ;;  %1384 = vmatpush.bf16.msra.mxu3 %v2348_v1  ;;  %v2347_v5 = vld [vmem:[%s2979_s1 + $0x30] sm:$0xff]  ;;  %s2357_s13 = smul.u32 148, %s2985_s19  ;;  %vm1279_vm1 = vcmask 1046528   ;;  %vm1506_vm3 = vcmask 130048   ;;  %s238_s24 = scalar_lea.vmem %s2982_s4, %s2985_s19 }
   0xd   : > { %v1541_v6 = vld [vmem:[%s2980_s2] sm:$0xff]  ;;  %1149 = vmatpush.bf16.msra.mxu2 %v2346_v2  ;;  %585 = vmatpush.bf16.msra.mxu0 %v2328_v3  ;;  %v2327_v8 = vld [vmem:[%s2979_s1 + $0x10] sm:$0xff]  ;;  %v1542_v24 = vld [vmem:[%s2980_s2 + $0x8] sm:$0xff]  ;;  %vm374_vm2 = vsmask.f32 7424  ;;  %s2358_s6 = smul.u32 272, %s2985_s19  ;;  %s241_s27 = scalar_lea.vmem %s2983_s5, %s2985_s19 }
   0xe   : > { %v2345_v7 = vld [vmem:[%s2979_s1 + $0x20] sm:$0xff]  ;;  %2368 = vset.pattern.permute.xlu0 %v2379_v9  ;;  %2369 = vset.pattern.permute.xlu1 %v2379_v9  ;;  %s2451_s16 = scalar_lea.vmem %s2978_s0, %s2357_s13  ;;  %v1543_v36 = vld [vmem:[%s2980_s2 + $0x10] sm:$0xff]  ;;  %v1544_v45 = vld [vmem:[%s2980_s2 + $0x18] sm:$0xff]  ;;  %vm1852_vm4 = vcmask 122880  }
   0xf   : > { %1577 = vperm.xlu0 %2368, %v1541_v6   ;;  %2370 = vset.pattern.permute.xlu2 %v2379_v9  ;;  %v2308_v10 = vld [vmem:[%s2451_s16] sm:$0xff]  ;;  %v2354_v11 = vld [vmem:[%s2451_s16 + $0x8] sm:$0xf0]  ;;  %v2329_v12 = vld [vmem:[%s2451_s16 + $0x10] sm:$0xff]  ;;  %s2603_s11 = scalar_lea.vmem %s2981_s3, %s2358_s6 }
  0x10   : > { %726 = vmatpush.bf16.msra.mxu1 %v2325_v4  ;;  %1385 = vmatpush.bf16.msra.mxu3 %v2347_v5  ;;  %v2355_v13 = vld [vmem:[%s2451_s16 + $0x8] sm:$0xe]  ;;  %v378_v16 = vshll.u32 %v2308_v10, 16  ;;  %v1281_v18 = vrot.slane %v2329_v12, 1  ;;  %v948_v21 = vshll.u32 %v2329_v12, 16  ;;  %v376_v22 = vshrl.u32 %v2308_v10, 16 }
  0x11   : > { %1150 = vmatpush.bf16.msra.mxu2 %v2345_v7  ;;  %586 = vmatpush.bf16.msra.mxu0 %v2327_v8  ;;  %v2353_v14 = vld [vmem:[%s2451_s16 + $0x8] sm:$0xff]   ;;  %v2356_v17 = vor.u32 %v2355_v13, %v2354_v11  ;;  %v2310_v35 = vld [vmem:[%s2451_s16 + $0x10] sm:$0xff]  ;;  %v2330_v37 = vld [vmem:[%s2451_s16 + $0x18] sm:$0xff]  ;;  %v952_v40 = vshrl.u32 %v2329_v12, 16 }
  0x12   : > { %v2309_v15 = vld [vmem:[%s2451_s16 + $0x8] sm:$0xff]  ;;  %v941_v19 = vshrl.u32 %v2353_v14, 16  ;;  %v943_v20 = vshll.u32 %v2353_v14, 16  ;;  %v380_v26 = vrot.slane %v378_v16, 1  ;;  %v950_v28 = vrot.slane %v948_v21, 1  ;;  %1587 = vperm.xlu1 %2369, %v1543_v36   ;;  %v2311_v51 = vld [vmem:[%s2451_s16 + $0x18] sm:$0xff] }
  0x13   : > { %2175 = vmatmul.msk.bf16.vlgmr.msra.gmra.mxu1 %vm527_vm0, %v2308_v10  ;;  %v383_v23 = vshll.u32 %v2309_v15, 16  ;;  %v1280_v25 = vrot.slane %v2356_v17, 1  ;;  %v387_v38 = vshrl.u32 %v2309_v15, 16  ;;  %v391_v39 = vshll.u32 %v2310_v35, 16  ;;  %v2331_v52 = vld [vmem:[%s2451_s16 + $0x20] sm:$0xff]  ;;  %v1547_v2 = vld [vmem:[%s2980_s2 + $0x30] sm:$0xff] }
  0x14   : > { %v945_v27 = vrot.slane %v943_v20, 1  ;;  %v381_v31 = vor.u32 %v380_v26, %v376_v22  ;;  %v956_v41 = vshll.u32 %v2330_v37, 16  ;;  %v1283_v42 = vrot.slane %v2330_v37, 1  ;;  %v2312_v1 = vld [vmem:[%s2451_s16 + $0x20] sm:$0xff]  ;;  %v2332_v3 = vld [vmem:[%s2451_s16 + $0x28] sm:$0xff]  ;;  %v1548_v12 = vld [vmem:[%s2980_s2 + $0x38] sm:$0xff] }
  0x15   : > { %v385_v29 = vrot.slane %v383_v23, 1  ;;  %v1282_v30 = vsel %vm1279_vm1, %v1280_v25, %v1281_v18  ;;  %v393_v44 = vrot.slane %v391_v39, 1  ;;  %v954_v46 = vor.u32 %v952_v40, %v950_v28  ;;  %v1545_v11 = vld [vmem:[%s2980_s2 + $0x20] sm:$0xff]  ;;  %v2333_v20 = vld [vmem:[%s2451_s16 + $0x30] sm:$0xff]  ;;  %v2334_v36 = vld [vmem:[%s2451_s16 + $0x38] sm:$0xff] }
  0x16   : > { %2289 = vmatmul.msk.bf16.vlgmr.msra.gmra.mxu3 %vm527_vm0, %v1282_v30  ;;  %v946_v32 = vor.u32 %v945_v27, %v941_v19  ;;  %v958_v47 = vrot.slane %v956_v41, 1  ;;  %v1284_v48 = vsel %vm1279_vm1, %v1281_v18, %v1283_v42  ;;  %v395_v53 = vshrl.u32 %v2310_v35, 16  ;;  %1597 = vperm.xlu2 %2370, %v1545_v11   ;;  %v2313_v18 = vld [vmem:[%s2451_s16 + $0x28] sm:$0xff] }
  0x17   : > { %1582 = vperm.xlu0 %2368, %v1542_v24   ;;  %v386_v33 = vsel %vm374_vm2, %v381_v31, %v385_v29  ;;  %v389_v43 = vor.u32 %v387_v38, %v385_v29  ;;  %v399_v54 = vshll.u32 %v2311_v51, 16  ;;  %v960_v55 = vshrl.u32 %v2330_v37, 16  ;;  %v1546_v19 = vld [vmem:[%s2980_s2 + $0x28] sm:$0xff] }
  0x18   : > { %v951_v34 = vsel %vm374_vm2, %v946_v32, %v950_v28  ;;  %2150 = vmatmul.msk.bf16.vlgmr.msra.gmra.mxu0 %vm527_vm0, %v386_v33  ;;  %v959_v50 = vsel %vm374_vm2, %v954_v46, %v958_v47  ;;  %v964_v56 = vshll.u32 %v2331_v52, 16  ;;  %v1285_v57 = vrot.slane %v2331_v52, 1  ;;  %v1550_v28 = vld [vmem:[%s2980_s2 + $0x48] sm:$0xff] }
  0x19   : > { %2264 = vmatmul.msk.bf16.vlgmr.msra.gmra.mxu2 %vm527_vm0, %v951_v34  ;;  %v394_v49 = vsel %vm374_vm2, %v389_v43, %v393_v44  ;;  %v397_v58 = vor.u32 %v395_v53, %v393_v44  ;;  %v401_v59 = vrot.slane %v399_v54, 1  ;;  %v962_v60 = vor.u32 %v960_v55, %v958_v47  ;;  %v2314_v34 = vld [vmem:[%s2451_s16 + $0x30] sm:$0xff]  ;;  %v1549_v44 = vld [vmem:[%s2980_s2 + $0x40] sm:$0xff] }
  0x1a   : > { %1592 = vperm.xlu1 %2369, %v1544_v45   ;;  %v966_v61 = vrot.slane %v964_v56, 1  ;;  %v1286_v62 = vsel %vm1279_vm1, %v1283_v42, %v1285_v57  ;;  %v403_v4 = vshrl.u32 %v2311_v51, 16  ;;  %v407_v5 = vshll.u32 %v2312_v1, 16 }
  0x1b   : > { %v402_v63 = vsel %vm374_vm2, %v397_v58, %v401_v59  ;;  %v968_v6 = vshrl.u32 %v2331_v52, 16  ;;  %v972_v7 = vshll.u32 %v2332_v3, 16  ;;  %v1287_v8 = vrot.slane %v2332_v3, 1  ;;  %v2335_v52 = vld [vmem:[%s2451_s16 + $0x40] sm:$0xff] }
  0x1c   : > { %v967_v0 = vsel %vm374_vm2, %v962_v60, %v966_v61  ;;  %v405_v9 = vor.u32 %v403_v4, %v401_v59  ;;  %v409_v10 = vrot.slane %v407_v5, 1  ;;  %v411_v21 = vshrl.u32 %v2312_v1, 16  ;;  %v1554_v60 = vld [vmem:[%s2980_s2 + $0x68] sm:$0xff] }
  0x1d   : > { %v970_v13 = vor.u32 %v968_v6, %v966_v61  ;;  %v974_v14 = vrot.slane %v972_v7, 1  ;;  %v415_v22 = vshll.u32 %v2313_v18, 16  ;;  %v976_v23 = vshrl.u32 %v2332_v3, 16  ;;  %v2336_v3 = vld [vmem:[%s2451_s16 + $0x48] sm:$0xff]  ;;  %v1552_v6 = vld [vmem:[%s2980_s2 + $0x58] sm:$0xff] }
  0x1e   : > { %v410_v16 = vsel %vm374_vm2, %v405_v9, %v409_v10  ;;  %1602 = vperm.xlu2 %2370, %v1546_v19   ;;  %v980_v24 = vshll.u32 %v2333_v20, 16  ;;  %v1289_v25 = vrot.slane %v2333_v20, 1  ;;  %v413_v26 = vor.u32 %v411_v21, %v409_v10  ;;  %v2337_v19 = vld [vmem:[%s2451_s16 + $0x50] sm:$0xff] }
  0x1f   : > { %1607 = vperm.xlu0 %2368, %v1547_v2   ;;  %v975_v17 = vsel %vm374_vm2, %v970_v13, %v974_v14  ;;  %v417_v27 = vrot.slane %v415_v22, 1  ;;  %v978_v29 = vor.u32 %v976_v23, %v974_v14  ;;  %v419_v37 = vshrl.u32 %v2313_v18, 16  ;;  %v2316_v2 = vld [vmem:[%s2451_s16 + $0x40] sm:$0xff] }
  0x20   : > { %v982_v30 = vrot.slane %v980_v24, 1  ;;  %v1290_v31 = vsel %vm1279_vm1, %v1287_v8, %v1289_v25  ;;  %v423_v38 = vshll.u32 %v2314_v34, 16  ;;  %v984_v39 = vshrl.u32 %v2333_v20, 16  ;;  %v1557_v22 = vld [vmem:[%s2980_s2 + $0x80] sm:$0xff] }
  0x21   : > { %v418_v32 = vsel %vm374_vm2, %v413_v26, %v417_v27  ;;  %v988_v40 = vshll.u32 %v2334_v36, 16  ;;  %v1291_v41 = vrot.slane %v2334_v36, 1  ;;  %v421_v42 = vor.u32 %v419_v37, %v417_v27 }
  0x22   : > { %1612 = vperm.xlu1 %2369, %v1548_v12   ;;  %v983_v33 = vsel %vm374_vm2, %v978_v29, %v982_v30  ;;  %v425_v43 = vrot.slane %v423_v38, 1  ;;  %v986_v45 = vor.u32 %v984_v39, %v982_v30  ;;  %v427_v53 = vshrl.u32 %v2314_v34, 16 }
  0x23   : > { %2176 = vmatmul.msk.bf16.gmra.mxu1 %vm527_vm0, %v2309_v15  ;;  %v1288_v15 = vsel %vm1279_vm1, %v1285_v57, %v1287_v8  ;;  %v990_v46 = vrot.slane %v988_v40, 1  ;;  %v1292_v47 = vsel %vm1279_vm1, %v1289_v25, %v1291_v41  ;;  %v992_v55 = vshrl.u32 %v2334_v36, 16  ;;  %v2590_v40 = vld [vmem:[%s2451_s16 + $0x50] sm:$0xff] }
  0x24   : > { %v996_v56 = vshll.u32 %v2335_v52, 16  ;;  %v1293_v57 = vrot.slane %v2335_v52, 1  ;;  %v429_v58 = vor.u32 %v427_v53, %v425_v43  ;;  %v439_v5 = vshll.u32 %v2316_v2, 16 }
  0x25   : > { %v994_v61 = vor.u32 %v992_v55, %v990_v46  ;;  %v1000_v7 = vshrl.u32 %v2335_v52, 16  ;;  %v1004_v8 = vshll.u32 %v2336_v3, 16  ;;  %v1295_v9 = vrot.slane %v2336_v3, 1 }
  0x26   : > { %2290 = vmatmul.msk.bf16.gmra.mxu3 %vm527_vm0, %v1284_v48  ;;  %1617 = vperm.xlu2 %2370, %v1549_v44   ;;  %v426_v48 = vsel %vm374_vm2, %v421_v42, %v425_v43  ;;  %v441_v11 = vrot.slane %v439_v5, 1  ;;  %v443_v20 = vshrl.u32 %v2316_v2, 16  ;;  %v1008_v24 = vshrl.u32 %v2336_v3, 16  ;;  %v1565_v3 = vld [vmem:[%s2980_s2 + $0xc0] sm:$0xff] }
  0x27   : > { %1622 = vperm.xlu0 %2368, %v1550_v28   ;;  %v1006_v13 = vrot.slane %v1004_v8, 1  ;;  %v1296_v14 = vsel %vm1279_vm1, %v1293_v57, %v1295_v9  ;;  %v1012_v25 = vshll.u32 %v2337_v19, 16  ;;  %v1297_v26 = vrot.slane %v2337_v19, 1 }
  0x28   : > { %2151 = vmatmul.msk.bf16.gmra.mxu0 %vm527_vm0, %v394_v49  ;;  %v991_v49 = vsel %vm374_vm2, %v986_v45, %v990_v46  ;;  %v445_v27 = vor.u32 %v443_v20, %v441_v11 }
  0x29   : > { %2265 = vmatmul.msk.bf16.gmra.mxu2 %vm527_vm0, %v959_v50  ;;  %v2315_v50 = vld [vmem:[%s2451_s16 + $0x38] sm:$0xff]  ;;  %v1010_v29 = vor.u32 %v1008_v24, %v1006_v13  ;;  %v1014_v30 = vrot.slane %v1012_v25, 1 }
  0x2a   : > { %v431_v54 = vshll.u32 %v2315_v50, 16  ;;  %v435_v4 = vshrl.u32 %v2315_v50, 16 }
  0x2b   : > { %v1015_v36 = vsel %vm374_vm2, %v1010_v29, %v1014_v30 }
  0x2c   : > { %v433_v59 = vrot.slane %v431_v54, 1 }
  0x2e   : > { %1632 = vperm.xlu2 %2370, %v1552_v6   ;;  %v437_v10 = vor.u32 %v435_v4, %v433_v59 }
  0x33   : > { %2177 = vmatmul.msk.bf16.gmra.mxu1 %vm527_vm0, %v2310_v35  ;;  %v1551_v35 = vld [vmem:[%s2980_s2 + $0x50] sm:$0xff] }
  0x34   : > { %1627 = vperm.xlu1 %2369, %v1551_v35   ;;  %v1559_v35 = vld [vmem:[%s2980_s2 + $0x90] sm:$0xff] }
  0x36   : > { %2291 = vmatmul.msk.bf16.gmra.mxu3 %vm527_vm0, %v1286_v62  ;;  %v998_v62 = vrot.slane %v996_v56, 1 }
  0x38   : > { %2152 = vmatmul.msk.bf16.gmra.mxu0 %vm527_vm0, %v402_v63  ;;  %v1294_v63 = vsel %vm1279_vm1, %v1291_v41, %v1293_v57  ;;  %v1002_v12 = vor.u32 %v1000_v7, %v998_v62  ;;  %v2594_v41 = vld [vmem:[%s2451_s16 + $0x58] sm:$0xff] }
  0x39   : > { %2266 = vmatmul.msk.bf16.gmra.mxu2 %vm527_vm0, %v967_v0  ;;  %v434_v0 = vsel %vm374_vm2, %v429_v58, %v433_v59  ;;  %v1299_v53 = vrot.slane %v2594_v41, 1  ;;  %v1560_v57 = vld [vmem:[%s2980_s2 + $0x98] sm:$0xff] }
  0x3c   : > { %1642 = vperm.xlu1 %2369, %v1554_v60  }
  0x43   : > { %2178 = vmatmul.msk.bf16.gmra.mxu1 %vm527_vm0, %v2311_v51  ;;  %v1553_v51 = vld [vmem:[%s2980_s2 + $0x60] sm:$0xff] }
  0x44   : > { %1637 = vperm.xlu0 %2368, %v1553_v51   ;;  %1657 = vperm.xlu1 %2369, %v1557_v22   ;;  %v1020_v51 = vshll.u32 %v2594_v41, 16 }
  0x46   : > { %2292 = vmatmul.msk.bf16.gmra.mxu3 %vm527_vm0, %v1288_v15  ;;  %v442_v15 = vsel %vm374_vm2, %v437_v10, %v441_v11  ;;  %v1022_v59 = vrot.slane %v1020_v51, 1 }
  0x48   : > { %2153 = vmatmul.msk.bf16.gmra.mxu0 %vm527_vm0, %v410_v16  ;;  %v1556_v16 = vld [vmem:[%s2980_s2 + $0x78] sm:$0xff] }
  0x49   : > { %2267 = vmatmul.msk.bf16.gmra.mxu2 %vm527_vm0, %v975_v17  ;;  %v1007_v17 = vsel %vm374_vm2, %v1002_v12, %v1006_v13  ;;  %v2627_v12 = vld [vmem:[%s2451_s16 + $0x58] sm:$0xff]  ;;  %v1563_v13 = vld [vmem:[%s2980_s2 + $0xb0] sm:$0xff] }
  0x4c   : > { %1652 = vperm.xlu0 %2368, %v1556_v16   ;;  %1672 = vperm.xlu1 %2369, %v1560_v57  }
  0x53   : > { %2179 = vmatmul.msk.bf16.gmra.mxu1 %vm527_vm0, %v2312_v1  ;;  %v999_v1 = vsel %vm374_vm2, %v994_v61, %v998_v62  ;;  %v1300_v61 = vsel %vm1279_vm1, %v1297_v26, %v1299_v53 }
  0x54   : > { %1667 = vperm.xlu0 %2368, %v1559_v35   ;;  %1687 = vperm.xlu1 %2369, %v1563_v13  }
  0x56   : > { %2293 = vmatmul.msk.bf16.gmra.mxu3 %vm527_vm0, %v1290_v31  ;;  %v1298_v31 = vsel %vm1279_vm1, %v1295_v9, %v1297_v26  ;;  %v463_v26 = vshll.u32 %v2627_v12, 16 }
  0x58   : > { %2154 = vmatmul.msk.bf16.gmra.mxu0 %vm527_vm0, %v418_v32 }
  0x59   : > { %2268 = vmatmul.msk.bf16.gmra.mxu2 %vm527_vm0, %v983_v33 }
  0x63   : > { %2180 = vmatmul.msk.bf16.gmra.mxu1 %vm527_vm0, %v2313_v18  ;;  %v2317_v18 = vld [vmem:[%s2451_s16 + $0x48] sm:$0xff] }
  0x64   : > { %v447_v21 = vshll.u32 %v2317_v18, 16  ;;  %v451_v46 = vshrl.u32 %v2317_v18, 16 }
  0x66   : > { %2294 = vmatmul.msk.bf16.gmra.mxu3 %vm527_vm0, %v1292_v47  ;;  %v449_v28 = vrot.slane %v447_v21, 1  ;;  %v455_v47 = vshll.u32 %v2590_v40, 16  ;;  %v459_v21 = vshrl.u32 %v2590_v40, 16 }
  0x68   : > { %2155 = vmatmul.msk.bf16.gmra.mxu0 %vm527_vm0, %v426_v48  ;;  %v450_v33 = vsel %vm374_vm2, %v445_v27, %v449_v28  ;;  %v1562_v48 = vld [vmem:[%s2980_s2 + $0xa8] sm:$0xff]  ;;  %v453_v55 = vor.u32 %v451_v46, %v449_v28  ;;  %v457_v56 = vrot.slane %v455_v47, 1  ;;  %v1568_v28 = vld [vmem:[%s2980_s2 + $0xd8] sm:$0xff] }
  0x69   : > { %2269 = vmatmul.msk.bf16.gmra.mxu2 %vm527_vm0, %v991_v49  ;;  %1682 = vperm.xlu0 %2368, %v1562_v48   ;;  %v1558_v27 = vld [vmem:[%s2980_s2 + $0x88] sm:$0xff] }
  0x71   : > { %1697 = vperm.xlu0 %2368, %v1565_v3  }
  0x73   : > { %2181 = vmatmul.msk.bf16.gmra.mxu1 %vm527_vm0, %v2314_v34  ;;  %v1555_v34 = vld [vmem:[%s2980_s2 + $0x70] sm:$0xff] }
  0x74   : > { %1647 = vperm.xlu2 %2370, %v1555_v34  }
  0x76   : > { %2295 = vmatmul.msk.bf16.gmra.mxu3 %vm527_vm0, %v1294_v63 }
  0x78   : > { %2156 = vmatmul.msk.bf16.gmra.mxu0 %vm527_vm0, %v434_v0 }
  0x79   : > { %2270 = vmatmul.msk.bf16.gmra.mxu2 %vm527_vm0, %v999_v1  ;;  %1712 = vperm.xlu0 %2368, %v1568_v28  }
  0x7c   : > { %1662 = vperm.xlu2 %2370, %v1558_v27  }
  0x81   : > { %v1578_v43 = vpop.permute.xlu0 %1577 }
  0x83   : > { %2182 = vmatmul.msk.bf16.gmra.mxu1 %vm527_vm0, %v2315_v50  ;;  %v1016_v50 = vshrl.u32 %v2337_v19, 16 }
  0x84   : > { %v1588_v20 = vpop.permute.xlu1 %1587 }
  0x85   : > { %v1018_v58 = vor.u32 %v1016_v50, %v1014_v30 }
  0x86   : > { %2296 = vmatmul.msk.bf16.gmra.mxu3 %vm527_vm0, %v1296_v14  ;;  %v2633_v14 = vld [vmem:[%s2451_s16 + $0x60] sm:$0xff] }
  0x87   : > { %v1023_v5 = vsel %vm374_vm2, %v1018_v58, %v1022_v59  ;;  %v1301_v34 = vrot.slane %v2633_v14, 1 }
  0x88   : > { %2157 = vmatmul.msk.bf16.gmra.mxu0 %vm527_vm0, %v442_v15 }
  0x89   : > { %2271 = vmatmul.msk.bf16.gmra.mxu2 %vm527_vm0, %v1007_v17  ;;  %v1583_v4 = vpop.permute.xlu0 %1582  ;;  %v1302_v47 = vsel %vm1279_vm1, %v1299_v53, %v1301_v34 }
  0x90   : > { %v728_v23 = vpop.f32.mrf.mxu1 }
  0x93   : > { %2183 = vmatmul.msk.bf16.gmra.mxu1 %vm527_vm0, %v2316_v2  ;;  %v458_v2 = vsel %vm374_vm2, %v453_v55, %v457_v56 }
  0x95   : > { %v588_v32 = vpop.f32.mrf.mxu0 }
  0x96   : > { %2297 = vmatmul.msk.bf16.gmra.mxu3 %vm527_vm0, %v1298_v31  ;;  %v729_v38 = vadd.f32 %v728_v23, %v588_v32  ;;  %v1024_v31 = vshrl.u32 %v2594_v41, 16  ;;  %v1028_v32 = vshll.u32 %v2633_v14, 16  ;;  %v1593_v41 = vpop.permute.xlu1 %1592 }
  0x98   : > { %v730_v37 = vpop.f32.mrf.mxu1  ;;  %2158 = vmatmul.msk.bf16.gmra.mxu0 %vm527_vm0, %v450_v33 }
  0x99   : > { %2272 = vmatmul.msk.bf16.gmra.mxu2 %vm527_vm0, %v1015_v36  ;;  %v1387_v39 = vpop.f32.mrf.mxu3 }
  0x9c   : > { %v1152_v42 = vpop.f32.mrf.mxu2 }
  0x9d   : > { %v1237_v44 = vadd.f32 %v1152_v42, %v729_v38  ;;  %v590_v45 = vpop.f32.mrf.mxu0  ;;  %v465_v38 = vrot.slane %v463_v26, 1  ;;  %v1026_v42 = vor.u32 %v1024_v31, %v1022_v59 }
  0x9e   : > { %v731_v60 = vadd.f32 %v730_v37, %v590_v45  ;;  %v461_v37 = vor.u32 %v459_v21, %v457_v56 }
  0x9f   : > { %v1472_v52 = vadd.f32 %v1387_v39, %v1237_v44  ;;  %v1566_v39 = vld [vmem:[%s2980_s2 + $0xc8] sm:$0xff] }
  0xa0   : > { %v733_v49 = vpop.f32.mrf.mxu1  ;;  %1702 = vperm.xlu1 %2369, %v1566_v39  }
  0xa1   : > { %1507 = vst.msk [vmem:[%s2603_s11] sm:$0xff] %vm1506_vm3, %v1472_v52  ;;  %v1389_v54 = vpop.f32.mrf.mxu3  ;;  %v1745_v63 = vmul.f32 %v1578_v43, %v1472_v52  ;;  %v1030_v43 = vrot.slane %v1028_v32, 1 }
  0xa3   : > { %2184 = vmatmul.msk.bf16.gmra.mxu1 %vm527_vm0, %v2317_v18  ;;  %v1854_v8 = vmul.f32 %v1745_v63, %v1472_v52  ;;  %v1779_v15 = vsel %vm1506_vm3, %v1745_v63, 0.0  ;;  %v466_v52 = vsel %vm374_vm2, %v461_v37, %v465_v38  ;;  %v1031_v53 = vsel %vm374_vm2, %v1026_v42, %v1030_v43  ;;  %v2681_v63 = vld [vmem:[%s2451_s16 + $0x68] sm:$0xff] }
  0xa4   : > { %v1154_v62 = vpop.f32.mrf.mxu2 }
  0xa5   : > { %v1238_v0 = vadd.f32 %v1154_v62, %v731_v60  ;;  %v593_v1 = vpop.f32.mrf.mxu0  ;;  %v1888_v22 = vsel %vm1506_vm3, %v1854_v8, 0.0  ;;  %v1569_v62 = vld [vmem:[%s2980_s2 + $0xe0] sm:$0xff] }
  0xa6   : > { %2298 = vmatmul.msk.bf16.gmra.mxu3 %vm527_vm0, %v1300_v61  ;;  %v734_v10 = vadd.f32 %v733_v49, %v593_v1  ;;  %v2675_v61 = vld [vmem:[%s2451_s16 + $0x60] sm:$0xff] }
  0xa7   : > { %v1473_v7 = vadd.f32 %v1389_v54, %v1238_v0  ;;  %v1571_v54 = vld [vmem:[%s2980_s2 + $0xf0] sm:$0xff] }
  0xa8   : > { %v735_v6 = vpop.f32.mrf.mxu1  ;;  %2159 = vmatmul.msk.bf16.gmra.mxu0 %vm527_vm0, %v458_v2  ;;  %1727 = vperm.xlu0 %2368, %v1571_v54   ;;  %v1561_v2 = vld [vmem:[%s2980_s2 + $0xa0] sm:$0xff] }
  0xa9   : > { %1508 = vst.msk [vmem:[%s2603_s11 + $0x8] sm:$0xff] %vm1506_vm3, %v1473_v7  ;;  %v1746_v9 = vmul.f32 %v1583_v4, %v1473_v7  ;;  %2273 = vmatmul.msk.bf16.gmra.mxu2 %vm527_vm0, %v1023_v5  ;;  %v1392_v11 = vpop.f32.mrf.mxu3  ;;  %1717 = vperm.xlu1 %2369, %v1569_v62   ;;  %v1598_v5 = vpop.permute.xlu2 %1597 }
  0xaa   : > { %1677 = vperm.xlu2 %2370, %v1561_v2  }
  0xab   : > { %v1780_v16 = vsel %vm1506_vm3, %v1746_v9, 0.0  ;;  %v1855_v17 = vmul.f32 %v1746_v9, %v1473_v7  ;;  %v467_v9 = vshrl.u32 %v2627_v12, 16 }
  0xac   : > { %v1781_v18 = vadd.f32 %v1780_v16, %v1779_v15  ;;  %v1157_v19 = vpop.f32.mrf.mxu2  ;;  %v1032_v16 = vshrl.u32 %v2633_v14, 16 }
  0xad   : > { %v1889_v23 = vsel %vm1506_vm3, %v1855_v17, 0.0  ;;  %v1239_v24 = vadd.f32 %v1157_v19, %v734_v10  ;;  %v595_v25 = vpop.f32.mrf.mxu0  ;;  %v471_v10 = vshll.u32 %v2675_v61, 16  ;;  %v1036_v17 = vshll.u32 %v2681_v63, 16 }
  0xae   : > { %v1890_v29 = vadd.f32 %v1889_v23, %v1888_v22  ;;  %v736_v46 = vadd.f32 %v735_v6, %v595_v25  ;;  %v1303_v19 = vrot.slane %v2681_v63, 1  ;;  %v469_v22 = vor.u32 %v467_v9, %v465_v38 }
  0xaf   : > { %v1474_v33 = vadd.f32 %v1392_v11, %v1239_v24  ;;  %v1574_v11 = vld [vmem:[%s2980_s2 + $0x108] sm:$0xff]  ;;  %v473_v23 = vrot.slane %v471_v10, 1  ;;  %v1572_v24 = vld [vmem:[%s2980_s2 + $0xf8] sm:$0xff]  ;;  %v1034_v25 = vor.u32 %v1032_v16, %v1030_v43  ;;  %v1038_v26 = vrot.slane %v1036_v17, 1 }
  0xb0   : > { %v738_v30 = vpop.f32.mrf.mxu1  ;;  %1742 = vperm.xlu0 %2368, %v1574_v11   ;;  %v1570_v11 = vld [vmem:[%s2980_s2 + $0xe8] sm:$0xff] }
  0xb1   : > { %1509 = vst.msk [vmem:[%s2603_s11 + $0x10] sm:$0xff] %vm1506_vm3, %v1474_v33  ;;  %v1747_v35 = vmul.f32 %v1588_v20, %v1474_v33  ;;  %v1394_v36 = vpop.f32.mrf.mxu3  ;;  %1732 = vperm.xlu1 %2369, %v1572_v24   ;;  %v474_v37 = vsel %vm374_vm2, %v469_v22, %v473_v23  ;;  %v1603_v14 = vpop.permute.xlu2 %1602 }
  0xb3   : > { %2185 = vmatmul.msk.bf16.gmra.mxu1 %vm527_vm0, %v2590_v40  ;;  %v1782_v44 = vsel %vm1506_vm3, %v1747_v35, 0.0  ;;  %v1856_v45 = vmul.f32 %v1747_v35, %v1474_v33 }
  0xb4   : > { %v1783_v40 = vadd.f32 %v1782_v44, %v1781_v18  ;;  %v1159_v48 = vpop.f32.mrf.mxu2 }
  0xb5   : > { %v1891_v49 = vsel %vm1506_vm3, %v1856_v45, 0.0  ;;  %v1240_v50 = vadd.f32 %v1159_v48, %v736_v46  ;;  %v598_v51 = vpop.f32.mrf.mxu0  ;;  %v2721_v46 = vld [vmem:[%s2451_s16 + $0x68] sm:$0xff] }
  0xb6   : > { %v1892_v55 = vadd.f32 %v1891_v49, %v1890_v29  ;;  %2299 = vmatmul.msk.bf16.gmra.mxu3 %vm527_vm0, %v1302_v47  ;;  %v739_v59 = vadd.f32 %v738_v30, %v598_v51  ;;  %v1304_v30 = vsel %vm1279_vm1, %v1301_v34, %v1303_v19  ;;  %v1039_v34 = vsel %vm374_vm2, %v1034_v25, %v1038_v26  ;;  %v2724_v47 = vld [vmem:[%s2451_s16 + $0x70] sm:$0xff] }
  0xb7   : > { %v1475_v57 = vadd.f32 %v1394_v36, %v1240_v50  ;;  %v1567_v49 = vld [vmem:[%s2980_s2 + $0xd0] sm:$0xff] }
  0xb8   : > { %v740_v56 = vpop.f32.mrf.mxu1  ;;  %2160 = vmatmul.msk.bf16.gmra.mxu0 %vm527_vm0, %v466_v52 }
  0xb9   : > { %1510 = vst.msk [vmem:[%s2603_s11 + $0x18] sm:$0xff] %vm1506_vm3, %v1475_v57  ;;  %v1748_v58 = vmul.f32 %v1593_v41, %v1475_v57  ;;  %2274 = vmatmul.msk.bf16.gmra.mxu2 %vm527_vm0, %v1031_v53  ;;  %v1397_v60 = vpop.f32.mrf.mxu3  ;;  %v475_v41 = vshrl.u32 %v2675_v61, 16  ;;  %v479_v53 = vshll.u32 %v2721_v46, 16 }
  0xbb   : > { %v1784_v0 = vsel %vm1506_vm3, %v1748_v58, 0.0  ;;  %v1857_v1 = vmul.f32 %v1748_v58, %v1475_v57  ;;  %v1608_v57 = vpop.permute.xlu0 %1607 }
  0xbc   : > { %v1785_v3 = vadd.f32 %v1784_v0, %v1783_v40  ;;  %v1162_v4 = vpop.f32.mrf.mxu2  ;;  %v1305_v0 = vrot.slane %v2724_v47, 1 }
  0xbd   : > { %v1893_v6 = vsel %vm1506_vm3, %v1857_v1, 0.0  ;;  %v1241_v7 = vadd.f32 %v1162_v4, %v739_v59  ;;  %v600_v8 = vpop.f32.mrf.mxu0  ;;  %v1040_v59 = vshrl.u32 %v2681_v63, 16  ;;  %v481_v4 = vrot.slane %v479_v53, 1  ;;  %v1613_v63 = vpop.permute.xlu1 %1612 }
  0xbe   : > { %v1894_v13 = vadd.f32 %v1893_v6, %v1892_v55  ;;  %v741_v29 = vadd.f32 %v740_v56, %v600_v8  ;;  %v1306_v10 = vsel %vm1279_vm1, %v1303_v19, %v1305_v0 }
  0xbf   : > { %v1476_v18 = vadd.f32 %v1397_v60, %v1241_v7  ;;  %v1044_v60 = vshll.u32 %v2724_v47, 16 }
  0xc0   : > { %v743_v15 = vpop.f32.mrf.mxu1 }
  0xc1   : > { %1511 = vst.msk [vmem:[%s2603_s11 + $0x20] sm:$0xff] %vm1506_vm3, %v1476_v18  ;;  %v1749_v20 = vmul.f32 %v1598_v5, %v1476_v18  ;;  %v1399_v21 = vpop.f32.mrf.mxu3  ;;  %v1042_v5 = vor.u32 %v1040_v59, %v1038_v26  ;;  %v1046_v6 = vrot.slane %v1044_v60, 1  ;;  %v2758_v26 = vld [vmem:[%s2451_s16 + $0x70] sm:$0xff] }
  0xc3   : > { %2186 = vmatmul.msk.bf16.gmra.mxu1 %vm527_vm0, %v2627_v12  ;;  %v1786_v27 = vsel %vm1506_vm3, %v1749_v20, 0.0  ;;  %v1858_v28 = vmul.f32 %v1749_v20, %v1476_v18  ;;  %v1564_v12 = vld [vmem:[%s2980_s2 + $0xb8] sm:$0xff]  ;;  %v1047_v19 = vsel %vm374_vm2, %v1042_v5, %v1046_v6 }
  0xc4   : > { %v1787_v31 = vadd.f32 %v1786_v27, %v1785_v3  ;;  %v1164_v32 = vpop.f32.mrf.mxu2  ;;  %1692 = vperm.xlu2 %2370, %v1564_v12   ;;  %v477_v3 = vor.u32 %v475_v41, %v473_v23  ;;  %v2761_v27 = vld [vmem:[%s2451_s16 + $0x78] sm:$0xff] }
  0xc5   : > { %v1895_v33 = vsel %vm1506_vm3, %v1858_v28, 0.0  ;;  %v1242_v35 = vadd.f32 %v1164_v32, %v741_v29  ;;  %v603_v36 = vpop.f32.mrf.mxu0  ;;  %v2790_v5 = vld [vmem:[%s2451_s16 + $0x78] sm:$0xff] }
  0xc6   : > { %v1896_v38 = vadd.f32 %v1895_v33, %v1894_v13  ;;  %2300 = vmatmul.msk.bf16.gmra.mxu3 %vm527_vm0, %v1304_v30  ;;  %v744_v44 = vadd.f32 %v743_v15, %v603_v36  ;;  %v482_v18 = vsel %vm374_vm2, %v477_v3, %v481_v4  ;;  %v1573_v30 = vld [vmem:[%s2980_s2 + $0x100] sm:$0xff]  ;;  %v483_v36 = vshrl.u32 %v2721_v46, 16 }
  0xc7   : > { %v1477_v42 = vadd.f32 %v1399_v21, %v1242_v35 }
  0xc8   : > { %v745_v39 = vpop.f32.mrf.mxu1  ;;  %2161 = vmatmul.msk.bf16.gmra.mxu0 %vm527_vm0, %v474_v37  ;;  %v487_v37 = vshll.u32 %v2758_v26, 16 }
  0xc9   : > { %1512 = vst.msk [vmem:[%s2603_s11 + $0x28] sm:$0xff] %vm1506_vm3, %v1477_v42  ;;  %v1750_v43 = vmul.f32 %v1603_v14, %v1477_v42  ;;  %2275 = vmatmul.msk.bf16.gmra.mxu2 %vm527_vm0, %v1039_v34  ;;  %v1402_v45 = vpop.f32.mrf.mxu3  ;;  %v1618_v14 = vpop.permute.xlu2 %1617 }
  0xcb   : > { %v1788_v40 = vsel %vm1506_vm3, %v1750_v43, 0.0  ;;  %v1859_v48 = vmul.f32 %v1750_v43, %v1477_v42  ;;  %v1052_v42 = vshll.u32 %v2761_v27, 16 }
  0xcc   : > { %v1789_v50 = vadd.f32 %v1788_v40, %v1787_v31  ;;  %v1167_v51 = vpop.f32.mrf.mxu2  ;;  %1707 = vperm.xlu2 %2370, %v1567_v49   ;;  %v489_v49 = vrot.slane %v487_v37, 1 }
  0xcd   : > { %v1897_v52 = vsel %vm1506_vm3, %v1859_v48, 0.0  ;;  %v1243_v54 = vadd.f32 %v1167_v51, %v744_v44  ;;  %v605_v55 = vpop.f32.mrf.mxu0  ;;  %v1307_v44 = vrot.slane %v2761_v27, 1  ;;  %v485_v48 = vor.u32 %v483_v36, %v481_v4 }
  0xce   : > { %v1898_v56 = vadd.f32 %v1897_v52, %v1896_v38  ;;  %v746_v9 = vadd.f32 %v745_v39, %v605_v55  ;;  %v1048_v39 = vshrl.u32 %v2724_v47, 16  ;;  %v1054_v51 = vrot.slane %v1052_v42, 1 }
  0xcf   : > { %v1478_v62 = vadd.f32 %v1402_v45, %v1243_v54  ;;  %v1308_v41 = vsel %vm1279_vm1, %v1305_v0, %v1307_v44  ;;  %v490_v59 = vsel %vm374_vm2, %v485_v48, %v489_v49  ;;  %v2817_v48 = vld [vmem:[%s2451_s16 + $0x80] sm:$0xff] }
  0xd0   : > { %v748_v58 = vpop.f32.mrf.mxu1 }
  0xd1   : > { %1513 = vst.msk [vmem:[%s2603_s11 + $0x30] sm:$0xff] %vm1506_vm3, %v1478_v62  ;;  %v1751_v1 = vmul.f32 %v1608_v57, %v1478_v62  ;;  %v1404_v2 = vpop.f32.mrf.mxu3 }
  0xd3   : > { %2187 = vmatmul.msk.bf16.gmra.mxu1 %vm527_vm0, %v2675_v61  ;;  %v1790_v7 = vsel %vm1506_vm3, %v1751_v1, 0.0  ;;  %v1860_v8 = vmul.f32 %v1751_v1, %v1478_v62  ;;  %v1623_v62 = vpop.permute.xlu0 %1622 }
  0xd4   : > { %v1791_v61 = vadd.f32 %v1790_v7, %v1789_v50  ;;  %v1169_v13 = vpop.f32.mrf.mxu2  ;;  %1722 = vperm.xlu2 %2370, %v1570_v11   ;;  %v1050_v50 = vor.u32 %v1048_v39, %v1046_v6  ;;  %v2793_v6 = vld [vmem:[%s2451_s16 + $0x80] sm:$0xff] }
  0xd5   : > { %v1899_v15 = vsel %vm1506_vm3, %v1860_v8, 0.0  ;;  %v1244_v16 = vadd.f32 %v1169_v13, %v746_v9  ;;  %v608_v17 = vpop.f32.mrf.mxu0 }
  0xd6   : > { %v1900_v20 = vadd.f32 %v1899_v15, %v1898_v56  ;;  %2301 = vmatmul.msk.bf16.gmra.mxu3 %vm527_vm0, %v1306_v10  ;;  %v749_v24 = vadd.f32 %v748_v58, %v608_v17  ;;  %v1055_v1 = vsel %vm374_vm2, %v1050_v50, %v1054_v51  ;;  %v491_v15 = vshrl.u32 %v2758_v26, 16 }
  0xd7   : > { %v1479_v22 = vadd.f32 %v1404_v2, %v1244_v16  ;;  %v495_v16 = vshll.u32 %v2790_v5, 16 }
  0xd8   : > { %v750_v21 = vpop.f32.mrf.mxu1  ;;  %2162 = vmatmul.msk.bf16.gmra.mxu0 %vm527_vm0, %v482_v18  ;;  %v1628_v18 = vpop.permute.xlu1 %1627 }
  0xd9   : > { %1514 = vst.msk [vmem:[%s2603_s11 + $0x38] sm:$0xff] %vm1506_vm3, %v1479_v22  ;;  %v1752_v23 = vmul.f32 %v1613_v63, %v1479_v22  ;;  %2276 = vmatmul.msk.bf16.gmra.mxu2 %vm527_vm0, %v1047_v19  ;;  %v1407_v25 = vpop.f32.mrf.mxu3  ;;  %v1056_v63 = vshrl.u32 %v2761_v27, 16  ;;  %v1060_v19 = vshll.u32 %v2793_v6, 16 }
  0xdb   : > { %v1792_v28 = vsel %vm1506_vm3, %v1752_v23, 0.0  ;;  %v1861_v29 = vmul.f32 %v1752_v23, %v1479_v22  ;;  %v1309_v22 = vrot.slane %v2793_v6, 1 }
  0xdc   : > { %v1793_v12 = vadd.f32 %v1792_v28, %v1791_v61  ;;  %v1172_v31 = vpop.f32.mrf.mxu2  ;;  %1737 = vperm.xlu2 %2370, %v1573_v30   ;;  %v497_v28 = vrot.slane %v495_v16, 1  ;;  %v1062_v30 = vrot.slane %v1060_v19, 1 }
  0xdd   : > { %v1901_v32 = vsel %vm1506_vm3, %v1861_v29, 0.0  ;;  %v1245_v33 = vadd.f32 %v1172_v31, %v749_v24  ;;  %v610_v35 = vpop.f32.mrf.mxu0  ;;  %v1058_v29 = vor.u32 %v1056_v63, %v1054_v51 }
  0xde   : > { %v1902_v38 = vadd.f32 %v1901_v32, %v1900_v20  ;;  %v751_v55 = vadd.f32 %v750_v21, %v610_v35  ;;  %v1310_v32 = vsel %vm1279_vm1, %v1307_v44, %v1309_v22 }
  0xdf   : > { %v1480_v43 = vadd.f32 %v1407_v25, %v1245_v33  ;;  %v493_v25 = vor.u32 %v491_v15, %v489_v49  ;;  %v1063_v39 = vsel %vm374_vm2, %v1058_v29, %v1062_v30  ;;  %v2820_v49 = vld [vmem:[%s2451_s16 + $0x88] sm:$0xff] }
  0xe0   : > { %v753_v34 = vpop.f32.mrf.mxu1 }
  0xe1   : > { %1515 = vst.msk [vmem:[%s2603_s11 + $0x40] sm:$0xff] %vm1506_vm3, %v1480_v43  ;;  %v1753_v45 = vmul.f32 %v1618_v14, %v1480_v43  ;;  %v1409_v40 = vpop.f32.mrf.mxu3 }
  0xe3   : > { %2188 = vmatmul.msk.bf16.gmra.mxu1 %vm527_vm0, %v2721_v46  ;;  %v1794_v52 = vsel %vm1506_vm3, %v1753_v45, 0.0  ;;  %v1862_v54 = vmul.f32 %v1753_v45, %v1480_v43 }
  0xe4   : > { %v1795_v53 = vadd.f32 %v1794_v52, %v1793_v12  ;;  %v1174_v56 = vpop.f32.mrf.mxu2 }
  0xe5   : > { %v1903_v57 = vsel %vm1506_vm3, %v1862_v54, 0.0  ;;  %v1246_v58 = vadd.f32 %v1174_v56, %v751_v55  ;;  %v613_v46 = vpop.f32.mrf.mxu0  ;;  %v499_v56 = vshrl.u32 %v2790_v5, 16 }
  0xe6   : > { %v1904_v60 = vadd.f32 %v1903_v57, %v1902_v38  ;;  %2302 = vmatmul.msk.bf16.gmra.mxu3 %vm527_vm0, %v1308_v41  ;;  %v754_v3 = vadd.f32 %v753_v34, %v613_v46  ;;  %v1633_v34 = vpop.permute.xlu2 %1632  ;;  %v503_v57 = vshll.u32 %v2817_v48, 16  ;;  %v1638_v46 = vpop.permute.xlu0 %1637 }
  0xe7   : > { %v1481_v47 = vadd.f32 %v1409_v40, %v1246_v58 }
  0xe8   : > { %v755_v2 = vpop.f32.mrf.mxu1  ;;  %2163 = vmatmul.msk.bf16.gmra.mxu0 %vm527_vm0, %v490_v59 }
  0xe9   : > { %1516 = vst.msk [vmem:[%s2603_s11 + $0x48] sm:$0xff] %vm1506_vm3, %v1481_v47  ;;  %v1754_v0 = vmul.f32 %v1623_v62, %v1481_v47  ;;  %2277 = vmatmul.msk.bf16.gmra.mxu2 %vm527_vm0, %v1055_v1  ;;  %v1412_v4 = vpop.f32.mrf.mxu3  ;;  %v1068_v62 = vshll.u32 %v2820_v49, 16 }
  0xeb   : > { %v1796_v7 = vsel %vm1506_vm3, %v1754_v0, 0.0  ;;  %v1863_v8 = vmul.f32 %v1754_v0, %v1481_v47 }
  0xec   : > { %v1797_v9 = vadd.f32 %v1796_v7, %v1795_v53  ;;  %v1177_v10 = vpop.f32.mrf.mxu2 }
  0xed   : > { %v1905_v11 = vsel %vm1506_vm3, %v1863_v8, 0.0  ;;  %v1247_v61 = vadd.f32 %v1177_v10, %v754_v3  ;;  %v615_v13 = vpop.f32.mrf.mxu0  ;;  %v501_v3 = vor.u32 %v499_v56, %v497_v28  ;;  %v1070_v8 = vrot.slane %v1068_v62, 1 }
  0xee   : > { %v1906_v17 = vadd.f32 %v1905_v11, %v1904_v60  ;;  %v756_v27 = vadd.f32 %v755_v2, %v615_v13  ;;  %v1064_v60 = vshrl.u32 %v2793_v6, 16  ;;  %v1311_v2 = vrot.slane %v2820_v49, 1  ;;  %v847_v13 = vld [vmem:[%s2451_s16 + $0x90] sm:$0x1] }
  0xef   : > { %v1482_v21 = vadd.f32 %v1412_v4, %v1247_v61  ;;  %v505_v4 = vrot.slane %v503_v57, 1 }
  0xf0   : > { %v758_v20 = vpop.f32.mrf.mxu1  ;;  %v1066_v7 = vor.u32 %v1064_v60, %v1062_v30  ;;  %v1312_v61 = vsel %vm1279_vm1, %v1309_v22, %v1311_v2 }
  0xf1   : > { %1517 = vst.msk [vmem:[%s2603_s11 + $0x50] sm:$0xff] %vm1506_vm3, %v1482_v21  ;;  %v1755_v23 = vmul.f32 %v1628_v18, %v1482_v21  ;;  %v1414_v24 = vpop.f32.mrf.mxu3 }
  0xf3   : > { %2189 = vmatmul.msk.bf16.gmra.mxu1 %vm527_vm0, %v2758_v26  ;;  %v1798_v12 = vsel %vm1506_vm3, %v1755_v23, 0.0  ;;  %v1864_v31 = vmul.f32 %v1755_v23, %v1482_v21  ;;  %v498_v26 = vsel %vm374_vm2, %v493_v25, %v497_v28  ;;  %v1643_v21 = vpop.permute.xlu1 %1642  ;;  %v1071_v23 = vsel %vm374_vm2, %v1066_v7, %v1070_v8 }
  0xf4   : > { %v1799_v33 = vadd.f32 %v1798_v12, %v1797_v9  ;;  %v1179_v35 = vpop.f32.mrf.mxu2  ;;  %v281_v9 = vld [vmem:[%s2451_s16 + $0x88] sm:$0x1]  ;;  %v921_v25 = vunpack.c.l.b16 %v847_v13 }
  0xf5   : > { %v1907_v36 = vsel %vm1506_vm3, %v1864_v31, 0.0  ;;  %v1248_v37 = vadd.f32 %v1179_v35, %v756_v27  ;;  %v618_v38 = vpop.f32.mrf.mxu0  ;;  %v355_v63 = vunpack.c.l.b16 %v281_v9 }
  0xf6   : > { %v1908_v14 = vadd.f32 %v1907_v36, %v1906_v17  ;;  %2303 = vmatmul.msk.bf16.gmra.mxu3 %vm527_vm0, %v1310_v32  ;;  %v759_v45 = vadd.f32 %v758_v20, %v618_v38  ;;  %v506_v20 = vsel %vm374_vm2, %v501_v3, %v505_v4  ;;  %v939_v31 = vpack.c.b16 %v921_v25, %v921_v25 }
  0xf7   : > { %v1483_v43 = vadd.f32 %v1414_v24, %v1248_v37  ;;  %v373_v12 = vpack.c.b16 %v355_v63, %v355_v63 }
  0xf8   : > { %v760_v42 = vpop.f32.mrf.mxu1  ;;  %2164 = vmatmul.msk.bf16.gmra.mxu0 %vm527_vm0, %v498_v26  ;;  %v507_v26 = vshrl.u32 %v2817_v48, 16 }
  0xf9   : > { %1518 = vst.msk [vmem:[%s2603_s11 + $0x58] sm:$0xff] %vm1506_vm3, %v1483_v43  ;;  %v1756_v44 = vmul.f32 %v1633_v34, %v1483_v43  ;;  %2278 = vmatmul.msk.bf16.gmra.mxu2 %vm527_vm0, %v1063_v39  ;;  %v1417_v40 = vpop.f32.mrf.mxu3  ;;  %v1648_v39 = vpop.permute.xlu2 %1647 }
  0xfb   : > { %v1800_v50 = vsel %vm1506_vm3, %v1756_v44, 0.0  ;;  %v1865_v51 = vmul.f32 %v1756_v44, %v1483_v43  ;;  %v1072_v43 = vshrl.u32 %v2820_v49, 16  ;;  %v1076_v44 = vshll.u32 %v939_v31, 16 }
  0xfc   : > { %v1801_v52 = vadd.f32 %v1800_v50, %v1799_v33  ;;  %v1182_v54 = vpop.f32.mrf.mxu2 }
  0xfd   : > { %v1909_v55 = vsel %vm1506_vm3, %v1865_v51, 0.0  ;;  %v1249_v41 = vadd.f32 %v1182_v54, %v759_v45  ;;  %v620_v53 = vpop.f32.mrf.mxu0 }
  0xfe   : > { %v1910_v58 = vadd.f32 %v1909_v55, %v1908_v14  ;;  %v761_v11 = vadd.f32 %v760_v42, %v620_v53  ;;  %v511_v14 = vshll.u32 %v373_v12, 16  ;;  %v1074_v55 = vor.u32 %v1072_v43, %v1070_v8 }
  0xff   : > { %v1484_v1 = vadd.f32 %v1417_v40, %v1249_v41  ;;  %v1313_v40 = vrot.slane %v939_v31, 1  ;;  %v1078_v41 = vrot.slane %v1076_v44, 1 }
 0x100   : > { %v763_v59 = vpop.f32.mrf.mxu1  ;;  %v513_v54 = vrot.slane %v511_v14, 1 }
 0x101   : > { %1519 = vst.msk [vmem:[%s2603_s11 + $0x60] sm:$0xff] %vm1506_vm3, %v1484_v1  ;;  %v1757_v47 = vmul.f32 %v1638_v46, %v1484_v1  ;;  %v1419_v0 = vpop.f32.mrf.mxu3  ;;  %v1079_v3 = vsel %vm374_vm2, %v1074_v55, %v1078_v41  ;;  %v1663_v12 = vpop.permute.xlu2 %1662 }
 0x103   : > { %2190 = vmatmul.msk.bf16.gmra.mxu1 %vm527_vm0, %v2790_v5  ;;  %v1802_v6 = vsel %vm1506_vm3, %v1757_v47, 0.0  ;;  %v1866_v10 = vmul.f32 %v1757_v47, %v1484_v1 }
 0x104   : > { %v1803_v15 = vadd.f32 %v1802_v6, %v1801_v52  ;;  %v1184_v16 = vpop.f32.mrf.mxu2  ;;  %v509_v52 = vor.u32 %v507_v26, %v505_v4 }
 0x105   : > { %v1911_v17 = vsel %vm1506_vm3, %v1866_v10, 0.0  ;;  %v1250_v5 = vadd.f32 %v1184_v16, %v761_v11  ;;  %v623_v18 = vpop.f32.mrf.mxu0 }
 0x106   : > { %v1912_v19 = vadd.f32 %v1911_v17, %v1910_v58  ;;  %2304 = vmatmul.msk.bf16.gmra.mxu3 %vm527_vm0, %v1312_v61  ;;  %v764_v29 = vadd.f32 %v763_v59, %v623_v18  ;;  %v1314_v58 = vsel %vm1279_vm1, %v1311_v2, %v1313_v40  ;;  %v1658_v17 = vpop.permute.xlu1 %1657 }
 0x107   : > { %v1485_v22 = vadd.f32 %v1419_v0, %v1250_v5  ;;  %v1653_v0 = vpop.permute.xlu0 %1652 }
 0x108   : > { %v765_v24 = vpop.f32.mrf.mxu1  ;;  %2165 = vmatmul.msk.bf16.gmra.mxu0 %vm527_vm0, %v506_v20 }
 0x109   : > { %1520 = vst.msk [vmem:[%s2603_s11 + $0x68] sm:$0xff] %vm1506_vm3, %v1485_v22  ;;  %v1758_v28 = vmul.f32 %v1643_v21, %v1485_v22  ;;  %2279 = vmatmul.msk.bf16.gmra.mxu2 %vm527_vm0, %v1071_v23  ;;  %v1422_v30 = vpop.f32.mrf.mxu3 }
 0x10b   : > { %v1804_v27 = vsel %vm1506_vm3, %v1758_v28, 0.0  ;;  %v1867_v32 = vmul.f32 %v1758_v28, %v1485_v22 }
 0x10c   : > { %v1805_v33 = vadd.f32 %v1804_v27, %v1803_v15  ;;  %v1187_v35 = vpop.f32.mrf.mxu2 }
 0x10d   : > { %v1913_v36 = vsel %vm1506_vm3, %v1867_v32, 0.0  ;;  %v1251_v37 = vadd.f32 %v1187_v35, %v764_v29  ;;  %v625_v38 = vpop.f32.mrf.mxu0 }
 0x10e   : > { %v1914_v34 = vadd.f32 %v1913_v36, %v1912_v19  ;;  %v766_v57 = vadd.f32 %v765_v24, %v625_v38 }
 0x10f   : > { %v1486_v45 = vadd.f32 %v1422_v30, %v1251_v37 }
 0x110   : > { %v768_v42 = vpop.f32.mrf.mxu1 }
 0x111   : > { %1521 = vst.msk [vmem:[%s2603_s11 + $0x70] sm:$0xff] %vm1506_vm3, %v1486_v45  ;;  %v1759_v50 = vmul.f32 %v1648_v39, %v1486_v45  ;;  %v1424_v51 = vpop.f32.mrf.mxu3 }
 0x113   : > { %2191 = vmatmul.msk.bf16.gmra.mxu1 %vm527_vm0, %v2817_v48  ;;  %v1806_v53 = vsel %vm1506_vm3, %v1759_v50, 0.0  ;;  %v1868_v56 = vmul.f32 %v1759_v50, %v1486_v45  ;;  %v514_v48 = vsel %vm374_vm2, %v509_v52, %v513_v54  ;;  %v1668_v45 = vpop.permute.xlu0 %1667 }
 0x114   : > { %v1807_v46 = vadd.f32 %v1806_v53, %v1805_v33  ;;  %v1189_v59 = vpop.f32.mrf.mxu2 }
 0x115   : > { %v1915_v60 = vsel %vm1506_vm3, %v1868_v56, 0.0  ;;  %v1252_v62 = vadd.f32 %v1189_v59, %v766_v57  ;;  %v628_v1 = vpop.f32.mrf.mxu0 }
 0x116   : > { %v1916_v47 = vadd.f32 %v1915_v60, %v1914_v34  ;;  %2305 = vmatmul.msk.bf16.gmra.mxu3 %vm527_vm0, %v1314_v58  ;;  %v769_v2 = vadd.f32 %v768_v42, %v628_v1  ;;  %v1673_v60 = vpop.permute.xlu1 %1672 }
 0x117   : > { %v1487_v7 = vadd.f32 %v1424_v51, %v1252_v62 }
 0x118   : > { %v770_v4 = vpop.f32.mrf.mxu1  ;;  %2166 = vmatmul.msk.bf16.gmra.mxu0 %vm527_vm0, %v514_v48 }
 0x119   : > { %1522 = vst.msk [vmem:[%s2603_s11 + $0x78] sm:$0xff] %vm1506_vm3, %v1487_v7  ;;  %v1760_v49 = vmul.f32 %v1653_v0, %v1487_v7  ;;  %2280 = vmatmul.msk.bf16.gmra.mxu2 %vm527_vm0, %v1079_v3  ;;  %v1427_v8 = vpop.f32.mrf.mxu3 }
 0x11b   : > { %v1808_v9 = vsel %vm1506_vm3, %v1760_v49, 0.0  ;;  %v1869_v6 = vmul.f32 %v1760_v49, %v1487_v7 }
 0x11c   : > { %v1809_v10 = vadd.f32 %v1808_v9, %v1807_v46  ;;  %v1192_v11 = vpop.f32.mrf.mxu2 }
 0x11d   : > { %v1917_v61 = vsel %vm1506_vm3, %v1869_v6, 0.0  ;;  %v1253_v13 = vadd.f32 %v1192_v11, %v769_v2  ;;  %v630_v15 = vpop.f32.mrf.mxu0 }
 0x11e   : > { %v1918_v16 = vadd.f32 %v1917_v61, %v1916_v47  ;;  %v771_v23 = vadd.f32 %v770_v4, %v630_v15 }
 0x11f   : > { %v1488_v18 = vadd.f32 %v1427_v8, %v1253_v13 }
 0x120   : > { %v773_v5 = vpop.f32.mrf.mxu1 }
 0x121   : > { %1523 = vst.msk [vmem:[%s2603_s11 + $0x80] sm:$0xff] %vm1506_vm3, %v1488_v18  ;;  %v1761_v20 = vmul.f32 %v1658_v17, %v1488_v18  ;;  %v1429_v63 = vpop.f32.mrf.mxu3 }
 0x123   : > { %v1810_v19 = vsel %vm1506_vm3, %v1761_v20, 0.0  ;;  %v1870_v21 = vmul.f32 %v1761_v20, %v1488_v18 }
 0x124   : > { %v1811_v24 = vadd.f32 %v1810_v19, %v1809_v10  ;;  %v1194_v25 = vpop.f32.mrf.mxu2  ;;  %v1678_v10 = vpop.permute.xlu2 %1677 }
 0x125   : > { %v1919_v22 = vsel %vm1506_vm3, %v1870_v21, 0.0  ;;  %v1254_v28 = vadd.f32 %v1194_v25, %v771_v23  ;;  %v633_v29 = vpop.f32.mrf.mxu0 }
 0x126   : > { %v1920_v30 = vadd.f32 %v1919_v22, %v1918_v16  ;;  %v774_v33 = vadd.f32 %v773_v5, %v633_v29 }
 0x127   : > { %v1489_v27 = vadd.f32 %v1429_v63, %v1254_v28 }
 0x128   : > { %v775_v31 = vpop.f32.mrf.mxu1 }
 0x129   : > { %1524 = vst.msk [vmem:[%s2603_s11 + $0x88] sm:$0xff] %vm1506_vm3, %v1489_v27  ;;  %v1762_v32 = vmul.f32 %v1663_v12, %v1489_v27  ;;  %v1432_v35 = vpop.f32.mrf.mxu3 }
 0x12b   : > { %v1812_v36 = vsel %vm1506_vm3, %v1762_v32, 0.0  ;;  %v1871_v37 = vmul.f32 %v1762_v32, %v1489_v27 }
 0x12c   : > { %v1813_v38 = vadd.f32 %v1812_v36, %v1811_v24  ;;  %v1197_v26 = vpop.f32.mrf.mxu2  ;;  %v1683_v24 = vpop.permute.xlu0 %1682 }
 0x12d   : > { %v1921_v14 = vsel %vm1506_vm3, %v1871_v37, 0.0  ;;  %v1255_v34 = vadd.f32 %v1197_v26, %v774_v33  ;;  %v635_v39 = vpop.f32.mrf.mxu0 }
 0x12e   : > { %v1922_v42 = vadd.f32 %v1921_v14, %v1920_v30  ;;  %v776_v54 = vadd.f32 %v775_v31, %v635_v39 }
 0x12f   : > { %v1490_v44 = vadd.f32 %v1432_v35, %v1255_v34 }
 0x130   : > { %v778_v43 = vpop.f32.mrf.mxu1 }
 0x131   : > { %1525 = vst.msk [vmem:[%s2603_s11 + $0x90] sm:$0xff] %vm1506_vm3, %v1490_v44  ;;  %v1763_v40 = vmul.f32 %v1668_v45, %v1490_v44  ;;  %v1434_v50 = vpop.f32.mrf.mxu3 }
 0x133   : > { %v1814_v51 = vsel %vm1506_vm3, %v1763_v40, 0.0  ;;  %v1872_v52 = vmul.f32 %v1763_v40, %v1490_v44 }
 0x134   : > { %v1815_v55 = vadd.f32 %v1814_v51, %v1813_v38  ;;  %v1199_v41 = vpop.f32.mrf.mxu2  ;;  %v1688_v38 = vpop.permute.xlu1 %1687 }
 0x135   : > { %v1923_v53 = vsel %vm1506_vm3, %v1872_v52, 0.0  ;;  %v1256_v56 = vadd.f32 %v1199_v41, %v776_v54  ;;  %v638_v57 = vpop.f32.mrf.mxu0 }
 0x136   : > { %v1924_v58 = vadd.f32 %v1923_v53, %v1922_v42  ;;  %v779_v1 = vadd.f32 %v778_v43, %v638_v57 }
 0x137   : > { %v1491_v59 = vadd.f32 %v1434_v50, %v1256_v56 }
 0x138   : > { %v780_v46 = vpop.f32.mrf.mxu1 }
 0x139   : > { %1526 = vst.msk [vmem:[%s2603_s11 + $0x98] sm:$0xff] %vm1506_vm3, %v1491_v59  ;;  %v1764_v62 = vmul.f32 %v1673_v60, %v1491_v59  ;;  %v1437_v48 = vpop.f32.mrf.mxu3 }
 0x13b   : > { %v1816_v47 = vsel %vm1506_vm3, %v1764_v62, 0.0  ;;  %v1873_v0 = vmul.f32 %v1764_v62, %v1491_v59 }
 0x13c   : > { %v1817_v3 = vadd.f32 %v1816_v47, %v1815_v55  ;;  %v1202_v4 = vpop.f32.mrf.mxu2 }
 0x13d   : > { %v1925_v7 = vsel %vm1506_vm3, %v1873_v0, 0.0  ;;  %v1257_v49 = vadd.f32 %v1202_v4, %v779_v1  ;;  %v640_v2 = vpop.f32.mrf.mxu0 }
 0x13e   : > { %v1926_v8 = vadd.f32 %v1925_v7, %v1924_v58  ;;  %v781_v16 = vadd.f32 %v780_v46, %v640_v2 }
 0x13f   : > { %v1492_v6 = vadd.f32 %v1437_v48, %v1257_v49 }
 0x140   : > { %v783_v9 = vpop.f32.mrf.mxu1 }
 0x141   : > { %1527 = vst.msk [vmem:[%s2603_s11 + $0xa0] sm:$0xff] %vm1506_vm3, %v1492_v6  ;;  %v1765_v11 = vmul.f32 %v1678_v10, %v1492_v6  ;;  %v1439_v61 = vpop.f32.mrf.mxu3 }
 0x143   : > { %v1818_v13 = vsel %vm1506_vm3, %v1765_v11, 0.0  ;;  %v1874_v15 = vmul.f32 %v1765_v11, %v1492_v6 }
 0x144   : > { %v1819_v17 = vadd.f32 %v1818_v13, %v1817_v3  ;;  %v1204_v5 = vpop.f32.mrf.mxu2 }
 0x145   : > { %v1927_v18 = vsel %vm1506_vm3, %v1874_v15, 0.0  ;;  %v1258_v20 = vadd.f32 %v1204_v5, %v781_v16  ;;  %v643_v63 = vpop.f32.mrf.mxu0 }
 0x146   : > { %v1928_v19 = vadd.f32 %v1927_v18, %v1926_v8  ;;  %v784_v22 = vadd.f32 %v783_v9, %v643_v63 }
 0x147   : > { %v1493_v23 = vadd.f32 %v1439_v61, %v1258_v20 }
 0x148   : > { %v785_v21 = vpop.f32.mrf.mxu1 }
 0x149   : > { %1528 = vst.msk [vmem:[%s2603_s11 + $0xa8] sm:$0xff] %vm1506_vm3, %v1493_v23  ;;  %v1766_v25 = vmul.f32 %v1683_v24, %v1493_v23  ;;  %v1442_v28 = vpop.f32.mrf.mxu3 }
 0x14b   : > { %v1820_v29 = vsel %vm1506_vm3, %v1766_v25, 0.0  ;;  %v1875_v30 = vmul.f32 %v1766_v25, %v1493_v23  ;;  %v1693_v23 = vpop.permute.xlu2 %1692 }
 0x14c   : > { %v1821_v12 = vadd.f32 %v1820_v29, %v1819_v17  ;;  %v1207_v31 = vpop.f32.mrf.mxu2 }
 0x14d   : > { %v1929_v27 = vsel %vm1506_vm3, %v1875_v30, 0.0  ;;  %v1259_v32 = vadd.f32 %v1207_v31, %v784_v22  ;;  %v645_v33 = vpop.f32.mrf.mxu0  ;;  %v1698_v30 = vpop.permute.xlu0 %1697 }
 0x14e   : > { %v1930_v35 = vadd.f32 %v1929_v27, %v1928_v19  ;;  %v786_v42 = vadd.f32 %v785_v21, %v645_v33 }
 0x14f   : > { %v1494_v37 = vadd.f32 %v1442_v28, %v1259_v32  ;;  %v1703_v32 = vpop.permute.xlu1 %1702 }
 0x150   : > { %v788_v36 = vpop.f32.mrf.mxu1 }
 0x151   : > { %1529 = vst.msk [vmem:[%s2603_s11 + $0xb0] sm:$0xff] %vm1506_vm3, %v1494_v37  ;;  %v1767_v26 = vmul.f32 %v1688_v38, %v1494_v37  ;;  %v1444_v14 = vpop.f32.mrf.mxu3 }
 0x153   : > { %v1822_v34 = vsel %vm1506_vm3, %v1767_v26, 0.0  ;;  %v1876_v39 = vmul.f32 %v1767_v26, %v1494_v37  ;;  %v1708_v33 = vpop.permute.xlu2 %1707 }
 0x154   : > { %v2896_v43 = vadd.f32 %v1822_v34, %v1821_v12  ;;  %v1209_v44 = vpop.f32.mrf.mxu2 }
 0x155   : > { %v1931_v45 = vsel %vm1506_vm3, %v1876_v39, 0.0  ;;  %v1260_v40 = vadd.f32 %v1209_v44, %v786_v42  ;;  %v648_v50 = vpop.f32.mrf.mxu0  ;;  %v1713_v34 = vpop.permute.xlu0 %1712 }
 0x156   : > { %v2899_v51 = vadd.f32 %v1931_v45, %v1930_v35  ;;  %v789_v55 = vadd.f32 %v788_v36, %v648_v50 }
 0x157   : > { %v2901_v54 = vadd.f32 %v1444_v14, %v1260_v40  ;;  %v1718_v50 = vpop.permute.xlu1 %1717 }
 0x158   : > { %v790_v52 = vpop.f32.mrf.mxu1 }
 0x159   : > { %1530 = vst.msk [vmem:[%s2603_s11 + $0xb8] sm:$0xff] %vm1506_vm3, %v2901_v54  ;;  %v1447_v41 = vpop.f32.mrf.mxu3  ;;  %v1768_v26 = vmul.f32 %v1693_v23, %v2901_v54 }
 0x15b   : > { %v1877_v44 = vmul.f32 %v1768_v26, %v2901_v54 }
 0x15c   : > { %v1212_v53 = vpop.f32.mrf.mxu2 }
 0x15d   : > { %v1261_v56 = vadd.f32 %v1212_v53, %v789_v55  ;;  %v650_v57 = vpop.f32.mrf.mxu0 }
 0x15e   : > { %v791_v60 = vadd.f32 %v790_v52, %v650_v57  ;;  %v1723_v57 = vpop.permute.xlu2 %1722 }
 0x15f   : > { %v2906_v46 = vadd.f32 %v1447_v41, %v1261_v56  ;;  %v1824_v41 = vsel %vm1506_vm3, %v1768_v26, 0.0 }
 0x160   : > { %v793_v58 = vpop.f32.mrf.mxu1 }
 0x161   : > { %1531 = vst.msk [vmem:[%s2603_s11 + $0xc0] sm:$0xff] %vm1506_vm3, %v2906_v46  ;;  %v1449_v59 = vpop.f32.mrf.mxu3  ;;  %v1769_v39 = vmul.f32 %v1698_v30, %v2906_v46 }
 0x163   : > { %v1878_v53 = vmul.f32 %v1769_v39, %v2906_v46 }
 0x164   : > { %v1214_v62 = vpop.f32.mrf.mxu2 }
 0x165   : > { %v1262_v1 = vadd.f32 %v1214_v62, %v791_v60  ;;  %v653_v48 = vpop.f32.mrf.mxu0  ;;  %v1933_v60 = vsel %vm1506_vm3, %v1877_v44, 0.0  ;;  %v1826_v62 = vsel %vm1506_vm3, %v1769_v39, 0.0 }
 0x166   : > { %v794_v3 = vadd.f32 %v793_v58, %v653_v48  ;;  %v1825_v48 = vadd.f32 %v1824_v41, %v2896_v43 }
 0x167   : > { %v2911_v0 = vadd.f32 %v1449_v59, %v1262_v1 }
 0x168   : > { %v795_v47 = vpop.f32.mrf.mxu1 }
 0x169   : > { %1532 = vst.msk [vmem:[%s2603_s11 + $0xc8] sm:$0xff] %vm1506_vm3, %v2911_v0  ;;  %v1452_v4 = vpop.f32.mrf.mxu3  ;;  %v1770_v45 = vmul.f32 %v1703_v32, %v2911_v0 }
 0x16b   : > { %v1879_v54 = vmul.f32 %v1770_v45, %v2911_v0 }
 0x16c   : > { %v1217_v7 = vpop.f32.mrf.mxu2 }
 0x16d   : > { %v1263_v49 = vadd.f32 %v1217_v7, %v794_v3  ;;  %v655_v2 = vpop.f32.mrf.mxu0  ;;  %v1828_v7 = vsel %vm1506_vm3, %v1770_v45, 0.0  ;;  %v1937_v0 = vsel %vm1506_vm3, %v1879_v54, 0.0 }
 0x16e   : > { %v796_v10 = vadd.f32 %v795_v47, %v655_v2  ;;  %v1934_v2 = vadd.f32 %v1933_v60, %v2899_v51 }
 0x16f   : > { %v1498_v8 = vadd.f32 %v1452_v4, %v1263_v49  ;;  %v1935_v4 = vsel %vm1506_vm3, %v1878_v53, 0.0 }
 0x170   : > { %v798_v9 = vpop.f32.mrf.mxu1 }
 0x171   : > { %1533 = vst.msk [vmem:[%s2603_s11 + $0xd0] sm:$0xff] %vm1506_vm3, %v1498_v8  ;;  %v1454_v6 = vpop.f32.mrf.mxu3  ;;  %v1771_v52 = vmul.f32 %v1708_v33, %v1498_v8 }
 0x173   : > { %v1880_v47 = vmul.f32 %v1771_v52, %v1498_v8  ;;  %v1830_v43 = vsel %vm1506_vm3, %v1771_v52, 0.0 }
 0x174   : > { %v1219_v11 = vpop.f32.mrf.mxu2 }
 0x175   : > { %v1264_v61 = vadd.f32 %v1219_v11, %v796_v10  ;;  %v658_v13 = vpop.f32.mrf.mxu0  ;;  %v1728_v10 = vpop.permute.xlu0 %1727  ;;  %v1936_v11 = vadd.f32 %v1935_v4, %v1934_v2 }
 0x176   : > { %v799_v16 = vadd.f32 %v798_v9, %v658_v13  ;;  %v1827_v9 = vadd.f32 %v1826_v62, %v1825_v48  ;;  %v1939_v13 = vsel %vm1506_vm3, %v1880_v47, 0.0 }
 0x177   : > { %v1499_v15 = vadd.f32 %v1454_v6, %v1264_v61 }
 0x178   : > { %v800_v5 = vpop.f32.mrf.mxu1  ;;  %v1829_v61 = vadd.f32 %v1828_v7, %v1827_v9 }
 0x179   : > { %1534 = vst.msk [vmem:[%s2603_s11 + $0xd8] sm:$0xff] %vm1506_vm3, %v1499_v15  ;;  %v1457_v17 = vpop.f32.mrf.mxu3  ;;  %v1772_v58 = vmul.f32 %v1713_v34, %v1499_v15 }
 0x17b   : > { %v1881_v6 = vmul.f32 %v1772_v58, %v1499_v15  ;;  %v1733_v15 = vpop.permute.xlu1 %1732 }
 0x17c   : > { %v1222_v18 = vpop.f32.mrf.mxu2 }
 0x17d   : > { %v1265_v20 = vadd.f32 %v1222_v18, %v799_v16  ;;  %v660_v63 = vpop.f32.mrf.mxu0  ;;  %v1941_v23 = vsel %vm1506_vm3, %v1881_v6, 0.0 }
 0x17e   : > { %v801_v24 = vadd.f32 %v800_v5, %v660_v63  ;;  %v1832_v5 = vsel %vm1506_vm3, %v1772_v58, 0.0  ;;  %v1938_v63 = vadd.f32 %v1937_v0, %v1936_v11 }
 0x17f   : > { %v2920_v19 = vadd.f32 %v1457_v17, %v1265_v20 }
 0x180   : > { %v803_v25 = vpop.f32.mrf.mxu1  ;;  %v1940_v30 = vadd.f32 %v1939_v13, %v1938_v63 }
 0x181   : > { %1535 = vst.msk [vmem:[%s2603_s11 + $0xe0] sm:$0xff] %vm1506_vm3, %v2920_v19  ;;  %v1459_v21 = vpop.f32.mrf.mxu3  ;;  %v1773_v46 = vmul.f32 %v1718_v50, %v2920_v19 }
 0x183   : > { %v1882_v18 = vmul.f32 %v1773_v46, %v2920_v19 }
 0x184   : > { %v1224_v22 = vpop.f32.mrf.mxu2 }
 0x185   : > { %v1266_v28 = vadd.f32 %v1224_v22, %v801_v24  ;;  %v663_v29 = vpop.f32.mrf.mxu0  ;;  %v1834_v24 = vsel %vm1506_vm3, %v1773_v46, 0.0  ;;  %v1943_v32 = vsel %vm1506_vm3, %v1882_v18, 0.0 }
 0x186   : > { %v804_v31 = vadd.f32 %v803_v25, %v663_v29  ;;  %v1738_v29 = vpop.permute.xlu2 %1737 }
 0x187   : > { %v1501_v12 = vadd.f32 %v1459_v21, %v1266_v28  ;;  %v1831_v21 = vadd.f32 %v1830_v43, %v1829_v61 }
 0x188   : > { %v805_v38 = vpop.f32.mrf.mxu1 }
 0x189   : > { %1536 = vst.msk [vmem:[%s2603_s11 + $0xe8] sm:$0xff] %vm1506_vm3, %v1501_v12  ;;  %v1462_v27 = vpop.f32.mrf.mxu3  ;;  %v1774_v8 = vmul.f32 %v1723_v57, %v1501_v12 }
 0x18b   : > { %v1883_v25 = vmul.f32 %v1774_v8, %v1501_v12  ;;  %v1836_v19 = vsel %vm1506_vm3, %v1774_v8, 0.0 }
 0x18c   : > { %v1227_v35 = vpop.f32.mrf.mxu2 }
 0x18d   : > { %v1267_v36 = vadd.f32 %v1227_v35, %v804_v31  ;;  %v665_v37 = vpop.f32.mrf.mxu0  ;;  %v1833_v31 = vadd.f32 %v1832_v5, %v1831_v21  ;;  %v1945_v26 = vsel %vm1506_vm3, %v1883_v25, 0.0 }
 0x18e   : > { %v806_v40 = vadd.f32 %v805_v38, %v665_v37 }
 0x18f   : > { %v1502_v14 = vadd.f32 %v1462_v27, %v1267_v36  ;;  %v1942_v36 = vadd.f32 %v1941_v23, %v1940_v30  ;;  %v1835_v37 = vadd.f32 %v1834_v24, %v1833_v31 }
 0x190   : > { %v808_v3 = vpop.f32.mrf.mxu1 }
 0x191   : > { %1537 = vst.msk [vmem:[%s2603_s11 + $0xf0] sm:$0xff] %vm1506_vm3, %v1502_v14  ;;  %v1464_v42 = vpop.f32.mrf.mxu3  ;;  %v1775_v20 = vmul.f32 %v1728_v10, %v1502_v14  ;;  %v1837_v44 = vadd.f32 %v1836_v19, %v1835_v37 }
 0x193   : > { %v1884_v33 = vmul.f32 %v1775_v20, %v1502_v14  ;;  %v1838_v12 = vsel %vm1506_vm3, %v1775_v20, 0.0 }
 0x194   : > { %v1229_v55 = vpop.f32.mrf.mxu2  ;;  %v1839_v41 = vadd.f32 %v1838_v12, %v1837_v44 }
 0x195   : > { %v1268_v56 = vadd.f32 %v1229_v55, %v806_v40  ;;  %v668_v59 = vpop.f32.mrf.mxu0  ;;  %v1947_v40 = vsel %vm1506_vm3, %v1884_v33, 0.0 }
 0x196   : > { %v809_v49 = vadd.f32 %v808_v3, %v668_v59  ;;  %v1743_v59 = vpop.permute.xlu0 %1742 }
 0x197   : > { %v1503_v1 = vadd.f32 %v1464_v42, %v1268_v56  ;;  %v1944_v42 = vadd.f32 %v1943_v32, %v1942_v36 }
 0x198   : > { %v810_v38 = vpop.f32.mrf.mxu1 }
 0x199   : > { %1538 = vst.msk [vmem:[%s2603_s11 + $0xf8] sm:$0xff] %vm1506_vm3, %v1503_v1  ;;  %v1467_v16 = vpop.f32.mrf.mxu3  ;;  %v1776_v22 = vmul.f32 %v1733_v15, %v1503_v1  ;;  %v1946_v55 = vadd.f32 %v1945_v26, %v1944_v42 }
 0x19b   : > { %v1885_v34 = vmul.f32 %v1776_v22, %v1503_v1  ;;  %v1840_v14 = vsel %vm1506_vm3, %v1776_v22, 0.0  ;;  %v1948_v60 = vadd.f32 %v1947_v40, %v1946_v55 }
 0x19c   : > { %v1232_v17 = vpop.f32.mrf.mxu2  ;;  %v1841_v62 = vadd.f32 %v1840_v14, %v1839_v41 }
 0x19d   : > { %v1269_v51 = vadd.f32 %v1232_v17, %v809_v49  ;;  %v670_v27 = vpop.f32.mrf.mxu0  ;;  %v1949_v56 = vsel %vm1506_vm3, %v1885_v34, 0.0 }
 0x19e   : > { %v811_v39 = vadd.f32 %v810_v38, %v670_v27  ;;  %v1950_v48 = vadd.f32 %v1949_v56, %v1948_v60 }
 0x19f   : > { %v1504_v28 = vadd.f32 %v1467_v16, %v1269_v51 }
 0x1a1   : > { %1539 = vst.msk [vmem:[%s2603_s11 + $0x100] sm:$0xff] %vm1506_vm3, %v1504_v28  ;;  %v1777_v35 = vmul.f32 %v1738_v29, %v1504_v28  ;;  %v1469_v53 = vpop.f32.mrf.mxu3 }
 0x1a3   : > { %v1886_v50 = vmul.f32 %v1777_v35, %v1504_v28  ;;  %v1842_v57 = vsel %vm1506_vm3, %v1777_v35, 0.0 }
 0x1a4   : > { %v1234_v45 = vpop.f32.mrf.mxu2  ;;  %v1843_v47 = vadd.f32 %v1842_v57, %v1841_v62 }
 0x1a5   : > { %v1270_v52 = vadd.f32 %v1234_v45, %v811_v39  ;;  %v1951_v54 = vsel %vm1506_vm3, %v1886_v50, 0.0 }
 0x1a6   : > { %v1952_v7 = vadd.f32 %v1951_v54, %v1950_v48 }
 0x1a7   : > { %v1505_v58 = vadd.f32 %v1469_v53, %v1270_v52 }
 0x1a9   : > { %1540 = vst.msk [vmem:[%s2603_s11 + $0x108] sm:$0xff] %vm1506_vm3, %v1505_v58  ;;  %v1778_v1 = vmul.f32 %v1743_v59, %v1505_v58 }
 0x1ab   : > { %v1844_v3 = vsel %vm1506_vm3, %v1778_v1, 0.0  ;;  %v1887_v4 = vmul.f32 %v1778_v1, %v1505_v58 }
 0x1ac   : > { %v1845_v46 = vadd.f32 %v1844_v3, %v1843_v47 }
 0x1ad   : > { %v1953_v49 = vsel %vm1506_vm3, %v1887_v4, 0.0 }
 0x1ae   : > { %v1846_v2 = vrot.slane %v1845_v46, 4  ;;  %v1954_v9 = vadd.f32 %v1953_v49, %v1952_v7 }
 0x1b0   : > { %v1847_v6 = vadd.f32 %v1846_v2, %v1845_v46  ;;  %v1955_v10 = vrot.slane %v1954_v9, 4 }
 0x1b2   : > { %v1848_v0 = vrot.slane %v1847_v6, 2  ;;  %v1956_v43 = vadd.f32 %v1955_v10, %v1954_v9 }
 0x1b4   : > { %v1849_v8 = vadd.f32 %v1848_v0, %v1847_v6  ;;  %v1957_v11 = vrot.slane %v1956_v43, 2 }
 0x1b6   : > { %v1850_v61 = vrot.slane %v1849_v8, 1  ;;  %v1958_v13 = vadd.f32 %v1957_v11, %v1956_v43 }
 0x1b8   : > { %v1851_v16 = vadd.f32 %v1850_v61, %v1849_v8  ;;  %v1959_v17 = vrot.slane %v1958_v13, 1 }
 0x1ba   : > { %1853 = vst.msk [vmem:[%s238_s24] sm:$0x1] %vm1852_vm4, %v1851_v16  ;;  %v1960_v5 = vadd.f32 %v1959_v17, %v1958_v13 }
 0x1bc   : > { %1961 = vst.msk [vmem:[%s241_s27] sm:$0x1] %vm1852_vm4, %v1960_v5 }
 0x1bd PF: > { %s16_s18 = sadd.s32 1, %s2377_s18  }
 0x1be   : > { %p13_p4 = scmp.ge.s32.totalorder %s16_s18, 4  }
 0x1c0   :  { %15 = sbr.rel (!%p13_p4) target bundleno = 1 (0x1), region = 86 }

// kernel: tile.43
= control target key start
LH: loop header
LB: loop body
LE: loop exit
PB: predicated region body
PF: predicated region fallthrough
CT: control target
= control target key end

     0   :  { %s28_s0 = inlined_call_operand.vmem [shape: f32[32], index: 0, kind: input, shape index: {}]   ;;  %s29_s1 = inlined_call_operand.vmem [shape: f32[9,32], index: 1, kind: output, shape index: {}]  }
   0x1   :  { %v4_v0 = vld [vmem:[%s28_s0] ss:$0 sm:$0xff] }
   0x2   :  { %5 = vst [vmem:[%s29_s1] sm:$0xff] %v4_v0 }
   0x3   :  { %8 = vst [vmem:[%s29_s1 + $0x8] sm:$0xff] %v4_v0 }

// kernel: tile.44
= control target key start
LH: loop header
LB: loop body
LE: loop exit
PB: predicated region body
PF: predicated region fallthrough
CT: control target
= control target key end

     0   :  { %s6_s6 = smov 3  ;;  %s52_s9 = smov 96   ;;  %vm3_vm0 = vcmask 261120   ;;  %vm10_vm1 = vcmask 1048320   ;;  %vm17_vm2 = vcmask 785920   ;;  %vm24_vm3 = vcmask 523520   ;;  %s86_s0 = inlined_call_operand.vmem [shape: f32[9,32], index: 0, kind: input, shape index: {}]   ;;  %s87_s1 = inlined_call_operand.vmem [shape: f32[1,1,288], index: 1, kind: output, shape index: {}]  }
   0x1   :  { %v44_v0 = vld [vmem:[%s86_s0 + $0x3] ss:$4 sm:%s6_s6]   ;;  %s20_s10 = smov 3  ;;  %s13_s13 = smov 3 }
   0x2   :  { %8 = vrot.lane.b32.xlu0 %v44_v0, %s52_s9  ;;  %v46_v1 = vld [vmem:[%s86_s0 + $0x1] ss:$4 sm:%s20_s10]   ;;  %s53_s14 = smov 32   ;;  %s54_s17 = smov 64  }
   0x3   :  { %22 = vrot.lane.b32.xlu1 %v46_v1, %s53_s14  ;;  %v45_v2 = vld [vmem:[%s86_s0 + $0x2] ss:$4 sm:%s13_s13]   ;;  %v2_v3 = vld [vmem:[%s86_s0] ss:$4 sm:$0x7]  }
   0x4   :  { %4 = vst.msk [vmem:[#allocation0] ss:$8 sm:$0x7] %vm3_vm0, %v2_v3  }
   0xa   :  { %15 = vrot.lane.b32.xlu0 %v45_v2, %s54_s17 }
   0xb   :  { %v39_v4 = vld [vmem:[#allocation0 + $0x10] sm:$0x1] }
   0xc   :  { %48 = vst [vmem:[%s87_s1 + $0x2] sm:$0x1] %v39_v4 }
  0x74   :  { %v9_v5 = vpop.permute.xlu0 %8  }
  0x75   :  { %11 = vst.msk [vmem:[#allocation0] ss:$8 sm:$0x3] %vm10_vm1, %v9_v5   ;;  %v23_v6 = vpop.permute.xlu1 %22  }
  0x7c   :  { %v16_v7 = vpop.permute.xlu0 %15  }
  0x7d   :  { %18 = vst.msk [vmem:[#allocation0] ss:$8 sm:$0x3] %vm17_vm2, %v16_v7  }
  0x7e   :  { %25 = vst.msk [vmem:[#allocation0] ss:$8 sm:$0x3] %vm24_vm3, %v23_v6  }
  0x85   :  { %v28_v8 = vld [vmem:[#allocation0] sm:$0x1]  ;;  %v33_v9 = vld [vmem:[#allocation0 + $0x8] sm:$0x1] }
  0x86   :  { %31 = vst [vmem:[%s87_s1] sm:$0x1] %v28_v8 }
  0x87   :  { %47 = vst [vmem:[%s87_s1 + $0x1] sm:$0x1] %v33_v9 }

// kernel: discriminator_forward.12
= control target key start
LH: loop header
LB: loop body
LE: loop exit
PB: predicated region body
PF: predicated region fallthrough
CT: control target
= control target key end

     0   :  { %s310_s12 = smov 0   ;;  %s333_s0 = inlined_call_operand.vmem [shape: f32[2,8,288], index: 0, kind: input, shape index: {}]   ;;  %s334_s1 = inlined_call_operand.vmem [shape: f32[1,1,288], index: 1, kind: input, shape index: {}]   ;;  %s335_s2 = inlined_call_operand.vmem [shape: f32[1,1,288], index: 2, kind: input, shape index: {}]   ;;  %s336_s3 = inlined_call_operand.vmem [shape: f32[2,8,288], index: 3, kind: output, shape index: {}]  }
   0x1 LB: > { %s264_s13 = sadd.s32 4294967295, %s288_s12   ;;  %p268_p0 = scmp.ge.s32.totalorder %s288_s12, 1  ;;  %s288_s12 = sphi %s310_s12, %s13_s12  }
   0x2   : > { %p137_p1 = scmp.lt.s32.totalorder %s288_s12, 3 }
   0x4   : > { %p138_p2 = pnand %p268_p0, %p137_p1 }
   0x5   : > { %p161_p3 = scmp.lt.s32.totalorder (!%p138_p2), %s264_s13, 1 }
   0x6   : > { %141 = sbr.rel (%p138_p2) target bundleno = 26 (0x1a), region = 32 }
   0xb   : > { %v174_v0 = vld [vmem:[%s334_s1] sm:$0x7]  ;;  %s338_s13 = smov (!%p161_p3, %s264_s13), 1  ;;  %vm207_vm3 = vcmask 261120  }
   0xc   : > { %v185_v1 = vld [vmem:[%s335_s2] sm:$0x7]  ;;  %s273_s18 = smul.u32 24, %s338_s13  ;;  %v176_v2 = vperm.slane %v174_v0, 0  ;;  %v177_v3 = vperm.slane %v174_v0, 1  ;;  %v178_v4 = vperm.slane %v174_v0, 2 }
   0xd   : > { %v187_v5 = vperm.slane %v185_v1, 0  ;;  %v188_v6 = vperm.slane %v185_v1, 1  ;;  %v189_v7 = vperm.slane %v185_v1, 2 }
   0xe   : > { %s165_s21 = scalar_lea.vmem %s333_s0, %s273_s18  ;;  %s170_s24 = scalar_lea.vmem %s336_s3, %s273_s18 }
   0xf   : > { %v171_v8 = vld [vmem:[%s165_s21] sm:$0xff]  ;;  %v173_v9 = vld [vmem:[%s165_s21 + $0x10] sm:$0xff]  ;;  %v172_v10 = vld [vmem:[%s165_s21 + $0x8] sm:$0xff] }
  0x10   : > { %v182_v11 = vmul.f32 %v176_v2, %v171_v8  ;;  %v183_v12 = vmul.f32 %v177_v3, %v172_v10  ;;  %v184_v13 = vmul.f32 %v178_v4, %v173_v9 }
  0x12   : > { %v193_v14 = vadd.f32 %v187_v5, %v182_v11  ;;  %v194_v15 = vadd.f32 %v188_v6, %v183_v12  ;;  %v195_v16 = vadd.f32 %v189_v7, %v184_v13 }
  0x14   : > { %vm196_vm0 = vcmp.gt.f32.partialorder %v193_v14, 0.0  ;;  %v199_v17 = vmul.f32 0.2, %v193_v14  ;;  %vm197_vm1 = vcmp.gt.f32.partialorder %v194_v15, 0.0  ;;  %v200_v18 = vmul.f32 0.2, %v194_v15 }
  0x15   : > { %vm198_vm2 = vcmp.gt.f32.partialorder %v195_v16, 0.0  ;;  %v201_v19 = vmul.f32 0.2, %v195_v16 }
  0x16   : > { %v202_v20 = vsel %vm196_vm0, %v193_v14, %v199_v17  ;;  %v203_v21 = vsel %vm197_vm1, %v194_v15, %v200_v18 }
  0x17   : > { %205 = vst [vmem:[%s170_s24] sm:$0xff] %v202_v20  ;;  %v204_v22 = vsel %vm198_vm2, %v195_v16, %v201_v19 }
  0x18   : > { %206 = vst [vmem:[%s170_s24 + $0x8] sm:$0xff] %v203_v21 }
  0x19   : > { %208 = vst.msk [vmem:[%s170_s24 + $0x10] sm:$0xff] %vm207_vm3, %v204_v22 }
  0x1a PF: > { %s13_s12 = sadd.s32 1, %s288_s12  }
  0x1b   : > { %p10_p4 = scmp.ge.s32.totalorder %s13_s12, 4  }
  0x1d   :  { %12 = sbr.rel (!%p10_p4) target bundleno = 1 (0x1), region = 62 }

// kernel: discriminator_forward.11
= control target key start
LH: loop header
LB: loop body
LE: loop exit
PB: predicated region body
PF: predicated region fallthrough
CT: control target
= control target key end

     0   :  { %s1183_s18 = smov 0   ;;  %s1378_s0 = inlined_call_operand.vmem [shape: bf16[2,88,64], index: 0, kind: input, shape index: {}]   ;;  %s1379_s1 = inlined_call_operand.vmem [shape: bf16[256,32], index: 1, kind: input, shape index: {}]   ;;  %s1380_s2 = inlined_call_operand.vmem [shape: f32[72,1], index: 2, kind: input, shape index: {}]   ;;  %s1381_s3 = inlined_call_operand.vmem [shape: f32[2,72,32], index: 3, kind: output, shape index: {0}]   ;;  %s1382_s4 = inlined_call_operand.vmem [shape: f32[2,1,32], index: 4, kind: output, shape index: {1}]   ;;  %s1383_s5 = inlined_call_operand.vmem [shape: f32[2,1,32], index: 5, kind: output, shape index: {2}]  }
   0x1 LB: > { %s978_s19 = sadd.s32 4294967295, %s1150_s18   ;;  %p982_p0 = scmp.ge.s32.totalorder %s1150_s18, 1  ;;  %s1150_s18 = sphi %s1183_s18, %s16_s18  }
   0x2   : > { %p192_p1 = scmp.lt.s32.totalorder %s1150_s18, 3 }
   0x4   : > { %p193_p2 = pnand %p982_p0, %p192_p1 }
   0x5   : > { %p226_p3 = scmp.lt.s32.totalorder (!%p193_p2), %s978_s19, 1 }
   0x6   : > { %196 = sbr.rel (%p193_p2) target bundleno = 250 (0xfa), region = 32 }
   0xb   : > { %v1114_v0 = vld [vmem:[%s1379_s1 + $0x38] sm:$0xff]  ;;  %v1113_v4 = vld [vmem:[%s1379_s1 + $0x30] sm:$0xff]  ;;  %s1385_s19 = smov (!%p226_p3, %s978_s19), 1  ;;  %v1152_v8 = vmov 0   ;;  %v1112_v9 = vld [vmem:[%s1379_s1 + $0x28] sm:$0xff]  ;;  %vm651_vm1 = vcmask 1046528  }
   0xc   : > { %v1110_v1 = vld [vmem:[%s1379_s1 + $0x18] sm:$0xff]  ;;  %378 = vmatpush.bf16.msra.mxu0 %v1114_v0  ;;  %v1109_v5 = vld [vmem:[%s1379_s1 + $0x10] sm:$0xff]  ;;  %s1127_s11 = smul.u32 44, %s1385_s19  ;;  %1138 = vset.pattern.permute.xlu0 %v1152_v8  ;;  %v752_v10 = vld [vmem:[%s1380_s2] sm:$0xff]  ;;  %vm294_vm0 = vsmask.f32 7424  ;;  %s238_s9 = scalar_lea.vmem %s1382_s4, %s1385_s19 }
   0xd   : > { %v1126_v2 = vld [vmem:[%s1379_s1 + $0x78] sm:$0xff]  ;;  %447 = vmatpush.bf16.msra.mxu1 %v1110_v1  ;;  %v1125_v6 = vld [vmem:[%s1379_s1 + $0x70] sm:$0xff]  ;;  %1139 = vset.pattern.permute.xlu1 %v1152_v8  ;;  %v1108_v11 = vld [vmem:[%s1379_s1 + $0x8] sm:$0xff]  ;;  %vm358_vm2 = vcmask 523264   ;;  %s1128_s28 = smul.u32 72, %s1385_s19  ;;  %vm742_vm3 = vcmask 261120   ;;  %s241_s12 = scalar_lea.vmem %s1383_s5, %s1385_s19 }
   0xe   : > { %v1122_v3 = vld [vmem:[%s1379_s1 + $0x58] sm:$0xff]  ;;  %704 = vmatpush.bf16.msra.mxu3 %v1126_v2  ;;  %v1121_v7 = vld [vmem:[%s1379_s1 + $0x50] sm:$0xff]  ;;  %1140 = vset.pattern.permute.xlu2 %v1152_v8  ;;  %v1124_v12 = vld [vmem:[%s1379_s1 + $0x68] sm:$0xff]  ;;  %s1236_s26 = scalar_lea.vmem %s1378_s0, %s1127_s11  ;;  %vm838_vm4 = vcmask 253952  }
   0xf   : > { %601 = vmatpush.bf16.msra.mxu2 %v1122_v3  ;;  %v1120_v13 = vld [vmem:[%s1379_s1 + $0x48] sm:$0xff]  ;;  %v1103_v14 = vld [vmem:[%s1236_s26] sm:$0xff]  ;;  %763 = vperm.xlu0 %1138, %v752_v10   ;;  %v1105_v43 = vld [vmem:[%s1236_s26 + $0x10] sm:$0xff]  ;;  %s1329_s6 = scalar_lea.vmem %s1381_s3, %s1128_s28 }
  0x10   : > { %379 = vmatpush.bf16.msra.mxu0 %v1113_v4  ;;  %v1240_v15 = vld [vmem:[%s1236_s26 + $0x8] sm:$0xff]  ;;  %v1142_v19 = vld [vmem:[%s1236_s26 + $0x4] sm:$0xe]  ;;  %v296_v20 = vshrl.u32 %v1103_v14, 16  ;;  %v298_v21 = vshll.u32 %v1103_v14, 16  ;;  %v754_v44 = vld [vmem:[%s1380_s2 + $0x10] sm:$0xff] }
  0x11   : > { %448 = vmatpush.bf16.msra.mxu1 %v1109_v5  ;;  %v477_v16 = vld [vmem:[%s1236_s26 + $0x4] sm:$0xff]   ;;  %v1115_v18 = vld [vmem:[%s1236_s26 + $0xc] sm:$0xff]  ;;  %v303_v22 = vshll.u32 %v1240_v15, 16  ;;  %v1116_v45 = vld [vmem:[%s1236_s26 + $0x14] sm:$0xff]  ;;  %773 = vperm.xlu1 %1139, %v754_v44   ;;  %v307_v46 = vshrl.u32 %v1240_v15, 16  ;;  %v311_v47 = vshll.u32 %v1105_v43, 16 }
  0x12   : > { %705 = vmatpush.bf16.msra.mxu3 %v1125_v6  ;;  %v1141_v17 = vld [vmem:[%s1236_s26 + $0x4] sm:$0xf0]  ;;  %v1111_v23 = vld [vmem:[%s1379_s1 + $0x20] sm:$0xff]  ;;  %v527_v25 = vshll.u32 %v1115_v18, 16  ;;  %v300_v28 = vrot.slane %v298_v21, 1  ;;  %v653_v31 = vrot.slane %v1115_v18, 1 }
  0x13   : > { %602 = vmatpush.bf16.msra.mxu2 %v1121_v7  ;;  %v1107_v24 = vld [vmem:[%s1379_s1] sm:$0xff]  ;;  %v305_v29 = vrot.slane %v303_v22, 1  ;;  %v1143_v30 = vor.u32 %v1142_v19, %v1141_v17  ;;  %v520_v32 = vshrl.u32 %v477_v16, 16  ;;  %v522_v33 = vshll.u32 %v477_v16, 16  ;;  %v753_v36 = vld [vmem:[%s1380_s2 + $0x8] sm:$0xff]  ;;  %v755_v50 = vld [vmem:[%s1380_s2 + $0x18] sm:$0xff] }
  0x14   : > { %380 = vmatpush.bf16.msra.mxu0 %v1112_v9  ;;  %v1123_v26 = vld [vmem:[%s1379_s1 + $0x60] sm:$0xff]  ;;  %v301_v34 = vor.u32 %v300_v28, %v296_v20  ;;  %v529_v38 = vrot.slane %v527_v25, 1  ;;  %v531_v48 = vshrl.u32 %v1115_v18, 16  ;;  %v535_v49 = vshll.u32 %v1116_v45, 16  ;;  %v1106_v59 = vld [vmem:[%s1236_s26 + $0x18] sm:$0xff]  ;;  %v758_v60 = vld [vmem:[%s1380_s2 + $0x30] sm:$0xff] }
  0x15   : > { %449 = vmatpush.bf16.msra.mxu1 %v1108_v11  ;;  %v1119_v27 = vld [vmem:[%s1379_s1 + $0x40] sm:$0xff]  ;;  %v652_v35 = vrot.slane %v1143_v30, 1  ;;  %v524_v37 = vrot.slane %v522_v33, 1  ;;  %v309_v51 = vor.u32 %v307_v46, %v305_v29  ;;  %v313_v52 = vrot.slane %v311_v47, 1  ;;  %v759_v17 = vld [vmem:[%s1380_s2 + $0x38] sm:$0xff] }
  0x16   : > { %706 = vmatpush.bf16.msra.mxu3 %v1124_v12  ;;  %v306_v39 = vsel %vm294_vm0, %v301_v34, %v305_v29  ;;  %v655_v53 = vrot.slane %v1116_v45, 1  ;;  %v533_v54 = vor.u32 %v531_v48, %v529_v38  ;;  %v537_v55 = vrot.slane %v535_v49, 1  ;;  %v1117_v61 = vld [vmem:[%s1236_s26 + $0x1c] sm:$0xff]  ;;  %v260_v6 = vld [vmem:[%s1236_s26 + $0x24] sm:$0x1] }
  0x17   : > { %603 = vmatpush.bf16.msra.mxu2 %v1120_v13  ;;  %v654_v40 = vsel %vm651_vm1, %v652_v35, %v653_v31  ;;  %v525_v41 = vor.u32 %v524_v37, %v520_v32  ;;  %768 = vperm.xlu0 %1138, %v753_v36   ;;  %v314_v56 = vsel %vm294_vm0, %v309_v51, %v313_v52  ;;  %v315_v62 = vshrl.u32 %v1105_v43, 16  ;;  %v251_v5 = vld [vmem:[%s1236_s26 + $0x20] sm:$0xf] }
  0x18   : > { %381 = vmatpush.bf16.msra.mxu0 %v1111_v23  ;;  %v656_v57 = vsel %vm651_vm1, %v653_v31, %v655_v53  ;;  %v538_v58 = vsel %vm294_vm0, %v533_v54, %v537_v55  ;;  %v319_v63 = vshll.u32 %v1106_v59, 16  ;;  %v539_v0 = vshrl.u32 %v1116_v45, 16  ;;  %v756_v18 = vld [vmem:[%s1380_s2 + $0x20] sm:$0xff] }
  0x19   : > { %450 = vmatpush.bf16.msra.mxu1 %v1107_v24  ;;  %v530_v42 = vsel %vm294_vm0, %v525_v41, %v529_v38  ;;  %778 = vperm.xlu1 %1139, %v755_v50   ;;  %v543_v1 = vshll.u32 %v1117_v61, 16  ;;  %v317_v2 = vor.u32 %v315_v62, %v313_v52  ;;  %v657_v4 = vrot.slane %v1117_v61, 1  ;;  %v757_v24 = vld [vmem:[%s1380_s2 + $0x28] sm:$0xff]  ;;  %v760_v33 = vld [vmem:[%s1380_s2 + $0x40] sm:$0xff] }
  0x1a   : > { %707 = vmatpush.bf16.msra.mxu3 %v1123_v26  ;;  %v321_v3 = vrot.slane %v319_v63, 1  ;;  %v541_v7 = vor.u32 %v539_v0, %v537_v55  ;;  %v287_v10 = vunpack.c.l.b16 %v251_v5  ;;  %v288_v11 = vunpack.c.l.b16 %v260_v6  ;;  %783 = vperm.xlu2 %1140, %v756_v18  }
  0x1b   : > { %604 = vmatpush.bf16.msra.mxu2 %v1119_v27  ;;  %1017 = vmatmul.msk.bf16.vlgmr.msra.gmra.mxu0 %vm358_vm2, %v306_v39  ;;  %v545_v8 = vrot.slane %v543_v1, 1  ;;  %v658_v12 = vsel %vm651_vm1, %v655_v53, %v657_v4  ;;  %v323_v20 = vshrl.u32 %v1106_v59, 16  ;;  %v547_v22 = vshrl.u32 %v1117_v61, 16 }
  0x1c   : > { %1038 = vmatmul.msk.bf16.vlgmr.msra.gmra.mxu1 %vm358_vm2, %v1103_v14  ;;  %v322_v9 = vsel %vm294_vm0, %v317_v2, %v321_v3  ;;  %v1057_v14 = vld [vmem:[%s1236_s26 + $0x24] sm:$0xf]  ;;  %v293_v16 = vpack.c.b16 %v288_v11, %v287_v10  ;;  %v407_v37 = vpack.c.b16 %v287_v10, %v287_v10 }
  0x1d   : > { %1096 = vmatmul.msk.bf16.vlgmr.msra.gmra.mxu3 %vm358_vm2, %v654_v40  ;;  %v546_v13 = vsel %vm294_vm0, %v541_v7, %v545_v8  ;;  %v325_v25 = vor.u32 %v323_v20, %v321_v3  ;;  %v549_v28 = vor.u32 %v547_v22, %v545_v8 }
  0x1e   : > { %1075 = vmatmul.msk.bf16.vlgmr.msra.gmra.mxu2 %vm358_vm2, %v530_v42  ;;  %v327_v21 = vshll.u32 %v293_v16, 16  ;;  %v331_v34 = vshrl.u32 %v293_v16, 16 }
  0x1f   : > { %793 = vperm.xlu0 %1138, %v758_v60  }
  0x20   : > { %v329_v26 = vrot.slane %v327_v21, 1 }
  0x21   : > { %798 = vperm.xlu1 %1139, %v759_v17  }
  0x22   : > { %788 = vperm.xlu2 %1140, %v757_v24   ;;  %v330_v30 = vsel %vm294_vm0, %v325_v25, %v329_v26  ;;  %v333_v36 = vor.u32 %v331_v34, %v329_v26 }
  0x2a   : > { %803 = vperm.xlu2 %1140, %v760_v33  }
  0x2b   : > { %1018 = vmatmul.msk.bf16.gmra.mxu0 %vm358_vm2, %v314_v56 }
  0x2c   : > { %1039 = vmatmul.msk.bf16.gmra.mxu1 %vm358_vm2, %v1240_v15  ;;  %v1118_v15 = vld [vmem:[%s1236_s26 + $0x24] sm:$0x10] }
  0x2d   : > { %1097 = vmatmul.msk.bf16.gmra.mxu3 %vm358_vm2, %v656_v57  ;;  %v1058_v19 = vor.u32 %v1118_v15, %v1057_v14 }
  0x2e   : > { %1076 = vmatmul.msk.bf16.gmra.mxu2 %vm358_vm2, %v538_v58 }
  0x2f   : > { %v551_v23 = vshll.u32 %v1058_v19, 16  ;;  %v659_v27 = vrot.slane %v1058_v19, 1  ;;  %v555_v35 = vshrl.u32 %v1058_v19, 16 }
  0x31   : > { %v553_v29 = vrot.slane %v551_v23, 1  ;;  %v660_v31 = vsel %vm651_vm1, %v657_v4, %v659_v27 }
  0x33   : > { %v554_v32 = vsel %vm294_vm0, %v549_v28, %v553_v29  ;;  %v557_v38 = vor.u32 %v555_v35, %v553_v29 }
  0x3b   : > { %1019 = vmatmul.msk.bf16.gmra.mxu0 %vm358_vm2, %v322_v9 }
  0x3c   : > { %1040 = vmatmul.msk.bf16.gmra.mxu1 %vm358_vm2, %v1105_v43 }
  0x3d   : > { %1098 = vmatmul.msk.bf16.gmra.mxu3 %vm358_vm2, %v658_v12 }
  0x3e   : > { %1077 = vmatmul.msk.bf16.gmra.mxu2 %vm358_vm2, %v546_v13 }
  0x4b   : > { %1020 = vmatmul.msk.bf16.gmra.mxu0 %vm358_vm2, %v330_v30 }
  0x4c   : > { %1041 = vmatmul.msk.bf16.gmra.mxu1 %vm358_vm2, %v1106_v59 }
  0x4d   : > { %1099 = vmatmul.msk.bf16.gmra.mxu3 %vm358_vm2, %v660_v31 }
  0x4e   : > { %1078 = vmatmul.msk.bf16.gmra.mxu2 %vm358_vm2, %v554_v32 }
  0x5b   : > { %1021 = vmatmul.msk.bf16.gmra.mxu0 %vm358_vm2, %v333_v36 }
  0x5c   : > { %1042 = vmatmul.msk.bf16.gmra.mxu1 %vm358_vm2, %v407_v37 }
  0x5d   : > { %1100 = vmatmul.msk.bf16.gmra.mxu3 %vm358_vm2, %v659_v27 }
  0x5e   : > { %1079 = vmatmul.msk.bf16.gmra.mxu2 %vm358_vm2, %v557_v38 }
  0x74   : > { %v784_v21 = vpop.permute.xlu2 %783 }
  0x7c   : > { %v789_v38 = vpop.permute.xlu2 %788 }
  0x81   : > { %v764_v12 = vpop.permute.xlu0 %763 }
  0x83   : > { %v774_v13 = vpop.permute.xlu1 %773 }
  0x89   : > { %v769_v23 = vpop.permute.xlu0 %768 }
  0x8b   : > { %v779_v28 = vpop.permute.xlu1 %778 }
  0x98   : > { %v383_v39 = vpop.f32.mrf.mxu0 }
  0x99   : > { %v452_v40 = vpop.f32.mrf.mxu1 }
  0x9a   : > { %v453_v41 = vadd.f32 %v452_v40, %v383_v39 }
  0xa0   : > { %v709_v42 = vpop.f32.mrf.mxu3  ;;  %v385_v44 = vpop.f32.mrf.mxu0 }
  0xa1   : > { %v606_v43 = vpop.f32.mrf.mxu2  ;;  %v454_v46 = vpop.f32.mrf.mxu1 }
  0xa2   : > { %v630_v45 = vadd.f32 %v606_v43, %v453_v41  ;;  %v455_v48 = vadd.f32 %v454_v46, %v385_v44 }
  0xa4   : > { %v733_v47 = vadd.f32 %v709_v42, %v630_v45 }
  0xa6   : > { %743 = vst.msk [vmem:[%s1329_s6] sm:$0xff] %vm742_vm3, %v733_v47  ;;  %v806_v31 = vmul.f32 %v764_v12, %v733_v47 }
  0xa8   : > { %v711_v49 = vpop.f32.mrf.mxu3  ;;  %v388_v51 = vpop.f32.mrf.mxu0  ;;  %v840_v36 = vmul.f32 %v806_v31, %v733_v47  ;;  %v815_v43 = vsel %vm742_vm3, %v806_v31, 0.0 }
  0xa9   : > { %v608_v50 = vpop.f32.mrf.mxu2  ;;  %v457_v53 = vpop.f32.mrf.mxu1 }
  0xaa   : > { %v631_v52 = vadd.f32 %v608_v50, %v455_v48  ;;  %v458_v55 = vadd.f32 %v457_v53, %v388_v51 }
  0xac   : > { %v734_v54 = vadd.f32 %v711_v49, %v631_v52  ;;  %v849_v52 = vsel %vm742_vm3, %v840_v36, 0.0 }
  0xae   : > { %744 = vst.msk [vmem:[%s1329_s6 + $0x8] sm:$0xff] %vm742_vm3, %v734_v54  ;;  %v807_v27 = vmul.f32 %v769_v23, %v734_v54 }
  0xb0   : > { %v714_v56 = vpop.f32.mrf.mxu3  ;;  %v390_v58 = vpop.f32.mrf.mxu0  ;;  %v841_v35 = vmul.f32 %v807_v27, %v734_v54  ;;  %v816_v39 = vsel %vm742_vm3, %v807_v27, 0.0 }
  0xb1   : > { %v611_v57 = vpop.f32.mrf.mxu2  ;;  %v459_v60 = vpop.f32.mrf.mxu1  ;;  %v817_v53 = vadd.f32 %v816_v39, %v815_v43 }
  0xb2   : > { %v632_v59 = vadd.f32 %v611_v57, %v458_v55  ;;  %v460_v62 = vadd.f32 %v459_v60, %v390_v58  ;;  %v850_v48 = vsel %vm742_vm3, %v841_v35, 0.0  ;;  %v794_v55 = vpop.permute.xlu0 %793 }
  0xb3   : > { %v851_v60 = vadd.f32 %v850_v48, %v849_v52 }
  0xb4   : > { %v735_v61 = vadd.f32 %v714_v56, %v632_v59 }
  0xb6   : > { %745 = vst.msk [vmem:[%s1329_s6 + $0x10] sm:$0xff] %vm742_vm3, %v735_v61  ;;  %v808_v32 = vmul.f32 %v774_v13, %v735_v61 }
  0xb8   : > { %v716_v63 = vpop.f32.mrf.mxu3  ;;  %v393_v1 = vpop.f32.mrf.mxu0  ;;  %v842_v37 = vmul.f32 %v808_v32, %v735_v61  ;;  %v818_v49 = vsel %vm742_vm3, %v808_v32, 0.0 }
  0xb9   : > { %v613_v0 = vpop.f32.mrf.mxu2  ;;  %v462_v3 = vpop.f32.mrf.mxu1  ;;  %v819_v61 = vadd.f32 %v818_v49, %v817_v53 }
  0xba   : > { %v633_v2 = vadd.f32 %v613_v0, %v460_v62  ;;  %v463_v5 = vadd.f32 %v462_v3, %v393_v1  ;;  %v852_v54 = vsel %vm742_vm3, %v842_v37, 0.0 }
  0xbc   : > { %v736_v4 = vadd.f32 %v716_v63, %v633_v2  ;;  %v799_v63 = vpop.permute.xlu1 %798 }
  0xbe   : > { %746 = vst.msk [vmem:[%s1329_s6 + $0x18] sm:$0xff] %vm742_vm3, %v736_v4  ;;  %v809_v34 = vmul.f32 %v779_v28, %v736_v4 }
  0xc0   : > { %v719_v6 = vpop.f32.mrf.mxu3  ;;  %v395_v8 = vpop.f32.mrf.mxu0  ;;  %v843_v44 = vmul.f32 %v809_v34, %v736_v4  ;;  %v820_v56 = vsel %vm742_vm3, %v809_v34, 0.0  ;;  %v853_v4 = vadd.f32 %v852_v54, %v851_v60 }
  0xc1   : > { %v616_v7 = vpop.f32.mrf.mxu2  ;;  %v464_v10 = vpop.f32.mrf.mxu1 }
  0xc2   : > { %v634_v9 = vadd.f32 %v616_v7, %v463_v5  ;;  %v465_v14 = vadd.f32 %v464_v10, %v395_v8  ;;  %v854_v62 = vsel %vm742_vm3, %v843_v44, 0.0  ;;  %v821_v5 = vadd.f32 %v820_v56, %v819_v61 }
  0xc3   : > { %v855_v10 = vadd.f32 %v854_v62, %v853_v4 }
  0xc4   : > { %v737_v11 = vadd.f32 %v719_v6, %v634_v9 }
  0xc6   : > { %747 = vst.msk [vmem:[%s1329_s6 + $0x20] sm:$0xff] %vm742_vm3, %v737_v11  ;;  %v810_v40 = vmul.f32 %v784_v21, %v737_v11 }
  0xc8   : > { %v721_v15 = vpop.f32.mrf.mxu3  ;;  %v398_v17 = vpop.f32.mrf.mxu0  ;;  %v844_v57 = vmul.f32 %v810_v40, %v737_v11  ;;  %v822_v0 = vsel %vm742_vm3, %v810_v40, 0.0 }
  0xc9   : > { %v618_v16 = vpop.f32.mrf.mxu2  ;;  %v467_v19 = vpop.f32.mrf.mxu1  ;;  %v823_v11 = vadd.f32 %v822_v0, %v821_v5 }
  0xca   : > { %v635_v18 = vadd.f32 %v618_v16, %v465_v14  ;;  %v468_v22 = vadd.f32 %v467_v19, %v398_v17  ;;  %v856_v6 = vsel %vm742_vm3, %v844_v57, 0.0 }
  0xcb   : > { %v857_v19 = vadd.f32 %v856_v6, %v855_v10 }
  0xcc   : > { %v738_v20 = vadd.f32 %v721_v15, %v635_v18 }
  0xce   : > { %748 = vst.msk [vmem:[%s1329_s6 + $0x28] sm:$0xff] %vm742_vm3, %v738_v20  ;;  %v811_v50 = vmul.f32 %v789_v38, %v738_v20 }
  0xd0   : > { %v724_v24 = vpop.f32.mrf.mxu3  ;;  %v400_v26 = vpop.f32.mrf.mxu0  ;;  %v845_v1 = vmul.f32 %v811_v50, %v738_v20  ;;  %v824_v7 = vsel %vm742_vm3, %v811_v50, 0.0 }
  0xd1   : > { %v621_v25 = vpop.f32.mrf.mxu2  ;;  %v469_v30 = vpop.f32.mrf.mxu1  ;;  %v825_v20 = vadd.f32 %v824_v7, %v823_v11 }
  0xd2   : > { %v636_v29 = vadd.f32 %v621_v25, %v468_v22  ;;  %v470_v41 = vadd.f32 %v469_v30, %v400_v26  ;;  %v858_v14 = vsel %vm742_vm3, %v845_v1, 0.0  ;;  %v804_v26 = vpop.permute.xlu2 %803 }
  0xd4   : > { %v739_v33 = vadd.f32 %v724_v24, %v636_v29  ;;  %v859_v24 = vadd.f32 %v858_v14, %v857_v19 }
  0xd6   : > { %749 = vst.msk [vmem:[%s1329_s6 + $0x30] sm:$0xff] %vm742_vm3, %v739_v33  ;;  %v812_v58 = vmul.f32 %v794_v55, %v739_v33 }
  0xd8   : > { %v726_v42 = vpop.f32.mrf.mxu3  ;;  %v403_v46 = vpop.f32.mrf.mxu0  ;;  %v846_v8 = vmul.f32 %v812_v58, %v739_v33  ;;  %v826_v15 = vsel %vm742_vm3, %v812_v58, 0.0 }
  0xd9   : > { %v623_v45 = vpop.f32.mrf.mxu2  ;;  %v472_v47 = vpop.f32.mrf.mxu1  ;;  %v827_v25 = vadd.f32 %v826_v15, %v825_v20 }
  0xda   : > { %v637_v51 = vadd.f32 %v623_v45, %v470_v41  ;;  %v473_v3 = vadd.f32 %v472_v47, %v403_v46  ;;  %v860_v21 = vsel %vm742_vm3, %v846_v8, 0.0 }
  0xdb   : > { %v861_v29 = vadd.f32 %v860_v21, %v859_v24 }
  0xdc   : > { %v740_v59 = vadd.f32 %v726_v42, %v637_v51 }
  0xde   : > { %750 = vst.msk [vmem:[%s1329_s6 + $0x38] sm:$0xff] %vm742_vm3, %v740_v59  ;;  %v813_v2 = vmul.f32 %v799_v63, %v740_v59 }
  0xe0   : > { %v729_v9 = vpop.f32.mrf.mxu3  ;;  %v405_v13 = vpop.f32.mrf.mxu0  ;;  %v847_v16 = vmul.f32 %v813_v2, %v740_v59  ;;  %v828_v22 = vsel %vm742_vm3, %v813_v2, 0.0 }
  0xe1   : > { %v626_v12 = vpop.f32.mrf.mxu2  ;;  %v474_v18 = vpop.f32.mrf.mxu1  ;;  %v829_v30 = vadd.f32 %v828_v22, %v827_v25 }
  0xe2   : > { %v638_v17 = vadd.f32 %v626_v12, %v473_v3  ;;  %v862_v27 = vsel %vm742_vm3, %v847_v16, 0.0 }
  0xe3   : > { %v863_v34 = vadd.f32 %v862_v27, %v861_v29 }
  0xe4   : > { %v741_v23 = vadd.f32 %v729_v9, %v638_v17 }
  0xe6   : > { %751 = vst.msk [vmem:[%s1329_s6 + $0x40] sm:$0xff] %vm742_vm3, %v741_v23  ;;  %v814_v28 = vmul.f32 %v804_v26, %v741_v23 }
  0xe8   : > { %v830_v31 = vsel %vm742_vm3, %v814_v28, 0.0  ;;  %v848_v32 = vmul.f32 %v814_v28, %v741_v23  ;;  %v731_v33 = vpop.f32.mrf.mxu3 }
  0xe9   : > { %v831_v35 = vadd.f32 %v830_v31, %v829_v30  ;;  %v628_v36 = vpop.f32.mrf.mxu2 }
  0xea   : > { %v864_v37 = vsel %vm742_vm3, %v848_v32, 0.0 }
  0xeb   : > { %v832_v38 = vrot.slane %v831_v35, 4  ;;  %v865_v39 = vadd.f32 %v864_v37, %v863_v34 }
  0xed   : > { %v833_v40 = vadd.f32 %v832_v38, %v831_v35  ;;  %v866_v41 = vrot.slane %v865_v39, 4 }
  0xef   : > { %v834_v42 = vrot.slane %v833_v40, 2  ;;  %v867_v43 = vadd.f32 %v866_v41, %v865_v39 }
  0xf1   : > { %v835_v44 = vadd.f32 %v834_v42, %v833_v40  ;;  %v868_v45 = vrot.slane %v867_v43, 2 }
  0xf3   : > { %v836_v46 = vrot.slane %v835_v44, 1  ;;  %v869_v48 = vadd.f32 %v868_v45, %v867_v43 }
  0xf5   : > { %v837_v49 = vadd.f32 %v836_v46, %v835_v44  ;;  %v870_v50 = vrot.slane %v869_v48, 1 }
  0xf7   : > { %839 = vst.msk [vmem:[%s238_s9] sm:$0x1] %vm838_vm4, %v837_v49  ;;  %v871_v51 = vadd.f32 %v870_v50, %v869_v48 }
  0xf9   : > { %872 = vst.msk [vmem:[%s241_s12] sm:$0x1] %vm838_vm4, %v871_v51 }
  0xfa PF: > { %s16_s18 = sadd.s32 1, %s1150_s18  }
  0xfb   : > { %p13_p4 = scmp.ge.s32.totalorder %s16_s18, 4  }
  0xfd   :  { %15 = sbr.rel (!%p13_p4) target bundleno = 1 (0x1), region = 86 }

// kernel: tile.53
= control target key start
LH: loop header
LB: loop body
LE: loop exit
PB: predicated region body
PF: predicated region fallthrough
CT: control target
= control target key end

     0   :  { %s22_s0 = inlined_call_operand.vmem [shape: f32[64], index: 0, kind: input, shape index: {}]   ;;  %s23_s1 = inlined_call_operand.vmem [shape: f32[5,64], index: 1, kind: output, shape index: {}]  }
   0x1   :  { %v4_v0 = vld [vmem:[%s22_s0] ss:$0 sm:$0xff] }
   0x2   :  { %5 = vst [vmem:[%s23_s1] sm:$0xff] %v4_v0 }

// kernel: tile.54
= control target key start
LH: loop header
LB: loop body
LE: loop exit
PB: predicated region body
PF: predicated region fallthrough
CT: control target
= control target key end

     0   :  { %s6_s6 = smov 3  ;;  %vm3_vm0 = vcmask 523264   ;;  %vm10_vm1 = vcmask 1048064   ;;  %s60_s0 = inlined_call_operand.vmem [shape: f32[5,64], index: 0, kind: input, shape index: {}]   ;;  %s61_s1 = inlined_call_operand.vmem [shape: f32[1,1,320], index: 1, kind: output, shape index: {}]  }
   0x1   :  { %v2_v0 = vld [vmem:[%s60_s0] ss:$2 sm:$0x7]   ;;  %v30_v1 = vld [vmem:[%s60_s0 + $0x1] ss:$2 sm:%s6_s6]   ;;  %s34_s0 = smov 64  }
   0x2   :  { %4 = vst.msk [vmem:[#allocation0] ss:$8 sm:$0x7] %vm3_vm0, %v2_v0   ;;  %8 = vrot.lane.b32.xlu0 %v30_v1, %s34_s0 }
   0x9   :  { %v25_v2 = vld [vmem:[#allocation0 + $0x10] sm:$0x1] }
   0xa   :  { %32 = vst [vmem:[%s61_s1 + $0x2] sm:$0x1] %v25_v2 }
  0x74   :  { %v9_v3 = vpop.permute.xlu0 %8  }
  0x75   :  { %11 = vst.msk [vmem:[#allocation0] ss:$8 sm:$0x3] %vm10_vm1, %v9_v3  }
  0x7c   :  { %v14_v4 = vld [vmem:[#allocation0] sm:$0x1]  ;;  %v19_v5 = vld [vmem:[#allocation0 + $0x8] sm:$0x1] }
  0x7d   :  { %17 = vst [vmem:[%s61_s1] sm:$0x1] %v14_v4 }
  0x7e   :  { %31 = vst [vmem:[%s61_s1 + $0x1] sm:$0x1] %v19_v5 }

// kernel: discriminator_forward.13
= control target key start
LH: loop header
LB: loop body
LE: loop exit
PB: predicated region body
PF: predicated region fallthrough
CT: control target
= control target key end

     0   :  { %s1046_s18 = smov 0   ;;  %s1214_s0 = inlined_call_operand.vmem [shape: bf16[2,32,128], index: 0, kind: input, shape index: {}]   ;;  %s1215_s1 = inlined_call_operand.vmem [shape: bf16[512,64], index: 1, kind: input, shape index: {}]   ;;  %s1216_s2 = inlined_call_operand.vmem [shape: f32[20,1], index: 2, kind: input, shape index: {}]   ;;  %s1217_s3 = inlined_call_operand.vmem [shape: f32[2,20,64], index: 3, kind: output, shape index: {0}]   ;;  %s1218_s4 = inlined_call_operand.vmem [shape: f32[2,1,64], index: 4, kind: output, shape index: {1}]   ;;  %s1219_s5 = inlined_call_operand.vmem [shape: f32[2,1,64], index: 5, kind: output, shape index: {2}]  }
   0x1 LB: > { %s814_s19 = sadd.s32 4294967295, %s1013_s18   ;;  %p818_p0 = scmp.ge.s32.totalorder %s1013_s18, 1  ;;  %s1013_s18 = sphi %s1046_s18, %s16_s18  }
   0x2   : > { %p192_p1 = scmp.lt.s32.totalorder %s1013_s18, 3 }
   0x4   : > { %p193_p2 = pnand %p818_p0, %p192_p1 }
   0x5   : > { %p226_p3 = scmp.lt.s32.totalorder (!%p193_p2), %s814_s19, 1 }
   0x6   : > { %196 = sbr.rel (%p193_p2) target bundleno = 217 (0xd9), region = 32 }
   0xb   : > { %v977_v0 = vld [vmem:[%s1215_s1 + $0x78] sm:$0xff]  ;;  %v976_v4 = vld [vmem:[%s1215_s1 + $0x70] sm:$0xff]  ;;  %s1221_s19 = smov (!%p226_p3, %s814_s19), 1  ;;  %v975_v8 = vld [vmem:[%s1215_s1 + $0x68] sm:$0xff]  ;;  %v1015_v45 = vmov 0   ;;  %vm580_vm2 = vcmask 1044480  }
   0xc   : > { %v969_v1 = vld [vmem:[%s1215_s1 + $0x38] sm:$0xff]  ;;  %352 = vmatpush.bf16.msra.mxu0 %v977_v0  ;;  %v968_v5 = vld [vmem:[%s1215_s1 + $0x30] sm:$0xff]  ;;  %s960_s11 = sshll.u32 %s1221_s19, 4  ;;  %v967_v9 = vld [vmem:[%s1215_s1 + $0x28] sm:$0xff]  ;;  %1005 = vset.pattern.permute.xlu0 %v1015_v45  ;;  %vm286_vm0 = vsmask.f32 7424  ;;  %s238_s7 = scalar_lea.vmem %s1218_s4, %s1221_s19 }
   0xd   : > { %v986_v2 = vld [vmem:[%s1215_s1 + $0xb8] sm:$0xff]  ;;  %423 = vmatpush.bf16.msra.mxu1 %v969_v1  ;;  %v985_v6 = vld [vmem:[%s1215_s1 + $0xb0] sm:$0xff]  ;;  %v984_v10 = vld [vmem:[%s1215_s1 + $0xa8] sm:$0xff]  ;;  %s1096_s24 = scalar_lea.vmem %s1214_s0, %s960_s11  ;;  %1006 = vset.pattern.permute.xlu1 %v1015_v45  ;;  %vm471_vm1 = vsmask.f32 5376  ;;  %s995_s27 = smul.u32 24, %s1221_s19 }
   0xe   : > { %v994_v3 = vld [vmem:[%s1215_s1 + $0xf8] sm:$0xff]  ;;  %539 = vmatpush.bf16.msra.mxu2 %v986_v2  ;;  %v993_v7 = vld [vmem:[%s1215_s1 + $0xf0] sm:$0xff]  ;;  %v992_v11 = vld [vmem:[%s1215_s1 + $0xe8] sm:$0xff]  ;;  %vm655_vm3 = vcmask 523264   ;;  %vm658_vm4 = vcmask 519168   ;;  %vm692_vm5 = vcmask 516096   ;;  %s241_s10 = scalar_lea.vmem %s1219_s5, %s1221_s19 }
   0xf   : > { %634 = vmatpush.bf16.msra.mxu3 %v994_v3  ;;  %v974_v12 = vld [vmem:[%s1215_s1 + $0x60] sm:$0xff]  ;;  %v261_v16 = vld [vmem:[%s1096_s24 + $0x8] sm:$0x7]  ;;  %v978_v20 = vld [vmem:[%s1096_s24 + $0x8] sm:$0x10]  ;;  %s235_s29 = scalar_lea.vmem %s1217_s3, %s995_s27 }
  0x10   : > { %353 = vmatpush.bf16.msra.mxu0 %v976_v4  ;;  %v966_v13 = vld [vmem:[%s1215_s1 + $0x20] sm:$0xff]  ;;  %v892_v19 = vld [vmem:[%s1096_s24 + $0x8] sm:$0xf]  ;;  %v973_v23 = vld [vmem:[%s1215_s1 + $0x58] sm:$0xff]  ;;  %v283_v26 = vunpack.c.l.b16 %v261_v16 }
  0x11   : > { %424 = vmatpush.bf16.msra.mxu1 %v968_v5  ;;  %v983_v14 = vld [vmem:[%s1215_s1 + $0xa0] sm:$0xff]  ;;  %v965_v24 = vld [vmem:[%s1215_s1 + $0x18] sm:$0xff]  ;;  %v1130_v30 = vor.u32 %v978_v20, %v892_v19  ;;  %v972_v32 = vld [vmem:[%s1215_s1 + $0x50] sm:$0xff] }
  0x12   : > { %540 = vmatpush.bf16.msra.mxu2 %v985_v6  ;;  %v991_v15 = vld [vmem:[%s1215_s1 + $0xe0] sm:$0xff]  ;;  %v982_v27 = vld [vmem:[%s1215_s1 + $0x98] sm:$0xff]  ;;  %v964_v33 = vld [vmem:[%s1215_s1 + $0x10] sm:$0xff]  ;;  %v1145_v36 = vpack.c.b16 %v283_v26, %v283_v26 }
  0x13   : > { %635 = vmatpush.bf16.msra.mxu3 %v993_v7  ;;  %v441_v17 = vld [vmem:[%s1096_s24] sm:$0xc]  ;;  %v442_v18 = vld [vmem:[%s1096_s24 + $0x4] sm:$0xf]  ;;  %v990_v28 = vld [vmem:[%s1215_s1 + $0xd8] sm:$0xff]  ;;  %v481_v42 = vshrl.u32 %v1130_v30, 16 }
  0x14   : > { %354 = vmatpush.bf16.msra.mxu0 %v975_v8  ;;  %v465_v21 = vunpack.c.l.b16 %v441_v17  ;;  %v466_v22 = vunpack.c.l.b16 %v442_v18  ;;  %v1122_v25 = vld [vmem:[%s1096_s24] sm:$0xff]  ;;  %v981_v34 = vld [vmem:[%s1215_s1 + $0x90] sm:$0xff]  ;;  %v484_v43 = vshll.u32 %v1130_v30, 16  ;;  %v971_v46 = vld [vmem:[%s1215_s1 + $0x48] sm:$0xff]  ;;  %v295_v50 = vshll.u32 %v1145_v36, 16 }
  0x15   : > { %425 = vmatpush.bf16.msra.mxu1 %v967_v9  ;;  %v560_v31 = vld [vmem:[%s1096_s24] sm:$0x8]  ;;  %v989_v35 = vld [vmem:[%s1215_s1 + $0xd0] sm:$0xff]  ;;  %v290_v37 = vshll.u32 %v1122_v25, 16  ;;  %v963_v47 = vld [vmem:[%s1215_s1 + $0x8] sm:$0xff]  ;;  %v288_v48 = vshrl.u32 %v1122_v25, 16 }
  0x16   : > { %541 = vmatpush.bf16.msra.mxu2 %v984_v10  ;;  %v469_v29 = vpack.c.b16 %v466_v22, %v465_v21  ;;  %v578_v38 = vunpack.c.l.b16 %v560_v31  ;;  %v660_v39 = vld [vmem:[%s1216_s2] sm:$0xff]  ;;  %v662_v44 = vld [vmem:[%s1216_s2 + $0x10] sm:$0xf]  ;;  %v980_v52 = vld [vmem:[%s1215_s1 + $0x88] sm:$0xff]  ;;  %v483_v56 = vrot.slane %v481_v42, 2  ;;  %v486_v57 = vrot.slane %v484_v43, 3 }
  0x17   : > { %636 = vmatpush.bf16.msra.mxu3 %v992_v11  ;;  %665 = vperm.xlu0 %1005, %v660_v39   ;;  %v292_v49 = vrot.slane %v290_v37, 1  ;;  %v988_v53 = vld [vmem:[%s1215_s1 + $0xc8] sm:$0xff]  ;;  %v970_v58 = vld [vmem:[%s1215_s1 + $0x40] sm:$0xff]  ;;  %v297_v61 = vrot.slane %v295_v50, 1  ;;  %v582_v4 = vrot.slane %v1130_v30, 3  ;;  %v299_v9 = vshrl.u32 %v1145_v36, 16 }
  0x18   : > { %355 = vmatpush.bf16.msra.mxu0 %v974_v12  ;;  %v473_v40 = vshrl.u32 %v469_v29, 16  ;;  %v476_v41 = vshll.u32 %v469_v29, 16  ;;  %675 = vperm.xlu1 %1006, %v662_v44   ;;  %v579_v51 = vpack.c.b16 %v466_v22, %v578_v38  ;;  %v962_v59 = vld [vmem:[%s1215_s1] sm:$0xff]  ;;  %v661_v62 = vld [vmem:[%s1216_s2 + $0x8] sm:$0xff]  ;;  %v487_v2 = vor.u32 %v486_v57, %v483_v56 }
  0x19   : > { %426 = vmatpush.bf16.msra.mxu1 %v966_v13  ;;  %v293_v60 = vor.u32 %v292_v49, %v288_v48  ;;  %v979_v63 = vld [vmem:[%s1215_s1 + $0x80] sm:$0xff]  ;;  %v244_v8 = vld [vmem:[%s1096_s24 + $0x8] sm:$0x3]  ;;  %v301_v11 = vor.u32 %v299_v9, %v297_v61 }
  0x1a   : > { %542 = vmatpush.bf16.msra.mxu2 %v983_v14  ;;  %v475_v54 = vrot.slane %v473_v40, 2  ;;  %v478_v55 = vrot.slane %v476_v41, 3  ;;  %v987_v0 = vld [vmem:[%s1215_s1 + $0xc0] sm:$0xff]  ;;  %v581_v3 = vrot.slane %v579_v51, 3  ;;  %v371_v10 = vunpack.c.l.b16 %v244_v8 }
  0x1b   : > { %637 = vmatpush.bf16.msra.mxu3 %v991_v15  ;;  %v298_v5 = vsel %vm286_vm0, %v293_v60, %v297_v61 }
  0x1c   : > { %356 = vmatpush.bf16.msra.mxu0 %v973_v23  ;;  %v479_v1 = vor.u32 %v478_v55, %v475_v54  ;;  %v583_v7 = vsel %vm580_vm2, %v581_v3, %v582_v4  ;;  %v372_v12 = vpack.c.b16 %v371_v10, %v371_v10 }
  0x1d   : > { %427 = vmatpush.bf16.msra.mxu1 %v965_v24 }
  0x1e   : > { %543 = vmatpush.bf16.msra.mxu2 %v982_v27  ;;  %v488_v6 = vsel %vm471_vm1, %v479_v1, %v487_v2 }
  0x1f   : > { %638 = vmatpush.bf16.msra.mxu3 %v990_v28  ;;  %670 = vperm.xlu0 %1005, %v661_v62  }
  0x20   : > { %357 = vmatpush.bf16.msra.mxu0 %v972_v32 }
  0x21   : > { %428 = vmatpush.bf16.msra.mxu1 %v964_v33 }
  0x22   : > { %544 = vmatpush.bf16.msra.mxu2 %v981_v34 }
  0x23   : > { %639 = vmatpush.bf16.msra.mxu3 %v989_v35 }
  0x24   : > { %358 = vmatpush.bf16.msra.mxu0 %v971_v46 }
  0x25   : > { %429 = vmatpush.bf16.msra.mxu1 %v963_v47 }
  0x26   : > { %545 = vmatpush.bf16.msra.mxu2 %v980_v52 }
  0x27   : > { %640 = vmatpush.bf16.msra.mxu3 %v988_v53 }
  0x28   : > { %359 = vmatpush.bf16.msra.mxu0 %v970_v58 }
  0x29   : > { %430 = vmatpush.bf16.msra.mxu1 %v962_v59 }
  0x2a   : > { %546 = vmatpush.bf16.msra.mxu2 %v979_v63 }
  0x2b   : > { %641 = vmatpush.bf16.msra.mxu3 %v987_v0  ;;  %360 = vmatmul.bf16.vlgmr.msra.gmra.mxu0 %v298_v5 }
  0x2c   : > { %431 = vmatmul.bf16.vlgmr.msra.gmra.mxu1 %v1122_v25 }
  0x2d   : > { %547 = vmatmul.bf16.vlgmr.msra.gmra.mxu2 %v488_v6 }
  0x2e   : > { %642 = vmatmul.bf16.vlgmr.msra.gmra.mxu3 %v583_v7 }
  0x3b   : > { %365 = vmatmul.bf16.gmra.mxu0 %v301_v11 }
  0x3c   : > { %436 = vmatmul.bf16.gmra.mxu1 %v372_v12 }
  0x3d   : > { %552 = vmatmul.bf16.gmra.mxu2 %v487_v2 }
  0x3e   : > { %647 = vmatmul.bf16.gmra.mxu3 %v582_v4 }
  0x89   : > { %v666_v21 = vpop.permute.xlu0 %665 }
  0x8a   : > { %v676_v40 = vpop.permute.xlu1 %675 }
  0x91   : > { %v671_v30 = vpop.permute.xlu0 %670 }
  0xa8   : > { %v361_v13 = vpop.f32.mrf.mxu0 }
  0xa9   : > { %v432_v14 = vpop.f32.mrf.mxu1 }
  0xaa   : > { %v433_v15 = vadd.f32 %v432_v14, %v361_v13 }
  0xb0   : > { %v548_v16 = vpop.f32.mrf.mxu2  ;;  %v363_v19 = vpop.f32.mrf.mxu0 }
  0xb1   : > { %v643_v17 = vpop.f32.mrf.mxu3  ;;  %v557_v18 = vadd.f32 %v548_v16, %v433_v15  ;;  %v434_v20 = vpop.f32.mrf.mxu1 }
  0xb2   : > { %v435_v23 = vadd.f32 %v434_v20, %v363_v19 }
  0xb3   : > { %v652_v22 = vadd.f32 %v643_v17, %v557_v18 }
  0xb5   : > { %656 = vst.msk [vmem:[%s235_s29] sm:$0xff] %vm655_vm3, %v652_v22  ;;  %v678_v33 = vmul.f32 %v666_v21, %v652_v22 }
  0xb7   : > { %v694_v41 = vmul.f32 %v678_v33, %v652_v22  ;;  %v681_v44 = vsel %vm655_vm3, %v678_v33, 0.0 }
  0xb8   : > { %v550_v24 = vpop.f32.mrf.mxu2  ;;  %v366_v27 = vpop.f32.mrf.mxu0 }
  0xb9   : > { %v645_v25 = vpop.f32.mrf.mxu3  ;;  %v558_v26 = vadd.f32 %v550_v24, %v435_v23  ;;  %v437_v28 = vpop.f32.mrf.mxu1  ;;  %v697_v48 = vsel %vm655_vm3, %v694_v41, 0.0 }
  0xba   : > { %v438_v32 = vadd.f32 %v437_v28, %v366_v27 }
  0xbb   : > { %v653_v29 = vadd.f32 %v645_v25, %v558_v26 }
  0xbd   : > { %657 = vst.msk [vmem:[%s235_s29 + $0x8] sm:$0xff] %vm655_vm3, %v653_v29  ;;  %v679_v31 = vmul.f32 %v671_v30, %v653_v29 }
  0xbf   : > { %v695_v36 = vmul.f32 %v679_v31, %v653_v29  ;;  %v682_v42 = vsel %vm655_vm3, %v679_v31, 0.0 }
  0xc0   : > { %v553_v34 = vpop.f32.mrf.mxu2  ;;  %v368_v38 = vpop.f32.mrf.mxu0  ;;  %v683_v47 = vadd.f32 %v682_v42, %v681_v44 }
  0xc1   : > { %v648_v35 = vpop.f32.mrf.mxu3  ;;  %v559_v37 = vadd.f32 %v553_v34, %v438_v32  ;;  %v439_v39 = vpop.f32.mrf.mxu1  ;;  %v698_v45 = vsel %vm655_vm3, %v695_v36, 0.0 }
  0xc2   : > { %v699_v51 = vadd.f32 %v698_v45, %v697_v48 }
  0xc3   : > { %v654_v43 = vadd.f32 %v648_v35, %v559_v37 }
  0xc5   : > { %659 = vst.msk [vmem:[%s235_s29 + $0x10] sm:$0xf] %vm658_vm4, %v654_v43  ;;  %v680_v46 = vmul.f32 %v676_v40, %v654_v43 }
  0xc7   : > { %v684_v49 = vsel %vm658_vm4, %v680_v46, 0.0  ;;  %v696_v50 = vmul.f32 %v680_v46, %v654_v43 }
  0xc8   : > { %v685_v52 = vadd.f32 %v684_v49, %v683_v47  ;;  %v555_v53 = vpop.f32.mrf.mxu2 }
  0xc9   : > { %v650_v54 = vpop.f32.mrf.mxu3  ;;  %v700_v55 = vsel %vm658_vm4, %v696_v50, 0.0 }
  0xca   : > { %v686_v56 = vrot.slane %v685_v52, 4  ;;  %v701_v57 = vadd.f32 %v700_v55, %v699_v51 }
  0xcc   : > { %v687_v58 = vadd.f32 %v686_v56, %v685_v52  ;;  %v702_v59 = vrot.slane %v701_v57, 4 }
  0xce   : > { %v688_v60 = vrot.slane %v687_v58, 2  ;;  %v703_v61 = vadd.f32 %v702_v59, %v701_v57 }
  0xd0   : > { %v689_v62 = vadd.f32 %v688_v60, %v687_v58  ;;  %v704_v63 = vrot.slane %v703_v61, 2 }
  0xd2   : > { %v690_v0 = vrot.slane %v689_v62, 1  ;;  %v705_v1 = vadd.f32 %v704_v63, %v703_v61 }
  0xd4   : > { %v691_v2 = vadd.f32 %v690_v0, %v689_v62  ;;  %v706_v3 = vrot.slane %v705_v1, 1 }
  0xd6   : > { %693 = vst.msk [vmem:[%s238_s7] sm:$0x1] %vm692_vm5, %v691_v2  ;;  %v707_v4 = vadd.f32 %v706_v3, %v705_v1 }
  0xd8   : > { %708 = vst.msk [vmem:[%s241_s10] sm:$0x1] %vm692_vm5, %v707_v4 }
  0xd9 PF: > { %s16_s18 = sadd.s32 1, %s1013_s18  }
  0xda   : > { %p13_p4 = scmp.ge.s32.totalorder %s16_s18, 4  }
  0xdc   :  { %15 = sbr.rel (!%p13_p4) target bundleno = 1 (0x1), region = 86 }

// kernel: discriminator_forward.14
= control target key start
LH: loop header
LB: loop body
LE: loop exit
PB: predicated region body
PF: predicated region fallthrough
CT: control target
= control target key end

     0   :  { %s306_s12 = smov 0   ;;  %s329_s0 = inlined_call_operand.vmem [shape: f32[2,4,320], index: 0, kind: input, shape index: {}]   ;;  %s330_s1 = inlined_call_operand.vmem [shape: f32[1,1,320], index: 1, kind: input, shape index: {}]   ;;  %s331_s2 = inlined_call_operand.vmem [shape: f32[1,1,320], index: 2, kind: input, shape index: {}]   ;;  %s332_s3 = inlined_call_operand.vmem [shape: f32[2,4,320], index: 3, kind: output, shape index: {}]  }
   0x1 LB: > { %s260_s13 = sadd.s32 4294967295, %s284_s12   ;;  %p264_p0 = scmp.ge.s32.totalorder %s284_s12, 1  ;;  %s284_s12 = sphi %s306_s12, %s13_s12  }
   0x2   : > { %p137_p1 = scmp.lt.s32.totalorder %s284_s12, 3 }
   0x4   : > { %p138_p2 = pnand %p264_p0, %p137_p1 }
   0x5   : > { %p161_p3 = scmp.lt.s32.totalorder (!%p138_p2), %s260_s13, 1 }
   0x6   : > { %141 = sbr.rel (%p138_p2) target bundleno = 25 (0x19), region = 32 }
   0xb   : > { %v173_v0 = vld [vmem:[%s330_s1] sm:$0x7]  ;;  %s334_s13 = smov (!%p161_p3, %s260_s13), 1  ;;  %vm180_vm0 = vcmask 1043456   ;;  %vm203_vm3 = vcmask 519168  }
   0xc   : > { %v185_v1 = vld [vmem:[%s331_s2] sm:$0x7]  ;;  %v175_v2 = vperm.slane %v173_v0, 0  ;;  %v176_v3 = vperm.slane %v173_v0, 1  ;;  %s269_s18 = smul.u32 12, %s334_s13  ;;  %v177_v7 = vperm.slane %v173_v0, 2 }
   0xd   : > { %v188_v4 = vperm.slane %v185_v1, 1  ;;  %v187_v6 = vperm.slane %v185_v1, 0  ;;  %v189_v10 = vperm.slane %v185_v1, 2 }
   0xe   : > { %v179_v5 = vrot.slane %v176_v3, 4  ;;  %s165_s21 = scalar_lea.vmem %s329_s0, %s269_s18  ;;  %s170_s24 = scalar_lea.vmem %s332_s3, %s269_s18 }
   0xf   : > { %v191_v8 = vrot.slane %v188_v4, 4  ;;  %v171_v11 = vld [vmem:[%s165_s21] sm:$0xff]  ;;  %v172_v12 = vld [vmem:[%s165_s21 + $0x8] sm:$0xf] }
  0x10   : > { %v181_v9 = vsel %vm180_vm0, %v175_v2, %v179_v5  ;;  %v184_v15 = vmul.f32 %v177_v7, %v172_v12 }
  0x11   : > { %v192_v13 = vsel %vm180_vm0, %v187_v6, %v191_v8  ;;  %v183_v14 = vmul.f32 %v181_v9, %v171_v11 }
  0x12   : > { %v195_v17 = vadd.f32 %v189_v10, %v184_v15 }
  0x13   : > { %v194_v16 = vadd.f32 %v192_v13, %v183_v14 }
  0x14   : > { %vm197_vm2 = vcmp.gt.f32.partialorder %v195_v17, 0.0  ;;  %v199_v19 = vmul.f32 0.2, %v195_v17 }
  0x15   : > { %vm196_vm1 = vcmp.gt.f32.partialorder %v194_v16, 0.0  ;;  %v198_v18 = vmul.f32 0.2, %v194_v16 }
  0x16   : > { %v201_v21 = vsel %vm197_vm2, %v195_v17, %v199_v19 }
  0x17   : > { %v200_v20 = vsel %vm196_vm1, %v194_v16, %v198_v18  ;;  %204 = vst.msk [vmem:[%s170_s24 + $0x8] sm:$0xf] %vm203_vm3, %v201_v21 }
  0x18   : > { %202 = vst [vmem:[%s170_s24] sm:$0xff] %v200_v20 }
  0x19 PF: > { %s13_s12 = sadd.s32 1, %s284_s12  }
  0x1a   : > { %p10_p4 = scmp.ge.s32.totalorder %s13_s12, 4  }
  0x1c   :  { %12 = sbr.rel (!%p10_p4) target bundleno = 1 (0x1), region = 62 }

// kernel: discriminator_forward.15
= control target key start
LH: loop header
LB: loop body
LE: loop exit
PB: predicated region body
PF: predicated region fallthrough
CT: control target
= control target key end

     0   :  { %vm665_vm3 = vcmask 1024   ;;  %s1209_s1 = inlined_call_operand.vmem [shape: bf16[1024,1], index: 1, kind: input, shape index: {}]   ;;  %s1210_s0 = inlined_call_operand.vmem [shape: bf16[2,1024], index: 0, kind: input, shape index: {}]   ;;  %s1211_s2 = inlined_call_operand.vmem [shape: f32[2,1], index: 2, kind: output, shape index: {}]  }
   0x1   :  { %v935_v0 = vld [vmem:[%s1209_s1 + $0x38] sm:$0xff]  ;;  %v934_v4 = vld [vmem:[%s1209_s1 + $0x30] sm:$0xff]  ;;  %v933_v8 = vld [vmem:[%s1209_s1 + $0x28] sm:$0xff] }
   0x2   :  { %v943_v1 = vld [vmem:[%s1209_s1 + $0x78] sm:$0xff]  ;;  %542 = vmatpush.bf16.msra.mxu0 %v935_v0  ;;  %v942_v5 = vld [vmem:[%s1209_s1 + $0x70] sm:$0xff]  ;;  %v941_v9 = vld [vmem:[%s1209_s1 + $0x68] sm:$0xff] }
   0x3   :  { %v951_v2 = vld [vmem:[%s1209_s1 + $0xb8] sm:$0xff]  ;;  %555 = vmatpush.bf16.msra.mxu1 %v943_v1  ;;  %v950_v6 = vld [vmem:[%s1209_s1 + $0xb0] sm:$0xff]  ;;  %v949_v10 = vld [vmem:[%s1209_s1 + $0xa8] sm:$0xff] }
   0x4   :  { %v959_v3 = vld [vmem:[%s1209_s1 + $0xf8] sm:$0xff]  ;;  %568 = vmatpush.bf16.msra.mxu2 %v951_v2  ;;  %v958_v7 = vld [vmem:[%s1209_s1 + $0xf0] sm:$0xff]  ;;  %v957_v11 = vld [vmem:[%s1209_s1 + $0xe8] sm:$0xff] }
   0x5   :  { %581 = vmatpush.bf16.msra.mxu3 %v959_v3  ;;  %v932_v12 = vld [vmem:[%s1209_s1 + $0x20] sm:$0xff]  ;;  %v931_v17 = vld [vmem:[%s1209_s1 + $0x18] sm:$0xff]  ;;  %v930_v21 = vld [vmem:[%s1209_s1 + $0x10] sm:$0xff] }
   0x6   :  { %543 = vmatpush.bf16.msra.mxu0 %v934_v4  ;;  %v940_v13 = vld [vmem:[%s1209_s1 + $0x60] sm:$0xff]  ;;  %v939_v18 = vld [vmem:[%s1209_s1 + $0x58] sm:$0xff]  ;;  %v938_v22 = vld [vmem:[%s1209_s1 + $0x50] sm:$0xff] }
   0x7   :  { %556 = vmatpush.bf16.msra.mxu1 %v942_v5  ;;  %v948_v14 = vld [vmem:[%s1209_s1 + $0xa0] sm:$0xff]  ;;  %v947_v19 = vld [vmem:[%s1209_s1 + $0x98] sm:$0xff]  ;;  %v946_v23 = vld [vmem:[%s1209_s1 + $0x90] sm:$0xff] }
   0x8   :  { %569 = vmatpush.bf16.msra.mxu2 %v950_v6  ;;  %v956_v15 = vld [vmem:[%s1209_s1 + $0xe0] sm:$0xff]  ;;  %v955_v20 = vld [vmem:[%s1209_s1 + $0xd8] sm:$0xff]  ;;  %v954_v24 = vld [vmem:[%s1209_s1 + $0xd0] sm:$0xff] }
   0x9   :  { %582 = vmatpush.bf16.msra.mxu3 %v958_v7  ;;  %v11_v16 = vld [vmem:[%s1210_s0] sm:$0xff]  ;;  %v929_v25 = vld [vmem:[%s1209_s1 + $0x8] sm:$0xff]  ;;  %v967_v33 = vld [vmem:[%s1209_s1 + $0x138] sm:$0xff] }
   0xa   :  { %544 = vmatpush.bf16.msra.mxu0 %v933_v8  ;;  %141 = vst [vmem:[#allocation1] ss:$9 sm:$0xff] %v11_v16  ;;  %v937_v26 = vld [vmem:[%s1209_s1 + $0x48] sm:$0xff]  ;;  %v928_v29 = vld [vmem:[%s1209_s1] sm:$0xff]  ;;  %v975_v34 = vld [vmem:[%s1209_s1 + $0x178] sm:$0xff] }
   0xb   :  { %557 = vmatpush.bf16.msra.mxu1 %v941_v9  ;;  %v945_v27 = vld [vmem:[%s1209_s1 + $0x88] sm:$0xff]  ;;  %v936_v30 = vld [vmem:[%s1209_s1 + $0x40] sm:$0xff]  ;;  %v983_v35 = vld [vmem:[%s1209_s1 + $0x1b8] sm:$0xff] }
   0xc   :  { %570 = vmatpush.bf16.msra.mxu2 %v949_v10  ;;  %v953_v28 = vld [vmem:[%s1209_s1 + $0xc8] sm:$0xff]  ;;  %v944_v31 = vld [vmem:[%s1209_s1 + $0x80] sm:$0xff]  ;;  %v991_v36 = vld [vmem:[%s1209_s1 + $0x1f8] sm:$0xff] }
   0xd   :  { %583 = vmatpush.bf16.msra.mxu3 %v957_v11  ;;  %v952_v32 = vld [vmem:[%s1209_s1 + $0xc0] sm:$0xff]  ;;  %v966_v37 = vld [vmem:[%s1209_s1 + $0x130] sm:$0xff]  ;;  %v965_v45 = vld [vmem:[%s1209_s1 + $0x128] sm:$0xff] }
   0xe   :  { %545 = vmatpush.bf16.msra.mxu0 %v932_v12  ;;  %v974_v40 = vld [vmem:[%s1209_s1 + $0x170] sm:$0xff]  ;;  %v973_v46 = vld [vmem:[%s1209_s1 + $0x168] sm:$0xff]  ;;  %v964_v49 = vld [vmem:[%s1209_s1 + $0x120] sm:$0xff] }
   0xf   :  { %558 = vmatpush.bf16.msra.mxu1 %v940_v13  ;;  %v982_v43 = vld [vmem:[%s1209_s1 + $0x1b0] sm:$0xff]  ;;  %v981_v47 = vld [vmem:[%s1209_s1 + $0x1a8] sm:$0xff]  ;;  %v972_v50 = vld [vmem:[%s1209_s1 + $0x160] sm:$0xff] }
  0x10   :  { %571 = vmatpush.bf16.msra.mxu2 %v948_v14  ;;  %v990_v44 = vld [vmem:[%s1209_s1 + $0x1f0] sm:$0xff]  ;;  %v989_v48 = vld [vmem:[%s1209_s1 + $0x1e8] sm:$0xff]  ;;  %v980_v51 = vld [vmem:[%s1209_s1 + $0x1a0] sm:$0xff] }
  0x11   :  { %584 = vmatpush.bf16.msra.mxu3 %v956_v15  ;;  %v144_v38 = vld [vmem:[#allocation1 + $0x12] sm:$0xff]  ;;  %v142_v39 = vld [vmem:[#allocation1] sm:$0xff]  ;;  %v143_v42 = vld [vmem:[#allocation1 + $0x9] sm:$0xff] }
  0x12   :  { %546 = vmatpush.bf16.msra.mxu0 %v931_v17  ;;  %v145_v41 = vld [vmem:[#allocation1 + $0x1b] sm:$0xff]  ;;  %v962_v57 = vld [vmem:[%s1209_s1 + $0x110] sm:$0xff]  ;;  %v961_v61 = vld [vmem:[%s1209_s1 + $0x108] sm:$0xff] }
  0x13   :  { %559 = vmatpush.bf16.msra.mxu1 %v939_v18  ;;  %v988_v52 = vld [vmem:[%s1209_s1 + $0x1e0] sm:$0xff]  ;;  %v963_v53 = vld [vmem:[%s1209_s1 + $0x118] sm:$0xff]  ;;  %v970_v58 = vld [vmem:[%s1209_s1 + $0x150] sm:$0xff] }
  0x14   :  { %572 = vmatpush.bf16.msra.mxu2 %v947_v19  ;;  %v971_v54 = vld [vmem:[%s1209_s1 + $0x158] sm:$0xff]  ;;  %v978_v59 = vld [vmem:[%s1209_s1 + $0x190] sm:$0xff]  ;;  %v969_v62 = vld [vmem:[%s1209_s1 + $0x148] sm:$0xff] }
  0x15   :  { %585 = vmatpush.bf16.msra.mxu3 %v955_v20  ;;  %v979_v55 = vld [vmem:[%s1209_s1 + $0x198] sm:$0xff]  ;;  %v986_v60 = vld [vmem:[%s1209_s1 + $0x1d0] sm:$0xff]  ;;  %v977_v63 = vld [vmem:[%s1209_s1 + $0x188] sm:$0xff] }
  0x16   :  { %547 = vmatpush.bf16.msra.mxu0 %v930_v21  ;;  %v987_v56 = vld [vmem:[%s1209_s1 + $0x1d8] sm:$0xff]  ;;  %v985_v0 = vld [vmem:[%s1209_s1 + $0x1c8] sm:$0xff]  ;;  %v960_v1 = vld [vmem:[%s1209_s1 + $0x100] sm:$0xff] }
  0x17   :  { %560 = vmatpush.bf16.msra.mxu1 %v938_v22  ;;  %v968_v2 = vld [vmem:[%s1209_s1 + $0x140] sm:$0xff]  ;;  %v147_v6 = vld [vmem:[#allocation1 + $0x2d] sm:$0xff]  ;;  %v148_v7 = vld [vmem:[#allocation1 + $0x36] sm:$0xff] }
  0x18   :  { %573 = vmatpush.bf16.msra.mxu2 %v946_v23  ;;  %v976_v3 = vld [vmem:[%s1209_s1 + $0x180] sm:$0xff] }
  0x19   :  { %586 = vmatpush.bf16.msra.mxu3 %v954_v24  ;;  %v984_v4 = vld [vmem:[%s1209_s1 + $0x1c0] sm:$0xff] }
  0x1a   :  { %548 = vmatpush.bf16.msra.mxu0 %v929_v25  ;;  %v146_v5 = vld [vmem:[#allocation1 + $0x24] sm:$0xff] }
  0x1b   :  { %561 = vmatpush.bf16.msra.mxu1 %v937_v26  ;;  %v149_v8 = vld [vmem:[#allocation1 + $0x3f] sm:$0xff] }
  0x1c   :  { %574 = vmatpush.bf16.msra.mxu2 %v945_v27 }
  0x1d   :  { %587 = vmatpush.bf16.msra.mxu3 %v953_v28 }
  0x1e   :  { %549 = vmatpush.bf16.msra.mxu0 %v928_v29 }
  0x1f   :  { %562 = vmatpush.bf16.msra.mxu1 %v936_v30 }
  0x20   :  { %575 = vmatpush.bf16.msra.mxu2 %v944_v31 }
  0x21   :  { %588 = vmatpush.bf16.msra.mxu3 %v952_v32  ;;  %550 = vmatmul.bf16.vlgmr.msra.gmra.mxu0 %v142_v39 }
  0x22   :  { %594 = vmatpush.bf16.msrb.mxu0 %v967_v33  ;;  %563 = vmatmul.bf16.vlgmr.msra.gmra.mxu1 %v143_v42 }
  0x23   :  { %607 = vmatpush.bf16.msrb.mxu1 %v975_v34  ;;  %576 = vmatmul.bf16.vlgmr.msra.gmra.mxu2 %v144_v38 }
  0x24   :  { %620 = vmatpush.bf16.msrb.mxu2 %v983_v35  ;;  %589 = vmatmul.bf16.vlgmr.msra.gmra.mxu3 %v145_v41 }
  0x25   :  { %633 = vmatpush.bf16.msrb.mxu3 %v991_v36 }
  0x26   :  { %595 = vmatpush.bf16.msrb.mxu0 %v966_v37 }
  0x27   :  { %608 = vmatpush.bf16.msrb.mxu1 %v974_v40 }
  0x28   :  { %621 = vmatpush.bf16.msrb.mxu2 %v982_v43 }
  0x29   :  { %634 = vmatpush.bf16.msrb.mxu3 %v990_v44 }
  0x2a   :  { %596 = vmatpush.bf16.msrb.mxu0 %v965_v45 }
  0x2b   :  { %609 = vmatpush.bf16.msrb.mxu1 %v973_v46 }
  0x2c   :  { %622 = vmatpush.bf16.msrb.mxu2 %v981_v47 }
  0x2d   :  { %635 = vmatpush.bf16.msrb.mxu3 %v989_v48 }
  0x2e   :  { %597 = vmatpush.bf16.msrb.mxu0 %v964_v49 }
  0x2f   :  { %610 = vmatpush.bf16.msrb.mxu1 %v972_v50 }
  0x30   :  { %623 = vmatpush.bf16.msrb.mxu2 %v980_v51 }
  0x31   :  { %636 = vmatpush.bf16.msrb.mxu3 %v988_v52 }
  0x32   :  { %598 = vmatpush.bf16.msrb.mxu0 %v963_v53 }
  0x33   :  { %611 = vmatpush.bf16.msrb.mxu1 %v971_v54 }
  0x34   :  { %624 = vmatpush.bf16.msrb.mxu2 %v979_v55 }
  0x35   :  { %637 = vmatpush.bf16.msrb.mxu3 %v987_v56 }
  0x36   :  { %599 = vmatpush.bf16.msrb.mxu0 %v962_v57 }
  0x37   :  { %612 = vmatpush.bf16.msrb.mxu1 %v970_v58 }
  0x38   :  { %625 = vmatpush.bf16.msrb.mxu2 %v978_v59 }
  0x39   :  { %638 = vmatpush.bf16.msrb.mxu3 %v986_v60 }
  0x3a   :  { %600 = vmatpush.bf16.msrb.mxu0 %v961_v61 }
  0x3b   :  { %613 = vmatpush.bf16.msrb.mxu1 %v969_v62 }
  0x3c   :  { %626 = vmatpush.bf16.msrb.mxu2 %v977_v63 }
  0x3d   :  { %639 = vmatpush.bf16.msrb.mxu3 %v985_v0 }
  0x3e   :  { %601 = vmatpush.bf16.msrb.mxu0 %v960_v1 }
  0x3f   :  { %614 = vmatpush.bf16.msrb.mxu1 %v968_v2 }
  0x40   :  { %627 = vmatpush.bf16.msrb.mxu2 %v976_v3 }
  0x41   :  { %640 = vmatpush.bf16.msrb.mxu3 %v984_v4  ;;  %602 = vmatmul.bf16.vlgmr.msrb.gmra.mxu0 %v146_v5 }
  0x42   :  { %615 = vmatmul.bf16.vlgmr.msrb.gmra.mxu1 %v147_v6 }
  0x43   :  { %628 = vmatmul.bf16.vlgmr.msrb.gmra.mxu2 %v148_v7 }
  0x44   :  { %641 = vmatmul.bf16.vlgmr.msrb.gmra.mxu3 %v149_v8 }
  0x9e   :  { %v551_v9 = vpop.f32.mrf.mxu0 }
  0x9f   :  { %v564_v10 = vpop.f32.mrf.mxu1 }
  0xa0   :  { %v565_v17 = vadd.f32 %v564_v10, %v551_v9 }
  0xa6   :  { %v577_v11 = vpop.f32.mrf.mxu2  ;;  %v553_v13 = vpop.f32.mrf.mxu0 }
  0xa7   :  { %v590_v12 = vpop.f32.mrf.mxu3  ;;  %v566_v14 = vpop.f32.mrf.mxu1  ;;  %v578_v18 = vadd.f32 %v577_v11, %v565_v17 }
  0xa9   :  { %v591_v19 = vadd.f32 %v590_v12, %v578_v18 }
  0xae   :  { %v579_v15 = vpop.f32.mrf.mxu2 }
  0xaf   :  { %v592_v16 = vpop.f32.mrf.mxu3 }
  0xbe   :  { %v603_v20 = vpop.f32.mrf.mxu0 }
  0xbf   :  { %v616_v21 = vpop.f32.mrf.mxu1  ;;  %v604_v22 = vadd.f32 %v603_v20, %v591_v19 }
  0xc1   :  { %v617_v23 = vadd.f32 %v616_v21, %v604_v22 }
  0xc6   :  { %v629_v24 = vpop.f32.mrf.mxu2  ;;  %v605_v27 = vpop.f32.mrf.mxu0 }
  0xc7   :  { %v642_v25 = vpop.f32.mrf.mxu3  ;;  %v630_v26 = vadd.f32 %v629_v24, %v617_v23  ;;  %v618_v28 = vpop.f32.mrf.mxu1 }
  0xc9   :  { %v643_v29 = vadd.f32 %v642_v25, %v630_v26 }
  0xcb   :  { %v927_v30 = vmul.f32 -1.442695, %v643_v29 }
  0xcd   :  { %992 = vpow2.f32 %v927_v30 }
  0xce   :  { %v631_v31 = vpop.f32.mrf.mxu2 }
  0xcf   :  { %v644_v32 = vpop.f32.mrf.mxu3 }
  0xd3   :  { %v993_v33 = vpop.eup %992 }
  0xd4   :  { %v649_v34 = vadd.f32 1.0, %v993_v33 }
  0xd6   :  { %994 = vrcp.f32 %v649_v34  ;;  %v661_v38 = vand.u32 2147483648, %v649_v34  ;;  %v659_v40 = vand.u32 2147483647, %v649_v34  ;;  %vm655_vm1 = vweird.f32 %v649_v34 }
  0xd8   :  { %v662_v42 = vor.u32 1.1754944e-38, %v661_v38  ;;  %vm660_vm4 = vcmp.eq.f32.partialorder %v659_v40, 8.507059e+37 }
  0xdc   :  { %v995_v35 = vpop.eup %994 }
  0xdd   :  { %v651_v36 = vmul.f32 %v995_v35, %v649_v34  ;;  %vm656_vm0 = vweird.f32 %v995_v35 }
  0xde   :  { %vm657_vm2 = vmor %vm655_vm1, %vm656_vm0 }
  0xdf   :  { %v652_v37 = vsub.f32 1.0, %v651_v36 }
  0xe1   :  { %v653_v39 = vmul.f32 %v995_v35, %v652_v37 }
  0xe3   :  { %v654_v41 = vadd.f32 %v995_v35, %v653_v39 }
  0xe5   :  { %v658_v43 = vsel %vm657_vm2, %v995_v35, %v654_v41 }
  0xe6   :  { %v663_v44 = vsel %vm660_vm4, %v662_v42, %v658_v43 }
  0xe7   :  { %666 = vst.msk [vmem:[%s1211_s2] sm:$0x3] %vm665_vm3, %v663_v44 }

</bundles_post_ra>
